<compile_context>
chip_gen: v5e
topology: v5e:2x2
jax: 0.10.0
libtpu: 0.0.40
codegen_flags: <defaults>
</compile_context>

<pallas_src>
import functools

import jax
import jax.numpy as jnp
from jax.experimental import pallas as pl
from jax.experimental.pallas import tpu as pltpu

# ---------------- Encoder28 geometry ----------------
_C1, _C2, _C3, _NF = 32, 64, 128, 256
_H1, _H2, _H3 = 14, 7, 5            # spatial side after conv1 / conv2 / conv3
_P1, _P2, _P3 = _H1 * _H1, _H2 * _H2, _H3 * _H3   # 196, 49, 25
_PAD1 = _H1 + 2                      # 16: padded conv1-output side (for conv2, pad=1)


# ----------------------------------------------------------------------------
# Fused encoder kernel: one grid step processes `tb` images end-to-end in VMEM.
# ----------------------------------------------------------------------------
def _encoder_kernel(p1_ref, w1_ref, b1_ref, w2_ref, b2_ref, w3_ref, b3_ref,
                    wf_ref, bf_ref,                 # inputs
                    z_ref, h3_ref,                  # outputs
                    a1_scr, h1_scr, p2_scr, h2_scr, p3_scr,  # VMEM scratch
                    *, tb):
    f32 = jnp.float32
    bf16 = jnp.bfloat16

    # ---------------- conv1: single matmul over all tb images ----------------
    # p1_ref: (tb*196, 9*Cin) bf16 host-built im2col patches of the raw input.
    a1 = jnp.dot(p1_ref[...], w1_ref[...], preferred_element_type=f32)
    a1 = jnp.maximum(a1 + b1_ref[...], 0.0)               # (tb*196, 32) f32
    a1_scr[...] = a1

    # Scatter conv1 output into a zero-padded 16x16 spatial layout (per image),
    # so conv2's 3x3/stride-2 taps can be gathered without boundary special-cases.
    h1_scr[...] = jnp.zeros_like(h1_scr)
    for b in range(tb):
        for oh in range(_H1):
            src0 = b * _P1 + oh * _H1
            dst0 = b * (_PAD1 * _PAD1) + (oh + 1) * _PAD1 + 1
            h1_scr[dst0:dst0 + _H1, :] = a1_scr[src0:src0 + _H1, :]

    # ---------------- conv2 im2col (3x3, stride 2) entirely in VMEM ----------
    for b in range(tb):
        hbase = b * (_PAD1 * _PAD1)
        pbase = b * _P2
        for oh in range(_H2):
            for t in range(9):
                i, j = divmod(t, 3)
                row0 = hbase + (2 * oh + i) * _PAD1 + j
                taps = h1_scr[pl.ds(row0, _H2, stride=2), :]        # (7, 32)
                p2_scr[pbase + oh * _H2: pbase + (oh + 1) * _H2,
                       t * _C1:(t + 1) * _C1] = taps

    a2 = jnp.dot(p2_scr[...].astype(bf16), w2_ref[...],
                 preferred_element_type=f32)
    a2 = jnp.maximum(a2 + b2_ref[...], 0.0)                # (tb*49, 64) f32
    h2_scr[...] = a2

    # ---------------- conv3 im2col (3x3, stride 1, no pad) -------------------
    for b in range(tb):
        hbase = b * _P2
        pbase = b * _P3
        for oh in range(_H3):
            for t in range(9):
                i, j = divmod(t, 3)
                row0 = hbase + (oh + i) * _H2 + j
                taps = h2_scr[row0:row0 + _H3, :]                   # (5, 64)
                p3_scr[pbase + oh * _H3: pbase + (oh + 1) * _H3,
                       t * _C2:(t + 1) * _C2] = taps

    a3 = jnp.dot(p3_scr[...].astype(bf16), w3_ref[...],
                 preferred_element_type=f32)
    a3 = jnp.maximum(a3 + b3_ref[...], 0.0)                # (tb*25, 128) f32
    h3_ref[...] = a3                                       # stop_at==3 feature map

    # ---------------- fc: z[b] = flatten_NHWC(h3[b]) @ Wfc + b ----------------
    # Contraction over (p, c) done as 25 accumulated (tb,128)x(128,256) matmuls;
    # Wfc rows are pre-ordered (p*128 + c), so no flatten/transpose is needed.
    zacc = jnp.zeros((tb, _NF), f32)
    for p in range(_P3):
        hp = h3_ref[pl.ds(p, tb, stride=_P3), :].astype(bf16)       # (tb, 128)
        wp = wf_ref[p * _C3:(p + 1) * _C3, :]                       # (128, 256)
        zacc = zacc + jnp.dot(hp, wp, preferred_element_type=f32)
    z_ref[...] = zacc + bf_ref[...]


# ----------------------------------------------------------------------------
# Host-side helpers (pure layout work; all compute stays in the Pallas kernel).
# ----------------------------------------------------------------------------
def _conv1_im2col(x_nhwc):
    """3x3 / stride-2 / pad-1 patches of the raw input, tap-major channel-minor."""
    B, H, W, C = x_nhwc.shape
    xp = jnp.pad(x_nhwc, ((0, 0), (1, 1), (1, 1), (0, 0)))
    cols = []
    for i in range(3):
        for j in range(3):
            cols.append(xp[:, i:i + 2 * _H1:2, j:j + 2 * _H1:2, :])  # (B,14,14,C)
    patches = jnp.concatenate(cols, axis=-1)                         # (B,14,14,9C)
    return patches.reshape(B * _P1, 9 * C)


def gpa_forward(params, x_nchw, stop_at=-1, block_batch=2):
    """GPA.forward(x, stop_at) == Encoder28(x, stop_at) (stop_at in {3, -1})."""
    B, C, H, W = x_nchw.shape
    assert H == 28 and W == 28, (H, W)
    tb = max(1, int(block_batch))
    Bp = ((B + tb - 1) // tb) * tb

    x = jnp.transpose(x_nchw, (0, 2, 3, 1)).astype(jnp.float32)      # NCHW -> NHWC
    if Bp != B:
        x = jnp.concatenate(
            [x, jnp.zeros((Bp - B,) + x.shape[1:], x.dtype)], axis=0)

    K1 = 9 * C
    patches1 = _conv1_im2col(x).astype(jnp.bfloat16)                 # (Bp*196, 9C)
    patches1 = patches1.reshape(Bp // tb, tb * _P1, K1)

    flops = 2 * Bp * (_P1 * K1 * _C1 + _P2 * 9 * _C1 * _C2
                      + _P3 * 9 * _C2 * _C3 + _P3 * _C3 * _NF)
    bytes_accessed = (patches1.size * 2
                      + (params["w1"].size + params["w2"].size
                         + params["w3"].size + params["wf"].size) * 2
                      + Bp * _NF * 4 + Bp * _P3 * _C3 * 4)

    kernel = functools.partial(_encoder_kernel, tb=tb)

    z, h3 = pl.pallas_call(
        kernel,
        out_shape=(
            jax.ShapeDtypeStruct((Bp // tb, tb, _NF), jnp.float32),       # z
            jax.ShapeDtypeStruct((Bp // tb, tb * _P3, _C3), jnp.float32),  # h3 (NHWC)
        ),
        grid=(Bp // tb,),
        in_specs=[
            pl.BlockSpec((None, tb * _P1, K1), lambda g: (g, 0, 0)),  # conv1 patches
            pl.BlockSpec((K1, _C1), lambda g: (0, 0)),                # w1 (resident)
            pl.BlockSpec((1, _C1), lambda g: (0, 0)),                 # b1
            pl.BlockSpec((9 * _C1, _C2), lambda g: (0, 0)),           # w2
            pl.BlockSpec((1, _C2), lambda g: (0, 0)),                 # b2
            pl.BlockSpec((9 * _C2, _C3), lambda g: (0, 0)),           # w3
            pl.BlockSpec((1, _C3), lambda g: (0, 0)),                 # b3
            pl.BlockSpec((_P3 * _C3, _NF), lambda g: (0, 0)),         # wfc
            pl.BlockSpec((1, _NF), lambda g: (0, 0)),                 # bfc
        ],
        out_specs=(
            pl.BlockSpec((None, tb, _NF), lambda g: (g, 0, 0)),
            pl.BlockSpec((None, tb * _P3, _C3), lambda g: (g, 0, 0)),
        ),
        scratch_shapes=[
            pltpu.VMEM((tb * _P1, _C1), jnp.float32),                 # conv1 out
            pltpu.VMEM((tb * _PAD1 * _PAD1, _C1), jnp.float32),       # padded h1
            pltpu.VMEM((tb * _P2, 9 * _C1), jnp.float32),             # conv2 patches
            pltpu.VMEM((tb * _P2, _C2), jnp.float32),                 # conv2 out
            pltpu.VMEM((tb * _P3, 9 * _C2), jnp.float32),             # conv3 patches
        ],
        compiler_params=pltpu.CompilerParams(
            dimension_semantics=("parallel",),
        ),
        cost_estimate=pl.CostEstimate(
            flops=flops, transcendentals=0, bytes_accessed=bytes_accessed),
    )(patches1, params["w1"], params["b1"], params["w2"], params["b2"],
      params["w3"], params["b3"], params["wf"], params["bf"])

    z = z.reshape(Bp, _NF)[:B]
    h3 = h3.reshape(Bp, _P3, _C3)[:B]
    if stop_at == 3:
        # NCHW (B, 128, 5, 5) intermediate feature map (input to Decoder5).
        return jnp.transpose(h3, (0, 2, 1)).reshape(B, _C3, _H3, _H3)
    return z


# ----------------------------------------------------------------------------
# Deterministic synthetic parameters, already in the kernel's layout.
#
# Loading real PyTorch weights would require (correctness note):
#   * Conv2d weight (Cout, Cin, kh, kw) -> transpose to (kh, kw, Cin, Cout)
#     -> reshape (kh*kw*Cin, Cout)   [tap-major / channel-minor K ordering]
#   * Linear weight (out, 3200) whose input is the NCHW flatten (c*25 + p)
#     -> permute columns to NHWC order (p*128 + c) -> transpose to (3200, out)
# ----------------------------------------------------------------------------
def init_gpa_params(key, in_channels, num_features=_NF):
    ks = jax.random.split(key, 4)

    def he(k, shape, fan_in):
        return jax.random.normal(k, shape, jnp.float32) * jnp.sqrt(2.0 / fan_in)

    def conv_w(k, cin, cout):
        w = he(k, (3, 3, cin, cout), 3 * 3 * cin)      # (kh, kw, Cin, Cout)
        return w.reshape(9 * cin, cout).astype(jnp.bfloat16)

    return {
        "w1": conv_w(ks[0], in_channels, _C1),
        "b1": jnp.zeros((1, _C1), jnp.float32),
        "w2": conv_w(ks[1], _C1, _C2),
        "b2": jnp.zeros((1, _C2), jnp.float32),
        "w3": conv_w(ks[2], _C2, _C3),
        "b3": jnp.zeros((1, _C3), jnp.float32),
        # fc rows ordered (p*128 + c) == NHWC flatten of the (5,5,128) feature map
        "wf": he(ks[3], (_P3 * _C3, num_features), _P3 * _C3).astype(jnp.bfloat16),
        "bf": jnp.zeros((1, num_features), jnp.float32),
    }


if __name__ == "__main__":
    key = jax.random.PRNGKey(0)
    k_params, k_x = jax.random.split(key)

    in_features = 3    # input channels
    num_actions = 5    # unused by forward(); kept for module-signature parity
    batch = 4

    params = init_gpa_params(k_params, in_features, num_features=_NF)
    x = jax.random.normal(k_x, (batch, in_features, 28, 28), jnp.float32)

    fwd = jax.jit(functools.partial(gpa_forward, stop_at=-1, block_batch=2))
    z = fwd(params, x)
    jax.block_until_ready(z)

    assert z.shape == (batch, _NF), z.shape
    assert bool(jnp.all(jnp.isfinite(z)))
    print("KERNEL_OK")
</pallas_src>

<mosaic_0001>
module attributes {stable_mosaic.version = 11 : i64} {
  func.func @_encoder_kernel(%arg0: i32, %arg1: memref<1x392x27xbf16, #tpu.memory_space<vmem>>, %arg2: memref<27x32xbf16, #tpu.memory_space<vmem>>, %arg3: memref<1x32xf32, #tpu.memory_space<vmem>>, %arg4: memref<288x64xbf16, #tpu.memory_space<vmem>>, %arg5: memref<1x64xf32, #tpu.memory_space<vmem>>, %arg6: memref<576x128xbf16, #tpu.memory_space<vmem>>, %arg7: memref<1x128xf32, #tpu.memory_space<vmem>>, %arg8: memref<3200x256xbf16, #tpu.memory_space<vmem>>, %arg9: memref<1x256xf32, #tpu.memory_space<vmem>>, %arg10: memref<1x2x256xf32, #tpu.memory_space<vmem>>, %arg11: memref<1x50x128xf32, #tpu.memory_space<vmem>>, %arg12: memref<392x32xf32, #tpu.memory_space<vmem>>, %arg13: memref<512x32xf32, #tpu.memory_space<vmem>>, %arg14: memref<98x288xf32, #tpu.memory_space<vmem>>, %arg15: memref<98x64xf32, #tpu.memory_space<vmem>>, %arg16: memref<50x576xf32, #tpu.memory_space<vmem>>) attributes {dimension_semantics = [#tpu.dimension_semantics<parallel>], iteration_bounds = array<i64: 2>, scalar_prefetch = 0 : i64, scratch_operands = 5 : i64, tpu.core_type = #tpu.core_type<tc>, window_params = [{transform_indices = @transform_0, window_bounds = array<i64: 1, 392, 27>}, {pipeline_mode = #tpu.pipeline_mode<synchronous>, transform_indices = @transform_1, window_bounds = array<i64: 27, 32>}, {pipeline_mode = #tpu.pipeline_mode<synchronous>, transform_indices = @transform_2, window_bounds = array<i64: 1, 32>}, {pipeline_mode = #tpu.pipeline_mode<synchronous>, transform_indices = @transform_3, window_bounds = array<i64: 288, 64>}, {pipeline_mode = #tpu.pipeline_mode<synchronous>, transform_indices = @transform_4, window_bounds = array<i64: 1, 64>}, {pipeline_mode = #tpu.pipeline_mode<synchronous>, transform_indices = @transform_5, window_bounds = array<i64: 576, 128>}, {pipeline_mode = #tpu.pipeline_mode<synchronous>, transform_indices = @transform_6, window_bounds = array<i64: 1, 128>}, {pipeline_mode = #tpu.pipeline_mode<synchronous>, transform_indices = @transform_7, window_bounds = array<i64: 3200, 256>}, {pipeline_mode = #tpu.pipeline_mode<synchronous>, transform_indices = @transform_8, window_bounds = array<i64: 1, 256>}, {transform_indices = @transform_9, window_bounds = array<i64: 1, 2, 256>}, {transform_indices = @transform_10, window_bounds = array<i64: 1, 50, 128>}]} {
    %c0 = arith.constant 0 : index
    %c0_0 = arith.constant 0 : index
    %c0_1 = arith.constant 0 : index
    %0 = vector.load %arg1[%c0, %c0_0, %c0_1] : memref<1x392x27xbf16, #tpu.memory_space<vmem>>, vector<1x392x27xbf16>
    %1 = vector.shape_cast %0 : vector<1x392x27xbf16> to vector<392x27xbf16>
    %c0_2 = arith.constant 0 : index
    %c0_3 = arith.constant 0 : index
    %2 = vector.load %arg2[%c0_2, %c0_3] : memref<27x32xbf16, #tpu.memory_space<vmem>>, vector<27x32xbf16>
    %cst = arith.constant dense<0.000000e+00> : vector<392x32xf32>
    %3 = tpu.matmul %1, %2, %cst {dimension_numbers = #tpu.dot_dimension_numbers<[1], [0], [0], [1], [0, 0, 1, 1], [], []>} : vector<392x27xbf16>, vector<27x32xbf16>, vector<392x32xf32> -> vector<392x32xf32>
    %c0_4 = arith.constant 0 : index
    %c0_5 = arith.constant 0 : index
    %4 = vector.load %arg3[%c0_4, %c0_5] : memref<1x32xf32, #tpu.memory_space<vmem>>, vector<1x32xf32>
    %5 = vector.broadcast %4 : vector<1x32xf32> to vector<392x32xf32>
    %6 = arith.addf %3, %5 : vector<392x32xf32>
    %cst_6 = arith.constant 0.000000e+00 : f32
    %7 = vector.broadcast %cst_6 : f32 to vector<392x32xf32>
    %8 = arith.maximumf %6, %7 : vector<392x32xf32>
    %c0_7 = arith.constant 0 : index
    %c0_8 = arith.constant 0 : index
    %9 = vector.load %arg12[%c0_7, %c0_8] : memref<392x32xf32, #tpu.memory_space<vmem>>, vector<392x32xf32>
    tpu.vector_store %arg12[%c0_7, %c0_8], %8 {strides = array<i32>} : memref<392x32xf32, #tpu.memory_space<vmem>>, vector<392x32xf32>,
    %cst_9 = arith.constant 0.000000e+00 : f32
    %10 = vector.broadcast %cst_9 : f32 to vector<512x32xf32>
    %c0_10 = arith.constant 0 : index
    %c0_11 = arith.constant 0 : index
    %11 = vector.load %arg13[%c0_10, %c0_11] : memref<512x32xf32, #tpu.memory_space<vmem>>, vector<512x32xf32>
    tpu.vector_store %arg13[%c0_10, %c0_11], %10 {strides = array<i32>} : memref<512x32xf32, #tpu.memory_space<vmem>>, vector<512x32xf32>,
    %c0_12 = arith.constant 0 : index
    %c0_13 = arith.constant 0 : index
    %12 = vector.load %arg12[%c0_12, %c0_13] : memref<392x32xf32, #tpu.memory_space<vmem>>, vector<14x32xf32>
    %c17 = arith.constant 17 : index
    %c0_14 = arith.constant 0 : index
    %13 = vector.load %arg13[%c17, %c0_14] : memref<512x32xf32, #tpu.memory_space<vmem>>, vector<14x32xf32>
    tpu.vector_store %arg13[%c17, %c0_14], %12 {strides = array<i32>} : memref<512x32xf32, #tpu.memory_space<vmem>>, vector<14x32xf32>,
    %c14 = arith.constant 14 : index
    %c0_15 = arith.constant 0 : index
    %14 = vector.load %arg12[%c14, %c0_15] : memref<392x32xf32, #tpu.memory_space<vmem>>, vector<14x32xf32>
    %c33 = arith.constant 33 : index
    %c0_16 = arith.constant 0 : index
    %15 = vector.load %arg13[%c33, %c0_16] : memref<512x32xf32, #tpu.memory_space<vmem>>, vector<14x32xf32>
    tpu.vector_store %arg13[%c33, %c0_16], %14 {strides = array<i32>} : memref<512x32xf32, #tpu.memory_space<vmem>>, vector<14x32xf32>,
    %c28 = arith.constant 28 : index
    %c0_17 = arith.constant 0 : index
    %16 = vector.load %arg12[%c28, %c0_17] : memref<392x32xf32, #tpu.memory_space<vmem>>, vector<14x32xf32>
    %c49 = arith.constant 49 : index
    %c0_18 = arith.constant 0 : index
    %17 = vector.load %arg13[%c49, %c0_18] : memref<512x32xf32, #tpu.memory_space<vmem>>, vector<14x32xf32>
    tpu.vector_store %arg13[%c49, %c0_18], %16 {strides = array<i32>} : memref<512x32xf32, #tpu.memory_space<vmem>>, vector<14x32xf32>,
    %c42 = arith.constant 42 : index
    %c0_19 = arith.constant 0 : index
    %18 = vector.load %arg12[%c42, %c0_19] : memref<392x32xf32, #tpu.memory_space<vmem>>, vector<14x32xf32>
    %c65 = arith.constant 65 : index
    %c0_20 = arith.constant 0 : index
    %19 = vector.load %arg13[%c65, %c0_20] : memref<512x32xf32, #tpu.memory_space<vmem>>, vector<14x32xf32>
    tpu.vector_store %arg13[%c65, %c0_20], %18 {strides = array<i32>} : memref<512x32xf32, #tpu.memory_space<vmem>>, vector<14x32xf32>,
    %c56 = arith.constant 56 : index
    %c0_21 = arith.constant 0 : index
    %20 = vector.load %arg12[%c56, %c0_21] : memref<392x32xf32, #tpu.memory_space<vmem>>, vector<14x32xf32>
    %c81 = arith.constant 81 : index
    %c0_22 = arith.constant 0 : index
    %21 = vector.load %arg13[%c81, %c0_22] : memref<512x32xf32, #tpu.memory_space<vmem>>, vector<14x32xf32>
    tpu.vector_store %arg13[%c81, %c0_22], %20 {strides = array<i32>} : memref<512x32xf32, #tpu.memory_space<vmem>>, vector<14x32xf32>,
    %c70 = arith.constant 70 : index
    %c0_23 = arith.constant 0 : index
    %22 = vector.load %arg12[%c70, %c0_23] : memref<392x32xf32, #tpu.memory_space<vmem>>, vector<14x32xf32>
    %c97 = arith.constant 97 : index
    %c0_24 = arith.constant 0 : index
    %23 = vector.load %arg13[%c97, %c0_24] : memref<512x32xf32, #tpu.memory_space<vmem>>, vector<14x32xf32>
    tpu.vector_store %arg13[%c97, %c0_24], %22 {strides = array<i32>} : memref<512x32xf32, #tpu.memory_space<vmem>>, vector<14x32xf32>,
    %c84 = arith.constant 84 : index
    %c0_25 = arith.constant 0 : index
    %24 = vector.load %arg12[%c84, %c0_25] : memref<392x32xf32, #tpu.memory_space<vmem>>, vector<14x32xf32>
    %c113 = arith.constant 113 : index
    %c0_26 = arith.constant 0 : index
    %25 = vector.load %arg13[%c113, %c0_26] : memref<512x32xf32, #tpu.memory_space<vmem>>, vector<14x32xf32>
    tpu.vector_store %arg13[%c113, %c0_26], %24 {strides = array<i32>} : memref<512x32xf32, #tpu.memory_space<vmem>>, vector<14x32xf32>,
    %c98 = arith.constant 98 : index
    %c0_27 = arith.constant 0 : index
    %26 = vector.load %arg12[%c98, %c0_27] : memref<392x32xf32, #tpu.memory_space<vmem>>, vector<14x32xf32>
    %c129 = arith.constant 129 : index
    %c0_28 = arith.constant 0 : index
    %27 = vector.load %arg13[%c129, %c0_28] : memref<512x32xf32, #tpu.memory_space<vmem>>, vector<14x32xf32>
    tpu.vector_store %arg13[%c129, %c0_28], %26 {strides = array<i32>} : memref<512x32xf32, #tpu.memory_space<vmem>>, vector<14x32xf32>,
    %c112 = arith.constant 112 : index
    %c0_29 = arith.constant 0 : index
    %28 = vector.load %arg12[%c112, %c0_29] : memref<392x32xf32, #tpu.memory_space<vmem>>, vector<14x32xf32>
    %c145 = arith.constant 145 : index
    %c0_30 = arith.constant 0 : index
    %29 = vector.load %arg13[%c145, %c0_30] : memref<512x32xf32, #tpu.memory_space<vmem>>, vector<14x32xf32>
    tpu.vector_store %arg13[%c145, %c0_30], %28 {strides = array<i32>} : memref<512x32xf32, #tpu.memory_space<vmem>>, vector<14x32xf32>,
    %c126 = arith.constant 126 : index
    %c0_31 = arith.constant 0 : index
    %30 = vector.load %arg12[%c126, %c0_31] : memref<392x32xf32, #tpu.memory_space<vmem>>, vector<14x32xf32>
    %c161 = arith.constant 161 : index
    %c0_32 = arith.constant 0 : index
    %31 = vector.load %arg13[%c161, %c0_32] : memref<512x32xf32, #tpu.memory_space<vmem>>, vector<14x32xf32>
    tpu.vector_store %arg13[%c161, %c0_32], %30 {strides = array<i32>} : memref<512x32xf32, #tpu.memory_space<vmem>>, vector<14x32xf32>,
    %c140 = arith.constant 140 : index
    %c0_33 = arith.constant 0 : index
    %32 = vector.load %arg12[%c140, %c0_33] : memref<392x32xf32, #tpu.memory_space<vmem>>, vector<14x32xf32>
    %c177 = arith.constant 177 : index
    %c0_34 = arith.constant 0 : index
    %33 = vector.load %arg13[%c177, %c0_34] : memref<512x32xf32, #tpu.memory_space<vmem>>, vector<14x32xf32>
    tpu.vector_store %arg13[%c177, %c0_34], %32 {strides = array<i32>} : memref<512x32xf32, #tpu.memory_space<vmem>>, vector<14x32xf32>,
    %c154 = arith.constant 154 : index
    %c0_35 = arith.constant 0 : index
    %34 = vector.load %arg12[%c154, %c0_35] : memref<392x32xf32, #tpu.memory_space<vmem>>, vector<14x32xf32>
    %c193 = arith.constant 193 : index
    %c0_36 = arith.constant 0 : index
    %35 = vector.load %arg13[%c193, %c0_36] : memref<512x32xf32, #tpu.memory_space<vmem>>, vector<14x32xf32>
    tpu.vector_store %arg13[%c193, %c0_36], %34 {strides = array<i32>} : memref<512x32xf32, #tpu.memory_space<vmem>>, vector<14x32xf32>,
    %c168 = arith.constant 168 : index
    %c0_37 = arith.constant 0 : index
    %36 = vector.load %arg12[%c168, %c0_37] : memref<392x32xf32, #tpu.memory_space<vmem>>, vector<14x32xf32>
    %c209 = arith.constant 209 : index
    %c0_38 = arith.constant 0 : index
    %37 = vector.load %arg13[%c209, %c0_38] : memref<512x32xf32, #tpu.memory_space<vmem>>, vector<14x32xf32>
    tpu.vector_store %arg13[%c209, %c0_38], %36 {strides = array<i32>} : memref<512x32xf32, #tpu.memory_space<vmem>>, vector<14x32xf32>,
    %c182 = arith.constant 182 : index
    %c0_39 = arith.constant 0 : index
    %38 = vector.load %arg12[%c182, %c0_39] : memref<392x32xf32, #tpu.memory_space<vmem>>, vector<14x32xf32>
    %c225 = arith.constant 225 : index
    %c0_40 = arith.constant 0 : index
    %39 = vector.load %arg13[%c225, %c0_40] : memref<512x32xf32, #tpu.memory_space<vmem>>, vector<14x32xf32>
    tpu.vector_store %arg13[%c225, %c0_40], %38 {strides = array<i32>} : memref<512x32xf32, #tpu.memory_space<vmem>>, vector<14x32xf32>,
    %c196 = arith.constant 196 : index
    %c0_41 = arith.constant 0 : index
    %40 = vector.load %arg12[%c196, %c0_41] : memref<392x32xf32, #tpu.memory_space<vmem>>, vector<14x32xf32>
    %c273 = arith.constant 273 : index
    %c0_42 = arith.constant 0 : index
    %41 = vector.load %arg13[%c273, %c0_42] : memref<512x32xf32, #tpu.memory_space<vmem>>, vector<14x32xf32>
    tpu.vector_store %arg13[%c273, %c0_42], %40 {strides = array<i32>} : memref<512x32xf32, #tpu.memory_space<vmem>>, vector<14x32xf32>,
    %c210 = arith.constant 210 : index
    %c0_43 = arith.constant 0 : index
    %42 = vector.load %arg12[%c210, %c0_43] : memref<392x32xf32, #tpu.memory_space<vmem>>, vector<14x32xf32>
    %c289 = arith.constant 289 : index
    %c0_44 = arith.constant 0 : index
    %43 = vector.load %arg13[%c289, %c0_44] : memref<512x32xf32, #tpu.memory_space<vmem>>, vector<14x32xf32>
    tpu.vector_store %arg13[%c289, %c0_44], %42 {strides = array<i32>} : memref<512x32xf32, #tpu.memory_space<vmem>>, vector<14x32xf32>,
    %c224 = arith.constant 224 : index
    %c0_45 = arith.constant 0 : index
    %44 = vector.load %arg12[%c224, %c0_45] : memref<392x32xf32, #tpu.memory_space<vmem>>, vector<14x32xf32>
    %c305 = arith.constant 305 : index
    %c0_46 = arith.constant 0 : index
    %45 = vector.load %arg13[%c305, %c0_46] : memref<512x32xf32, #tpu.memory_space<vmem>>, vector<14x32xf32>
    tpu.vector_store %arg13[%c305, %c0_46], %44 {strides = array<i32>} : memref<512x32xf32, #tpu.memory_space<vmem>>, vector<14x32xf32>,
    %c238 = arith.constant 238 : index
    %c0_47 = arith.constant 0 : index
    %46 = vector.load %arg12[%c238, %c0_47] : memref<392x32xf32, #tpu.memory_space<vmem>>, vector<14x32xf32>
    %c321 = arith.constant 321 : index
    %c0_48 = arith.constant 0 : index
    %47 = vector.load %arg13[%c321, %c0_48] : memref<512x32xf32, #tpu.memory_space<vmem>>, vector<14x32xf32>
    tpu.vector_store %arg13[%c321, %c0_48], %46 {strides = array<i32>} : memref<512x32xf32, #tpu.memory_space<vmem>>, vector<14x32xf32>,
    %c252 = arith.constant 252 : index
    %c0_49 = arith.constant 0 : index
    %48 = vector.load %arg12[%c252, %c0_49] : memref<392x32xf32, #tpu.memory_space<vmem>>, vector<14x32xf32>
    %c337 = arith.constant 337 : index
    %c0_50 = arith.constant 0 : index
    %49 = vector.load %arg13[%c337, %c0_50] : memref<512x32xf32, #tpu.memory_space<vmem>>, vector<14x32xf32>
    tpu.vector_store %arg13[%c337, %c0_50], %48 {strides = array<i32>} : memref<512x32xf32, #tpu.memory_space<vmem>>, vector<14x32xf32>,
    %c266 = arith.constant 266 : index
    %c0_51 = arith.constant 0 : index
    %50 = vector.load %arg12[%c266, %c0_51] : memref<392x32xf32, #tpu.memory_space<vmem>>, vector<14x32xf32>
    %c353 = arith.constant 353 : index
    %c0_52 = arith.constant 0 : index
    %51 = vector.load %arg13[%c353, %c0_52] : memref<512x32xf32, #tpu.memory_space<vmem>>, vector<14x32xf32>
    tpu.vector_store %arg13[%c353, %c0_52], %50 {strides = array<i32>} : memref<512x32xf32, #tpu.memory_space<vmem>>, vector<14x32xf32>,
    %c280 = arith.constant 280 : index
    %c0_53 = arith.constant 0 : index
    %52 = vector.load %arg12[%c280, %c0_53] : memref<392x32xf32, #tpu.memory_space<vmem>>, vector<14x32xf32>
    %c369 = arith.constant 369 : index
    %c0_54 = arith.constant 0 : index
    %53 = vector.load %arg13[%c369, %c0_54] : memref<512x32xf32, #tpu.memory_space<vmem>>, vector<14x32xf32>
    tpu.vector_store %arg13[%c369, %c0_54], %52 {strides = array<i32>} : memref<512x32xf32, #tpu.memory_space<vmem>>, vector<14x32xf32>,
    %c294 = arith.constant 294 : index
    %c0_55 = arith.constant 0 : index
    %54 = vector.load %arg12[%c294, %c0_55] : memref<392x32xf32, #tpu.memory_space<vmem>>, vector<14x32xf32>
    %c385 = arith.constant 385 : index
    %c0_56 = arith.constant 0 : index
    %55 = vector.load %arg13[%c385, %c0_56] : memref<512x32xf32, #tpu.memory_space<vmem>>, vector<14x32xf32>
    tpu.vector_store %arg13[%c385, %c0_56], %54 {strides = array<i32>} : memref<512x32xf32, #tpu.memory_space<vmem>>, vector<14x32xf32>,
    %c308 = arith.constant 308 : index
    %c0_57 = arith.constant 0 : index
    %56 = vector.load %arg12[%c308, %c0_57] : memref<392x32xf32, #tpu.memory_space<vmem>>, vector<14x32xf32>
    %c401 = arith.constant 401 : index
    %c0_58 = arith.constant 0 : index
    %57 = vector.load %arg13[%c401, %c0_58] : memref<512x32xf32, #tpu.memory_space<vmem>>, vector<14x32xf32>
    tpu.vector_store %arg13[%c401, %c0_58], %56 {strides = array<i32>} : memref<512x32xf32, #tpu.memory_space<vmem>>, vector<14x32xf32>,
    %c322 = arith.constant 322 : index
    %c0_59 = arith.constant 0 : index
    %58 = vector.load %arg12[%c322, %c0_59] : memref<392x32xf32, #tpu.memory_space<vmem>>, vector<14x32xf32>
    %c417 = arith.constant 417 : index
    %c0_60 = arith.constant 0 : index
    %59 = vector.load %arg13[%c417, %c0_60] : memref<512x32xf32, #tpu.memory_space<vmem>>, vector<14x32xf32>
    tpu.vector_store %arg13[%c417, %c0_60], %58 {strides = array<i32>} : memref<512x32xf32, #tpu.memory_space<vmem>>, vector<14x32xf32>,
    %c336 = arith.constant 336 : index
    %c0_61 = arith.constant 0 : index
    %60 = vector.load %arg12[%c336, %c0_61] : memref<392x32xf32, #tpu.memory_space<vmem>>, vector<14x32xf32>
    %c433 = arith.constant 433 : index
    %c0_62 = arith.constant 0 : index
    %61 = vector.load %arg13[%c433, %c0_62] : memref<512x32xf32, #tpu.memory_space<vmem>>, vector<14x32xf32>
    tpu.vector_store %arg13[%c433, %c0_62], %60 {strides = array<i32>} : memref<512x32xf32, #tpu.memory_space<vmem>>, vector<14x32xf32>,
    %c350 = arith.constant 350 : index
    %c0_63 = arith.constant 0 : index
    %62 = vector.load %arg12[%c350, %c0_63] : memref<392x32xf32, #tpu.memory_space<vmem>>, vector<14x32xf32>
    %c449 = arith.constant 449 : index
    %c0_64 = arith.constant 0 : index
    %63 = vector.load %arg13[%c449, %c0_64] : memref<512x32xf32, #tpu.memory_space<vmem>>, vector<14x32xf32>
    tpu.vector_store %arg13[%c449, %c0_64], %62 {strides = array<i32>} : memref<512x32xf32, #tpu.memory_space<vmem>>, vector<14x32xf32>,
    %c364 = arith.constant 364 : index
    %c0_65 = arith.constant 0 : index
    %64 = vector.load %arg12[%c364, %c0_65] : memref<392x32xf32, #tpu.memory_space<vmem>>, vector<14x32xf32>
    %c465 = arith.constant 465 : index
    %c0_66 = arith.constant 0 : index
    %65 = vector.load %arg13[%c465, %c0_66] : memref<512x32xf32, #tpu.memory_space<vmem>>, vector<14x32xf32>
    tpu.vector_store %arg13[%c465, %c0_66], %64 {strides = array<i32>} : memref<512x32xf32, #tpu.memory_space<vmem>>, vector<14x32xf32>,
    %c378 = arith.constant 378 : index
    %c0_67 = arith.constant 0 : index
    %66 = vector.load %arg12[%c378, %c0_67] : memref<392x32xf32, #tpu.memory_space<vmem>>, vector<14x32xf32>
    %c481 = arith.constant 481 : index
    %c0_68 = arith.constant 0 : index
    %67 = vector.load %arg13[%c481, %c0_68] : memref<512x32xf32, #tpu.memory_space<vmem>>, vector<14x32xf32>
    tpu.vector_store %arg13[%c481, %c0_68], %66 {strides = array<i32>} : memref<512x32xf32, #tpu.memory_space<vmem>>, vector<14x32xf32>,
    %c0_69 = arith.constant 0 : index
    %c0_70 = arith.constant 0 : index
    %68 = tpu.strided_load %arg13[%c0_69, %c0_70] {strides = array<i32: 2, 1>} : memref<512x32xf32, #tpu.memory_space<vmem>>, vector<7x32xf32>
    %c0_71 = arith.constant 0 : index
    %c0_72 = arith.constant 0 : index
    %69 = vector.load %arg14[%c0_71, %c0_72] : memref<98x288xf32, #tpu.memory_space<vmem>>, vector<7x32xf32>
    tpu.vector_store %arg14[%c0_71, %c0_72], %68 {strides = array<i32>} : memref<98x288xf32, #tpu.memory_space<vmem>>, vector<7x32xf32>,
    %c1 = arith.constant 1 : index
    %c0_73 = arith.constant 0 : index
    %70 = tpu.strided_load %arg13[%c1, %c0_73] {strides = array<i32: 2, 1>} : memref<512x32xf32, #tpu.memory_space<vmem>>, vector<7x32xf32>
    %c0_74 = arith.constant 0 : index
    %c32 = arith.constant 32 : index
    %71 = vector.load %arg14[%c0_74, %c32] : memref<98x288xf32, #tpu.memory_space<vmem>>, vector<7x32xf32>
    tpu.vector_store %arg14[%c0_74, %c32], %70 {strides = array<i32>} : memref<98x288xf32, #tpu.memory_space<vmem>>, vector<7x32xf32>,
    %c2 = arith.constant 2 : index
    %c0_75 = arith.constant 0 : index
    %72 = tpu.strided_load %arg13[%c2, %c0_75] {strides = array<i32: 2, 1>} : memref<512x32xf32, #tpu.memory_space<vmem>>, vector<7x32xf32>
    %c0_76 = arith.constant 0 : index
    %c64 = arith.constant 64 : index
    %73 = vector.load %arg14[%c0_76, %c64] : memref<98x288xf32, #tpu.memory_space<vmem>>, vector<7x32xf32>
    tpu.vector_store %arg14[%c0_76, %c64], %72 {strides = array<i32>} : memref<98x288xf32, #tpu.memory_space<vmem>>, vector<7x32xf32>,
    %c16 = arith.constant 16 : index
    %c0_77 = arith.constant 0 : index
    %74 = tpu.strided_load %arg13[%c16, %c0_77] {strides = array<i32: 2, 1>} : memref<512x32xf32, #tpu.memory_space<vmem>>, vector<7x32xf32>
    %c0_78 = arith.constant 0 : index
    %c96 = arith.constant 96 : index
    %75 = vector.load %arg14[%c0_78, %c96] : memref<98x288xf32, #tpu.memory_space<vmem>>, vector<7x32xf32>
    tpu.vector_store %arg14[%c0_78, %c96], %74 {strides = array<i32>} : memref<98x288xf32, #tpu.memory_space<vmem>>, vector<7x32xf32>,
    %c17_79 = arith.constant 17 : index
    %c0_80 = arith.constant 0 : index
    %76 = tpu.strided_load %arg13[%c17_79, %c0_80] {strides = array<i32: 2, 1>} : memref<512x32xf32, #tpu.memory_space<vmem>>, vector<7x32xf32>
    %c0_81 = arith.constant 0 : index
    %c128 = arith.constant 128 : index
    %77 = vector.load %arg14[%c0_81, %c128] : memref<98x288xf32, #tpu.memory_space<vmem>>, vector<7x32xf32>
    tpu.vector_store %arg14[%c0_81, %c128], %76 {strides = array<i32>} : memref<98x288xf32, #tpu.memory_space<vmem>>, vector<7x32xf32>,
    %c18 = arith.constant 18 : index
    %c0_82 = arith.constant 0 : index
    %78 = tpu.strided_load %arg13[%c18, %c0_82] {strides = array<i32: 2, 1>} : memref<512x32xf32, #tpu.memory_space<vmem>>, vector<7x32xf32>
    %c0_83 = arith.constant 0 : index
    %c160 = arith.constant 160 : index
    %79 = vector.load %arg14[%c0_83, %c160] : memref<98x288xf32, #tpu.memory_space<vmem>>, vector<7x32xf32>
    tpu.vector_store %arg14[%c0_83, %c160], %78 {strides = array<i32>} : memref<98x288xf32, #tpu.memory_space<vmem>>, vector<7x32xf32>,
    %c32_84 = arith.constant 32 : index
    %c0_85 = arith.constant 0 : index
    %80 = tpu.strided_load %arg13[%c32_84, %c0_85] {strides = array<i32: 2, 1>} : memref<512x32xf32, #tpu.memory_space<vmem>>, vector<7x32xf32>
    %c0_86 = arith.constant 0 : index
    %c192 = arith.constant 192 : index
    %81 = vector.load %arg14[%c0_86, %c192] : memref<98x288xf32, #tpu.memory_space<vmem>>, vector<7x32xf32>
    tpu.vector_store %arg14[%c0_86, %c192], %80 {strides = array<i32>} : memref<98x288xf32, #tpu.memory_space<vmem>>, vector<7x32xf32>,
    %c33_87 = arith.constant 33 : index
    %c0_88 = arith.constant 0 : index
    %82 = tpu.strided_load %arg13[%c33_87, %c0_88] {strides = array<i32: 2, 1>} : memref<512x32xf32, #tpu.memory_space<vmem>>, vector<7x32xf32>
    %c0_89 = arith.constant 0 : index
    %c224_90 = arith.constant 224 : index
    %83 = vector.load %arg14[%c0_89, %c224_90] : memref<98x288xf32, #tpu.memory_space<vmem>>, vector<7x32xf32>
    tpu.vector_store %arg14[%c0_89, %c224_90], %82 {strides = array<i32>} : memref<98x288xf32, #tpu.memory_space<vmem>>, vector<7x32xf32>,
    %c34 = arith.constant 34 : index
    %c0_91 = arith.constant 0 : index
    %84 = tpu.strided_load %arg13[%c34, %c0_91] {strides = array<i32: 2, 1>} : memref<512x32xf32, #tpu.memory_space<vmem>>, vector<7x32xf32>
    %c0_92 = arith.constant 0 : index
    %c256 = arith.constant 256 : index
    %85 = vector.load %arg14[%c0_92, %c256] : memref<98x288xf32, #tpu.memory_space<vmem>>, vector<7x32xf32>
    tpu.vector_store %arg14[%c0_92, %c256], %84 {strides = array<i32>} : memref<98x288xf32, #tpu.memory_space<vmem>>, vector<7x32xf32>,
    %c32_93 = arith.constant 32 : index
    %c0_94 = arith.constant 0 : index
    %86 = tpu.strided_load %arg13[%c32_93, %c0_94] {strides = array<i32: 2, 1>} : memref<512x32xf32, #tpu.memory_space<vmem>>, vector<7x32xf32>
    %c7 = arith.constant 7 : index
    %c0_95 = arith.constant 0 : index
    %87 = vector.load %arg14[%c7, %c0_95] : memref<98x288xf32, #tpu.memory_space<vmem>>, vector<7x32xf32>
    tpu.vector_store %arg14[%c7, %c0_95], %86 {strides = array<i32>} : memref<98x288xf32, #tpu.memory_space<vmem>>, vector<7x32xf32>,
    %c33_96 = arith.constant 33 : index
    %c0_97 = arith.constant 0 : index
    %88 = tpu.strided_load %arg13[%c33_96, %c0_97] {strides = array<i32: 2, 1>} : memref<512x32xf32, #tpu.memory_space<vmem>>, vector<7x32xf32>
    %c7_98 = arith.constant 7 : index
    %c32_99 = arith.constant 32 : index
    %89 = vector.load %arg14[%c7_98, %c32_99] : memref<98x288xf32, #tpu.memory_space<vmem>>, vector<7x32xf32>
    tpu.vector_store %arg14[%c7_98, %c32_99], %88 {strides = array<i32>} : memref<98x288xf32, #tpu.memory_space<vmem>>, vector<7x32xf32>,
    %c34_100 = arith.constant 34 : index
    %c0_101 = arith.constant 0 : index
    %90 = tpu.strided_load %arg13[%c34_100, %c0_101] {strides = array<i32: 2, 1>} : memref<512x32xf32, #tpu.memory_space<vmem>>, vector<7x32xf32>
    %c7_102 = arith.constant 7 : index
    %c64_103 = arith.constant 64 : index
    %91 = vector.load %arg14[%c7_102, %c64_103] : memref<98x288xf32, #tpu.memory_space<vmem>>, vector<7x32xf32>
    tpu.vector_store %arg14[%c7_102, %c64_103], %90 {strides = array<i32>} : memref<98x288xf32, #tpu.memory_space<vmem>>, vector<7x32xf32>,
    %c48 = arith.constant 48 : index
    %c0_104 = arith.constant 0 : index
    %92 = tpu.strided_load %arg13[%c48, %c0_104] {strides = array<i32: 2, 1>} : memref<512x32xf32, #tpu.memory_space<vmem>>, vector<7x32xf32>
    %c7_105 = arith.constant 7 : index
    %c96_106 = arith.constant 96 : index
    %93 = vector.load %arg14[%c7_105, %c96_106] : memref<98x288xf32, #tpu.memory_space<vmem>>, vector<7x32xf32>
    tpu.vector_store %arg14[%c7_105, %c96_106], %92 {strides = array<i32>} : memref<98x288xf32, #tpu.memory_space<vmem>>, vector<7x32xf32>,
    %c49_107 = arith.constant 49 : index
    %c0_108 = arith.constant 0 : index
    %94 = tpu.strided_load %arg13[%c49_107, %c0_108] {strides = array<i32: 2, 1>} : memref<512x32xf32, #tpu.memory_space<vmem>>, vector<7x32xf32>
    %c7_109 = arith.constant 7 : index
    %c128_110 = arith.constant 128 : index
    %95 = vector.load %arg14[%c7_109, %c128_110] : memref<98x288xf32, #tpu.memory_space<vmem>>, vector<7x32xf32>
    tpu.vector_store %arg14[%c7_109, %c128_110], %94 {strides = array<i32>} : memref<98x288xf32, #tpu.memory_space<vmem>>, vector<7x32xf32>,
    %c50 = arith.constant 50 : index
    %c0_111 = arith.constant 0 : index
    %96 = tpu.strided_load %arg13[%c50, %c0_111] {strides = array<i32: 2, 1>} : memref<512x32xf32, #tpu.memory_space<vmem>>, vector<7x32xf32>
    %c7_112 = arith.constant 7 : index
    %c160_113 = arith.constant 160 : index
    %97 = vector.load %arg14[%c7_112, %c160_113] : memref<98x288xf32, #tpu.memory_space<vmem>>, vector<7x32xf32>
    tpu.vector_store %arg14[%c7_112, %c160_113], %96 {strides = array<i32>} : memref<98x288xf32, #tpu.memory_space<vmem>>, vector<7x32xf32>,
    %c64_114 = arith.constant 64 : index
    %c0_115 = arith.constant 0 : index
    %98 = tpu.strided_load %arg13[%c64_114, %c0_115] {strides = array<i32: 2, 1>} : memref<512x32xf32, #tpu.memory_space<vmem>>, vector<7x32xf32>
    %c7_116 = arith.constant 7 : index
    %c192_117 = arith.constant 192 : index
    %99 = vector.load %arg14[%c7_116, %c192_117] : memref<98x288xf32, #tpu.memory_space<vmem>>, vector<7x32xf32>
    tpu.vector_store %arg14[%c7_116, %c192_117], %98 {strides = array<i32>} : memref<98x288xf32, #tpu.memory_space<vmem>>, vector<7x32xf32>,
    %c65_118 = arith.constant 65 : index
    %c0_119 = arith.constant 0 : index
    %100 = tpu.strided_load %arg13[%c65_118, %c0_119] {strides = array<i32: 2, 1>} : memref<512x32xf32, #tpu.memory_space<vmem>>, vector<7x32xf32>
    %c7_120 = arith.constant 7 : index
    %c224_121 = arith.constant 224 : index
    %101 = vector.load %arg14[%c7_120, %c224_121] : memref<98x288xf32, #tpu.memory_space<vmem>>, vector<7x32xf32>
    tpu.vector_store %arg14[%c7_120, %c224_121], %100 {strides = array<i32>} : memref<98x288xf32, #tpu.memory_space<vmem>>, vector<7x32xf32>,
    %c66 = arith.constant 66 : index
    %c0_122 = arith.constant 0 : index
    %102 = tpu.strided_load %arg13[%c66, %c0_122] {strides = array<i32: 2, 1>} : memref<512x32xf32, #tpu.memory_space<vmem>>, vector<7x32xf32>
    %c7_123 = arith.constant 7 : index
    %c256_124 = arith.constant 256 : index
    %103 = vector.load %arg14[%c7_123, %c256_124] : memref<98x288xf32, #tpu.memory_space<vmem>>, vector<7x32xf32>
    tpu.vector_store %arg14[%c7_123, %c256_124], %102 {strides = array<i32>} : memref<98x288xf32, #tpu.memory_space<vmem>>, vector<7x32xf32>,
    %c64_125 = arith.constant 64 : index
    %c0_126 = arith.constant 0 : index
    %104 = tpu.strided_load %arg13[%c64_125, %c0_126] {strides = array<i32: 2, 1>} : memref<512x32xf32, #tpu.memory_space<vmem>>, vector<7x32xf32>
    %c14_127 = arith.constant 14 : index
    %c0_128 = arith.constant 0 : index
    %105 = vector.load %arg14[%c14_127, %c0_128] : memref<98x288xf32, #tpu.memory_space<vmem>>, vector<7x32xf32>
    tpu.vector_store %arg14[%c14_127, %c0_128], %104 {strides = array<i32>} : memref<98x288xf32, #tpu.memory_space<vmem>>, vector<7x32xf32>,
    %c65_129 = arith.constant 65 : index
    %c0_130 = arith.constant 0 : index
    %106 = tpu.strided_load %arg13[%c65_129, %c0_130] {strides = array<i32: 2, 1>} : memref<512x32xf32, #tpu.memory_space<vmem>>, vector<7x32xf32>
    %c14_131 = arith.constant 14 : index
    %c32_132 = arith.constant 32 : index
    %107 = vector.load %arg14[%c14_131, %c32_132] : memref<98x288xf32, #tpu.memory_space<vmem>>, vector<7x32xf32>
    tpu.vector_store %arg14[%c14_131, %c32_132], %106 {strides = array<i32>} : memref<98x288xf32, #tpu.memory_space<vmem>>, vector<7x32xf32>,
    %c66_133 = arith.constant 66 : index
    %c0_134 = arith.constant 0 : index
    %108 = tpu.strided_load %arg13[%c66_133, %c0_134] {strides = array<i32: 2, 1>} : memref<512x32xf32, #tpu.memory_space<vmem>>, vector<7x32xf32>
    %c14_135 = arith.constant 14 : index
    %c64_136 = arith.constant 64 : index
    %109 = vector.load %arg14[%c14_135, %c64_136] : memref<98x288xf32, #tpu.memory_space<vmem>>, vector<7x32xf32>
    tpu.vector_store %arg14[%c14_135, %c64_136], %108 {strides = array<i32>} : memref<98x288xf32, #tpu.memory_space<vmem>>, vector<7x32xf32>,
    %c80 = arith.constant 80 : index
    %c0_137 = arith.constant 0 : index
    %110 = tpu.strided_load %arg13[%c80, %c0_137] {strides = array<i32: 2, 1>} : memref<512x32xf32, #tpu.memory_space<vmem>>, vector<7x32xf32>
    %c14_138 = arith.constant 14 : index
    %c96_139 = arith.constant 96 : index
    %111 = vector.load %arg14[%c14_138, %c96_139] : memref<98x288xf32, #tpu.memory_space<vmem>>, vector<7x32xf32>
    tpu.vector_store %arg14[%c14_138, %c96_139], %110 {strides = array<i32>} : memref<98x288xf32, #tpu.memory_space<vmem>>, vector<7x32xf32>,
    %c81_140 = arith.constant 81 : index
    %c0_141 = arith.constant 0 : index
    %112 = tpu.strided_load %arg13[%c81_140, %c0_141] {strides = array<i32: 2, 1>} : memref<512x32xf32, #tpu.memory_space<vmem>>, vector<7x32xf32>
    %c14_142 = arith.constant 14 : index
    %c128_143 = arith.constant 128 : index
    %113 = vector.load %arg14[%c14_142, %c128_143] : memref<98x288xf32, #tpu.memory_space<vmem>>, vector<7x32xf32>
    tpu.vector_store %arg14[%c14_142, %c128_143], %112 {strides = array<i32>} : memref<98x288xf32, #tpu.memory_space<vmem>>, vector<7x32xf32>,
    %c82 = arith.constant 82 : index
    %c0_144 = arith.constant 0 : index
    %114 = tpu.strided_load %arg13[%c82, %c0_144] {strides = array<i32: 2, 1>} : memref<512x32xf32, #tpu.memory_space<vmem>>, vector<7x32xf32>
    %c14_145 = arith.constant 14 : index
    %c160_146 = arith.constant 160 : index
    %115 = vector.load %arg14[%c14_145, %c160_146] : memref<98x288xf32, #tpu.memory_space<vmem>>, vector<7x32xf32>
    tpu.vector_store %arg14[%c14_145, %c160_146], %114 {strides = array<i32>} : memref<98x288xf32, #tpu.memory_space<vmem>>, vector<7x32xf32>,
    %c96_147 = arith.constant 96 : index
    %c0_148 = arith.constant 0 : index
    %116 = tpu.strided_load %arg13[%c96_147, %c0_148] {strides = array<i32: 2, 1>} : memref<512x32xf32, #tpu.memory_space<vmem>>, vector<7x32xf32>
    %c14_149 = arith.constant 14 : index
    %c192_150 = arith.constant 192 : index
    %117 = vector.load %arg14[%c14_149, %c192_150] : memref<98x288xf32, #tpu.memory_space<vmem>>, vector<7x32xf32>
    tpu.vector_store %arg14[%c14_149, %c192_150], %116 {strides = array<i32>} : memref<98x288xf32, #tpu.memory_space<vmem>>, vector<7x32xf32>,
    %c97_151 = arith.constant 97 : index
    %c0_152 = arith.constant 0 : index
    %118 = tpu.strided_load %arg13[%c97_151, %c0_152] {strides = array<i32: 2, 1>} : memref<512x32xf32, #tpu.memory_space<vmem>>, vector<7x32xf32>
    %c14_153 = arith.constant 14 : index
    %c224_154 = arith.constant 224 : index
    %119 = vector.load %arg14[%c14_153, %c224_154] : memref<98x288xf32, #tpu.memory_space<vmem>>, vector<7x32xf32>
    tpu.vector_store %arg14[%c14_153, %c224_154], %118 {strides = array<i32>} : memref<98x288xf32, #tpu.memory_space<vmem>>, vector<7x32xf32>,
    %c98_155 = arith.constant 98 : index
    %c0_156 = arith.constant 0 : index
    %120 = tpu.strided_load %arg13[%c98_155, %c0_156] {strides = array<i32: 2, 1>} : memref<512x32xf32, #tpu.memory_space<vmem>>, vector<7x32xf32>
    %c14_157 = arith.constant 14 : index
    %c256_158 = arith.constant 256 : index
    %121 = vector.load %arg14[%c14_157, %c256_158] : memref<98x288xf32, #tpu.memory_space<vmem>>, vector<7x32xf32>
    tpu.vector_store %arg14[%c14_157, %c256_158], %120 {strides = array<i32>} : memref<98x288xf32, #tpu.memory_space<vmem>>, vector<7x32xf32>,
    %c96_159 = arith.constant 96 : index
    %c0_160 = arith.constant 0 : index
    %122 = tpu.strided_load %arg13[%c96_159, %c0_160] {strides = array<i32: 2, 1>} : memref<512x32xf32, #tpu.memory_space<vmem>>, vector<7x32xf32>
    %c21 = arith.constant 21 : index
    %c0_161 = arith.constant 0 : index
    %123 = vector.load %arg14[%c21, %c0_161] : memref<98x288xf32, #tpu.memory_space<vmem>>, vector<7x32xf32>
    tpu.vector_store %arg14[%c21, %c0_161], %122 {strides = array<i32>} : memref<98x288xf32, #tpu.memory_space<vmem>>, vector<7x32xf32>,
    %c97_162 = arith.constant 97 : index
    %c0_163 = arith.constant 0 : index
    %124 = tpu.strided_load %arg13[%c97_162, %c0_163] {strides = array<i32: 2, 1>} : memref<512x32xf32, #tpu.memory_space<vmem>>, vector<7x32xf32>
    %c21_164 = arith.constant 21 : index
    %c32_165 = arith.constant 32 : index
    %125 = vector.load %arg14[%c21_164, %c32_165] : memref<98x288xf32, #tpu.memory_space<vmem>>, vector<7x32xf32>
    tpu.vector_store %arg14[%c21_164, %c32_165], %124 {strides = array<i32>} : memref<98x288xf32, #tpu.memory_space<vmem>>, vector<7x32xf32>,
    %c98_166 = arith.constant 98 : index
    %c0_167 = arith.constant 0 : index
    %126 = tpu.strided_load %arg13[%c98_166, %c0_167] {strides = array<i32: 2, 1>} : memref<512x32xf32, #tpu.memory_space<vmem>>, vector<7x32xf32>
    %c21_168 = arith.constant 21 : index
    %c64_169 = arith.constant 64 : index
    %127 = vector.load %arg14[%c21_168, %c64_169] : memref<98x288xf32, #tpu.memory_space<vmem>>, vector<7x32xf32>
    tpu.vector_store %arg14[%c21_168, %c64_169], %126 {strides = array<i32>} : memref<98x288xf32, #tpu.memory_space<vmem>>, vector<7x32xf32>,
    %c112_170 = arith.constant 112 : index
    %c0_171 = arith.constant 0 : index
    %128 = tpu.strided_load %arg13[%c112_170, %c0_171] {strides = array<i32: 2, 1>} : memref<512x32xf32, #tpu.memory_space<vmem>>, vector<7x32xf32>
    %c21_172 = arith.constant 21 : index
    %c96_173 = arith.constant 96 : index
    %129 = vector.load %arg14[%c21_172, %c96_173] : memref<98x288xf32, #tpu.memory_space<vmem>>, vector<7x32xf32>
    tpu.vector_store %arg14[%c21_172, %c96_173], %128 {strides = array<i32>} : memref<98x288xf32, #tpu.memory_space<vmem>>, vector<7x32xf32>,
    %c113_174 = arith.constant 113 : index
    %c0_175 = arith.constant 0 : index
    %130 = tpu.strided_load %arg13[%c113_174, %c0_175] {strides = array<i32: 2, 1>} : memref<512x32xf32, #tpu.memory_space<vmem>>, vector<7x32xf32>
    %c21_176 = arith.constant 21 : index
    %c128_177 = arith.constant 128 : index
    %131 = vector.load %arg14[%c21_176, %c128_177] : memref<98x288xf32, #tpu.memory_space<vmem>>, vector<7x32xf32>
    tpu.vector_store %arg14[%c21_176, %c128_177], %130 {strides = array<i32>} : memref<98x288xf32, #tpu.memory_space<vmem>>, vector<7x32xf32>,
    %c114 = arith.constant 114 : index
    %c0_178 = arith.constant 0 : index
    %132 = tpu.strided_load %arg13[%c114, %c0_178] {strides = array<i32: 2, 1>} : memref<512x32xf32, #tpu.memory_space<vmem>>, vector<7x32xf32>
    %c21_179 = arith.constant 21 : index
    %c160_180 = arith.constant 160 : index
    %133 = vector.load %arg14[%c21_179, %c160_180] : memref<98x288xf32, #tpu.memory_space<vmem>>, vector<7x32xf32>
    tpu.vector_store %arg14[%c21_179, %c160_180], %132 {strides = array<i32>} : memref<98x288xf32, #tpu.memory_space<vmem>>, vector<7x32xf32>,
    %c128_181 = arith.constant 128 : index
    %c0_182 = arith.constant 0 : index
    %134 = tpu.strided_load %arg13[%c128_181, %c0_182] {strides = array<i32: 2, 1>} : memref<512x32xf32, #tpu.memory_space<vmem>>, vector<7x32xf32>
    %c21_183 = arith.constant 21 : index
    %c192_184 = arith.constant 192 : index
    %135 = vector.load %arg14[%c21_183, %c192_184] : memref<98x288xf32, #tpu.memory_space<vmem>>, vector<7x32xf32>
    tpu.vector_store %arg14[%c21_183, %c192_184], %134 {strides = array<i32>} : memref<98x288xf32, #tpu.memory_space<vmem>>, vector<7x32xf32>,
    %c129_185 = arith.constant 129 : index
    %c0_186 = arith.constant 0 : index
    %136 = tpu.strided_load %arg13[%c129_185, %c0_186] {strides = array<i32: 2, 1>} : memref<512x32xf32, #tpu.memory_space<vmem>>, vector<7x32xf32>
    %c21_187 = arith.constant 21 : index
    %c224_188 = arith.constant 224 : index
    %137 = vector.load %arg14[%c21_187, %c224_188] : memref<98x288xf32, #tpu.memory_space<vmem>>, vector<7x32xf32>
    tpu.vector_store %arg14[%c21_187, %c224_188], %136 {strides = array<i32>} : memref<98x288xf32, #tpu.memory_space<vmem>>, vector<7x32xf32>,
    %c130 = arith.constant 130 : index
    %c0_189 = arith.constant 0 : index
    %138 = tpu.strided_load %arg13[%c130, %c0_189] {strides = array<i32: 2, 1>} : memref<512x32xf32, #tpu.memory_space<vmem>>, vector<7x32xf32>
    %c21_190 = arith.constant 21 : index
    %c256_191 = arith.constant 256 : index
    %139 = vector.load %arg14[%c21_190, %c256_191] : memref<98x288xf32, #tpu.memory_space<vmem>>, vector<7x32xf32>
    tpu.vector_store %arg14[%c21_190, %c256_191], %138 {strides = array<i32>} : memref<98x288xf32, #tpu.memory_space<vmem>>, vector<7x32xf32>,
    %c128_192 = arith.constant 128 : index
    %c0_193 = arith.constant 0 : index
    %140 = tpu.strided_load %arg13[%c128_192, %c0_193] {strides = array<i32: 2, 1>} : memref<512x32xf32, #tpu.memory_space<vmem>>, vector<7x32xf32>
    %c28_194 = arith.constant 28 : index
    %c0_195 = arith.constant 0 : index
    %141 = vector.load %arg14[%c28_194, %c0_195] : memref<98x288xf32, #tpu.memory_space<vmem>>, vector<7x32xf32>
    tpu.vector_store %arg14[%c28_194, %c0_195], %140 {strides = array<i32>} : memref<98x288xf32, #tpu.memory_space<vmem>>, vector<7x32xf32>,
    %c129_196 = arith.constant 129 : index
    %c0_197 = arith.constant 0 : index
    %142 = tpu.strided_load %arg13[%c129_196, %c0_197] {strides = array<i32: 2, 1>} : memref<512x32xf32, #tpu.memory_space<vmem>>, vector<7x32xf32>
    %c28_198 = arith.constant 28 : index
    %c32_199 = arith.constant 32 : index
    %143 = vector.load %arg14[%c28_198, %c32_199] : memref<98x288xf32, #tpu.memory_space<vmem>>, vector<7x32xf32>
    tpu.vector_store %arg14[%c28_198, %c32_199], %142 {strides = array<i32>} : memref<98x288xf32, #tpu.memory_space<vmem>>, vector<7x32xf32>,
    %c130_200 = arith.constant 130 : index
    %c0_201 = arith.constant 0 : index
    %144 = tpu.strided_load %arg13[%c130_200, %c0_201] {strides = array<i32: 2, 1>} : memref<512x32xf32, #tpu.memory_space<vmem>>, vector<7x32xf32>
    %c28_202 = arith.constant 28 : index
    %c64_203 = arith.constant 64 : index
    %145 = vector.load %arg14[%c28_202, %c64_203] : memref<98x288xf32, #tpu.memory_space<vmem>>, vector<7x32xf32>
    tpu.vector_store %arg14[%c28_202, %c64_203], %144 {strides = array<i32>} : memref<98x288xf32, #tpu.memory_space<vmem>>, vector<7x32xf32>,
    %c144 = arith.constant 144 : index
    %c0_204 = arith.constant 0 : index
    %146 = tpu.strided_load %arg13[%c144, %c0_204] {strides = array<i32: 2, 1>} : memref<512x32xf32, #tpu.memory_space<vmem>>, vector<7x32xf32>
    %c28_205 = arith.constant 28 : index
    %c96_206 = arith.constant 96 : index
    %147 = vector.load %arg14[%c28_205, %c96_206] : memref<98x288xf32, #tpu.memory_space<vmem>>, vector<7x32xf32>
    tpu.vector_store %arg14[%c28_205, %c96_206], %146 {strides = array<i32>} : memref<98x288xf32, #tpu.memory_space<vmem>>, vector<7x32xf32>,
    %c145_207 = arith.constant 145 : index
    %c0_208 = arith.constant 0 : index
    %148 = tpu.strided_load %arg13[%c145_207, %c0_208] {strides = array<i32: 2, 1>} : memref<512x32xf32, #tpu.memory_space<vmem>>, vector<7x32xf32>
    %c28_209 = arith.constant 28 : index
    %c128_210 = arith.constant 128 : index
    %149 = vector.load %arg14[%c28_209, %c128_210] : memref<98x288xf32, #tpu.memory_space<vmem>>, vector<7x32xf32>
    tpu.vector_store %arg14[%c28_209, %c128_210], %148 {strides = array<i32>} : memref<98x288xf32, #tpu.memory_space<vmem>>, vector<7x32xf32>,
    %c146 = arith.constant 146 : index
    %c0_211 = arith.constant 0 : index
    %150 = tpu.strided_load %arg13[%c146, %c0_211] {strides = array<i32: 2, 1>} : memref<512x32xf32, #tpu.memory_space<vmem>>, vector<7x32xf32>
    %c28_212 = arith.constant 28 : index
    %c160_213 = arith.constant 160 : index
    %151 = vector.load %arg14[%c28_212, %c160_213] : memref<98x288xf32, #tpu.memory_space<vmem>>, vector<7x32xf32>
    tpu.vector_store %arg14[%c28_212, %c160_213], %150 {strides = array<i32>} : memref<98x288xf32, #tpu.memory_space<vmem>>, vector<7x32xf32>,
    %c160_214 = arith.constant 160 : index
    %c0_215 = arith.constant 0 : index
    %152 = tpu.strided_load %arg13[%c160_214, %c0_215] {strides = array<i32: 2, 1>} : memref<512x32xf32, #tpu.memory_space<vmem>>, vector<7x32xf32>
    %c28_216 = arith.constant 28 : index
    %c192_217 = arith.constant 192 : index
    %153 = vector.load %arg14[%c28_216, %c192_217] : memref<98x288xf32, #tpu.memory_space<vmem>>, vector<7x32xf32>
    tpu.vector_store %arg14[%c28_216, %c192_217], %152 {strides = array<i32>} : memref<98x288xf32, #tpu.memory_space<vmem>>, vector<7x32xf32>,
    %c161_218 = arith.constant 161 : index
    %c0_219 = arith.constant 0 : index
    %154 = tpu.strided_load %arg13[%c161_218, %c0_219] {strides = array<i32: 2, 1>} : memref<512x32xf32, #tpu.memory_space<vmem>>, vector<7x32xf32>
    %c28_220 = arith.constant 28 : index
    %c224_221 = arith.constant 224 : index
    %155 = vector.load %arg14[%c28_220, %c224_221] : memref<98x288xf32, #tpu.memory_space<vmem>>, vector<7x32xf32>
    tpu.vector_store %arg14[%c28_220, %c224_221], %154 {strides = array<i32>} : memref<98x288xf32, #tpu.memory_space<vmem>>, vector<7x32xf32>,
    %c162 = arith.constant 162 : index
    %c0_222 = arith.constant 0 : index
    %156 = tpu.strided_load %arg13[%c162, %c0_222] {strides = array<i32: 2, 1>} : memref<512x32xf32, #tpu.memory_space<vmem>>, vector<7x32xf32>
    %c28_223 = arith.constant 28 : index
    %c256_224 = arith.constant 256 : index
    %157 = vector.load %arg14[%c28_223, %c256_224] : memref<98x288xf32, #tpu.memory_space<vmem>>, vector<7x32xf32>
    tpu.vector_store %arg14[%c28_223, %c256_224], %156 {strides = array<i32>} : memref<98x288xf32, #tpu.memory_space<vmem>>, vector<7x32xf32>,
    %c160_225 = arith.constant 160 : index
    %c0_226 = arith.constant 0 : index
    %158 = tpu.strided_load %arg13[%c160_225, %c0_226] {strides = array<i32: 2, 1>} : memref<512x32xf32, #tpu.memory_space<vmem>>, vector<7x32xf32>
    %c35 = arith.constant 35 : index
    %c0_227 = arith.constant 0 : index
    %159 = vector.load %arg14[%c35, %c0_227] : memref<98x288xf32, #tpu.memory_space<vmem>>, vector<7x32xf32>
    tpu.vector_store %arg14[%c35, %c0_227], %158 {strides = array<i32>} : memref<98x288xf32, #tpu.memory_space<vmem>>, vector<7x32xf32>,
    %c161_228 = arith.constant 161 : index
    %c0_229 = arith.constant 0 : index
    %160 = tpu.strided_load %arg13[%c161_228, %c0_229] {strides = array<i32: 2, 1>} : memref<512x32xf32, #tpu.memory_space<vmem>>, vector<7x32xf32>
    %c35_230 = arith.constant 35 : index
    %c32_231 = arith.constant 32 : index
    %161 = vector.load %arg14[%c35_230, %c32_231] : memref<98x288xf32, #tpu.memory_space<vmem>>, vector<7x32xf32>
    tpu.vector_store %arg14[%c35_230, %c32_231], %160 {strides = array<i32>} : memref<98x288xf32, #tpu.memory_space<vmem>>, vector<7x32xf32>,
    %c162_232 = arith.constant 162 : index
    %c0_233 = arith.constant 0 : index
    %162 = tpu.strided_load %arg13[%c162_232, %c0_233] {strides = array<i32: 2, 1>} : memref<512x32xf32, #tpu.memory_space<vmem>>, vector<7x32xf32>
    %c35_234 = arith.constant 35 : index
    %c64_235 = arith.constant 64 : index
    %163 = vector.load %arg14[%c35_234, %c64_235] : memref<98x288xf32, #tpu.memory_space<vmem>>, vector<7x32xf32>
    tpu.vector_store %arg14[%c35_234, %c64_235], %162 {strides = array<i32>} : memref<98x288xf32, #tpu.memory_space<vmem>>, vector<7x32xf32>,
    %c176 = arith.constant 176 : index
    %c0_236 = arith.constant 0 : index
    %164 = tpu.strided_load %arg13[%c176, %c0_236] {strides = array<i32: 2, 1>} : memref<512x32xf32, #tpu.memory_space<vmem>>, vector<7x32xf32>
    %c35_237 = arith.constant 35 : index
    %c96_238 = arith.constant 96 : index
    %165 = vector.load %arg14[%c35_237, %c96_238] : memref<98x288xf32, #tpu.memory_space<vmem>>, vector<7x32xf32>
    tpu.vector_store %arg14[%c35_237, %c96_238], %164 {strides = array<i32>} : memref<98x288xf32, #tpu.memory_space<vmem>>, vector<7x32xf32>,
    %c177_239 = arith.constant 177 : index
    %c0_240 = arith.constant 0 : index
    %166 = tpu.strided_load %arg13[%c177_239, %c0_240] {strides = array<i32: 2, 1>} : memref<512x32xf32, #tpu.memory_space<vmem>>, vector<7x32xf32>
    %c35_241 = arith.constant 35 : index
    %c128_242 = arith.constant 128 : index
    %167 = vector.load %arg14[%c35_241, %c128_242] : memref<98x288xf32, #tpu.memory_space<vmem>>, vector<7x32xf32>
    tpu.vector_store %arg14[%c35_241, %c128_242], %166 {strides = array<i32>} : memref<98x288xf32, #tpu.memory_space<vmem>>, vector<7x32xf32>,
    %c178 = arith.constant 178 : index
    %c0_243 = arith.constant 0 : index
    %168 = tpu.strided_load %arg13[%c178, %c0_243] {strides = array<i32: 2, 1>} : memref<512x32xf32, #tpu.memory_space<vmem>>, vector<7x32xf32>
    %c35_244 = arith.constant 35 : index
    %c160_245 = arith.constant 160 : index
    %169 = vector.load %arg14[%c35_244, %c160_245] : memref<98x288xf32, #tpu.memory_space<vmem>>, vector<7x32xf32>
    tpu.vector_store %arg14[%c35_244, %c160_245], %168 {strides = array<i32>} : memref<98x288xf32, #tpu.memory_space<vmem>>, vector<7x32xf32>,
    %c192_246 = arith.constant 192 : index
    %c0_247 = arith.constant 0 : index
    %170 = tpu.strided_load %arg13[%c192_246, %c0_247] {strides = array<i32: 2, 1>} : memref<512x32xf32, #tpu.memory_space<vmem>>, vector<7x32xf32>
    %c35_248 = arith.constant 35 : index
    %c192_249 = arith.constant 192 : index
    %171 = vector.load %arg14[%c35_248, %c192_249] : memref<98x288xf32, #tpu.memory_space<vmem>>, vector<7x32xf32>
    tpu.vector_store %arg14[%c35_248, %c192_249], %170 {strides = array<i32>} : memref<98x288xf32, #tpu.memory_space<vmem>>, vector<7x32xf32>,
    %c193_250 = arith.constant 193 : index
    %c0_251 = arith.constant 0 : index
    %172 = tpu.strided_load %arg13[%c193_250, %c0_251] {strides = array<i32: 2, 1>} : memref<512x32xf32, #tpu.memory_space<vmem>>, vector<7x32xf32>
    %c35_252 = arith.constant 35 : index
    %c224_253 = arith.constant 224 : index
    %173 = vector.load %arg14[%c35_252, %c224_253] : memref<98x288xf32, #tpu.memory_space<vmem>>, vector<7x32xf32>
    tpu.vector_store %arg14[%c35_252, %c224_253], %172 {strides = array<i32>} : memref<98x288xf32, #tpu.memory_space<vmem>>, vector<7x32xf32>,
    %c194 = arith.constant 194 : index
    %c0_254 = arith.constant 0 : index
    %174 = tpu.strided_load %arg13[%c194, %c0_254] {strides = array<i32: 2, 1>} : memref<512x32xf32, #tpu.memory_space<vmem>>, vector<7x32xf32>
    %c35_255 = arith.constant 35 : index
    %c256_256 = arith.constant 256 : index
    %175 = vector.load %arg14[%c35_255, %c256_256] : memref<98x288xf32, #tpu.memory_space<vmem>>, vector<7x32xf32>
    tpu.vector_store %arg14[%c35_255, %c256_256], %174 {strides = array<i32>} : memref<98x288xf32, #tpu.memory_space<vmem>>, vector<7x32xf32>,
    %c192_257 = arith.constant 192 : index
    %c0_258 = arith.constant 0 : index
    %176 = tpu.strided_load %arg13[%c192_257, %c0_258] {strides = array<i32: 2, 1>} : memref<512x32xf32, #tpu.memory_space<vmem>>, vector<7x32xf32>
    %c42_259 = arith.constant 42 : index
    %c0_260 = arith.constant 0 : index
    %177 = vector.load %arg14[%c42_259, %c0_260] : memref<98x288xf32, #tpu.memory_space<vmem>>, vector<7x32xf32>
    tpu.vector_store %arg14[%c42_259, %c0_260], %176 {strides = array<i32>} : memref<98x288xf32, #tpu.memory_space<vmem>>, vector<7x32xf32>,
    %c193_261 = arith.constant 193 : index
    %c0_262 = arith.constant 0 : index
    %178 = tpu.strided_load %arg13[%c193_261, %c0_262] {strides = array<i32: 2, 1>} : memref<512x32xf32, #tpu.memory_space<vmem>>, vector<7x32xf32>
    %c42_263 = arith.constant 42 : index
    %c32_264 = arith.constant 32 : index
    %179 = vector.load %arg14[%c42_263, %c32_264] : memref<98x288xf32, #tpu.memory_space<vmem>>, vector<7x32xf32>
    tpu.vector_store %arg14[%c42_263, %c32_264], %178 {strides = array<i32>} : memref<98x288xf32, #tpu.memory_space<vmem>>, vector<7x32xf32>,
    %c194_265 = arith.constant 194 : index
    %c0_266 = arith.constant 0 : index
    %180 = tpu.strided_load %arg13[%c194_265, %c0_266] {strides = array<i32: 2, 1>} : memref<512x32xf32, #tpu.memory_space<vmem>>, vector<7x32xf32>
    %c42_267 = arith.constant 42 : index
    %c64_268 = arith.constant 64 : index
    %181 = vector.load %arg14[%c42_267, %c64_268] : memref<98x288xf32, #tpu.memory_space<vmem>>, vector<7x32xf32>
    tpu.vector_store %arg14[%c42_267, %c64_268], %180 {strides = array<i32>} : memref<98x288xf32, #tpu.memory_space<vmem>>, vector<7x32xf32>,
    %c208 = arith.constant 208 : index
    %c0_269 = arith.constant 0 : index
    %182 = tpu.strided_load %arg13[%c208, %c0_269] {strides = array<i32: 2, 1>} : memref<512x32xf32, #tpu.memory_space<vmem>>, vector<7x32xf32>
    %c42_270 = arith.constant 42 : index
    %c96_271 = arith.constant 96 : index
    %183 = vector.load %arg14[%c42_270, %c96_271] : memref<98x288xf32, #tpu.memory_space<vmem>>, vector<7x32xf32>
    tpu.vector_store %arg14[%c42_270, %c96_271], %182 {strides = array<i32>} : memref<98x288xf32, #tpu.memory_space<vmem>>, vector<7x32xf32>,
    %c209_272 = arith.constant 209 : index
    %c0_273 = arith.constant 0 : index
    %184 = tpu.strided_load %arg13[%c209_272, %c0_273] {strides = array<i32: 2, 1>} : memref<512x32xf32, #tpu.memory_space<vmem>>, vector<7x32xf32>
    %c42_274 = arith.constant 42 : index
    %c128_275 = arith.constant 128 : index
    %185 = vector.load %arg14[%c42_274, %c128_275] : memref<98x288xf32, #tpu.memory_space<vmem>>, vector<7x32xf32>
    tpu.vector_store %arg14[%c42_274, %c128_275], %184 {strides = array<i32>} : memref<98x288xf32, #tpu.memory_space<vmem>>, vector<7x32xf32>,
    %c210_276 = arith.constant 210 : index
    %c0_277 = arith.constant 0 : index
    %186 = tpu.strided_load %arg13[%c210_276, %c0_277] {strides = array<i32: 2, 1>} : memref<512x32xf32, #tpu.memory_space<vmem>>, vector<7x32xf32>
    %c42_278 = arith.constant 42 : index
    %c160_279 = arith.constant 160 : index
    %187 = vector.load %arg14[%c42_278, %c160_279] : memref<98x288xf32, #tpu.memory_space<vmem>>, vector<7x32xf32>
    tpu.vector_store %arg14[%c42_278, %c160_279], %186 {strides = array<i32>} : memref<98x288xf32, #tpu.memory_space<vmem>>, vector<7x32xf32>,
    %c224_280 = arith.constant 224 : index
    %c0_281 = arith.constant 0 : index
    %188 = tpu.strided_load %arg13[%c224_280, %c0_281] {strides = array<i32: 2, 1>} : memref<512x32xf32, #tpu.memory_space<vmem>>, vector<7x32xf32>
    %c42_282 = arith.constant 42 : index
    %c192_283 = arith.constant 192 : index
    %189 = vector.load %arg14[%c42_282, %c192_283] : memref<98x288xf32, #tpu.memory_space<vmem>>, vector<7x32xf32>
    tpu.vector_store %arg14[%c42_282, %c192_283], %188 {strides = array<i32>} : memref<98x288xf32, #tpu.memory_space<vmem>>, vector<7x32xf32>,
    %c225_284 = arith.constant 225 : index
    %c0_285 = arith.constant 0 : index
    %190 = tpu.strided_load %arg13[%c225_284, %c0_285] {strides = array<i32: 2, 1>} : memref<512x32xf32, #tpu.memory_space<vmem>>, vector<7x32xf32>
    %c42_286 = arith.constant 42 : index
    %c224_287 = arith.constant 224 : index
    %191 = vector.load %arg14[%c42_286, %c224_287] : memref<98x288xf32, #tpu.memory_space<vmem>>, vector<7x32xf32>
    tpu.vector_store %arg14[%c42_286, %c224_287], %190 {strides = array<i32>} : memref<98x288xf32, #tpu.memory_space<vmem>>, vector<7x32xf32>,
    %c226 = arith.constant 226 : index
    %c0_288 = arith.constant 0 : index
    %192 = tpu.strided_load %arg13[%c226, %c0_288] {strides = array<i32: 2, 1>} : memref<512x32xf32, #tpu.memory_space<vmem>>, vector<7x32xf32>
    %c42_289 = arith.constant 42 : index
    %c256_290 = arith.constant 256 : index
    %193 = vector.load %arg14[%c42_289, %c256_290] : memref<98x288xf32, #tpu.memory_space<vmem>>, vector<7x32xf32>
    tpu.vector_store %arg14[%c42_289, %c256_290], %192 {strides = array<i32>} : memref<98x288xf32, #tpu.memory_space<vmem>>, vector<7x32xf32>,
    %c256_291 = arith.constant 256 : index
    %c0_292 = arith.constant 0 : index
    %194 = tpu.strided_load %arg13[%c256_291, %c0_292] {strides = array<i32: 2, 1>} : memref<512x32xf32, #tpu.memory_space<vmem>>, vector<7x32xf32>
    %c49_293 = arith.constant 49 : index
    %c0_294 = arith.constant 0 : index
    %195 = vector.load %arg14[%c49_293, %c0_294] : memref<98x288xf32, #tpu.memory_space<vmem>>, vector<7x32xf32>
    tpu.vector_store %arg14[%c49_293, %c0_294], %194 {strides = array<i32>} : memref<98x288xf32, #tpu.memory_space<vmem>>, vector<7x32xf32>,
    %c257 = arith.constant 257 : index
    %c0_295 = arith.constant 0 : index
    %196 = tpu.strided_load %arg13[%c257, %c0_295] {strides = array<i32: 2, 1>} : memref<512x32xf32, #tpu.memory_space<vmem>>, vector<7x32xf32>
    %c49_296 = arith.constant 49 : index
    %c32_297 = arith.constant 32 : index
    %197 = vector.load %arg14[%c49_296, %c32_297] : memref<98x288xf32, #tpu.memory_space<vmem>>, vector<7x32xf32>
    tpu.vector_store %arg14[%c49_296, %c32_297], %196 {strides = array<i32>} : memref<98x288xf32, #tpu.memory_space<vmem>>, vector<7x32xf32>,
    %c258 = arith.constant 258 : index
    %c0_298 = arith.constant 0 : index
    %198 = tpu.strided_load %arg13[%c258, %c0_298] {strides = array<i32: 2, 1>} : memref<512x32xf32, #tpu.memory_space<vmem>>, vector<7x32xf32>
    %c49_299 = arith.constant 49 : index
    %c64_300 = arith.constant 64 : index
    %199 = vector.load %arg14[%c49_299, %c64_300] : memref<98x288xf32, #tpu.memory_space<vmem>>, vector<7x32xf32>
    tpu.vector_store %arg14[%c49_299, %c64_300], %198 {strides = array<i32>} : memref<98x288xf32, #tpu.memory_space<vmem>>, vector<7x32xf32>,
    %c272 = arith.constant 272 : index
    %c0_301 = arith.constant 0 : index
    %200 = tpu.strided_load %arg13[%c272, %c0_301] {strides = array<i32: 2, 1>} : memref<512x32xf32, #tpu.memory_space<vmem>>, vector<7x32xf32>
    %c49_302 = arith.constant 49 : index
    %c96_303 = arith.constant 96 : index
    %201 = vector.load %arg14[%c49_302, %c96_303] : memref<98x288xf32, #tpu.memory_space<vmem>>, vector<7x32xf32>
    tpu.vector_store %arg14[%c49_302, %c96_303], %200 {strides = array<i32>} : memref<98x288xf32, #tpu.memory_space<vmem>>, vector<7x32xf32>,
    %c273_304 = arith.constant 273 : index
    %c0_305 = arith.constant 0 : index
    %202 = tpu.strided_load %arg13[%c273_304, %c0_305] {strides = array<i32: 2, 1>} : memref<512x32xf32, #tpu.memory_space<vmem>>, vector<7x32xf32>
    %c49_306 = arith.constant 49 : index
    %c128_307 = arith.constant 128 : index
    %203 = vector.load %arg14[%c49_306, %c128_307] : memref<98x288xf32, #tpu.memory_space<vmem>>, vector<7x32xf32>
    tpu.vector_store %arg14[%c49_306, %c128_307], %202 {strides = array<i32>} : memref<98x288xf32, #tpu.memory_space<vmem>>, vector<7x32xf32>,
    %c274 = arith.constant 274 : index
    %c0_308 = arith.constant 0 : index
    %204 = tpu.strided_load %arg13[%c274, %c0_308] {strides = array<i32: 2, 1>} : memref<512x32xf32, #tpu.memory_space<vmem>>, vector<7x32xf32>
    %c49_309 = arith.constant 49 : index
    %c160_310 = arith.constant 160 : index
    %205 = vector.load %arg14[%c49_309, %c160_310] : memref<98x288xf32, #tpu.memory_space<vmem>>, vector<7x32xf32>
    tpu.vector_store %arg14[%c49_309, %c160_310], %204 {strides = array<i32>} : memref<98x288xf32, #tpu.memory_space<vmem>>, vector<7x32xf32>,
    %c288 = arith.constant 288 : index
    %c0_311 = arith.constant 0 : index
    %206 = tpu.strided_load %arg13[%c288, %c0_311] {strides = array<i32: 2, 1>} : memref<512x32xf32, #tpu.memory_space<vmem>>, vector<7x32xf32>
    %c49_312 = arith.constant 49 : index
    %c192_313 = arith.constant 192 : index
    %207 = vector.load %arg14[%c49_312, %c192_313] : memref<98x288xf32, #tpu.memory_space<vmem>>, vector<7x32xf32>
    tpu.vector_store %arg14[%c49_312, %c192_313], %206 {strides = array<i32>} : memref<98x288xf32, #tpu.memory_space<vmem>>, vector<7x32xf32>,
    %c289_314 = arith.constant 289 : index
    %c0_315 = arith.constant 0 : index
    %208 = tpu.strided_load %arg13[%c289_314, %c0_315] {strides = array<i32: 2, 1>} : memref<512x32xf32, #tpu.memory_space<vmem>>, vector<7x32xf32>
    %c49_316 = arith.constant 49 : index
    %c224_317 = arith.constant 224 : index
    %209 = vector.load %arg14[%c49_316, %c224_317] : memref<98x288xf32, #tpu.memory_space<vmem>>, vector<7x32xf32>
    tpu.vector_store %arg14[%c49_316, %c224_317], %208 {strides = array<i32>} : memref<98x288xf32, #tpu.memory_space<vmem>>, vector<7x32xf32>,
    %c290 = arith.constant 290 : index
    %c0_318 = arith.constant 0 : index
    %210 = tpu.strided_load %arg13[%c290, %c0_318] {strides = array<i32: 2, 1>} : memref<512x32xf32, #tpu.memory_space<vmem>>, vector<7x32xf32>
    %c49_319 = arith.constant 49 : index
    %c256_320 = arith.constant 256 : index
    %211 = vector.load %arg14[%c49_319, %c256_320] : memref<98x288xf32, #tpu.memory_space<vmem>>, vector<7x32xf32>
    tpu.vector_store %arg14[%c49_319, %c256_320], %210 {strides = array<i32>} : memref<98x288xf32, #tpu.memory_space<vmem>>, vector<7x32xf32>,
    %c288_321 = arith.constant 288 : index
    %c0_322 = arith.constant 0 : index
    %212 = tpu.strided_load %arg13[%c288_321, %c0_322] {strides = array<i32: 2, 1>} : memref<512x32xf32, #tpu.memory_space<vmem>>, vector<7x32xf32>
    %c56_323 = arith.constant 56 : index
    %c0_324 = arith.constant 0 : index
    %213 = vector.load %arg14[%c56_323, %c0_324] : memref<98x288xf32, #tpu.memory_space<vmem>>, vector<7x32xf32>
    tpu.vector_store %arg14[%c56_323, %c0_324], %212 {strides = array<i32>} : memref<98x288xf32, #tpu.memory_space<vmem>>, vector<7x32xf32>,
    %c289_325 = arith.constant 289 : index
    %c0_326 = arith.constant 0 : index
    %214 = tpu.strided_load %arg13[%c289_325, %c0_326] {strides = array<i32: 2, 1>} : memref<512x32xf32, #tpu.memory_space<vmem>>, vector<7x32xf32>
    %c56_327 = arith.constant 56 : index
    %c32_328 = arith.constant 32 : index
    %215 = vector.load %arg14[%c56_327, %c32_328] : memref<98x288xf32, #tpu.memory_space<vmem>>, vector<7x32xf32>
    tpu.vector_store %arg14[%c56_327, %c32_328], %214 {strides = array<i32>} : memref<98x288xf32, #tpu.memory_space<vmem>>, vector<7x32xf32>,
    %c290_329 = arith.constant 290 : index
    %c0_330 = arith.constant 0 : index
    %216 = tpu.strided_load %arg13[%c290_329, %c0_330] {strides = array<i32: 2, 1>} : memref<512x32xf32, #tpu.memory_space<vmem>>, vector<7x32xf32>
    %c56_331 = arith.constant 56 : index
    %c64_332 = arith.constant 64 : index
    %217 = vector.load %arg14[%c56_331, %c64_332] : memref<98x288xf32, #tpu.memory_space<vmem>>, vector<7x32xf32>
    tpu.vector_store %arg14[%c56_331, %c64_332], %216 {strides = array<i32>} : memref<98x288xf32, #tpu.memory_space<vmem>>, vector<7x32xf32>,
    %c304 = arith.constant 304 : index
    %c0_333 = arith.constant 0 : index
    %218 = tpu.strided_load %arg13[%c304, %c0_333] {strides = array<i32: 2, 1>} : memref<512x32xf32, #tpu.memory_space<vmem>>, vector<7x32xf32>
    %c56_334 = arith.constant 56 : index
    %c96_335 = arith.constant 96 : index
    %219 = vector.load %arg14[%c56_334, %c96_335] : memref<98x288xf32, #tpu.memory_space<vmem>>, vector<7x32xf32>
    tpu.vector_store %arg14[%c56_334, %c96_335], %218 {strides = array<i32>} : memref<98x288xf32, #tpu.memory_space<vmem>>, vector<7x32xf32>,
    %c305_336 = arith.constant 305 : index
    %c0_337 = arith.constant 0 : index
    %220 = tpu.strided_load %arg13[%c305_336, %c0_337] {strides = array<i32: 2, 1>} : memref<512x32xf32, #tpu.memory_space<vmem>>, vector<7x32xf32>
    %c56_338 = arith.constant 56 : index
    %c128_339 = arith.constant 128 : index
    %221 = vector.load %arg14[%c56_338, %c128_339] : memref<98x288xf32, #tpu.memory_space<vmem>>, vector<7x32xf32>
    tpu.vector_store %arg14[%c56_338, %c128_339], %220 {strides = array<i32>} : memref<98x288xf32, #tpu.memory_space<vmem>>, vector<7x32xf32>,
    %c306 = arith.constant 306 : index
    %c0_340 = arith.constant 0 : index
    %222 = tpu.strided_load %arg13[%c306, %c0_340] {strides = array<i32: 2, 1>} : memref<512x32xf32, #tpu.memory_space<vmem>>, vector<7x32xf32>
    %c56_341 = arith.constant 56 : index
    %c160_342 = arith.constant 160 : index
    %223 = vector.load %arg14[%c56_341, %c160_342] : memref<98x288xf32, #tpu.memory_space<vmem>>, vector<7x32xf32>
    tpu.vector_store %arg14[%c56_341, %c160_342], %222 {strides = array<i32>} : memref<98x288xf32, #tpu.memory_space<vmem>>, vector<7x32xf32>,
    %c320 = arith.constant 320 : index
    %c0_343 = arith.constant 0 : index
    %224 = tpu.strided_load %arg13[%c320, %c0_343] {strides = array<i32: 2, 1>} : memref<512x32xf32, #tpu.memory_space<vmem>>, vector<7x32xf32>
    %c56_344 = arith.constant 56 : index
    %c192_345 = arith.constant 192 : index
    %225 = vector.load %arg14[%c56_344, %c192_345] : memref<98x288xf32, #tpu.memory_space<vmem>>, vector<7x32xf32>
    tpu.vector_store %arg14[%c56_344, %c192_345], %224 {strides = array<i32>} : memref<98x288xf32, #tpu.memory_space<vmem>>, vector<7x32xf32>,
    %c321_346 = arith.constant 321 : index
    %c0_347 = arith.constant 0 : index
    %226 = tpu.strided_load %arg13[%c321_346, %c0_347] {strides = array<i32: 2, 1>} : memref<512x32xf32, #tpu.memory_space<vmem>>, vector<7x32xf32>
    %c56_348 = arith.constant 56 : index
    %c224_349 = arith.constant 224 : index
    %227 = vector.load %arg14[%c56_348, %c224_349] : memref<98x288xf32, #tpu.memory_space<vmem>>, vector<7x32xf32>
    tpu.vector_store %arg14[%c56_348, %c224_349], %226 {strides = array<i32>} : memref<98x288xf32, #tpu.memory_space<vmem>>, vector<7x32xf32>,
    %c322_350 = arith.constant 322 : index
    %c0_351 = arith.constant 0 : index
    %228 = tpu.strided_load %arg13[%c322_350, %c0_351] {strides = array<i32: 2, 1>} : memref<512x32xf32, #tpu.memory_space<vmem>>, vector<7x32xf32>
    %c56_352 = arith.constant 56 : index
    %c256_353 = arith.constant 256 : index
    %229 = vector.load %arg14[%c56_352, %c256_353] : memref<98x288xf32, #tpu.memory_space<vmem>>, vector<7x32xf32>
    tpu.vector_store %arg14[%c56_352, %c256_353], %228 {strides = array<i32>} : memref<98x288xf32, #tpu.memory_space<vmem>>, vector<7x32xf32>,
    %c320_354 = arith.constant 320 : index
    %c0_355 = arith.constant 0 : index
    %230 = tpu.strided_load %arg13[%c320_354, %c0_355] {strides = array<i32: 2, 1>} : memref<512x32xf32, #tpu.memory_space<vmem>>, vector<7x32xf32>
    %c63 = arith.constant 63 : index
    %c0_356 = arith.constant 0 : index
    %231 = vector.load %arg14[%c63, %c0_356] : memref<98x288xf32, #tpu.memory_space<vmem>>, vector<7x32xf32>
    tpu.vector_store %arg14[%c63, %c0_356], %230 {strides = array<i32>} : memref<98x288xf32, #tpu.memory_space<vmem>>, vector<7x32xf32>,
    %c321_357 = arith.constant 321 : index
    %c0_358 = arith.constant 0 : index
    %232 = tpu.strided_load %arg13[%c321_357, %c0_358] {strides = array<i32: 2, 1>} : memref<512x32xf32, #tpu.memory_space<vmem>>, vector<7x32xf32>
    %c63_359 = arith.constant 63 : index
    %c32_360 = arith.constant 32 : index
    %233 = vector.load %arg14[%c63_359, %c32_360] : memref<98x288xf32, #tpu.memory_space<vmem>>, vector<7x32xf32>
    tpu.vector_store %arg14[%c63_359, %c32_360], %232 {strides = array<i32>} : memref<98x288xf32, #tpu.memory_space<vmem>>, vector<7x32xf32>,
    %c322_361 = arith.constant 322 : index
    %c0_362 = arith.constant 0 : index
    %234 = tpu.strided_load %arg13[%c322_361, %c0_362] {strides = array<i32: 2, 1>} : memref<512x32xf32, #tpu.memory_space<vmem>>, vector<7x32xf32>
    %c63_363 = arith.constant 63 : index
    %c64_364 = arith.constant 64 : index
    %235 = vector.load %arg14[%c63_363, %c64_364] : memref<98x288xf32, #tpu.memory_space<vmem>>, vector<7x32xf32>
    tpu.vector_store %arg14[%c63_363, %c64_364], %234 {strides = array<i32>} : memref<98x288xf32, #tpu.memory_space<vmem>>, vector<7x32xf32>,
    %c336_365 = arith.constant 336 : index
    %c0_366 = arith.constant 0 : index
    %236 = tpu.strided_load %arg13[%c336_365, %c0_366] {strides = array<i32: 2, 1>} : memref<512x32xf32, #tpu.memory_space<vmem>>, vector<7x32xf32>
    %c63_367 = arith.constant 63 : index
    %c96_368 = arith.constant 96 : index
    %237 = vector.load %arg14[%c63_367, %c96_368] : memref<98x288xf32, #tpu.memory_space<vmem>>, vector<7x32xf32>
    tpu.vector_store %arg14[%c63_367, %c96_368], %236 {strides = array<i32>} : memref<98x288xf32, #tpu.memory_space<vmem>>, vector<7x32xf32>,
    %c337_369 = arith.constant 337 : index
    %c0_370 = arith.constant 0 : index
    %238 = tpu.strided_load %arg13[%c337_369, %c0_370] {strides = array<i32: 2, 1>} : memref<512x32xf32, #tpu.memory_space<vmem>>, vector<7x32xf32>
    %c63_371 = arith.constant 63 : index
    %c128_372 = arith.constant 128 : index
    %239 = vector.load %arg14[%c63_371, %c128_372] : memref<98x288xf32, #tpu.memory_space<vmem>>, vector<7x32xf32>
    tpu.vector_store %arg14[%c63_371, %c128_372], %238 {strides = array<i32>} : memref<98x288xf32, #tpu.memory_space<vmem>>, vector<7x32xf32>,
    %c338 = arith.constant 338 : index
    %c0_373 = arith.constant 0 : index
    %240 = tpu.strided_load %arg13[%c338, %c0_373] {strides = array<i32: 2, 1>} : memref<512x32xf32, #tpu.memory_space<vmem>>, vector<7x32xf32>
    %c63_374 = arith.constant 63 : index
    %c160_375 = arith.constant 160 : index
    %241 = vector.load %arg14[%c63_374, %c160_375] : memref<98x288xf32, #tpu.memory_space<vmem>>, vector<7x32xf32>
    tpu.vector_store %arg14[%c63_374, %c160_375], %240 {strides = array<i32>} : memref<98x288xf32, #tpu.memory_space<vmem>>, vector<7x32xf32>,
    %c352 = arith.constant 352 : index
    %c0_376 = arith.constant 0 : index
    %242 = tpu.strided_load %arg13[%c352, %c0_376] {strides = array<i32: 2, 1>} : memref<512x32xf32, #tpu.memory_space<vmem>>, vector<7x32xf32>
    %c63_377 = arith.constant 63 : index
    %c192_378 = arith.constant 192 : index
    %243 = vector.load %arg14[%c63_377, %c192_378] : memref<98x288xf32, #tpu.memory_space<vmem>>, vector<7x32xf32>
    tpu.vector_store %arg14[%c63_377, %c192_378], %242 {strides = array<i32>} : memref<98x288xf32, #tpu.memory_space<vmem>>, vector<7x32xf32>,
    %c353_379 = arith.constant 353 : index
    %c0_380 = arith.constant 0 : index
    %244 = tpu.strided_load %arg13[%c353_379, %c0_380] {strides = array<i32: 2, 1>} : memref<512x32xf32, #tpu.memory_space<vmem>>, vector<7x32xf32>
    %c63_381 = arith.constant 63 : index
    %c224_382 = arith.constant 224 : index
    %245 = vector.load %arg14[%c63_381, %c224_382] : memref<98x288xf32, #tpu.memory_space<vmem>>, vector<7x32xf32>
    tpu.vector_store %arg14[%c63_381, %c224_382], %244 {strides = array<i32>} : memref<98x288xf32, #tpu.memory_space<vmem>>, vector<7x32xf32>,
    %c354 = arith.constant 354 : index
    %c0_383 = arith.constant 0 : index
    %246 = tpu.strided_load %arg13[%c354, %c0_383] {strides = array<i32: 2, 1>} : memref<512x32xf32, #tpu.memory_space<vmem>>, vector<7x32xf32>
    %c63_384 = arith.constant 63 : index
    %c256_385 = arith.constant 256 : index
    %247 = vector.load %arg14[%c63_384, %c256_385] : memref<98x288xf32, #tpu.memory_space<vmem>>, vector<7x32xf32>
    tpu.vector_store %arg14[%c63_384, %c256_385], %246 {strides = array<i32>} : memref<98x288xf32, #tpu.memory_space<vmem>>, vector<7x32xf32>,
    %c352_386 = arith.constant 352 : index
    %c0_387 = arith.constant 0 : index
    %248 = tpu.strided_load %arg13[%c352_386, %c0_387] {strides = array<i32: 2, 1>} : memref<512x32xf32, #tpu.memory_space<vmem>>, vector<7x32xf32>
    %c70_388 = arith.constant 70 : index
    %c0_389 = arith.constant 0 : index
    %249 = vector.load %arg14[%c70_388, %c0_389] : memref<98x288xf32, #tpu.memory_space<vmem>>, vector<7x32xf32>
    tpu.vector_store %arg14[%c70_388, %c0_389], %248 {strides = array<i32>} : memref<98x288xf32, #tpu.memory_space<vmem>>, vector<7x32xf32>,
    %c353_390 = arith.constant 353 : index
    %c0_391 = arith.constant 0 : index
    %250 = tpu.strided_load %arg13[%c353_390, %c0_391] {strides = array<i32: 2, 1>} : memref<512x32xf32, #tpu.memory_space<vmem>>, vector<7x32xf32>
    %c70_392 = arith.constant 70 : index
    %c32_393 = arith.constant 32 : index
    %251 = vector.load %arg14[%c70_392, %c32_393] : memref<98x288xf32, #tpu.memory_space<vmem>>, vector<7x32xf32>
    tpu.vector_store %arg14[%c70_392, %c32_393], %250 {strides = array<i32>} : memref<98x288xf32, #tpu.memory_space<vmem>>, vector<7x32xf32>,
    %c354_394 = arith.constant 354 : index
    %c0_395 = arith.constant 0 : index
    %252 = tpu.strided_load %arg13[%c354_394, %c0_395] {strides = array<i32: 2, 1>} : memref<512x32xf32, #tpu.memory_space<vmem>>, vector<7x32xf32>
    %c70_396 = arith.constant 70 : index
    %c64_397 = arith.constant 64 : index
    %253 = vector.load %arg14[%c70_396, %c64_397] : memref<98x288xf32, #tpu.memory_space<vmem>>, vector<7x32xf32>
    tpu.vector_store %arg14[%c70_396, %c64_397], %252 {strides = array<i32>} : memref<98x288xf32, #tpu.memory_space<vmem>>, vector<7x32xf32>,
    %c368 = arith.constant 368 : index
    %c0_398 = arith.constant 0 : index
    %254 = tpu.strided_load %arg13[%c368, %c0_398] {strides = array<i32: 2, 1>} : memref<512x32xf32, #tpu.memory_space<vmem>>, vector<7x32xf32>
    %c70_399 = arith.constant 70 : index
    %c96_400 = arith.constant 96 : index
    %255 = vector.load %arg14[%c70_399, %c96_400] : memref<98x288xf32, #tpu.memory_space<vmem>>, vector<7x32xf32>
    tpu.vector_store %arg14[%c70_399, %c96_400], %254 {strides = array<i32>} : memref<98x288xf32, #tpu.memory_space<vmem>>, vector<7x32xf32>,
    %c369_401 = arith.constant 369 : index
    %c0_402 = arith.constant 0 : index
    %256 = tpu.strided_load %arg13[%c369_401, %c0_402] {strides = array<i32: 2, 1>} : memref<512x32xf32, #tpu.memory_space<vmem>>, vector<7x32xf32>
    %c70_403 = arith.constant 70 : index
    %c128_404 = arith.constant 128 : index
    %257 = vector.load %arg14[%c70_403, %c128_404] : memref<98x288xf32, #tpu.memory_space<vmem>>, vector<7x32xf32>
    tpu.vector_store %arg14[%c70_403, %c128_404], %256 {strides = array<i32>} : memref<98x288xf32, #tpu.memory_space<vmem>>, vector<7x32xf32>,
    %c370 = arith.constant 370 : index
    %c0_405 = arith.constant 0 : index
    %258 = tpu.strided_load %arg13[%c370, %c0_405] {strides = array<i32: 2, 1>} : memref<512x32xf32, #tpu.memory_space<vmem>>, vector<7x32xf32>
    %c70_406 = arith.constant 70 : index
    %c160_407 = arith.constant 160 : index
    %259 = vector.load %arg14[%c70_406, %c160_407] : memref<98x288xf32, #tpu.memory_space<vmem>>, vector<7x32xf32>
    tpu.vector_store %arg14[%c70_406, %c160_407], %258 {strides = array<i32>} : memref<98x288xf32, #tpu.memory_space<vmem>>, vector<7x32xf32>,
    %c384 = arith.constant 384 : index
    %c0_408 = arith.constant 0 : index
    %260 = tpu.strided_load %arg13[%c384, %c0_408] {strides = array<i32: 2, 1>} : memref<512x32xf32, #tpu.memory_space<vmem>>, vector<7x32xf32>
    %c70_409 = arith.constant 70 : index
    %c192_410 = arith.constant 192 : index
    %261 = vector.load %arg14[%c70_409, %c192_410] : memref<98x288xf32, #tpu.memory_space<vmem>>, vector<7x32xf32>
    tpu.vector_store %arg14[%c70_409, %c192_410], %260 {strides = array<i32>} : memref<98x288xf32, #tpu.memory_space<vmem>>, vector<7x32xf32>,
    %c385_411 = arith.constant 385 : index
    %c0_412 = arith.constant 0 : index
    %262 = tpu.strided_load %arg13[%c385_411, %c0_412] {strides = array<i32: 2, 1>} : memref<512x32xf32, #tpu.memory_space<vmem>>, vector<7x32xf32>
    %c70_413 = arith.constant 70 : index
    %c224_414 = arith.constant 224 : index
    %263 = vector.load %arg14[%c70_413, %c224_414] : memref<98x288xf32, #tpu.memory_space<vmem>>, vector<7x32xf32>
    tpu.vector_store %arg14[%c70_413, %c224_414], %262 {strides = array<i32>} : memref<98x288xf32, #tpu.memory_space<vmem>>, vector<7x32xf32>,
    %c386 = arith.constant 386 : index
    %c0_415 = arith.constant 0 : index
    %264 = tpu.strided_load %arg13[%c386, %c0_415] {strides = array<i32: 2, 1>} : memref<512x32xf32, #tpu.memory_space<vmem>>, vector<7x32xf32>
    %c70_416 = arith.constant 70 : index
    %c256_417 = arith.constant 256 : index
    %265 = vector.load %arg14[%c70_416, %c256_417] : memref<98x288xf32, #tpu.memory_space<vmem>>, vector<7x32xf32>
    tpu.vector_store %arg14[%c70_416, %c256_417], %264 {strides = array<i32>} : memref<98x288xf32, #tpu.memory_space<vmem>>, vector<7x32xf32>,
    %c384_418 = arith.constant 384 : index
    %c0_419 = arith.constant 0 : index
    %266 = tpu.strided_load %arg13[%c384_418, %c0_419] {strides = array<i32: 2, 1>} : memref<512x32xf32, #tpu.memory_space<vmem>>, vector<7x32xf32>
    %c77 = arith.constant 77 : index
    %c0_420 = arith.constant 0 : index
    %267 = vector.load %arg14[%c77, %c0_420] : memref<98x288xf32, #tpu.memory_space<vmem>>, vector<7x32xf32>
    tpu.vector_store %arg14[%c77, %c0_420], %266 {strides = array<i32>} : memref<98x288xf32, #tpu.memory_space<vmem>>, vector<7x32xf32>,
    %c385_421 = arith.constant 385 : index
    %c0_422 = arith.constant 0 : index
    %268 = tpu.strided_load %arg13[%c385_421, %c0_422] {strides = array<i32: 2, 1>} : memref<512x32xf32, #tpu.memory_space<vmem>>, vector<7x32xf32>
    %c77_423 = arith.constant 77 : index
    %c32_424 = arith.constant 32 : index
    %269 = vector.load %arg14[%c77_423, %c32_424] : memref<98x288xf32, #tpu.memory_space<vmem>>, vector<7x32xf32>
    tpu.vector_store %arg14[%c77_423, %c32_424], %268 {strides = array<i32>} : memref<98x288xf32, #tpu.memory_space<vmem>>, vector<7x32xf32>,
    %c386_425 = arith.constant 386 : index
    %c0_426 = arith.constant 0 : index
    %270 = tpu.strided_load %arg13[%c386_425, %c0_426] {strides = array<i32: 2, 1>} : memref<512x32xf32, #tpu.memory_space<vmem>>, vector<7x32xf32>
    %c77_427 = arith.constant 77 : index
    %c64_428 = arith.constant 64 : index
    %271 = vector.load %arg14[%c77_427, %c64_428] : memref<98x288xf32, #tpu.memory_space<vmem>>, vector<7x32xf32>
    tpu.vector_store %arg14[%c77_427, %c64_428], %270 {strides = array<i32>} : memref<98x288xf32, #tpu.memory_space<vmem>>, vector<7x32xf32>,
    %c400 = arith.constant 400 : index
    %c0_429 = arith.constant 0 : index
    %272 = tpu.strided_load %arg13[%c400, %c0_429] {strides = array<i32: 2, 1>} : memref<512x32xf32, #tpu.memory_space<vmem>>, vector<7x32xf32>
    %c77_430 = arith.constant 77 : index
    %c96_431 = arith.constant 96 : index
    %273 = vector.load %arg14[%c77_430, %c96_431] : memref<98x288xf32, #tpu.memory_space<vmem>>, vector<7x32xf32>
    tpu.vector_store %arg14[%c77_430, %c96_431], %272 {strides = array<i32>} : memref<98x288xf32, #tpu.memory_space<vmem>>, vector<7x32xf32>,
    %c401_432 = arith.constant 401 : index
    %c0_433 = arith.constant 0 : index
    %274 = tpu.strided_load %arg13[%c401_432, %c0_433] {strides = array<i32: 2, 1>} : memref<512x32xf32, #tpu.memory_space<vmem>>, vector<7x32xf32>
    %c77_434 = arith.constant 77 : index
    %c128_435 = arith.constant 128 : index
    %275 = vector.load %arg14[%c77_434, %c128_435] : memref<98x288xf32, #tpu.memory_space<vmem>>, vector<7x32xf32>
    tpu.vector_store %arg14[%c77_434, %c128_435], %274 {strides = array<i32>} : memref<98x288xf32, #tpu.memory_space<vmem>>, vector<7x32xf32>,
    %c402 = arith.constant 402 : index
    %c0_436 = arith.constant 0 : index
    %276 = tpu.strided_load %arg13[%c402, %c0_436] {strides = array<i32: 2, 1>} : memref<512x32xf32, #tpu.memory_space<vmem>>, vector<7x32xf32>
    %c77_437 = arith.constant 77 : index
    %c160_438 = arith.constant 160 : index
    %277 = vector.load %arg14[%c77_437, %c160_438] : memref<98x288xf32, #tpu.memory_space<vmem>>, vector<7x32xf32>
    tpu.vector_store %arg14[%c77_437, %c160_438], %276 {strides = array<i32>} : memref<98x288xf32, #tpu.memory_space<vmem>>, vector<7x32xf32>,
    %c416 = arith.constant 416 : index
    %c0_439 = arith.constant 0 : index
    %278 = tpu.strided_load %arg13[%c416, %c0_439] {strides = array<i32: 2, 1>} : memref<512x32xf32, #tpu.memory_space<vmem>>, vector<7x32xf32>
    %c77_440 = arith.constant 77 : index
    %c192_441 = arith.constant 192 : index
    %279 = vector.load %arg14[%c77_440, %c192_441] : memref<98x288xf32, #tpu.memory_space<vmem>>, vector<7x32xf32>
    tpu.vector_store %arg14[%c77_440, %c192_441], %278 {strides = array<i32>} : memref<98x288xf32, #tpu.memory_space<vmem>>, vector<7x32xf32>,
    %c417_442 = arith.constant 417 : index
    %c0_443 = arith.constant 0 : index
    %280 = tpu.strided_load %arg13[%c417_442, %c0_443] {strides = array<i32: 2, 1>} : memref<512x32xf32, #tpu.memory_space<vmem>>, vector<7x32xf32>
    %c77_444 = arith.constant 77 : index
    %c224_445 = arith.constant 224 : index
    %281 = vector.load %arg14[%c77_444, %c224_445] : memref<98x288xf32, #tpu.memory_space<vmem>>, vector<7x32xf32>
    tpu.vector_store %arg14[%c77_444, %c224_445], %280 {strides = array<i32>} : memref<98x288xf32, #tpu.memory_space<vmem>>, vector<7x32xf32>,
    %c418 = arith.constant 418 : index
    %c0_446 = arith.constant 0 : index
    %282 = tpu.strided_load %arg13[%c418, %c0_446] {strides = array<i32: 2, 1>} : memref<512x32xf32, #tpu.memory_space<vmem>>, vector<7x32xf32>
    %c77_447 = arith.constant 77 : index
    %c256_448 = arith.constant 256 : index
    %283 = vector.load %arg14[%c77_447, %c256_448] : memref<98x288xf32, #tpu.memory_space<vmem>>, vector<7x32xf32>
    tpu.vector_store %arg14[%c77_447, %c256_448], %282 {strides = array<i32>} : memref<98x288xf32, #tpu.memory_space<vmem>>, vector<7x32xf32>,
    %c416_449 = arith.constant 416 : index
    %c0_450 = arith.constant 0 : index
    %284 = tpu.strided_load %arg13[%c416_449, %c0_450] {strides = array<i32: 2, 1>} : memref<512x32xf32, #tpu.memory_space<vmem>>, vector<7x32xf32>
    %c84_451 = arith.constant 84 : index
    %c0_452 = arith.constant 0 : index
    %285 = vector.load %arg14[%c84_451, %c0_452] : memref<98x288xf32, #tpu.memory_space<vmem>>, vector<7x32xf32>
    tpu.vector_store %arg14[%c84_451, %c0_452], %284 {strides = array<i32>} : memref<98x288xf32, #tpu.memory_space<vmem>>, vector<7x32xf32>,
    %c417_453 = arith.constant 417 : index
    %c0_454 = arith.constant 0 : index
    %286 = tpu.strided_load %arg13[%c417_453, %c0_454] {strides = array<i32: 2, 1>} : memref<512x32xf32, #tpu.memory_space<vmem>>, vector<7x32xf32>
    %c84_455 = arith.constant 84 : index
    %c32_456 = arith.constant 32 : index
    %287 = vector.load %arg14[%c84_455, %c32_456] : memref<98x288xf32, #tpu.memory_space<vmem>>, vector<7x32xf32>
    tpu.vector_store %arg14[%c84_455, %c32_456], %286 {strides = array<i32>} : memref<98x288xf32, #tpu.memory_space<vmem>>, vector<7x32xf32>,
    %c418_457 = arith.constant 418 : index
    %c0_458 = arith.constant 0 : index
    %288 = tpu.strided_load %arg13[%c418_457, %c0_458] {strides = array<i32: 2, 1>} : memref<512x32xf32, #tpu.memory_space<vmem>>, vector<7x32xf32>
    %c84_459 = arith.constant 84 : index
    %c64_460 = arith.constant 64 : index
    %289 = vector.load %arg14[%c84_459, %c64_460] : memref<98x288xf32, #tpu.memory_space<vmem>>, vector<7x32xf32>
    tpu.vector_store %arg14[%c84_459, %c64_460], %288 {strides = array<i32>} : memref<98x288xf32, #tpu.memory_space<vmem>>, vector<7x32xf32>,
    %c432 = arith.constant 432 : index
    %c0_461 = arith.constant 0 : index
    %290 = tpu.strided_load %arg13[%c432, %c0_461] {strides = array<i32: 2, 1>} : memref<512x32xf32, #tpu.memory_space<vmem>>, vector<7x32xf32>
    %c84_462 = arith.constant 84 : index
    %c96_463 = arith.constant 96 : index
    %291 = vector.load %arg14[%c84_462, %c96_463] : memref<98x288xf32, #tpu.memory_space<vmem>>, vector<7x32xf32>
    tpu.vector_store %arg14[%c84_462, %c96_463], %290 {strides = array<i32>} : memref<98x288xf32, #tpu.memory_space<vmem>>, vector<7x32xf32>,
    %c433_464 = arith.constant 433 : index
    %c0_465 = arith.constant 0 : index
    %292 = tpu.strided_load %arg13[%c433_464, %c0_465] {strides = array<i32: 2, 1>} : memref<512x32xf32, #tpu.memory_space<vmem>>, vector<7x32xf32>
    %c84_466 = arith.constant 84 : index
    %c128_467 = arith.constant 128 : index
    %293 = vector.load %arg14[%c84_466, %c128_467] : memref<98x288xf32, #tpu.memory_space<vmem>>, vector<7x32xf32>
    tpu.vector_store %arg14[%c84_466, %c128_467], %292 {strides = array<i32>} : memref<98x288xf32, #tpu.memory_space<vmem>>, vector<7x32xf32>,
    %c434 = arith.constant 434 : index
    %c0_468 = arith.constant 0 : index
    %294 = tpu.strided_load %arg13[%c434, %c0_468] {strides = array<i32: 2, 1>} : memref<512x32xf32, #tpu.memory_space<vmem>>, vector<7x32xf32>
    %c84_469 = arith.constant 84 : index
    %c160_470 = arith.constant 160 : index
    %295 = vector.load %arg14[%c84_469, %c160_470] : memref<98x288xf32, #tpu.memory_space<vmem>>, vector<7x32xf32>
    tpu.vector_store %arg14[%c84_469, %c160_470], %294 {strides = array<i32>} : memref<98x288xf32, #tpu.memory_space<vmem>>, vector<7x32xf32>,
    %c448 = arith.constant 448 : index
    %c0_471 = arith.constant 0 : index
    %296 = tpu.strided_load %arg13[%c448, %c0_471] {strides = array<i32: 2, 1>} : memref<512x32xf32, #tpu.memory_space<vmem>>, vector<7x32xf32>
    %c84_472 = arith.constant 84 : index
    %c192_473 = arith.constant 192 : index
    %297 = vector.load %arg14[%c84_472, %c192_473] : memref<98x288xf32, #tpu.memory_space<vmem>>, vector<7x32xf32>
    tpu.vector_store %arg14[%c84_472, %c192_473], %296 {strides = array<i32>} : memref<98x288xf32, #tpu.memory_space<vmem>>, vector<7x32xf32>,
    %c449_474 = arith.constant 449 : index
    %c0_475 = arith.constant 0 : index
    %298 = tpu.strided_load %arg13[%c449_474, %c0_475] {strides = array<i32: 2, 1>} : memref<512x32xf32, #tpu.memory_space<vmem>>, vector<7x32xf32>
    %c84_476 = arith.constant 84 : index
    %c224_477 = arith.constant 224 : index
    %299 = vector.load %arg14[%c84_476, %c224_477] : memref<98x288xf32, #tpu.memory_space<vmem>>, vector<7x32xf32>
    tpu.vector_store %arg14[%c84_476, %c224_477], %298 {strides = array<i32>} : memref<98x288xf32, #tpu.memory_space<vmem>>, vector<7x32xf32>,
    %c450 = arith.constant 450 : index
    %c0_478 = arith.constant 0 : index
    %300 = tpu.strided_load %arg13[%c450, %c0_478] {strides = array<i32: 2, 1>} : memref<512x32xf32, #tpu.memory_space<vmem>>, vector<7x32xf32>
    %c84_479 = arith.constant 84 : index
    %c256_480 = arith.constant 256 : index
    %301 = vector.load %arg14[%c84_479, %c256_480] : memref<98x288xf32, #tpu.memory_space<vmem>>, vector<7x32xf32>
    tpu.vector_store %arg14[%c84_479, %c256_480], %300 {strides = array<i32>} : memref<98x288xf32, #tpu.memory_space<vmem>>, vector<7x32xf32>,
    %c448_481 = arith.constant 448 : index
    %c0_482 = arith.constant 0 : index
    %302 = tpu.strided_load %arg13[%c448_481, %c0_482] {strides = array<i32: 2, 1>} : memref<512x32xf32, #tpu.memory_space<vmem>>, vector<7x32xf32>
    %c91 = arith.constant 91 : index
    %c0_483 = arith.constant 0 : index
    %303 = vector.load %arg14[%c91, %c0_483] : memref<98x288xf32, #tpu.memory_space<vmem>>, vector<7x32xf32>
    tpu.vector_store %arg14[%c91, %c0_483], %302 {strides = array<i32>} : memref<98x288xf32, #tpu.memory_space<vmem>>, vector<7x32xf32>,
    %c449_484 = arith.constant 449 : index
    %c0_485 = arith.constant 0 : index
    %304 = tpu.strided_load %arg13[%c449_484, %c0_485] {strides = array<i32: 2, 1>} : memref<512x32xf32, #tpu.memory_space<vmem>>, vector<7x32xf32>
    %c91_486 = arith.constant 91 : index
    %c32_487 = arith.constant 32 : index
    %305 = vector.load %arg14[%c91_486, %c32_487] : memref<98x288xf32, #tpu.memory_space<vmem>>, vector<7x32xf32>
    tpu.vector_store %arg14[%c91_486, %c32_487], %304 {strides = array<i32>} : memref<98x288xf32, #tpu.memory_space<vmem>>, vector<7x32xf32>,
    %c450_488 = arith.constant 450 : index
    %c0_489 = arith.constant 0 : index
    %306 = tpu.strided_load %arg13[%c450_488, %c0_489] {strides = array<i32: 2, 1>} : memref<512x32xf32, #tpu.memory_space<vmem>>, vector<7x32xf32>
    %c91_490 = arith.constant 91 : index
    %c64_491 = arith.constant 64 : index
    %307 = vector.load %arg14[%c91_490, %c64_491] : memref<98x288xf32, #tpu.memory_space<vmem>>, vector<7x32xf32>
    tpu.vector_store %arg14[%c91_490, %c64_491], %306 {strides = array<i32>} : memref<98x288xf32, #tpu.memory_space<vmem>>, vector<7x32xf32>,
    %c464 = arith.constant 464 : index
    %c0_492 = arith.constant 0 : index
    %308 = tpu.strided_load %arg13[%c464, %c0_492] {strides = array<i32: 2, 1>} : memref<512x32xf32, #tpu.memory_space<vmem>>, vector<7x32xf32>
    %c91_493 = arith.constant 91 : index
    %c96_494 = arith.constant 96 : index
    %309 = vector.load %arg14[%c91_493, %c96_494] : memref<98x288xf32, #tpu.memory_space<vmem>>, vector<7x32xf32>
    tpu.vector_store %arg14[%c91_493, %c96_494], %308 {strides = array<i32>} : memref<98x288xf32, #tpu.memory_space<vmem>>, vector<7x32xf32>,
    %c465_495 = arith.constant 465 : index
    %c0_496 = arith.constant 0 : index
    %310 = tpu.strided_load %arg13[%c465_495, %c0_496] {strides = array<i32: 2, 1>} : memref<512x32xf32, #tpu.memory_space<vmem>>, vector<7x32xf32>
    %c91_497 = arith.constant 91 : index
    %c128_498 = arith.constant 128 : index
    %311 = vector.load %arg14[%c91_497, %c128_498] : memref<98x288xf32, #tpu.memory_space<vmem>>, vector<7x32xf32>
    tpu.vector_store %arg14[%c91_497, %c128_498], %310 {strides = array<i32>} : memref<98x288xf32, #tpu.memory_space<vmem>>, vector<7x32xf32>,
    %c466 = arith.constant 466 : index
    %c0_499 = arith.constant 0 : index
    %312 = tpu.strided_load %arg13[%c466, %c0_499] {strides = array<i32: 2, 1>} : memref<512x32xf32, #tpu.memory_space<vmem>>, vector<7x32xf32>
    %c91_500 = arith.constant 91 : index
    %c160_501 = arith.constant 160 : index
    %313 = vector.load %arg14[%c91_500, %c160_501] : memref<98x288xf32, #tpu.memory_space<vmem>>, vector<7x32xf32>
    tpu.vector_store %arg14[%c91_500, %c160_501], %312 {strides = array<i32>} : memref<98x288xf32, #tpu.memory_space<vmem>>, vector<7x32xf32>,
    %c480 = arith.constant 480 : index
    %c0_502 = arith.constant 0 : index
    %314 = tpu.strided_load %arg13[%c480, %c0_502] {strides = array<i32: 2, 1>} : memref<512x32xf32, #tpu.memory_space<vmem>>, vector<7x32xf32>
    %c91_503 = arith.constant 91 : index
    %c192_504 = arith.constant 192 : index
    %315 = vector.load %arg14[%c91_503, %c192_504] : memref<98x288xf32, #tpu.memory_space<vmem>>, vector<7x32xf32>
    tpu.vector_store %arg14[%c91_503, %c192_504], %314 {strides = array<i32>} : memref<98x288xf32, #tpu.memory_space<vmem>>, vector<7x32xf32>,
    %c481_505 = arith.constant 481 : index
    %c0_506 = arith.constant 0 : index
    %316 = tpu.strided_load %arg13[%c481_505, %c0_506] {strides = array<i32: 2, 1>} : memref<512x32xf32, #tpu.memory_space<vmem>>, vector<7x32xf32>
    %c91_507 = arith.constant 91 : index
    %c224_508 = arith.constant 224 : index
    %317 = vector.load %arg14[%c91_507, %c224_508] : memref<98x288xf32, #tpu.memory_space<vmem>>, vector<7x32xf32>
    tpu.vector_store %arg14[%c91_507, %c224_508], %316 {strides = array<i32>} : memref<98x288xf32, #tpu.memory_space<vmem>>, vector<7x32xf32>,
    %c482 = arith.constant 482 : index
    %c0_509 = arith.constant 0 : index
    %318 = tpu.strided_load %arg13[%c482, %c0_509] {strides = array<i32: 2, 1>} : memref<512x32xf32, #tpu.memory_space<vmem>>, vector<7x32xf32>
    %c91_510 = arith.constant 91 : index
    %c256_511 = arith.constant 256 : index
    %319 = vector.load %arg14[%c91_510, %c256_511] : memref<98x288xf32, #tpu.memory_space<vmem>>, vector<7x32xf32>
    tpu.vector_store %arg14[%c91_510, %c256_511], %318 {strides = array<i32>} : memref<98x288xf32, #tpu.memory_space<vmem>>, vector<7x32xf32>,
    %c0_512 = arith.constant 0 : index
    %c0_513 = arith.constant 0 : index
    %320 = vector.load %arg14[%c0_512, %c0_513] : memref<98x288xf32, #tpu.memory_space<vmem>>, vector<98x288xf32>
    %321 = arith.truncf %320 : vector<98x288xf32> to vector<98x288xbf16>
    %c0_514 = arith.constant 0 : index
    %c0_515 = arith.constant 0 : index
    %322 = vector.load %arg4[%c0_514, %c0_515] : memref<288x64xbf16, #tpu.memory_space<vmem>>, vector<288x64xbf16>
    %cst_516 = arith.constant dense<0.000000e+00> : vector<98x64xf32>
    %323 = tpu.matmul %321, %322, %cst_516 {dimension_numbers = #tpu.dot_dimension_numbers<[1], [0], [0], [1], [0, 0, 1, 1], [], []>} : vector<98x288xbf16>, vector<288x64xbf16>, vector<98x64xf32> -> vector<98x64xf32>
    %c0_517 = arith.constant 0 : index
    %c0_518 = arith.constant 0 : index
    %324 = vector.load %arg5[%c0_517, %c0_518] : memref<1x64xf32, #tpu.memory_space<vmem>>, vector<1x64xf32>
    %325 = vector.broadcast %324 : vector<1x64xf32> to vector<98x64xf32>
    %326 = arith.addf %323, %325 : vector<98x64xf32>
    %cst_519 = arith.constant 0.000000e+00 : f32
    %327 = vector.broadcast %cst_519 : f32 to vector<98x64xf32>
    %328 = arith.maximumf %326, %327 : vector<98x64xf32>
    %c0_520 = arith.constant 0 : index
    %c0_521 = arith.constant 0 : index
    %329 = vector.load %arg15[%c0_520, %c0_521] : memref<98x64xf32, #tpu.memory_space<vmem>>, vector<98x64xf32>
    tpu.vector_store %arg15[%c0_520, %c0_521], %328 {strides = array<i32>} : memref<98x64xf32, #tpu.memory_space<vmem>>, vector<98x64xf32>,
    %c0_522 = arith.constant 0 : index
    %c0_523 = arith.constant 0 : index
    %330 = vector.load %arg15[%c0_522, %c0_523] : memref<98x64xf32, #tpu.memory_space<vmem>>, vector<5x64xf32>
    %c0_524 = arith.constant 0 : index
    %c0_525 = arith.constant 0 : index
    %331 = vector.load %arg16[%c0_524, %c0_525] : memref<50x576xf32, #tpu.memory_space<vmem>>, vector<5x64xf32>
    tpu.vector_store %arg16[%c0_524, %c0_525], %330 {strides = array<i32>} : memref<50x576xf32, #tpu.memory_space<vmem>>, vector<5x64xf32>,
    %c1_526 = arith.constant 1 : index
    %c0_527 = arith.constant 0 : index
    %332 = vector.load %arg15[%c1_526, %c0_527] : memref<98x64xf32, #tpu.memory_space<vmem>>, vector<5x64xf32>
    %c0_528 = arith.constant 0 : index
    %c64_529 = arith.constant 64 : index
    %333 = vector.load %arg16[%c0_528, %c64_529] : memref<50x576xf32, #tpu.memory_space<vmem>>, vector<5x64xf32>
    tpu.vector_store %arg16[%c0_528, %c64_529], %332 {strides = array<i32>} : memref<50x576xf32, #tpu.memory_space<vmem>>, vector<5x64xf32>,
    %c2_530 = arith.constant 2 : index
    %c0_531 = arith.constant 0 : index
    %334 = vector.load %arg15[%c2_530, %c0_531] : memref<98x64xf32, #tpu.memory_space<vmem>>, vector<5x64xf32>
    %c0_532 = arith.constant 0 : index
    %c128_533 = arith.constant 128 : index
    %335 = vector.load %arg16[%c0_532, %c128_533] : memref<50x576xf32, #tpu.memory_space<vmem>>, vector<5x64xf32>
    tpu.vector_store %arg16[%c0_532, %c128_533], %334 {strides = array<i32>} : memref<50x576xf32, #tpu.memory_space<vmem>>, vector<5x64xf32>,
    %c7_534 = arith.constant 7 : index
    %c0_535 = arith.constant 0 : index
    %336 = vector.load %arg15[%c7_534, %c0_535] : memref<98x64xf32, #tpu.memory_space<vmem>>, vector<5x64xf32>
    %c0_536 = arith.constant 0 : index
    %c192_537 = arith.constant 192 : index
    %337 = vector.load %arg16[%c0_536, %c192_537] : memref<50x576xf32, #tpu.memory_space<vmem>>, vector<5x64xf32>
    tpu.vector_store %arg16[%c0_536, %c192_537], %336 {strides = array<i32>} : memref<50x576xf32, #tpu.memory_space<vmem>>, vector<5x64xf32>,
    %c8 = arith.constant 8 : index
    %c0_538 = arith.constant 0 : index
    %338 = vector.load %arg15[%c8, %c0_538] : memref<98x64xf32, #tpu.memory_space<vmem>>, vector<5x64xf32>
    %c0_539 = arith.constant 0 : index
    %c256_540 = arith.constant 256 : index
    %339 = vector.load %arg16[%c0_539, %c256_540] : memref<50x576xf32, #tpu.memory_space<vmem>>, vector<5x64xf32>
    tpu.vector_store %arg16[%c0_539, %c256_540], %338 {strides = array<i32>} : memref<50x576xf32, #tpu.memory_space<vmem>>, vector<5x64xf32>,
    %c9 = arith.constant 9 : index
    %c0_541 = arith.constant 0 : index
    %340 = vector.load %arg15[%c9, %c0_541] : memref<98x64xf32, #tpu.memory_space<vmem>>, vector<5x64xf32>
    %c0_542 = arith.constant 0 : index
    %c320_543 = arith.constant 320 : index
    %341 = vector.load %arg16[%c0_542, %c320_543] : memref<50x576xf32, #tpu.memory_space<vmem>>, vector<5x64xf32>
    tpu.vector_store %arg16[%c0_542, %c320_543], %340 {strides = array<i32>} : memref<50x576xf32, #tpu.memory_space<vmem>>, vector<5x64xf32>,
    %c14_544 = arith.constant 14 : index
    %c0_545 = arith.constant 0 : index
    %342 = vector.load %arg15[%c14_544, %c0_545] : memref<98x64xf32, #tpu.memory_space<vmem>>, vector<5x64xf32>
    %c0_546 = arith.constant 0 : index
    %c384_547 = arith.constant 384 : index
    %343 = vector.load %arg16[%c0_546, %c384_547] : memref<50x576xf32, #tpu.memory_space<vmem>>, vector<5x64xf32>
    tpu.vector_store %arg16[%c0_546, %c384_547], %342 {strides = array<i32>} : memref<50x576xf32, #tpu.memory_space<vmem>>, vector<5x64xf32>,
    %c15 = arith.constant 15 : index
    %c0_548 = arith.constant 0 : index
    %344 = vector.load %arg15[%c15, %c0_548] : memref<98x64xf32, #tpu.memory_space<vmem>>, vector<5x64xf32>
    %c0_549 = arith.constant 0 : index
    %c448_550 = arith.constant 448 : index
    %345 = vector.load %arg16[%c0_549, %c448_550] : memref<50x576xf32, #tpu.memory_space<vmem>>, vector<5x64xf32>
    tpu.vector_store %arg16[%c0_549, %c448_550], %344 {strides = array<i32>} : memref<50x576xf32, #tpu.memory_space<vmem>>, vector<5x64xf32>,
    %c16_551 = arith.constant 16 : index
    %c0_552 = arith.constant 0 : index
    %346 = vector.load %arg15[%c16_551, %c0_552] : memref<98x64xf32, #tpu.memory_space<vmem>>, vector<5x64xf32>
    %c0_553 = arith.constant 0 : index
    %c512 = arith.constant 512 : index
    %347 = vector.load %arg16[%c0_553, %c512] : memref<50x576xf32, #tpu.memory_space<vmem>>, vector<5x64xf32>
    tpu.vector_store %arg16[%c0_553, %c512], %346 {strides = array<i32>} : memref<50x576xf32, #tpu.memory_space<vmem>>, vector<5x64xf32>,
    %c7_554 = arith.constant 7 : index
    %c0_555 = arith.constant 0 : index
    %348 = vector.load %arg15[%c7_554, %c0_555] : memref<98x64xf32, #tpu.memory_space<vmem>>, vector<5x64xf32>
    %c5 = arith.constant 5 : index
    %c0_556 = arith.constant 0 : index
    %349 = vector.load %arg16[%c5, %c0_556] : memref<50x576xf32, #tpu.memory_space<vmem>>, vector<5x64xf32>
    tpu.vector_store %arg16[%c5, %c0_556], %348 {strides = array<i32>} : memref<50x576xf32, #tpu.memory_space<vmem>>, vector<5x64xf32>,
    %c8_557 = arith.constant 8 : index
    %c0_558 = arith.constant 0 : index
    %350 = vector.load %arg15[%c8_557, %c0_558] : memref<98x64xf32, #tpu.memory_space<vmem>>, vector<5x64xf32>
    %c5_559 = arith.constant 5 : index
    %c64_560 = arith.constant 64 : index
    %351 = vector.load %arg16[%c5_559, %c64_560] : memref<50x576xf32, #tpu.memory_space<vmem>>, vector<5x64xf32>
    tpu.vector_store %arg16[%c5_559, %c64_560], %350 {strides = array<i32>} : memref<50x576xf32, #tpu.memory_space<vmem>>, vector<5x64xf32>,
    %c9_561 = arith.constant 9 : index
    %c0_562 = arith.constant 0 : index
    %352 = vector.load %arg15[%c9_561, %c0_562] : memref<98x64xf32, #tpu.memory_space<vmem>>, vector<5x64xf32>
    %c5_563 = arith.constant 5 : index
    %c128_564 = arith.constant 128 : index
    %353 = vector.load %arg16[%c5_563, %c128_564] : memref<50x576xf32, #tpu.memory_space<vmem>>, vector<5x64xf32>
    tpu.vector_store %arg16[%c5_563, %c128_564], %352 {strides = array<i32>} : memref<50x576xf32, #tpu.memory_space<vmem>>, vector<5x64xf32>,
    %c14_565 = arith.constant 14 : index
    %c0_566 = arith.constant 0 : index
    %354 = vector.load %arg15[%c14_565, %c0_566] : memref<98x64xf32, #tpu.memory_space<vmem>>, vector<5x64xf32>
    %c5_567 = arith.constant 5 : index
    %c192_568 = arith.constant 192 : index
    %355 = vector.load %arg16[%c5_567, %c192_568] : memref<50x576xf32, #tpu.memory_space<vmem>>, vector<5x64xf32>
    tpu.vector_store %arg16[%c5_567, %c192_568], %354 {strides = array<i32>} : memref<50x576xf32, #tpu.memory_space<vmem>>, vector<5x64xf32>,
    %c15_569 = arith.constant 15 : index
    %c0_570 = arith.constant 0 : index
    %356 = vector.load %arg15[%c15_569, %c0_570] : memref<98x64xf32, #tpu.memory_space<vmem>>, vector<5x64xf32>
    %c5_571 = arith.constant 5 : index
    %c256_572 = arith.constant 256 : index
    %357 = vector.load %arg16[%c5_571, %c256_572] : memref<50x576xf32, #tpu.memory_space<vmem>>, vector<5x64xf32>
    tpu.vector_store %arg16[%c5_571, %c256_572], %356 {strides = array<i32>} : memref<50x576xf32, #tpu.memory_space<vmem>>, vector<5x64xf32>,
    %c16_573 = arith.constant 16 : index
    %c0_574 = arith.constant 0 : index
    %358 = vector.load %arg15[%c16_573, %c0_574] : memref<98x64xf32, #tpu.memory_space<vmem>>, vector<5x64xf32>
    %c5_575 = arith.constant 5 : index
    %c320_576 = arith.constant 320 : index
    %359 = vector.load %arg16[%c5_575, %c320_576] : memref<50x576xf32, #tpu.memory_space<vmem>>, vector<5x64xf32>
    tpu.vector_store %arg16[%c5_575, %c320_576], %358 {strides = array<i32>} : memref<50x576xf32, #tpu.memory_space<vmem>>, vector<5x64xf32>,
    %c21_577 = arith.constant 21 : index
    %c0_578 = arith.constant 0 : index
    %360 = vector.load %arg15[%c21_577, %c0_578] : memref<98x64xf32, #tpu.memory_space<vmem>>, vector<5x64xf32>
    %c5_579 = arith.constant 5 : index
    %c384_580 = arith.constant 384 : index
    %361 = vector.load %arg16[%c5_579, %c384_580] : memref<50x576xf32, #tpu.memory_space<vmem>>, vector<5x64xf32>
    tpu.vector_store %arg16[%c5_579, %c384_580], %360 {strides = array<i32>} : memref<50x576xf32, #tpu.memory_space<vmem>>, vector<5x64xf32>,
    %c22 = arith.constant 22 : index
    %c0_581 = arith.constant 0 : index
    %362 = vector.load %arg15[%c22, %c0_581] : memref<98x64xf32, #tpu.memory_space<vmem>>, vector<5x64xf32>
    %c5_582 = arith.constant 5 : index
    %c448_583 = arith.constant 448 : index
    %363 = vector.load %arg16[%c5_582, %c448_583] : memref<50x576xf32, #tpu.memory_space<vmem>>, vector<5x64xf32>
    tpu.vector_store %arg16[%c5_582, %c448_583], %362 {strides = array<i32>} : memref<50x576xf32, #tpu.memory_space<vmem>>, vector<5x64xf32>,
    %c23 = arith.constant 23 : index
    %c0_584 = arith.constant 0 : index
    %364 = vector.load %arg15[%c23, %c0_584] : memref<98x64xf32, #tpu.memory_space<vmem>>, vector<5x64xf32>
    %c5_585 = arith.constant 5 : index
    %c512_586 = arith.constant 512 : index
    %365 = vector.load %arg16[%c5_585, %c512_586] : memref<50x576xf32, #tpu.memory_space<vmem>>, vector<5x64xf32>
    tpu.vector_store %arg16[%c5_585, %c512_586], %364 {strides = array<i32>} : memref<50x576xf32, #tpu.memory_space<vmem>>, vector<5x64xf32>,
    %c14_587 = arith.constant 14 : index
    %c0_588 = arith.constant 0 : index
    %366 = vector.load %arg15[%c14_587, %c0_588] : memref<98x64xf32, #tpu.memory_space<vmem>>, vector<5x64xf32>
    %c10 = arith.constant 10 : index
    %c0_589 = arith.constant 0 : index
    %367 = vector.load %arg16[%c10, %c0_589] : memref<50x576xf32, #tpu.memory_space<vmem>>, vector<5x64xf32>
    tpu.vector_store %arg16[%c10, %c0_589], %366 {strides = array<i32>} : memref<50x576xf32, #tpu.memory_space<vmem>>, vector<5x64xf32>,
    %c15_590 = arith.constant 15 : index
    %c0_591 = arith.constant 0 : index
    %368 = vector.load %arg15[%c15_590, %c0_591] : memref<98x64xf32, #tpu.memory_space<vmem>>, vector<5x64xf32>
    %c10_592 = arith.constant 10 : index
    %c64_593 = arith.constant 64 : index
    %369 = vector.load %arg16[%c10_592, %c64_593] : memref<50x576xf32, #tpu.memory_space<vmem>>, vector<5x64xf32>
    tpu.vector_store %arg16[%c10_592, %c64_593], %368 {strides = array<i32>} : memref<50x576xf32, #tpu.memory_space<vmem>>, vector<5x64xf32>,
    %c16_594 = arith.constant 16 : index
    %c0_595 = arith.constant 0 : index
    %370 = vector.load %arg15[%c16_594, %c0_595] : memref<98x64xf32, #tpu.memory_space<vmem>>, vector<5x64xf32>
    %c10_596 = arith.constant 10 : index
    %c128_597 = arith.constant 128 : index
    %371 = vector.load %arg16[%c10_596, %c128_597] : memref<50x576xf32, #tpu.memory_space<vmem>>, vector<5x64xf32>
    tpu.vector_store %arg16[%c10_596, %c128_597], %370 {strides = array<i32>} : memref<50x576xf32, #tpu.memory_space<vmem>>, vector<5x64xf32>,
    %c21_598 = arith.constant 21 : index
    %c0_599 = arith.constant 0 : index
    %372 = vector.load %arg15[%c21_598, %c0_599] : memref<98x64xf32, #tpu.memory_space<vmem>>, vector<5x64xf32>
    %c10_600 = arith.constant 10 : index
    %c192_601 = arith.constant 192 : index
    %373 = vector.load %arg16[%c10_600, %c192_601] : memref<50x576xf32, #tpu.memory_space<vmem>>, vector<5x64xf32>
    tpu.vector_store %arg16[%c10_600, %c192_601], %372 {strides = array<i32>} : memref<50x576xf32, #tpu.memory_space<vmem>>, vector<5x64xf32>,
    %c22_602 = arith.constant 22 : index
    %c0_603 = arith.constant 0 : index
    %374 = vector.load %arg15[%c22_602, %c0_603] : memref<98x64xf32, #tpu.memory_space<vmem>>, vector<5x64xf32>
    %c10_604 = arith.constant 10 : index
    %c256_605 = arith.constant 256 : index
    %375 = vector.load %arg16[%c10_604, %c256_605] : memref<50x576xf32, #tpu.memory_space<vmem>>, vector<5x64xf32>
    tpu.vector_store %arg16[%c10_604, %c256_605], %374 {strides = array<i32>} : memref<50x576xf32, #tpu.memory_space<vmem>>, vector<5x64xf32>,
    %c23_606 = arith.constant 23 : index
    %c0_607 = arith.constant 0 : index
    %376 = vector.load %arg15[%c23_606, %c0_607] : memref<98x64xf32, #tpu.memory_space<vmem>>, vector<5x64xf32>
    %c10_608 = arith.constant 10 : index
    %c320_609 = arith.constant 320 : index
    %377 = vector.load %arg16[%c10_608, %c320_609] : memref<50x576xf32, #tpu.memory_space<vmem>>, vector<5x64xf32>
    tpu.vector_store %arg16[%c10_608, %c320_609], %376 {strides = array<i32>} : memref<50x576xf32, #tpu.memory_space<vmem>>, vector<5x64xf32>,
    %c28_610 = arith.constant 28 : index
    %c0_611 = arith.constant 0 : index
    %378 = vector.load %arg15[%c28_610, %c0_611] : memref<98x64xf32, #tpu.memory_space<vmem>>, vector<5x64xf32>
    %c10_612 = arith.constant 10 : index
    %c384_613 = arith.constant 384 : index
    %379 = vector.load %arg16[%c10_612, %c384_613] : memref<50x576xf32, #tpu.memory_space<vmem>>, vector<5x64xf32>
    tpu.vector_store %arg16[%c10_612, %c384_613], %378 {strides = array<i32>} : memref<50x576xf32, #tpu.memory_space<vmem>>, vector<5x64xf32>,
    %c29 = arith.constant 29 : index
    %c0_614 = arith.constant 0 : index
    %380 = vector.load %arg15[%c29, %c0_614] : memref<98x64xf32, #tpu.memory_space<vmem>>, vector<5x64xf32>
    %c10_615 = arith.constant 10 : index
    %c448_616 = arith.constant 448 : index
    %381 = vector.load %arg16[%c10_615, %c448_616] : memref<50x576xf32, #tpu.memory_space<vmem>>, vector<5x64xf32>
    tpu.vector_store %arg16[%c10_615, %c448_616], %380 {strides = array<i32>} : memref<50x576xf32, #tpu.memory_space<vmem>>, vector<5x64xf32>,
    %c30 = arith.constant 30 : index
    %c0_617 = arith.constant 0 : index
    %382 = vector.load %arg15[%c30, %c0_617] : memref<98x64xf32, #tpu.memory_space<vmem>>, vector<5x64xf32>
    %c10_618 = arith.constant 10 : index
    %c512_619 = arith.constant 512 : index
    %383 = vector.load %arg16[%c10_618, %c512_619] : memref<50x576xf32, #tpu.memory_space<vmem>>, vector<5x64xf32>
    tpu.vector_store %arg16[%c10_618, %c512_619], %382 {strides = array<i32>} : memref<50x576xf32, #tpu.memory_space<vmem>>, vector<5x64xf32>,
    %c21_620 = arith.constant 21 : index
    %c0_621 = arith.constant 0 : index
    %384 = vector.load %arg15[%c21_620, %c0_621] : memref<98x64xf32, #tpu.memory_space<vmem>>, vector<5x64xf32>
    %c15_622 = arith.constant 15 : index
    %c0_623 = arith.constant 0 : index
    %385 = vector.load %arg16[%c15_622, %c0_623] : memref<50x576xf32, #tpu.memory_space<vmem>>, vector<5x64xf32>
    tpu.vector_store %arg16[%c15_622, %c0_623], %384 {strides = array<i32>} : memref<50x576xf32, #tpu.memory_space<vmem>>, vector<5x64xf32>,
    %c22_624 = arith.constant 22 : index
    %c0_625 = arith.constant 0 : index
    %386 = vector.load %arg15[%c22_624, %c0_625] : memref<98x64xf32, #tpu.memory_space<vmem>>, vector<5x64xf32>
    %c15_626 = arith.constant 15 : index
    %c64_627 = arith.constant 64 : index
    %387 = vector.load %arg16[%c15_626, %c64_627] : memref<50x576xf32, #tpu.memory_space<vmem>>, vector<5x64xf32>
    tpu.vector_store %arg16[%c15_626, %c64_627], %386 {strides = array<i32>} : memref<50x576xf32, #tpu.memory_space<vmem>>, vector<5x64xf32>,
    %c23_628 = arith.constant 23 : index
    %c0_629 = arith.constant 0 : index
    %388 = vector.load %arg15[%c23_628, %c0_629] : memref<98x64xf32, #tpu.memory_space<vmem>>, vector<5x64xf32>
    %c15_630 = arith.constant 15 : index
    %c128_631 = arith.constant 128 : index
    %389 = vector.load %arg16[%c15_630, %c128_631] : memref<50x576xf32, #tpu.memory_space<vmem>>, vector<5x64xf32>
    tpu.vector_store %arg16[%c15_630, %c128_631], %388 {strides = array<i32>} : memref<50x576xf32, #tpu.memory_space<vmem>>, vector<5x64xf32>,
    %c28_632 = arith.constant 28 : index
    %c0_633 = arith.constant 0 : index
    %390 = vector.load %arg15[%c28_632, %c0_633] : memref<98x64xf32, #tpu.memory_space<vmem>>, vector<5x64xf32>
    %c15_634 = arith.constant 15 : index
    %c192_635 = arith.constant 192 : index
    %391 = vector.load %arg16[%c15_634, %c192_635] : memref<50x576xf32, #tpu.memory_space<vmem>>, vector<5x64xf32>
    tpu.vector_store %arg16[%c15_634, %c192_635], %390 {strides = array<i32>} : memref<50x576xf32, #tpu.memory_space<vmem>>, vector<5x64xf32>,
    %c29_636 = arith.constant 29 : index
    %c0_637 = arith.constant 0 : index
    %392 = vector.load %arg15[%c29_636, %c0_637] : memref<98x64xf32, #tpu.memory_space<vmem>>, vector<5x64xf32>
    %c15_638 = arith.constant 15 : index
    %c256_639 = arith.constant 256 : index
    %393 = vector.load %arg16[%c15_638, %c256_639] : memref<50x576xf32, #tpu.memory_space<vmem>>, vector<5x64xf32>
    tpu.vector_store %arg16[%c15_638, %c256_639], %392 {strides = array<i32>} : memref<50x576xf32, #tpu.memory_space<vmem>>, vector<5x64xf32>,
    %c30_640 = arith.constant 30 : index
    %c0_641 = arith.constant 0 : index
    %394 = vector.load %arg15[%c30_640, %c0_641] : memref<98x64xf32, #tpu.memory_space<vmem>>, vector<5x64xf32>
    %c15_642 = arith.constant 15 : index
    %c320_643 = arith.constant 320 : index
    %395 = vector.load %arg16[%c15_642, %c320_643] : memref<50x576xf32, #tpu.memory_space<vmem>>, vector<5x64xf32>
    tpu.vector_store %arg16[%c15_642, %c320_643], %394 {strides = array<i32>} : memref<50x576xf32, #tpu.memory_space<vmem>>, vector<5x64xf32>,
    %c35_644 = arith.constant 35 : index
    %c0_645 = arith.constant 0 : index
    %396 = vector.load %arg15[%c35_644, %c0_645] : memref<98x64xf32, #tpu.memory_space<vmem>>, vector<5x64xf32>
    %c15_646 = arith.constant 15 : index
    %c384_647 = arith.constant 384 : index
    %397 = vector.load %arg16[%c15_646, %c384_647] : memref<50x576xf32, #tpu.memory_space<vmem>>, vector<5x64xf32>
    tpu.vector_store %arg16[%c15_646, %c384_647], %396 {strides = array<i32>} : memref<50x576xf32, #tpu.memory_space<vmem>>, vector<5x64xf32>,
    %c36 = arith.constant 36 : index
    %c0_648 = arith.constant 0 : index
    %398 = vector.load %arg15[%c36, %c0_648] : memref<98x64xf32, #tpu.memory_space<vmem>>, vector<5x64xf32>
    %c15_649 = arith.constant 15 : index
    %c448_650 = arith.constant 448 : index
    %399 = vector.load %arg16[%c15_649, %c448_650] : memref<50x576xf32, #tpu.memory_space<vmem>>, vector<5x64xf32>
    tpu.vector_store %arg16[%c15_649, %c448_650], %398 {strides = array<i32>} : memref<50x576xf32, #tpu.memory_space<vmem>>, vector<5x64xf32>,
    %c37 = arith.constant 37 : index
    %c0_651 = arith.constant 0 : index
    %400 = vector.load %arg15[%c37, %c0_651] : memref<98x64xf32, #tpu.memory_space<vmem>>, vector<5x64xf32>
    %c15_652 = arith.constant 15 : index
    %c512_653 = arith.constant 512 : index
    %401 = vector.load %arg16[%c15_652, %c512_653] : memref<50x576xf32, #tpu.memory_space<vmem>>, vector<5x64xf32>
    tpu.vector_store %arg16[%c15_652, %c512_653], %400 {strides = array<i32>} : memref<50x576xf32, #tpu.memory_space<vmem>>, vector<5x64xf32>,
    %c28_654 = arith.constant 28 : index
    %c0_655 = arith.constant 0 : index
    %402 = vector.load %arg15[%c28_654, %c0_655] : memref<98x64xf32, #tpu.memory_space<vmem>>, vector<5x64xf32>
    %c20 = arith.constant 20 : index
    %c0_656 = arith.constant 0 : index
    %403 = vector.load %arg16[%c20, %c0_656] : memref<50x576xf32, #tpu.memory_space<vmem>>, vector<5x64xf32>
    tpu.vector_store %arg16[%c20, %c0_656], %402 {strides = array<i32>} : memref<50x576xf32, #tpu.memory_space<vmem>>, vector<5x64xf32>,
    %c29_657 = arith.constant 29 : index
    %c0_658 = arith.constant 0 : index
    %404 = vector.load %arg15[%c29_657, %c0_658] : memref<98x64xf32, #tpu.memory_space<vmem>>, vector<5x64xf32>
    %c20_659 = arith.constant 20 : index
    %c64_660 = arith.constant 64 : index
    %405 = vector.load %arg16[%c20_659, %c64_660] : memref<50x576xf32, #tpu.memory_space<vmem>>, vector<5x64xf32>
    tpu.vector_store %arg16[%c20_659, %c64_660], %404 {strides = array<i32>} : memref<50x576xf32, #tpu.memory_space<vmem>>, vector<5x64xf32>,
    %c30_661 = arith.constant 30 : index
    %c0_662 = arith.constant 0 : index
    %406 = vector.load %arg15[%c30_661, %c0_662] : memref<98x64xf32, #tpu.memory_space<vmem>>, vector<5x64xf32>
    %c20_663 = arith.constant 20 : index
    %c128_664 = arith.constant 128 : index
    %407 = vector.load %arg16[%c20_663, %c128_664] : memref<50x576xf32, #tpu.memory_space<vmem>>, vector<5x64xf32>
    tpu.vector_store %arg16[%c20_663, %c128_664], %406 {strides = array<i32>} : memref<50x576xf32, #tpu.memory_space<vmem>>, vector<5x64xf32>,
    %c35_665 = arith.constant 35 : index
    %c0_666 = arith.constant 0 : index
    %408 = vector.load %arg15[%c35_665, %c0_666] : memref<98x64xf32, #tpu.memory_space<vmem>>, vector<5x64xf32>
    %c20_667 = arith.constant 20 : index
    %c192_668 = arith.constant 192 : index
    %409 = vector.load %arg16[%c20_667, %c192_668] : memref<50x576xf32, #tpu.memory_space<vmem>>, vector<5x64xf32>
    tpu.vector_store %arg16[%c20_667, %c192_668], %408 {strides = array<i32>} : memref<50x576xf32, #tpu.memory_space<vmem>>, vector<5x64xf32>,
    %c36_669 = arith.constant 36 : index
    %c0_670 = arith.constant 0 : index
    %410 = vector.load %arg15[%c36_669, %c0_670] : memref<98x64xf32, #tpu.memory_space<vmem>>, vector<5x64xf32>
    %c20_671 = arith.constant 20 : index
    %c256_672 = arith.constant 256 : index
    %411 = vector.load %arg16[%c20_671, %c256_672] : memref<50x576xf32, #tpu.memory_space<vmem>>, vector<5x64xf32>
    tpu.vector_store %arg16[%c20_671, %c256_672], %410 {strides = array<i32>} : memref<50x576xf32, #tpu.memory_space<vmem>>, vector<5x64xf32>,
    %c37_673 = arith.constant 37 : index
    %c0_674 = arith.constant 0 : index
    %412 = vector.load %arg15[%c37_673, %c0_674] : memref<98x64xf32, #tpu.memory_space<vmem>>, vector<5x64xf32>
    %c20_675 = arith.constant 20 : index
    %c320_676 = arith.constant 320 : index
    %413 = vector.load %arg16[%c20_675, %c320_676] : memref<50x576xf32, #tpu.memory_space<vmem>>, vector<5x64xf32>
    tpu.vector_store %arg16[%c20_675, %c320_676], %412 {strides = array<i32>} : memref<50x576xf32, #tpu.memory_space<vmem>>, vector<5x64xf32>,
    %c42_677 = arith.constant 42 : index
    %c0_678 = arith.constant 0 : index
    %414 = vector.load %arg15[%c42_677, %c0_678] : memref<98x64xf32, #tpu.memory_space<vmem>>, vector<5x64xf32>
    %c20_679 = arith.constant 20 : index
    %c384_680 = arith.constant 384 : index
    %415 = vector.load %arg16[%c20_679, %c384_680] : memref<50x576xf32, #tpu.memory_space<vmem>>, vector<5x64xf32>
    tpu.vector_store %arg16[%c20_679, %c384_680], %414 {strides = array<i32>} : memref<50x576xf32, #tpu.memory_space<vmem>>, vector<5x64xf32>,
    %c43 = arith.constant 43 : index
    %c0_681 = arith.constant 0 : index
    %416 = vector.load %arg15[%c43, %c0_681] : memref<98x64xf32, #tpu.memory_space<vmem>>, vector<5x64xf32>
    %c20_682 = arith.constant 20 : index
    %c448_683 = arith.constant 448 : index
    %417 = vector.load %arg16[%c20_682, %c448_683] : memref<50x576xf32, #tpu.memory_space<vmem>>, vector<5x64xf32>
    tpu.vector_store %arg16[%c20_682, %c448_683], %416 {strides = array<i32>} : memref<50x576xf32, #tpu.memory_space<vmem>>, vector<5x64xf32>,
    %c44 = arith.constant 44 : index
    %c0_684 = arith.constant 0 : index
    %418 = vector.load %arg15[%c44, %c0_684] : memref<98x64xf32, #tpu.memory_space<vmem>>, vector<5x64xf32>
    %c20_685 = arith.constant 20 : index
    %c512_686 = arith.constant 512 : index
    %419 = vector.load %arg16[%c20_685, %c512_686] : memref<50x576xf32, #tpu.memory_space<vmem>>, vector<5x64xf32>
    tpu.vector_store %arg16[%c20_685, %c512_686], %418 {strides = array<i32>} : memref<50x576xf32, #tpu.memory_space<vmem>>, vector<5x64xf32>,
    %c49_687 = arith.constant 49 : index
    %c0_688 = arith.constant 0 : index
    %420 = vector.load %arg15[%c49_687, %c0_688] : memref<98x64xf32, #tpu.memory_space<vmem>>, vector<5x64xf32>
    %c25 = arith.constant 25 : index
    %c0_689 = arith.constant 0 : index
    %421 = vector.load %arg16[%c25, %c0_689] : memref<50x576xf32, #tpu.memory_space<vmem>>, vector<5x64xf32>
    tpu.vector_store %arg16[%c25, %c0_689], %420 {strides = array<i32>} : memref<50x576xf32, #tpu.memory_space<vmem>>, vector<5x64xf32>,
    %c50_690 = arith.constant 50 : index
    %c0_691 = arith.constant 0 : index
    %422 = vector.load %arg15[%c50_690, %c0_691] : memref<98x64xf32, #tpu.memory_space<vmem>>, vector<5x64xf32>
    %c25_692 = arith.constant 25 : index
    %c64_693 = arith.constant 64 : index
    %423 = vector.load %arg16[%c25_692, %c64_693] : memref<50x576xf32, #tpu.memory_space<vmem>>, vector<5x64xf32>
    tpu.vector_store %arg16[%c25_692, %c64_693], %422 {strides = array<i32>} : memref<50x576xf32, #tpu.memory_space<vmem>>, vector<5x64xf32>,
    %c51 = arith.constant 51 : index
    %c0_694 = arith.constant 0 : index
    %424 = vector.load %arg15[%c51, %c0_694] : memref<98x64xf32, #tpu.memory_space<vmem>>, vector<5x64xf32>
    %c25_695 = arith.constant 25 : index
    %c128_696 = arith.constant 128 : index
    %425 = vector.load %arg16[%c25_695, %c128_696] : memref<50x576xf32, #tpu.memory_space<vmem>>, vector<5x64xf32>
    tpu.vector_store %arg16[%c25_695, %c128_696], %424 {strides = array<i32>} : memref<50x576xf32, #tpu.memory_space<vmem>>, vector<5x64xf32>,
    %c56_697 = arith.constant 56 : index
    %c0_698 = arith.constant 0 : index
    %426 = vector.load %arg15[%c56_697, %c0_698] : memref<98x64xf32, #tpu.memory_space<vmem>>, vector<5x64xf32>
    %c25_699 = arith.constant 25 : index
    %c192_700 = arith.constant 192 : index
    %427 = vector.load %arg16[%c25_699, %c192_700] : memref<50x576xf32, #tpu.memory_space<vmem>>, vector<5x64xf32>
    tpu.vector_store %arg16[%c25_699, %c192_700], %426 {strides = array<i32>} : memref<50x576xf32, #tpu.memory_space<vmem>>, vector<5x64xf32>,
    %c57 = arith.constant 57 : index
    %c0_701 = arith.constant 0 : index
    %428 = vector.load %arg15[%c57, %c0_701] : memref<98x64xf32, #tpu.memory_space<vmem>>, vector<5x64xf32>
    %c25_702 = arith.constant 25 : index
    %c256_703 = arith.constant 256 : index
    %429 = vector.load %arg16[%c25_702, %c256_703] : memref<50x576xf32, #tpu.memory_space<vmem>>, vector<5x64xf32>
    tpu.vector_store %arg16[%c25_702, %c256_703], %428 {strides = array<i32>} : memref<50x576xf32, #tpu.memory_space<vmem>>, vector<5x64xf32>,
    %c58 = arith.constant 58 : index
    %c0_704 = arith.constant 0 : index
    %430 = vector.load %arg15[%c58, %c0_704] : memref<98x64xf32, #tpu.memory_space<vmem>>, vector<5x64xf32>
    %c25_705 = arith.constant 25 : index
    %c320_706 = arith.constant 320 : index
    %431 = vector.load %arg16[%c25_705, %c320_706] : memref<50x576xf32, #tpu.memory_space<vmem>>, vector<5x64xf32>
    tpu.vector_store %arg16[%c25_705, %c320_706], %430 {strides = array<i32>} : memref<50x576xf32, #tpu.memory_space<vmem>>, vector<5x64xf32>,
    %c63_707 = arith.constant 63 : index
    %c0_708 = arith.constant 0 : index
    %432 = vector.load %arg15[%c63_707, %c0_708] : memref<98x64xf32, #tpu.memory_space<vmem>>, vector<5x64xf32>
    %c25_709 = arith.constant 25 : index
    %c384_710 = arith.constant 384 : index
    %433 = vector.load %arg16[%c25_709, %c384_710] : memref<50x576xf32, #tpu.memory_space<vmem>>, vector<5x64xf32>
    tpu.vector_store %arg16[%c25_709, %c384_710], %432 {strides = array<i32>} : memref<50x576xf32, #tpu.memory_space<vmem>>, vector<5x64xf32>,
    %c64_711 = arith.constant 64 : index
    %c0_712 = arith.constant 0 : index
    %434 = vector.load %arg15[%c64_711, %c0_712] : memref<98x64xf32, #tpu.memory_space<vmem>>, vector<5x64xf32>
    %c25_713 = arith.constant 25 : index
    %c448_714 = arith.constant 448 : index
    %435 = vector.load %arg16[%c25_713, %c448_714] : memref<50x576xf32, #tpu.memory_space<vmem>>, vector<5x64xf32>
    tpu.vector_store %arg16[%c25_713, %c448_714], %434 {strides = array<i32>} : memref<50x576xf32, #tpu.memory_space<vmem>>, vector<5x64xf32>,
    %c65_715 = arith.constant 65 : index
    %c0_716 = arith.constant 0 : index
    %436 = vector.load %arg15[%c65_715, %c0_716] : memref<98x64xf32, #tpu.memory_space<vmem>>, vector<5x64xf32>
    %c25_717 = arith.constant 25 : index
    %c512_718 = arith.constant 512 : index
    %437 = vector.load %arg16[%c25_717, %c512_718] : memref<50x576xf32, #tpu.memory_space<vmem>>, vector<5x64xf32>
    tpu.vector_store %arg16[%c25_717, %c512_718], %436 {strides = array<i32>} : memref<50x576xf32, #tpu.memory_space<vmem>>, vector<5x64xf32>,
    %c56_719 = arith.constant 56 : index
    %c0_720 = arith.constant 0 : index
    %438 = vector.load %arg15[%c56_719, %c0_720] : memref<98x64xf32, #tpu.memory_space<vmem>>, vector<5x64xf32>
    %c30_721 = arith.constant 30 : index
    %c0_722 = arith.constant 0 : index
    %439 = vector.load %arg16[%c30_721, %c0_722] : memref<50x576xf32, #tpu.memory_space<vmem>>, vector<5x64xf32>
    tpu.vector_store %arg16[%c30_721, %c0_722], %438 {strides = array<i32>} : memref<50x576xf32, #tpu.memory_space<vmem>>, vector<5x64xf32>,
    %c57_723 = arith.constant 57 : index
    %c0_724 = arith.constant 0 : index
    %440 = vector.load %arg15[%c57_723, %c0_724] : memref<98x64xf32, #tpu.memory_space<vmem>>, vector<5x64xf32>
    %c30_725 = arith.constant 30 : index
    %c64_726 = arith.constant 64 : index
    %441 = vector.load %arg16[%c30_725, %c64_726] : memref<50x576xf32, #tpu.memory_space<vmem>>, vector<5x64xf32>
    tpu.vector_store %arg16[%c30_725, %c64_726], %440 {strides = array<i32>} : memref<50x576xf32, #tpu.memory_space<vmem>>, vector<5x64xf32>,
    %c58_727 = arith.constant 58 : index
    %c0_728 = arith.constant 0 : index
    %442 = vector.load %arg15[%c58_727, %c0_728] : memref<98x64xf32, #tpu.memory_space<vmem>>, vector<5x64xf32>
    %c30_729 = arith.constant 30 : index
    %c128_730 = arith.constant 128 : index
    %443 = vector.load %arg16[%c30_729, %c128_730] : memref<50x576xf32, #tpu.memory_space<vmem>>, vector<5x64xf32>
    tpu.vector_store %arg16[%c30_729, %c128_730], %442 {strides = array<i32>} : memref<50x576xf32, #tpu.memory_space<vmem>>, vector<5x64xf32>,
    %c63_731 = arith.constant 63 : index
    %c0_732 = arith.constant 0 : index
    %444 = vector.load %arg15[%c63_731, %c0_732] : memref<98x64xf32, #tpu.memory_space<vmem>>, vector<5x64xf32>
    %c30_733 = arith.constant 30 : index
    %c192_734 = arith.constant 192 : index
    %445 = vector.load %arg16[%c30_733, %c192_734] : memref<50x576xf32, #tpu.memory_space<vmem>>, vector<5x64xf32>
    tpu.vector_store %arg16[%c30_733, %c192_734], %444 {strides = array<i32>} : memref<50x576xf32, #tpu.memory_space<vmem>>, vector<5x64xf32>,
    %c64_735 = arith.constant 64 : index
    %c0_736 = arith.constant 0 : index
    %446 = vector.load %arg15[%c64_735, %c0_736] : memref<98x64xf32, #tpu.memory_space<vmem>>, vector<5x64xf32>
    %c30_737 = arith.constant 30 : index
    %c256_738 = arith.constant 256 : index
    %447 = vector.load %arg16[%c30_737, %c256_738] : memref<50x576xf32, #tpu.memory_space<vmem>>, vector<5x64xf32>
    tpu.vector_store %arg16[%c30_737, %c256_738], %446 {strides = array<i32>} : memref<50x576xf32, #tpu.memory_space<vmem>>, vector<5x64xf32>,
    %c65_739 = arith.constant 65 : index
    %c0_740 = arith.constant 0 : index
    %448 = vector.load %arg15[%c65_739, %c0_740] : memref<98x64xf32, #tpu.memory_space<vmem>>, vector<5x64xf32>
    %c30_741 = arith.constant 30 : index
    %c320_742 = arith.constant 320 : index
    %449 = vector.load %arg16[%c30_741, %c320_742] : memref<50x576xf32, #tpu.memory_space<vmem>>, vector<5x64xf32>
    tpu.vector_store %arg16[%c30_741, %c320_742], %448 {strides = array<i32>} : memref<50x576xf32, #tpu.memory_space<vmem>>, vector<5x64xf32>,
    %c70_743 = arith.constant 70 : index
    %c0_744 = arith.constant 0 : index
    %450 = vector.load %arg15[%c70_743, %c0_744] : memref<98x64xf32, #tpu.memory_space<vmem>>, vector<5x64xf32>
    %c30_745 = arith.constant 30 : index
    %c384_746 = arith.constant 384 : index
    %451 = vector.load %arg16[%c30_745, %c384_746] : memref<50x576xf32, #tpu.memory_space<vmem>>, vector<5x64xf32>
    tpu.vector_store %arg16[%c30_745, %c384_746], %450 {strides = array<i32>} : memref<50x576xf32, #tpu.memory_space<vmem>>, vector<5x64xf32>,
    %c71 = arith.constant 71 : index
    %c0_747 = arith.constant 0 : index
    %452 = vector.load %arg15[%c71, %c0_747] : memref<98x64xf32, #tpu.memory_space<vmem>>, vector<5x64xf32>
    %c30_748 = arith.constant 30 : index
    %c448_749 = arith.constant 448 : index
    %453 = vector.load %arg16[%c30_748, %c448_749] : memref<50x576xf32, #tpu.memory_space<vmem>>, vector<5x64xf32>
    tpu.vector_store %arg16[%c30_748, %c448_749], %452 {strides = array<i32>} : memref<50x576xf32, #tpu.memory_space<vmem>>, vector<5x64xf32>,
    %c72 = arith.constant 72 : index
    %c0_750 = arith.constant 0 : index
    %454 = vector.load %arg15[%c72, %c0_750] : memref<98x64xf32, #tpu.memory_space<vmem>>, vector<5x64xf32>
    %c30_751 = arith.constant 30 : index
    %c512_752 = arith.constant 512 : index
    %455 = vector.load %arg16[%c30_751, %c512_752] : memref<50x576xf32, #tpu.memory_space<vmem>>, vector<5x64xf32>
    tpu.vector_store %arg16[%c30_751, %c512_752], %454 {strides = array<i32>} : memref<50x576xf32, #tpu.memory_space<vmem>>, vector<5x64xf32>,
    %c63_753 = arith.constant 63 : index
    %c0_754 = arith.constant 0 : index
    %456 = vector.load %arg15[%c63_753, %c0_754] : memref<98x64xf32, #tpu.memory_space<vmem>>, vector<5x64xf32>
    %c35_755 = arith.constant 35 : index
    %c0_756 = arith.constant 0 : index
    %457 = vector.load %arg16[%c35_755, %c0_756] : memref<50x576xf32, #tpu.memory_space<vmem>>, vector<5x64xf32>
    tpu.vector_store %arg16[%c35_755, %c0_756], %456 {strides = array<i32>} : memref<50x576xf32, #tpu.memory_space<vmem>>, vector<5x64xf32>,
    %c64_757 = arith.constant 64 : index
    %c0_758 = arith.constant 0 : index
    %458 = vector.load %arg15[%c64_757, %c0_758] : memref<98x64xf32, #tpu.memory_space<vmem>>, vector<5x64xf32>
    %c35_759 = arith.constant 35 : index
    %c64_760 = arith.constant 64 : index
    %459 = vector.load %arg16[%c35_759, %c64_760] : memref<50x576xf32, #tpu.memory_space<vmem>>, vector<5x64xf32>
    tpu.vector_store %arg16[%c35_759, %c64_760], %458 {strides = array<i32>} : memref<50x576xf32, #tpu.memory_space<vmem>>, vector<5x64xf32>,
    %c65_761 = arith.constant 65 : index
    %c0_762 = arith.constant 0 : index
    %460 = vector.load %arg15[%c65_761, %c0_762] : memref<98x64xf32, #tpu.memory_space<vmem>>, vector<5x64xf32>
    %c35_763 = arith.constant 35 : index
    %c128_764 = arith.constant 128 : index
    %461 = vector.load %arg16[%c35_763, %c128_764] : memref<50x576xf32, #tpu.memory_space<vmem>>, vector<5x64xf32>
    tpu.vector_store %arg16[%c35_763, %c128_764], %460 {strides = array<i32>} : memref<50x576xf32, #tpu.memory_space<vmem>>, vector<5x64xf32>,
    %c70_765 = arith.constant 70 : index
    %c0_766 = arith.constant 0 : index
    %462 = vector.load %arg15[%c70_765, %c0_766] : memref<98x64xf32, #tpu.memory_space<vmem>>, vector<5x64xf32>
    %c35_767 = arith.constant 35 : index
    %c192_768 = arith.constant 192 : index
    %463 = vector.load %arg16[%c35_767, %c192_768] : memref<50x576xf32, #tpu.memory_space<vmem>>, vector<5x64xf32>
    tpu.vector_store %arg16[%c35_767, %c192_768], %462 {strides = array<i32>} : memref<50x576xf32, #tpu.memory_space<vmem>>, vector<5x64xf32>,
    %c71_769 = arith.constant 71 : index
    %c0_770 = arith.constant 0 : index
    %464 = vector.load %arg15[%c71_769, %c0_770] : memref<98x64xf32, #tpu.memory_space<vmem>>, vector<5x64xf32>
    %c35_771 = arith.constant 35 : index
    %c256_772 = arith.constant 256 : index
    %465 = vector.load %arg16[%c35_771, %c256_772] : memref<50x576xf32, #tpu.memory_space<vmem>>, vector<5x64xf32>
    tpu.vector_store %arg16[%c35_771, %c256_772], %464 {strides = array<i32>} : memref<50x576xf32, #tpu.memory_space<vmem>>, vector<5x64xf32>,
    %c72_773 = arith.constant 72 : index
    %c0_774 = arith.constant 0 : index
    %466 = vector.load %arg15[%c72_773, %c0_774] : memref<98x64xf32, #tpu.memory_space<vmem>>, vector<5x64xf32>
    %c35_775 = arith.constant 35 : index
    %c320_776 = arith.constant 320 : index
    %467 = vector.load %arg16[%c35_775, %c320_776] : memref<50x576xf32, #tpu.memory_space<vmem>>, vector<5x64xf32>
    tpu.vector_store %arg16[%c35_775, %c320_776], %466 {strides = array<i32>} : memref<50x576xf32, #tpu.memory_space<vmem>>, vector<5x64xf32>,
    %c77_777 = arith.constant 77 : index
    %c0_778 = arith.constant 0 : index
    %468 = vector.load %arg15[%c77_777, %c0_778] : memref<98x64xf32, #tpu.memory_space<vmem>>, vector<5x64xf32>
    %c35_779 = arith.constant 35 : index
    %c384_780 = arith.constant 384 : index
    %469 = vector.load %arg16[%c35_779, %c384_780] : memref<50x576xf32, #tpu.memory_space<vmem>>, vector<5x64xf32>
    tpu.vector_store %arg16[%c35_779, %c384_780], %468 {strides = array<i32>} : memref<50x576xf32, #tpu.memory_space<vmem>>, vector<5x64xf32>,
    %c78 = arith.constant 78 : index
    %c0_781 = arith.constant 0 : index
    %470 = vector.load %arg15[%c78, %c0_781] : memref<98x64xf32, #tpu.memory_space<vmem>>, vector<5x64xf32>
    %c35_782 = arith.constant 35 : index
    %c448_783 = arith.constant 448 : index
    %471 = vector.load %arg16[%c35_782, %c448_783] : memref<50x576xf32, #tpu.memory_space<vmem>>, vector<5x64xf32>
    tpu.vector_store %arg16[%c35_782, %c448_783], %470 {strides = array<i32>} : memref<50x576xf32, #tpu.memory_space<vmem>>, vector<5x64xf32>,
    %c79 = arith.constant 79 : index
    %c0_784 = arith.constant 0 : index
    %472 = vector.load %arg15[%c79, %c0_784] : memref<98x64xf32, #tpu.memory_space<vmem>>, vector<5x64xf32>
    %c35_785 = arith.constant 35 : index
    %c512_786 = arith.constant 512 : index
    %473 = vector.load %arg16[%c35_785, %c512_786] : memref<50x576xf32, #tpu.memory_space<vmem>>, vector<5x64xf32>
    tpu.vector_store %arg16[%c35_785, %c512_786], %472 {strides = array<i32>} : memref<50x576xf32, #tpu.memory_space<vmem>>, vector<5x64xf32>,
    %c70_787 = arith.constant 70 : index
    %c0_788 = arith.constant 0 : index
    %474 = vector.load %arg15[%c70_787, %c0_788] : memref<98x64xf32, #tpu.memory_space<vmem>>, vector<5x64xf32>
    %c40 = arith.constant 40 : index
    %c0_789 = arith.constant 0 : index
    %475 = vector.load %arg16[%c40, %c0_789] : memref<50x576xf32, #tpu.memory_space<vmem>>, vector<5x64xf32>
    tpu.vector_store %arg16[%c40, %c0_789], %474 {strides = array<i32>} : memref<50x576xf32, #tpu.memory_space<vmem>>, vector<5x64xf32>,
    %c71_790 = arith.constant 71 : index
    %c0_791 = arith.constant 0 : index
    %476 = vector.load %arg15[%c71_790, %c0_791] : memref<98x64xf32, #tpu.memory_space<vmem>>, vector<5x64xf32>
    %c40_792 = arith.constant 40 : index
    %c64_793 = arith.constant 64 : index
    %477 = vector.load %arg16[%c40_792, %c64_793] : memref<50x576xf32, #tpu.memory_space<vmem>>, vector<5x64xf32>
    tpu.vector_store %arg16[%c40_792, %c64_793], %476 {strides = array<i32>} : memref<50x576xf32, #tpu.memory_space<vmem>>, vector<5x64xf32>,
    %c72_794 = arith.constant 72 : index
    %c0_795 = arith.constant 0 : index
    %478 = vector.load %arg15[%c72_794, %c0_795] : memref<98x64xf32, #tpu.memory_space<vmem>>, vector<5x64xf32>
    %c40_796 = arith.constant 40 : index
    %c128_797 = arith.constant 128 : index
    %479 = vector.load %arg16[%c40_796, %c128_797] : memref<50x576xf32, #tpu.memory_space<vmem>>, vector<5x64xf32>
    tpu.vector_store %arg16[%c40_796, %c128_797], %478 {strides = array<i32>} : memref<50x576xf32, #tpu.memory_space<vmem>>, vector<5x64xf32>,
    %c77_798 = arith.constant 77 : index
    %c0_799 = arith.constant 0 : index
    %480 = vector.load %arg15[%c77_798, %c0_799] : memref<98x64xf32, #tpu.memory_space<vmem>>, vector<5x64xf32>
    %c40_800 = arith.constant 40 : index
    %c192_801 = arith.constant 192 : index
    %481 = vector.load %arg16[%c40_800, %c192_801] : memref<50x576xf32, #tpu.memory_space<vmem>>, vector<5x64xf32>
    tpu.vector_store %arg16[%c40_800, %c192_801], %480 {strides = array<i32>} : memref<50x576xf32, #tpu.memory_space<vmem>>, vector<5x64xf32>,
    %c78_802 = arith.constant 78 : index
    %c0_803 = arith.constant 0 : index
    %482 = vector.load %arg15[%c78_802, %c0_803] : memref<98x64xf32, #tpu.memory_space<vmem>>, vector<5x64xf32>
    %c40_804 = arith.constant 40 : index
    %c256_805 = arith.constant 256 : index
    %483 = vector.load %arg16[%c40_804, %c256_805] : memref<50x576xf32, #tpu.memory_space<vmem>>, vector<5x64xf32>
    tpu.vector_store %arg16[%c40_804, %c256_805], %482 {strides = array<i32>} : memref<50x576xf32, #tpu.memory_space<vmem>>, vector<5x64xf32>,
    %c79_806 = arith.constant 79 : index
    %c0_807 = arith.constant 0 : index
    %484 = vector.load %arg15[%c79_806, %c0_807] : memref<98x64xf32, #tpu.memory_space<vmem>>, vector<5x64xf32>
    %c40_808 = arith.constant 40 : index
    %c320_809 = arith.constant 320 : index
    %485 = vector.load %arg16[%c40_808, %c320_809] : memref<50x576xf32, #tpu.memory_space<vmem>>, vector<5x64xf32>
    tpu.vector_store %arg16[%c40_808, %c320_809], %484 {strides = array<i32>} : memref<50x576xf32, #tpu.memory_space<vmem>>, vector<5x64xf32>,
    %c84_810 = arith.constant 84 : index
    %c0_811 = arith.constant 0 : index
    %486 = vector.load %arg15[%c84_810, %c0_811] : memref<98x64xf32, #tpu.memory_space<vmem>>, vector<5x64xf32>
    %c40_812 = arith.constant 40 : index
    %c384_813 = arith.constant 384 : index
    %487 = vector.load %arg16[%c40_812, %c384_813] : memref<50x576xf32, #tpu.memory_space<vmem>>, vector<5x64xf32>
    tpu.vector_store %arg16[%c40_812, %c384_813], %486 {strides = array<i32>} : memref<50x576xf32, #tpu.memory_space<vmem>>, vector<5x64xf32>,
    %c85 = arith.constant 85 : index
    %c0_814 = arith.constant 0 : index
    %488 = vector.load %arg15[%c85, %c0_814] : memref<98x64xf32, #tpu.memory_space<vmem>>, vector<5x64xf32>
    %c40_815 = arith.constant 40 : index
    %c448_816 = arith.constant 448 : index
    %489 = vector.load %arg16[%c40_815, %c448_816] : memref<50x576xf32, #tpu.memory_space<vmem>>, vector<5x64xf32>
    tpu.vector_store %arg16[%c40_815, %c448_816], %488 {strides = array<i32>} : memref<50x576xf32, #tpu.memory_space<vmem>>, vector<5x64xf32>,
    %c86 = arith.constant 86 : index
    %c0_817 = arith.constant 0 : index
    %490 = vector.load %arg15[%c86, %c0_817] : memref<98x64xf32, #tpu.memory_space<vmem>>, vector<5x64xf32>
    %c40_818 = arith.constant 40 : index
    %c512_819 = arith.constant 512 : index
    %491 = vector.load %arg16[%c40_818, %c512_819] : memref<50x576xf32, #tpu.memory_space<vmem>>, vector<5x64xf32>
    tpu.vector_store %arg16[%c40_818, %c512_819], %490 {strides = array<i32>} : memref<50x576xf32, #tpu.memory_space<vmem>>, vector<5x64xf32>,
    %c77_820 = arith.constant 77 : index
    %c0_821 = arith.constant 0 : index
    %492 = vector.load %arg15[%c77_820, %c0_821] : memref<98x64xf32, #tpu.memory_space<vmem>>, vector<5x64xf32>
    %c45 = arith.constant 45 : index
    %c0_822 = arith.constant 0 : index
    %493 = vector.load %arg16[%c45, %c0_822] : memref<50x576xf32, #tpu.memory_space<vmem>>, vector<5x64xf32>
    tpu.vector_store %arg16[%c45, %c0_822], %492 {strides = array<i32>} : memref<50x576xf32, #tpu.memory_space<vmem>>, vector<5x64xf32>,
    %c78_823 = arith.constant 78 : index
    %c0_824 = arith.constant 0 : index
    %494 = vector.load %arg15[%c78_823, %c0_824] : memref<98x64xf32, #tpu.memory_space<vmem>>, vector<5x64xf32>
    %c45_825 = arith.constant 45 : index
    %c64_826 = arith.constant 64 : index
    %495 = vector.load %arg16[%c45_825, %c64_826] : memref<50x576xf32, #tpu.memory_space<vmem>>, vector<5x64xf32>
    tpu.vector_store %arg16[%c45_825, %c64_826], %494 {strides = array<i32>} : memref<50x576xf32, #tpu.memory_space<vmem>>, vector<5x64xf32>,
    %c79_827 = arith.constant 79 : index
    %c0_828 = arith.constant 0 : index
    %496 = vector.load %arg15[%c79_827, %c0_828] : memref<98x64xf32, #tpu.memory_space<vmem>>, vector<5x64xf32>
    %c45_829 = arith.constant 45 : index
    %c128_830 = arith.constant 128 : index
    %497 = vector.load %arg16[%c45_829, %c128_830] : memref<50x576xf32, #tpu.memory_space<vmem>>, vector<5x64xf32>
    tpu.vector_store %arg16[%c45_829, %c128_830], %496 {strides = array<i32>} : memref<50x576xf32, #tpu.memory_space<vmem>>, vector<5x64xf32>,
    %c84_831 = arith.constant 84 : index
    %c0_832 = arith.constant 0 : index
    %498 = vector.load %arg15[%c84_831, %c0_832] : memref<98x64xf32, #tpu.memory_space<vmem>>, vector<5x64xf32>
    %c45_833 = arith.constant 45 : index
    %c192_834 = arith.constant 192 : index
    %499 = vector.load %arg16[%c45_833, %c192_834] : memref<50x576xf32, #tpu.memory_space<vmem>>, vector<5x64xf32>
    tpu.vector_store %arg16[%c45_833, %c192_834], %498 {strides = array<i32>} : memref<50x576xf32, #tpu.memory_space<vmem>>, vector<5x64xf32>,
    %c85_835 = arith.constant 85 : index
    %c0_836 = arith.constant 0 : index
    %500 = vector.load %arg15[%c85_835, %c0_836] : memref<98x64xf32, #tpu.memory_space<vmem>>, vector<5x64xf32>
    %c45_837 = arith.constant 45 : index
    %c256_838 = arith.constant 256 : index
    %501 = vector.load %arg16[%c45_837, %c256_838] : memref<50x576xf32, #tpu.memory_space<vmem>>, vector<5x64xf32>
    tpu.vector_store %arg16[%c45_837, %c256_838], %500 {strides = array<i32>} : memref<50x576xf32, #tpu.memory_space<vmem>>, vector<5x64xf32>,
    %c86_839 = arith.constant 86 : index
    %c0_840 = arith.constant 0 : index
    %502 = vector.load %arg15[%c86_839, %c0_840] : memref<98x64xf32, #tpu.memory_space<vmem>>, vector<5x64xf32>
    %c45_841 = arith.constant 45 : index
    %c320_842 = arith.constant 320 : index
    %503 = vector.load %arg16[%c45_841, %c320_842] : memref<50x576xf32, #tpu.memory_space<vmem>>, vector<5x64xf32>
    tpu.vector_store %arg16[%c45_841, %c320_842], %502 {strides = array<i32>} : memref<50x576xf32, #tpu.memory_space<vmem>>, vector<5x64xf32>,
    %c91_843 = arith.constant 91 : index
    %c0_844 = arith.constant 0 : index
    %504 = vector.load %arg15[%c91_843, %c0_844] : memref<98x64xf32, #tpu.memory_space<vmem>>, vector<5x64xf32>
    %c45_845 = arith.constant 45 : index
    %c384_846 = arith.constant 384 : index
    %505 = vector.load %arg16[%c45_845, %c384_846] : memref<50x576xf32, #tpu.memory_space<vmem>>, vector<5x64xf32>
    tpu.vector_store %arg16[%c45_845, %c384_846], %504 {strides = array<i32>} : memref<50x576xf32, #tpu.memory_space<vmem>>, vector<5x64xf32>,
    %c92 = arith.constant 92 : index
    %c0_847 = arith.constant 0 : index
    %506 = vector.load %arg15[%c92, %c0_847] : memref<98x64xf32, #tpu.memory_space<vmem>>, vector<5x64xf32>
    %c45_848 = arith.constant 45 : index
    %c448_849 = arith.constant 448 : index
    %507 = vector.load %arg16[%c45_848, %c448_849] : memref<50x576xf32, #tpu.memory_space<vmem>>, vector<5x64xf32>
    tpu.vector_store %arg16[%c45_848, %c448_849], %506 {strides = array<i32>} : memref<50x576xf32, #tpu.memory_space<vmem>>, vector<5x64xf32>,
    %c93 = arith.constant 93 : index
    %c0_850 = arith.constant 0 : index
    %508 = vector.load %arg15[%c93, %c0_850] : memref<98x64xf32, #tpu.memory_space<vmem>>, vector<5x64xf32>
    %c45_851 = arith.constant 45 : index
    %c512_852 = arith.constant 512 : index
    %509 = vector.load %arg16[%c45_851, %c512_852] : memref<50x576xf32, #tpu.memory_space<vmem>>, vector<5x64xf32>
    tpu.vector_store %arg16[%c45_851, %c512_852], %508 {strides = array<i32>} : memref<50x576xf32, #tpu.memory_space<vmem>>, vector<5x64xf32>,
    %c0_853 = arith.constant 0 : index
    %c0_854 = arith.constant 0 : index
    %510 = vector.load %arg16[%c0_853, %c0_854] : memref<50x576xf32, #tpu.memory_space<vmem>>, vector<50x576xf32>
    %511 = arith.truncf %510 : vector<50x576xf32> to vector<50x576xbf16>
    %c0_855 = arith.constant 0 : index
    %c0_856 = arith.constant 0 : index
    %512 = vector.load %arg6[%c0_855, %c0_856] : memref<576x128xbf16, #tpu.memory_space<vmem>>, vector<576x128xbf16>
    %cst_857 = arith.constant dense<0.000000e+00> : vector<50x128xf32>
    %513 = tpu.matmul %511, %512, %cst_857 {dimension_numbers = #tpu.dot_dimension_numbers<[1], [0], [0], [1], [0, 0, 1, 1], [], []>} : vector<50x576xbf16>, vector<576x128xbf16>, vector<50x128xf32> -> vector<50x128xf32>
    %c0_858 = arith.constant 0 : index
    %c0_859 = arith.constant 0 : index
    %514 = vector.load %arg7[%c0_858, %c0_859] : memref<1x128xf32, #tpu.memory_space<vmem>>, vector<1x128xf32>
    %515 = vector.broadcast %514 : vector<1x128xf32> to vector<50x128xf32>
    %516 = arith.addf %513, %515 : vector<50x128xf32>
    %cst_860 = arith.constant 0.000000e+00 : f32
    %517 = vector.broadcast %cst_860 : f32 to vector<50x128xf32>
    %518 = arith.maximumf %516, %517 : vector<50x128xf32>
    %c0_861 = arith.constant 0 : index
    %c0_862 = arith.constant 0 : index
    %c0_863 = arith.constant 0 : index
    %519 = vector.load %arg11[%c0_861, %c0_862, %c0_863] : memref<1x50x128xf32, #tpu.memory_space<vmem>>, vector<1x50x128xf32>
    %520 = vector.shape_cast %519 : vector<1x50x128xf32> to vector<50x128xf32>
    %521 = vector.shape_cast %518 : vector<50x128xf32> to vector<1x50x128xf32>
    tpu.vector_store %arg11[%c0_861, %c0_862, %c0_863], %521 {strides = array<i32>} : memref<1x50x128xf32, #tpu.memory_space<vmem>>, vector<1x50x128xf32>,
    %cst_864 = arith.constant 0.000000e+00 : f32
    %522 = vector.broadcast %cst_864 : f32 to vector<2x256xf32>
    %c0_865 = arith.constant 0 : index
    %c0_866 = arith.constant 0 : index
    %c0_867 = arith.constant 0 : index
    %523 = tpu.strided_load %arg11[%c0_865, %c0_866, %c0_867] {strides = array<i32: 1, 25, 1>} : memref<1x50x128xf32, #tpu.memory_space<vmem>>, vector<1x2x128xf32>
    %524 = vector.shape_cast %523 : vector<1x2x128xf32> to vector<2x128xf32>
    %525 = arith.truncf %524 : vector<2x128xf32> to vector<2x128xbf16>
    %c0_868 = arith.constant 0 : index
    %c0_869 = arith.constant 0 : index
    %526 = vector.load %arg8[%c0_868, %c0_869] : memref<3200x256xbf16, #tpu.memory_space<vmem>>, vector<128x256xbf16>
    %cst_870 = arith.constant dense<0.000000e+00> : vector<2x256xf32>
    %527 = tpu.matmul %525, %526, %cst_870 {dimension_numbers = #tpu.dot_dimension_numbers<[1], [0], [0], [1], [0, 0, 1, 1], [], []>} : vector<2x128xbf16>, vector<128x256xbf16>, vector<2x256xf32> -> vector<2x256xf32>
    %528 = arith.addf %522, %527 : vector<2x256xf32>
    %c0_871 = arith.constant 0 : index
    %c1_872 = arith.constant 1 : index
    %c0_873 = arith.constant 0 : index
    %529 = tpu.strided_load %arg11[%c0_871, %c1_872, %c0_873] {strides = array<i32: 1, 25, 1>} : memref<1x50x128xf32, #tpu.memory_space<vmem>>, vector<1x2x128xf32>
    %530 = vector.shape_cast %529 : vector<1x2x128xf32> to vector<2x128xf32>
    %531 = arith.truncf %530 : vector<2x128xf32> to vector<2x128xbf16>
    %c128_874 = arith.constant 128 : index
    %c0_875 = arith.constant 0 : index
    %532 = vector.load %arg8[%c128_874, %c0_875] : memref<3200x256xbf16, #tpu.memory_space<vmem>>, vector<128x256xbf16>
    %cst_876 = arith.constant dense<0.000000e+00> : vector<2x256xf32>
    %533 = tpu.matmul %531, %532, %cst_876 {dimension_numbers = #tpu.dot_dimension_numbers<[1], [0], [0], [1], [0, 0, 1, 1], [], []>} : vector<2x128xbf16>, vector<128x256xbf16>, vector<2x256xf32> -> vector<2x256xf32>
    %534 = arith.addf %528, %533 : vector<2x256xf32>
    %c0_877 = arith.constant 0 : index
    %c2_878 = arith.constant 2 : index
    %c0_879 = arith.constant 0 : index
    %535 = tpu.strided_load %arg11[%c0_877, %c2_878, %c0_879] {strides = array<i32: 1, 25, 1>} : memref<1x50x128xf32, #tpu.memory_space<vmem>>, vector<1x2x128xf32>
    %536 = vector.shape_cast %535 : vector<1x2x128xf32> to vector<2x128xf32>
    %537 = arith.truncf %536 : vector<2x128xf32> to vector<2x128xbf16>
    %c256_880 = arith.constant 256 : index
    %c0_881 = arith.constant 0 : index
    %538 = vector.load %arg8[%c256_880, %c0_881] : memref<3200x256xbf16, #tpu.memory_space<vmem>>, vector<128x256xbf16>
    %cst_882 = arith.constant dense<0.000000e+00> : vector<2x256xf32>
    %539 = tpu.matmul %537, %538, %cst_882 {dimension_numbers = #tpu.dot_dimension_numbers<[1], [0], [0], [1], [0, 0, 1, 1], [], []>} : vector<2x128xbf16>, vector<128x256xbf16>, vector<2x256xf32> -> vector<2x256xf32>
    %540 = arith.addf %534, %539 : vector<2x256xf32>
    %c0_883 = arith.constant 0 : index
    %c3 = arith.constant 3 : index
    %c0_884 = arith.constant 0 : index
    %541 = tpu.strided_load %arg11[%c0_883, %c3, %c0_884] {strides = array<i32: 1, 25, 1>} : memref<1x50x128xf32, #tpu.memory_space<vmem>>, vector<1x2x128xf32>
    %542 = vector.shape_cast %541 : vector<1x2x128xf32> to vector<2x128xf32>
    %543 = arith.truncf %542 : vector<2x128xf32> to vector<2x128xbf16>
    %c384_885 = arith.constant 384 : index
    %c0_886 = arith.constant 0 : index
    %544 = vector.load %arg8[%c384_885, %c0_886] : memref<3200x256xbf16, #tpu.memory_space<vmem>>, vector<128x256xbf16>
    %cst_887 = arith.constant dense<0.000000e+00> : vector<2x256xf32>
    %545 = tpu.matmul %543, %544, %cst_887 {dimension_numbers = #tpu.dot_dimension_numbers<[1], [0], [0], [1], [0, 0, 1, 1], [], []>} : vector<2x128xbf16>, vector<128x256xbf16>, vector<2x256xf32> -> vector<2x256xf32>
    %546 = arith.addf %540, %545 : vector<2x256xf32>
    %c0_888 = arith.constant 0 : index
    %c4 = arith.constant 4 : index
    %c0_889 = arith.constant 0 : index
    %547 = tpu.strided_load %arg11[%c0_888, %c4, %c0_889] {strides = array<i32: 1, 25, 1>} : memref<1x50x128xf32, #tpu.memory_space<vmem>>, vector<1x2x128xf32>
    %548 = vector.shape_cast %547 : vector<1x2x128xf32> to vector<2x128xf32>
    %549 = arith.truncf %548 : vector<2x128xf32> to vector<2x128xbf16>
    %c512_890 = arith.constant 512 : index
    %c0_891 = arith.constant 0 : index
    %550 = vector.load %arg8[%c512_890, %c0_891] : memref<3200x256xbf16, #tpu.memory_space<vmem>>, vector<128x256xbf16>
    %cst_892 = arith.constant dense<0.000000e+00> : vector<2x256xf32>
    %551 = tpu.matmul %549, %550, %cst_892 {dimension_numbers = #tpu.dot_dimension_numbers<[1], [0], [0], [1], [0, 0, 1, 1], [], []>} : vector<2x128xbf16>, vector<128x256xbf16>, vector<2x256xf32> -> vector<2x256xf32>
    %552 = arith.addf %546, %551 : vector<2x256xf32>
    %c0_893 = arith.constant 0 : index
    %c5_894 = arith.constant 5 : index
    %c0_895 = arith.constant 0 : index
    %553 = tpu.strided_load %arg11[%c0_893, %c5_894, %c0_895] {strides = array<i32: 1, 25, 1>} : memref<1x50x128xf32, #tpu.memory_space<vmem>>, vector<1x2x128xf32>
    %554 = vector.shape_cast %553 : vector<1x2x128xf32> to vector<2x128xf32>
    %555 = arith.truncf %554 : vector<2x128xf32> to vector<2x128xbf16>
    %c640 = arith.constant 640 : index
    %c0_896 = arith.constant 0 : index
    %556 = vector.load %arg8[%c640, %c0_896] : memref<3200x256xbf16, #tpu.memory_space<vmem>>, vector<128x256xbf16>
    %cst_897 = arith.constant dense<0.000000e+00> : vector<2x256xf32>
    %557 = tpu.matmul %555, %556, %cst_897 {dimension_numbers = #tpu.dot_dimension_numbers<[1], [0], [0], [1], [0, 0, 1, 1], [], []>} : vector<2x128xbf16>, vector<128x256xbf16>, vector<2x256xf32> -> vector<2x256xf32>
    %558 = arith.addf %552, %557 : vector<2x256xf32>
    %c0_898 = arith.constant 0 : index
    %c6 = arith.constant 6 : index
    %c0_899 = arith.constant 0 : index
    %559 = tpu.strided_load %arg11[%c0_898, %c6, %c0_899] {strides = array<i32: 1, 25, 1>} : memref<1x50x128xf32, #tpu.memory_space<vmem>>, vector<1x2x128xf32>
    %560 = vector.shape_cast %559 : vector<1x2x128xf32> to vector<2x128xf32>
    %561 = arith.truncf %560 : vector<2x128xf32> to vector<2x128xbf16>
    %c768 = arith.constant 768 : index
    %c0_900 = arith.constant 0 : index
    %562 = vector.load %arg8[%c768, %c0_900] : memref<3200x256xbf16, #tpu.memory_space<vmem>>, vector<128x256xbf16>
    %cst_901 = arith.constant dense<0.000000e+00> : vector<2x256xf32>
    %563 = tpu.matmul %561, %562, %cst_901 {dimension_numbers = #tpu.dot_dimension_numbers<[1], [0], [0], [1], [0, 0, 1, 1], [], []>} : vector<2x128xbf16>, vector<128x256xbf16>, vector<2x256xf32> -> vector<2x256xf32>
    %564 = arith.addf %558, %563 : vector<2x256xf32>
    %c0_902 = arith.constant 0 : index
    %c7_903 = arith.constant 7 : index
    %c0_904 = arith.constant 0 : index
    %565 = tpu.strided_load %arg11[%c0_902, %c7_903, %c0_904] {strides = array<i32: 1, 25, 1>} : memref<1x50x128xf32, #tpu.memory_space<vmem>>, vector<1x2x128xf32>
    %566 = vector.shape_cast %565 : vector<1x2x128xf32> to vector<2x128xf32>
    %567 = arith.truncf %566 : vector<2x128xf32> to vector<2x128xbf16>
    %c896 = arith.constant 896 : index
    %c0_905 = arith.constant 0 : index
    %568 = vector.load %arg8[%c896, %c0_905] : memref<3200x256xbf16, #tpu.memory_space<vmem>>, vector<128x256xbf16>
    %cst_906 = arith.constant dense<0.000000e+00> : vector<2x256xf32>
    %569 = tpu.matmul %567, %568, %cst_906 {dimension_numbers = #tpu.dot_dimension_numbers<[1], [0], [0], [1], [0, 0, 1, 1], [], []>} : vector<2x128xbf16>, vector<128x256xbf16>, vector<2x256xf32> -> vector<2x256xf32>
    %570 = arith.addf %564, %569 : vector<2x256xf32>
    %c0_907 = arith.constant 0 : index
    %c8_908 = arith.constant 8 : index
    %c0_909 = arith.constant 0 : index
    %571 = tpu.strided_load %arg11[%c0_907, %c8_908, %c0_909] {strides = array<i32: 1, 25, 1>} : memref<1x50x128xf32, #tpu.memory_space<vmem>>, vector<1x2x128xf32>
    %572 = vector.shape_cast %571 : vector<1x2x128xf32> to vector<2x128xf32>
    %573 = arith.truncf %572 : vector<2x128xf32> to vector<2x128xbf16>
    %c1024 = arith.constant 1024 : index
    %c0_910 = arith.constant 0 : index
    %574 = vector.load %arg8[%c1024, %c0_910] : memref<3200x256xbf16, #tpu.memory_space<vmem>>, vector<128x256xbf16>
    %cst_911 = arith.constant dense<0.000000e+00> : vector<2x256xf32>
    %575 = tpu.matmul %573, %574, %cst_911 {dimension_numbers = #tpu.dot_dimension_numbers<[1], [0], [0], [1], [0, 0, 1, 1], [], []>} : vector<2x128xbf16>, vector<128x256xbf16>, vector<2x256xf32> -> vector<2x256xf32>
    %576 = arith.addf %570, %575 : vector<2x256xf32>
    %c0_912 = arith.constant 0 : index
    %c9_913 = arith.constant 9 : index
    %c0_914 = arith.constant 0 : index
    %577 = tpu.strided_load %arg11[%c0_912, %c9_913, %c0_914] {strides = array<i32: 1, 25, 1>} : memref<1x50x128xf32, #tpu.memory_space<vmem>>, vector<1x2x128xf32>
    %578 = vector.shape_cast %577 : vector<1x2x128xf32> to vector<2x128xf32>
    %579 = arith.truncf %578 : vector<2x128xf32> to vector<2x128xbf16>
    %c1152 = arith.constant 1152 : index
    %c0_915 = arith.constant 0 : index
    %580 = vector.load %arg8[%c1152, %c0_915] : memref<3200x256xbf16, #tpu.memory_space<vmem>>, vector<128x256xbf16>
    %cst_916 = arith.constant dense<0.000000e+00> : vector<2x256xf32>
    %581 = tpu.matmul %579, %580, %cst_916 {dimension_numbers = #tpu.dot_dimension_numbers<[1], [0], [0], [1], [0, 0, 1, 1], [], []>} : vector<2x128xbf16>, vector<128x256xbf16>, vector<2x256xf32> -> vector<2x256xf32>
    %582 = arith.addf %576, %581 : vector<2x256xf32>
    %c0_917 = arith.constant 0 : index
    %c10_918 = arith.constant 10 : index
    %c0_919 = arith.constant 0 : index
    %583 = tpu.strided_load %arg11[%c0_917, %c10_918, %c0_919] {strides = array<i32: 1, 25, 1>} : memref<1x50x128xf32, #tpu.memory_space<vmem>>, vector<1x2x128xf32>
    %584 = vector.shape_cast %583 : vector<1x2x128xf32> to vector<2x128xf32>
    %585 = arith.truncf %584 : vector<2x128xf32> to vector<2x128xbf16>
    %c1280 = arith.constant 1280 : index
    %c0_920 = arith.constant 0 : index
    %586 = vector.load %arg8[%c1280, %c0_920] : memref<3200x256xbf16, #tpu.memory_space<vmem>>, vector<128x256xbf16>
    %cst_921 = arith.constant dense<0.000000e+00> : vector<2x256xf32>
    %587 = tpu.matmul %585, %586, %cst_921 {dimension_numbers = #tpu.dot_dimension_numbers<[1], [0], [0], [1], [0, 0, 1, 1], [], []>} : vector<2x128xbf16>, vector<128x256xbf16>, vector<2x256xf32> -> vector<2x256xf32>
    %588 = arith.addf %582, %587 : vector<2x256xf32>
    %c0_922 = arith.constant 0 : index
    %c11 = arith.constant 11 : index
    %c0_923 = arith.constant 0 : index
    %589 = tpu.strided_load %arg11[%c0_922, %c11, %c0_923] {strides = array<i32: 1, 25, 1>} : memref<1x50x128xf32, #tpu.memory_space<vmem>>, vector<1x2x128xf32>
    %590 = vector.shape_cast %589 : vector<1x2x128xf32> to vector<2x128xf32>
    %591 = arith.truncf %590 : vector<2x128xf32> to vector<2x128xbf16>
    %c1408 = arith.constant 1408 : index
    %c0_924 = arith.constant 0 : index
    %592 = vector.load %arg8[%c1408, %c0_924] : memref<3200x256xbf16, #tpu.memory_space<vmem>>, vector<128x256xbf16>
    %cst_925 = arith.constant dense<0.000000e+00> : vector<2x256xf32>
    %593 = tpu.matmul %591, %592, %cst_925 {dimension_numbers = #tpu.dot_dimension_numbers<[1], [0], [0], [1], [0, 0, 1, 1], [], []>} : vector<2x128xbf16>, vector<128x256xbf16>, vector<2x256xf32> -> vector<2x256xf32>
    %594 = arith.addf %588, %593 : vector<2x256xf32>
    %c0_926 = arith.constant 0 : index
    %c12 = arith.constant 12 : index
    %c0_927 = arith.constant 0 : index
    %595 = tpu.strided_load %arg11[%c0_926, %c12, %c0_927] {strides = array<i32: 1, 25, 1>} : memref<1x50x128xf32, #tpu.memory_space<vmem>>, vector<1x2x128xf32>
    %596 = vector.shape_cast %595 : vector<1x2x128xf32> to vector<2x128xf32>
    %597 = arith.truncf %596 : vector<2x128xf32> to vector<2x128xbf16>
    %c1536 = arith.constant 1536 : index
    %c0_928 = arith.constant 0 : index
    %598 = vector.load %arg8[%c1536, %c0_928] : memref<3200x256xbf16, #tpu.memory_space<vmem>>, vector<128x256xbf16>
    %cst_929 = arith.constant dense<0.000000e+00> : vector<2x256xf32>
    %599 = tpu.matmul %597, %598, %cst_929 {dimension_numbers = #tpu.dot_dimension_numbers<[1], [0], [0], [1], [0, 0, 1, 1], [], []>} : vector<2x128xbf16>, vector<128x256xbf16>, vector<2x256xf32> -> vector<2x256xf32>
    %600 = arith.addf %594, %599 : vector<2x256xf32>
    %c0_930 = arith.constant 0 : index
    %c13 = arith.constant 13 : index
    %c0_931 = arith.constant 0 : index
    %601 = tpu.strided_load %arg11[%c0_930, %c13, %c0_931] {strides = array<i32: 1, 25, 1>} : memref<1x50x128xf32, #tpu.memory_space<vmem>>, vector<1x2x128xf32>
    %602 = vector.shape_cast %601 : vector<1x2x128xf32> to vector<2x128xf32>
    %603 = arith.truncf %602 : vector<2x128xf32> to vector<2x128xbf16>
    %c1664 = arith.constant 1664 : index
    %c0_932 = arith.constant 0 : index
    %604 = vector.load %arg8[%c1664, %c0_932] : memref<3200x256xbf16, #tpu.memory_space<vmem>>, vector<128x256xbf16>
    %cst_933 = arith.constant dense<0.000000e+00> : vector<2x256xf32>
    %605 = tpu.matmul %603, %604, %cst_933 {dimension_numbers = #tpu.dot_dimension_numbers<[1], [0], [0], [1], [0, 0, 1, 1], [], []>} : vector<2x128xbf16>, vector<128x256xbf16>, vector<2x256xf32> -> vector<2x256xf32>
    %606 = arith.addf %600, %605 : vector<2x256xf32>
    %c0_934 = arith.constant 0 : index
    %c14_935 = arith.constant 14 : index
    %c0_936 = arith.constant 0 : index
    %607 = tpu.strided_load %arg11[%c0_934, %c14_935, %c0_936] {strides = array<i32: 1, 25, 1>} : memref<1x50x128xf32, #tpu.memory_space<vmem>>, vector<1x2x128xf32>
    %608 = vector.shape_cast %607 : vector<1x2x128xf32> to vector<2x128xf32>
    %609 = arith.truncf %608 : vector<2x128xf32> to vector<2x128xbf16>
    %c1792 = arith.constant 1792 : index
    %c0_937 = arith.constant 0 : index
    %610 = vector.load %arg8[%c1792, %c0_937] : memref<3200x256xbf16, #tpu.memory_space<vmem>>, vector<128x256xbf16>
    %cst_938 = arith.constant dense<0.000000e+00> : vector<2x256xf32>
    %611 = tpu.matmul %609, %610, %cst_938 {dimension_numbers = #tpu.dot_dimension_numbers<[1], [0], [0], [1], [0, 0, 1, 1], [], []>} : vector<2x128xbf16>, vector<128x256xbf16>, vector<2x256xf32> -> vector<2x256xf32>
    %612 = arith.addf %606, %611 : vector<2x256xf32>
    %c0_939 = arith.constant 0 : index
    %c15_940 = arith.constant 15 : index
    %c0_941 = arith.constant 0 : index
    %613 = tpu.strided_load %arg11[%c0_939, %c15_940, %c0_941] {strides = array<i32: 1, 25, 1>} : memref<1x50x128xf32, #tpu.memory_space<vmem>>, vector<1x2x128xf32>
    %614 = vector.shape_cast %613 : vector<1x2x128xf32> to vector<2x128xf32>
    %615 = arith.truncf %614 : vector<2x128xf32> to vector<2x128xbf16>
    %c1920 = arith.constant 1920 : index
    %c0_942 = arith.constant 0 : index
    %616 = vector.load %arg8[%c1920, %c0_942] : memref<3200x256xbf16, #tpu.memory_space<vmem>>, vector<128x256xbf16>
    %cst_943 = arith.constant dense<0.000000e+00> : vector<2x256xf32>
    %617 = tpu.matmul %615, %616, %cst_943 {dimension_numbers = #tpu.dot_dimension_numbers<[1], [0], [0], [1], [0, 0, 1, 1], [], []>} : vector<2x128xbf16>, vector<128x256xbf16>, vector<2x256xf32> -> vector<2x256xf32>
    %618 = arith.addf %612, %617 : vector<2x256xf32>
    %c0_944 = arith.constant 0 : index
    %c16_945 = arith.constant 16 : index
    %c0_946 = arith.constant 0 : index
    %619 = tpu.strided_load %arg11[%c0_944, %c16_945, %c0_946] {strides = array<i32: 1, 25, 1>} : memref<1x50x128xf32, #tpu.memory_space<vmem>>, vector<1x2x128xf32>
    %620 = vector.shape_cast %619 : vector<1x2x128xf32> to vector<2x128xf32>
    %621 = arith.truncf %620 : vector<2x128xf32> to vector<2x128xbf16>
    %c2048 = arith.constant 2048 : index
    %c0_947 = arith.constant 0 : index
    %622 = vector.load %arg8[%c2048, %c0_947] : memref<3200x256xbf16, #tpu.memory_space<vmem>>, vector<128x256xbf16>
    %cst_948 = arith.constant dense<0.000000e+00> : vector<2x256xf32>
    %623 = tpu.matmul %621, %622, %cst_948 {dimension_numbers = #tpu.dot_dimension_numbers<[1], [0], [0], [1], [0, 0, 1, 1], [], []>} : vector<2x128xbf16>, vector<128x256xbf16>, vector<2x256xf32> -> vector<2x256xf32>
    %624 = arith.addf %618, %623 : vector<2x256xf32>
    %c0_949 = arith.constant 0 : index
    %c17_950 = arith.constant 17 : index
    %c0_951 = arith.constant 0 : index
    %625 = tpu.strided_load %arg11[%c0_949, %c17_950, %c0_951] {strides = array<i32: 1, 25, 1>} : memref<1x50x128xf32, #tpu.memory_space<vmem>>, vector<1x2x128xf32>
    %626 = vector.shape_cast %625 : vector<1x2x128xf32> to vector<2x128xf32>
    %627 = arith.truncf %626 : vector<2x128xf32> to vector<2x128xbf16>
    %c2176 = arith.constant 2176 : index
    %c0_952 = arith.constant 0 : index
    %628 = vector.load %arg8[%c2176, %c0_952] : memref<3200x256xbf16, #tpu.memory_space<vmem>>, vector<128x256xbf16>
    %cst_953 = arith.constant dense<0.000000e+00> : vector<2x256xf32>
    %629 = tpu.matmul %627, %628, %cst_953 {dimension_numbers = #tpu.dot_dimension_numbers<[1], [0], [0], [1], [0, 0, 1, 1], [], []>} : vector<2x128xbf16>, vector<128x256xbf16>, vector<2x256xf32> -> vector<2x256xf32>
    %630 = arith.addf %624, %629 : vector<2x256xf32>
    %c0_954 = arith.constant 0 : index
    %c18_955 = arith.constant 18 : index
    %c0_956 = arith.constant 0 : index
    %631 = tpu.strided_load %arg11[%c0_954, %c18_955, %c0_956] {strides = array<i32: 1, 25, 1>} : memref<1x50x128xf32, #tpu.memory_space<vmem>>, vector<1x2x128xf32>
    %632 = vector.shape_cast %631 : vector<1x2x128xf32> to vector<2x128xf32>
    %633 = arith.truncf %632 : vector<2x128xf32> to vector<2x128xbf16>
    %c2304 = arith.constant 2304 : index
    %c0_957 = arith.constant 0 : index
    %634 = vector.load %arg8[%c2304, %c0_957] : memref<3200x256xbf16, #tpu.memory_space<vmem>>, vector<128x256xbf16>
    %cst_958 = arith.constant dense<0.000000e+00> : vector<2x256xf32>
    %635 = tpu.matmul %633, %634, %cst_958 {dimension_numbers = #tpu.dot_dimension_numbers<[1], [0], [0], [1], [0, 0, 1, 1], [], []>} : vector<2x128xbf16>, vector<128x256xbf16>, vector<2x256xf32> -> vector<2x256xf32>
    %636 = arith.addf %630, %635 : vector<2x256xf32>
    %c0_959 = arith.constant 0 : index
    %c19 = arith.constant 19 : index
    %c0_960 = arith.constant 0 : index
    %637 = tpu.strided_load %arg11[%c0_959, %c19, %c0_960] {strides = array<i32: 1, 25, 1>} : memref<1x50x128xf32, #tpu.memory_space<vmem>>, vector<1x2x128xf32>
    %638 = vector.shape_cast %637 : vector<1x2x128xf32> to vector<2x128xf32>
    %639 = arith.truncf %638 : vector<2x128xf32> to vector<2x128xbf16>
    %c2432 = arith.constant 2432 : index
    %c0_961 = arith.constant 0 : index
    %640 = vector.load %arg8[%c2432, %c0_961] : memref<3200x256xbf16, #tpu.memory_space<vmem>>, vector<128x256xbf16>
    %cst_962 = arith.constant dense<0.000000e+00> : vector<2x256xf32>
    %641 = tpu.matmul %639, %640, %cst_962 {dimension_numbers = #tpu.dot_dimension_numbers<[1], [0], [0], [1], [0, 0, 1, 1], [], []>} : vector<2x128xbf16>, vector<128x256xbf16>, vector<2x256xf32> -> vector<2x256xf32>
    %642 = arith.addf %636, %641 : vector<2x256xf32>
    %c0_963 = arith.constant 0 : index
    %c20_964 = arith.constant 20 : index
    %c0_965 = arith.constant 0 : index
    %643 = tpu.strided_load %arg11[%c0_963, %c20_964, %c0_965] {strides = array<i32: 1, 25, 1>} : memref<1x50x128xf32, #tpu.memory_space<vmem>>, vector<1x2x128xf32>
    %644 = vector.shape_cast %643 : vector<1x2x128xf32> to vector<2x128xf32>
    %645 = arith.truncf %644 : vector<2x128xf32> to vector<2x128xbf16>
    %c2560 = arith.constant 2560 : index
    %c0_966 = arith.constant 0 : index
    %646 = vector.load %arg8[%c2560, %c0_966] : memref<3200x256xbf16, #tpu.memory_space<vmem>>, vector<128x256xbf16>
    %cst_967 = arith.constant dense<0.000000e+00> : vector<2x256xf32>
    %647 = tpu.matmul %645, %646, %cst_967 {dimension_numbers = #tpu.dot_dimension_numbers<[1], [0], [0], [1], [0, 0, 1, 1], [], []>} : vector<2x128xbf16>, vector<128x256xbf16>, vector<2x256xf32> -> vector<2x256xf32>
    %648 = arith.addf %642, %647 : vector<2x256xf32>
    %c0_968 = arith.constant 0 : index
    %c21_969 = arith.constant 21 : index
    %c0_970 = arith.constant 0 : index
    %649 = tpu.strided_load %arg11[%c0_968, %c21_969, %c0_970] {strides = array<i32: 1, 25, 1>} : memref<1x50x128xf32, #tpu.memory_space<vmem>>, vector<1x2x128xf32>
    %650 = vector.shape_cast %649 : vector<1x2x128xf32> to vector<2x128xf32>
    %651 = arith.truncf %650 : vector<2x128xf32> to vector<2x128xbf16>
    %c2688 = arith.constant 2688 : index
    %c0_971 = arith.constant 0 : index
    %652 = vector.load %arg8[%c2688, %c0_971] : memref<3200x256xbf16, #tpu.memory_space<vmem>>, vector<128x256xbf16>
    %cst_972 = arith.constant dense<0.000000e+00> : vector<2x256xf32>
    %653 = tpu.matmul %651, %652, %cst_972 {dimension_numbers = #tpu.dot_dimension_numbers<[1], [0], [0], [1], [0, 0, 1, 1], [], []>} : vector<2x128xbf16>, vector<128x256xbf16>, vector<2x256xf32> -> vector<2x256xf32>
    %654 = arith.addf %648, %653 : vector<2x256xf32>
    %c0_973 = arith.constant 0 : index
    %c22_974 = arith.constant 22 : index
    %c0_975 = arith.constant 0 : index
    %655 = tpu.strided_load %arg11[%c0_973, %c22_974, %c0_975] {strides = array<i32: 1, 25, 1>} : memref<1x50x128xf32, #tpu.memory_space<vmem>>, vector<1x2x128xf32>
    %656 = vector.shape_cast %655 : vector<1x2x128xf32> to vector<2x128xf32>
    %657 = arith.truncf %656 : vector<2x128xf32> to vector<2x128xbf16>
    %c2816 = arith.constant 2816 : index
    %c0_976 = arith.constant 0 : index
    %658 = vector.load %arg8[%c2816, %c0_976] : memref<3200x256xbf16, #tpu.memory_space<vmem>>, vector<128x256xbf16>
    %cst_977 = arith.constant dense<0.000000e+00> : vector<2x256xf32>
    %659 = tpu.matmul %657, %658, %cst_977 {dimension_numbers = #tpu.dot_dimension_numbers<[1], [0], [0], [1], [0, 0, 1, 1], [], []>} : vector<2x128xbf16>, vector<128x256xbf16>, vector<2x256xf32> -> vector<2x256xf32>
    %660 = arith.addf %654, %659 : vector<2x256xf32>
    %c0_978 = arith.constant 0 : index
    %c23_979 = arith.constant 23 : index
    %c0_980 = arith.constant 0 : index
    %661 = tpu.strided_load %arg11[%c0_978, %c23_979, %c0_980] {strides = array<i32: 1, 25, 1>} : memref<1x50x128xf32, #tpu.memory_space<vmem>>, vector<1x2x128xf32>
    %662 = vector.shape_cast %661 : vector<1x2x128xf32> to vector<2x128xf32>
    %663 = arith.truncf %662 : vector<2x128xf32> to vector<2x128xbf16>
    %c2944 = arith.constant 2944 : index
    %c0_981 = arith.constant 0 : index
    %664 = vector.load %arg8[%c2944, %c0_981] : memref<3200x256xbf16, #tpu.memory_space<vmem>>, vector<128x256xbf16>
    %cst_982 = arith.constant dense<0.000000e+00> : vector<2x256xf32>
    %665 = tpu.matmul %663, %664, %cst_982 {dimension_numbers = #tpu.dot_dimension_numbers<[1], [0], [0], [1], [0, 0, 1, 1], [], []>} : vector<2x128xbf16>, vector<128x256xbf16>, vector<2x256xf32> -> vector<2x256xf32>
    %666 = arith.addf %660, %665 : vector<2x256xf32>
    %c0_983 = arith.constant 0 : index
    %c24 = arith.constant 24 : index
    %c0_984 = arith.constant 0 : index
    %667 = tpu.strided_load %arg11[%c0_983, %c24, %c0_984] {strides = array<i32: 1, 25, 1>} : memref<1x50x128xf32, #tpu.memory_space<vmem>>, vector<1x2x128xf32>
    %668 = vector.shape_cast %667 : vector<1x2x128xf32> to vector<2x128xf32>
    %669 = arith.truncf %668 : vector<2x128xf32> to vector<2x128xbf16>
    %c3072 = arith.constant 3072 : index
    %c0_985 = arith.constant 0 : index
    %670 = vector.load %arg8[%c3072, %c0_985] : memref<3200x256xbf16, #tpu.memory_space<vmem>>, vector<128x256xbf16>
    %cst_986 = arith.constant dense<0.000000e+00> : vector<2x256xf32>
    %671 = tpu.matmul %669, %670, %cst_986 {dimension_numbers = #tpu.dot_dimension_numbers<[1], [0], [0], [1], [0, 0, 1, 1], [], []>} : vector<2x128xbf16>, vector<128x256xbf16>, vector<2x256xf32> -> vector<2x256xf32>
    %672 = arith.addf %666, %671 : vector<2x256xf32>
    %c0_987 = arith.constant 0 : index
    %c0_988 = arith.constant 0 : index
    %673 = vector.load %arg9[%c0_987, %c0_988] : memref<1x256xf32, #tpu.memory_space<vmem>>, vector<1x256xf32>
    %674 = vector.broadcast %673 : vector<1x256xf32> to vector<2x256xf32>
    %675 = arith.addf %672, %674 : vector<2x256xf32>
    %c0_989 = arith.constant 0 : index
    %c0_990 = arith.constant 0 : index
    %c0_991 = arith.constant 0 : index
    %676 = vector.load %arg10[%c0_989, %c0_990, %c0_991] : memref<1x2x256xf32, #tpu.memory_space<vmem>>, vector<1x2x256xf32>
    %677 = vector.shape_cast %676 : vector<1x2x256xf32> to vector<2x256xf32>
    %678 = vector.shape_cast %675 : vector<2x256xf32> to vector<1x2x256xf32>
    tpu.vector_store %arg10[%c0_989, %c0_990, %c0_991], %678 {strides = array<i32>} : memref<1x2x256xf32, #tpu.memory_space<vmem>>, vector<1x2x256xf32>,
    return
  }
  func.func @transform_0(%arg0: i32) -> (i32, i32, i32) {
    %c0_i32 = arith.constant 0 : i32
    %c0_i32_0 = arith.constant 0 : i32
    %c0_i32_1 = arith.constant 0 : i32
    return %arg0, %c0_i32, %c0_i32_0 : i32, i32, i32
  }
  func.func @transform_1(%arg0: i32) -> (i32, i32) {
    %c0_i32 = arith.constant 0 : i32
    %c0_i32_0 = arith.constant 0 : i32
    %c0_i32_1 = arith.constant 0 : i32
    return %c0_i32, %c0_i32_0 : i32, i32
  }
  func.func @transform_2(%arg0: i32) -> (i32, i32) {
    %c0_i32 = arith.constant 0 : i32
    %c0_i32_0 = arith.constant 0 : i32
    %c0_i32_1 = arith.constant 0 : i32
    return %c0_i32, %c0_i32_0 : i32, i32
  }
  func.func @transform_3(%arg0: i32) -> (i32, i32) {
    %c0_i32 = arith.constant 0 : i32
    %c0_i32_0 = arith.constant 0 : i32
    %c0_i32_1 = arith.constant 0 : i32
    return %c0_i32, %c0_i32_0 : i32, i32
  }
  func.func @transform_4(%arg0: i32) -> (i32, i32) {
    %c0_i32 = arith.constant 0 : i32
    %c0_i32_0 = arith.constant 0 : i32
    %c0_i32_1 = arith.constant 0 : i32
    return %c0_i32, %c0_i32_0 : i32, i32
  }
  func.func @transform_5(%arg0: i32) -> (i32, i32) {
    %c0_i32 = arith.constant 0 : i32
    %c0_i32_0 = arith.constant 0 : i32
    %c0_i32_1 = arith.constant 0 : i32
    return %c0_i32, %c0_i32_0 : i32, i32
  }
  func.func @transform_6(%arg0: i32) -> (i32, i32) {
    %c0_i32 = arith.constant 0 : i32
    %c0_i32_0 = arith.constant 0 : i32
    %c0_i32_1 = arith.constant 0 : i32
    return %c0_i32, %c0_i32_0 : i32, i32
  }
  func.func @transform_7(%arg0: i32) -> (i32, i32) {
    %c0_i32 = arith.constant 0 : i32
    %c0_i32_0 = arith.constant 0 : i32
    %c0_i32_1 = arith.constant 0 : i32
    return %c0_i32, %c0_i32_0 : i32, i32
  }
  func.func @transform_8(%arg0: i32) -> (i32, i32) {
    %c0_i32 = arith.constant 0 : i32
    %c0_i32_0 = arith.constant 0 : i32
    %c0_i32_1 = arith.constant 0 : i32
    return %c0_i32, %c0_i32_0 : i32, i32
  }
  func.func @transform_9(%arg0: i32) -> (i32, i32, i32) {
    %c0_i32 = arith.constant 0 : i32
    %c0_i32_0 = arith.constant 0 : i32
    %c0_i32_1 = arith.constant 0 : i32
    return %arg0, %c0_i32, %c0_i32_0 : i32, i32, i32
  }
  func.func @transform_10(%arg0: i32) -> (i32, i32, i32) {
    %c0_i32 = arith.constant 0 : i32
    %c0_i32_0 = arith.constant 0 : i32
    %c0_i32_1 = arith.constant 0 : i32
    return %arg0, %c0_i32, %c0_i32_0 : i32, i32, i32
  }
}

</mosaic_0001>

<bundles_post_ra>
// kernel: gpa_forward.1
= control target key start
LH: loop header
LB: loop body
LE: loop exit
PB: predicated region body
PF: predicated region fallthrough
CT: control target
= control target key end

     0   :  { %s13283_s0 = inlined_call_operand.vmem [shape: bf16[2,392,27], index: 0, kind: input, shape index: {}]   ;;  %s13284_s1 = inlined_call_operand.vmem [shape: bf16[27,32], index: 1, kind: input, shape index: {}]   ;;  %s13285_s2 = inlined_call_operand.vmem [shape: f32[1,32], index: 2, kind: input, shape index: {}]   ;;  %s13286_s3 = inlined_call_operand.vmem [shape: bf16[288,64], index: 3, kind: input, shape index: {}]   ;;  %s13287_s4 = inlined_call_operand.vmem [shape: f32[1,64], index: 4, kind: input, shape index: {}]   ;;  %s13288_s5 = inlined_call_operand.vmem [shape: bf16[576,128], index: 5, kind: input, shape index: {}]   ;;  %s13289_s6 = inlined_call_operand.vmem [shape: f32[1,128], index: 6, kind: input, shape index: {}]   ;;  %s13290_s7 = inlined_call_operand.vmem [shape: bf16[3200,256], index: 7, kind: input, shape index: {}]   ;;  %s13291_s8 = inlined_call_operand.vmem [shape: f32[1,256], index: 8, kind: input, shape index: {}]   ;;  %s13292_s9 = inlined_call_operand.vmem [shape: f32[2,2,256], index: 9, kind: output, shape index: {0}]   ;;  %s13293_s10 = inlined_call_operand.hbm [shape: f32[2,50,128], index: 10, kind: output, shape index: {1}]  }
   0x1   :  { %13332 = sst [smem:[#allocation10_spill]] %s13283_s0 }
   0x2   :  { %13333 = sst [smem:[#allocation11_spill]] %s13284_s1 }
   0x3   :  { %13334 = sst [smem:[#allocation12_spill]] %s13285_s2 }
   0x4   :  { %16 = vsyncpa [#allocation8], 0 }
   0x5   :  { %18 = vsyncpa [#allocation8 + $0x1], 0  ;;  %s9472_s13 = smov 0   ;;  %s9474_s14 = smov 0  }
   0x6   :  { %s9476_s15 = smov 0   ;;  %s9478_s16 = smov 0  }
   0x7 LB: > { %s9493_s17 = sadd.s32 4294967295, %s9408_s16   ;;  %s6821_s18 = sadd.s32 4294967294, %s9408_s16   ;;  %s9408_s16 = sphi %s9478_s16, %s13424_s16   ;;  %s9404_s15 = sphi %s9476_s15, %s13423_s15   ;;  %s9400_s14 = sphi %s9474_s14, %s13422_s14   ;;  %s9396_s13 = sphi %s9472_s13, %s13421_s13  }
   0x8   : > { %s9497_s19 = sadd.s32 1, %s9408_s16   ;;  %s251_s20 = sadd.s32 1, %s9404_s15 }
   0x9   : > { %s248_s21 = ssub.s32 %s9408_s16, %s9497_s19  ;;  %p261_p0 = scmp.ne.s32.totalorder %s9404_s15, %s9400_s14 }
   0xa   : > { %p249_p1 = scmp.eq.s32.totalorder %s248_s21, 0  ;;  %p262_p2 = scmp.eq.s32.totalorder %s9493_s17, 1 }
   0xb   : > { %p267_p3 = scmp.ne.s32.totalorder %s9400_s14, %s9396_s13  ;;  %p268_p4 = scmp.eq.s32.totalorder %s6821_s18, 1 }
   0xc   : > { %s9508_s22 = scalar_select %p249_p1, %s9404_s15, %s251_s20  }
   0xd   : > { %p9510_p5 = por %p262_p2, %p261_p0  ;;  %p9514_p6 = por %p268_p4, %p267_p3 }
   0xe   : > { %p6824_p7 = scmp.ge.s32.totalorder %s9408_s16, 1  ;;  %p318_p8 = scmp.lt.s32.totalorder %s9408_s16, 3 }
  0x10   : > { %p319_p9 = pnand %p6824_p7, %p318_p8 }
  0x11   : > { %s13337_s1 = sld [smem:[#allocation11_spill]] (!%p319_p9)  ;;  %p361_p10 = scmp.lt.s32.totalorder (!%p319_p9), %s9493_s17, 1 }
  0x12   : > { %322 = sbr.rel (%p319_p9) target bundleno = 1738 (0x6ca), region = 56  ;;  %s13338_s0 = sld [smem:[#allocation10_spill]] (!%p319_p9) }
  0x13   : > { %s9412_s25 = smov (!%p319_p9), 32   ;;  %s9413_s26 = smov (!%p319_p9), 64  }
  0x14   : > { %s13339_s2 = sld [smem:[#allocation12_spill]] (!%p319_p9)  ;;  %s13420_s20 = sand.u32 (!%p319_p9), 1, %s9400_s14  }
  0x15   : > { %s6716_s28 = scalar_lea.sflag (!%p319_p9), [#allocation8], %s13420_s20  ;;  %s9366_s12 = scalar_lea.hbm (!%p319_p9), %s13293_s10, 112 }
  0x17   : > { %v6930_v0 = vld [vmem:[%s13337_s1 + $0x8] sm:$0xf]  ;;  %v8837_v1 = vld [vmem:[%s13337_s1 + $0x8] sm:$0x30]  ;;  %vm639_vm0 = vcmask 1044480   ;;  %vm640_vm1 = vcmask 1045504  }
  0x18   : > { %v6931_v2 = vor.u32 %v8837_v1, %v6930_v0  ;;  %v9410_v3 = vmov 65535   ;;  %s9528_s29 = scalar_select %p361_p10, %s9493_s17, 1  ;;  %v8836_v7 = vld [vmem:[%s13337_s1] sm:$0xff]  ;;  %vm563_vm2 = vcmask 220160   ;;  %vm828_vm3 = vcmask 261120  }
  0x19   : > { %v641_v4 = vsel %vm639_vm0, 4294967295, %v9410_v3  ;;  %v9411_v14 = vmov 0.0   ;;  %vm945_vm4 = vcmask 259072   ;;  %vm1056_vm5 = vcmask 260096  }
  0x1a   : > { %v642_v5 = vsel %vm640_vm1, %v641_v4, 0  ;;  %s9293_s30 = smul.u32 196, %s9528_s29  ;;  %878 = vst.msk [vmem:[#allocation3] sm:$0xff] %vm828_vm3, %v9411_v14  ;;  %v9666_v25 = vld [vmem:[%s13339_s2] ss:$0 sm:$0xff]  ;;  %vm1113_vm6 = vcmask 261127  }
  0x1b   : > { %v644_v6 = vand.u32 %v6931_v2, %v642_v5  ;;  %879 = vst.msk [vmem:[#allocation3 + $0x8] sm:$0xff] %vm828_vm3, %v9411_v14  ;;  %vm13304_vm7 = vcmask 261126   ;;  %vm13303_vm8 = vcmask 258048   ;;  %vm13297_vm9 = vcmask 522496  }
  0x1c   : > { %s9537_s21 = scalar_lea.vmem %s13338_s0, %s9293_s30  ;;  %880 = vst.msk [vmem:[#allocation3 + $0x10] sm:$0xff] %vm828_vm3, %v9411_v14  ;;  %s9414_s30 = smov 96   ;;  %vm13295_vm10 = vcmask 784896   ;;  %vm1593_vm11 = vcmask 261121   ;;  %vm13302_vm12 = vcmask 261125   ;;  %vm13301_vm13 = vcmask 257024  }
  0x1d   : > { %652 = vmatpush.bf16.msra.mxu0 %v644_v6  ;;  %v8812_v8 = vld [vmem:[%s9537_s21] sm:$0xff]  ;;  %v8813_v9 = vld [vmem:[%s9537_s21 + $0x8] sm:$0xff]  ;;  %v8814_v10 = vld [vmem:[%s9537_s21 + $0x10] sm:$0xff]  ;;  %881 = vst.msk [vmem:[#allocation3 + $0x18] sm:$0xff] %vm828_vm3, %v9411_v14  ;;  %vm13299_vm14 = vcmask 523521   ;;  %vm13294_vm15 = vcmask 785921  }
  0x1e   : > { %v8815_v11 = vld [vmem:[%s9537_s21 + $0x18] sm:$0xff]  ;;  %v8816_v12 = vld [vmem:[%s9537_s21 + $0x20] sm:$0xff]  ;;  %v8817_v13 = vld [vmem:[%s9537_s21 + $0x28] sm:$0xff]  ;;  %882 = vst.msk [vmem:[#allocation3 + $0x20] sm:$0xff] %vm828_vm3, %v9411_v14  ;;  %vm13296_vm0 = vcmask 261124   ;;  %vm13298_vm1 = vcmask 256000  }
  0x1f   : > { %883 = vst.msk [vmem:[#allocation3 + $0x28] sm:$0xff] %vm828_vm3, %v9411_v14  ;;  %v8818_v16 = vld [vmem:[%s9537_s21 + $0x30] sm:$0xff]  ;;  %v8819_v17 = vld [vmem:[%s9537_s21 + $0x38] sm:$0xff]  ;;  %v8820_v21 = vld [vmem:[%s9537_s21 + $0x40] sm:$0xff] }
  0x20   : > { %884 = vst.msk [vmem:[#allocation3 + $0x30] sm:$0xff] %vm828_vm3, %v9411_v14  ;;  %v8821_v29 = vld [vmem:[%s9537_s21 + $0x48] sm:$0xff]  ;;  %v8822_v41 = vld [vmem:[%s9537_s21 + $0x50] sm:$0xff]  ;;  %v8823_v54 = vld [vmem:[%s9537_s21 + $0x58] sm:$0xff] }
  0x21   : > { %653 = vmatpush.bf16.msra.mxu0 %v8836_v7  ;;  %885 = vst.msk [vmem:[#allocation3 + $0x38] sm:$0xff] %vm828_vm3, %v9411_v14 }
  0x22   : > { %v1059_v15 = vld [vmem:[#allocation3 + $0x1] ss:$2 sm:$0x7f]  ;;  %886 = vst.msk [vmem:[#allocation3 + $0x40] sm:$0xff] %vm828_vm3, %v9411_v14 }
  0x23   : > { %1061 = vrot.lane.b32.xlu0 %v1059_v15, %s9412_s25  ;;  %887 = vst.msk [vmem:[#allocation3 + $0x48] sm:$0xff] %vm828_vm3, %v9411_v14  ;;  %v1067_v18 = vld [vmem:[#allocation3 + $0x2] ss:$2 sm:$0x7f] }
  0x24   : > { %6932 = vmatmul.msk.bf16.vlgmr.msra.gmra.mxu0 %vm563_vm2, %v8812_v8  ;;  %888 = vst.msk [vmem:[#allocation3 + $0x50] sm:$0xff] %vm828_vm3, %v9411_v14 }
  0x25   : > { %889 = vst.msk [vmem:[#allocation3 + $0x58] sm:$0xff] %vm828_vm3, %v9411_v14 }
  0x26   : > { %890 = vst.msk [vmem:[#allocation3 + $0x60] sm:$0xff] %vm828_vm3, %v9411_v14 }
  0x27   : > { %891 = vst.msk [vmem:[#allocation3 + $0x68] sm:$0xff] %vm828_vm3, %v9411_v14 }
  0x28   : > { %892 = vst.msk [vmem:[#allocation3 + $0x70] sm:$0xff] %vm828_vm3, %v9411_v14 }
  0x29   : > { %893 = vst.msk [vmem:[#allocation3 + $0x78] sm:$0xff] %vm828_vm3, %v9411_v14 }
  0x2a   : > { %894 = vst.msk [vmem:[#allocation3 + $0x80] sm:$0xff] %vm828_vm3, %v9411_v14 }
  0x2b   : > { %895 = vst.msk [vmem:[#allocation3 + $0x88] sm:$0xff] %vm828_vm3, %v9411_v14  ;;  %1069 = vrot.lane.b32.xlu0 %v1067_v18, %s9413_s26 }
  0x2c   : > { %896 = vst.msk [vmem:[#allocation3 + $0x90] sm:$0xff] %vm828_vm3, %v9411_v14 }
  0x2d   : > { %897 = vst.msk [vmem:[#allocation3 + $0x98] sm:$0xff] %vm828_vm3, %v9411_v14 }
  0x2e   : > { %898 = vst.msk [vmem:[#allocation3 + $0xa0] sm:$0xff] %vm828_vm3, %v9411_v14 }
  0x2f   : > { %899 = vst.msk [vmem:[#allocation3 + $0xa8] sm:$0xff] %vm828_vm3, %v9411_v14 }
  0x30   : > { %900 = vst.msk [vmem:[#allocation3 + $0xb0] sm:$0xff] %vm828_vm3, %v9411_v14 }
  0x31   : > { %901 = vst.msk [vmem:[#allocation3 + $0xb8] sm:$0xff] %vm828_vm3, %v9411_v14 }
  0x32   : > { %902 = vst.msk [vmem:[#allocation3 + $0xc0] sm:$0xff] %vm828_vm3, %v9411_v14 }
  0x33   : > { %903 = vst.msk [vmem:[#allocation3 + $0xc8] sm:$0xff] %vm828_vm3, %v9411_v14 }
  0x34   : > { %6933 = vmatmul.msk.bf16.gmra.mxu0 %vm563_vm2, %v8813_v9  ;;  %904 = vst.msk [vmem:[#allocation3 + $0xd0] sm:$0xff] %vm828_vm3, %v9411_v14 }
  0x35   : > { %905 = vst.msk [vmem:[#allocation3 + $0xd8] sm:$0xff] %vm828_vm3, %v9411_v14 }
  0x36   : > { %906 = vst.msk [vmem:[#allocation3 + $0xe0] sm:$0xff] %vm828_vm3, %v9411_v14 }
  0x37   : > { %907 = vst.msk [vmem:[#allocation3 + $0xe8] sm:$0xff] %vm828_vm3, %v9411_v14 }
  0x38   : > { %910 = vst.msk [vmem:[#allocation3 + $0x100] sm:$0xff] %vm828_vm3, %v9411_v14 }
  0x39   : > { %911 = vst.msk [vmem:[#allocation3 + $0x108] sm:$0xff] %vm828_vm3, %v9411_v14 }
  0x3a   : > { %912 = vst.msk [vmem:[#allocation3 + $0x110] sm:$0xff] %vm828_vm3, %v9411_v14 }
  0x3b   : > { %913 = vst.msk [vmem:[#allocation3 + $0x118] sm:$0xff] %vm828_vm3, %v9411_v14 }
  0x3c   : > { %914 = vst.msk [vmem:[#allocation3 + $0x120] sm:$0xff] %vm828_vm3, %v9411_v14 }
  0x3d   : > { %915 = vst.msk [vmem:[#allocation3 + $0x128] sm:$0xff] %vm828_vm3, %v9411_v14 }
  0x3e   : > { %916 = vst.msk [vmem:[#allocation3 + $0x130] sm:$0xff] %vm828_vm3, %v9411_v14 }
  0x3f   : > { %917 = vst.msk [vmem:[#allocation3 + $0x138] sm:$0xff] %vm828_vm3, %v9411_v14 }
  0x40   : > { %918 = vst.msk [vmem:[#allocation3 + $0x140] sm:$0xff] %vm828_vm3, %v9411_v14  ;;  %v1596_v19 = vld [vmem:[#allocation3 + $0x101] ss:$2 sm:$0x7f] }
  0x41   : > { %919 = vst.msk [vmem:[#allocation3 + $0x148] sm:$0xff] %vm828_vm3, %v9411_v14  ;;  %v1598_v20 = vrot.slane %v1596_v19, 7  ;;  %v1605_v23 = vld [vmem:[#allocation3 + $0x102] ss:$2 sm:$0x7f] }
  0x42   : > { %920 = vst.msk [vmem:[#allocation3 + $0x150] sm:$0xff] %vm828_vm3, %v9411_v14  ;;  %v1607_v24 = vrot.slane %v1605_v23, 7 }
  0x43   : > { %921 = vst.msk [vmem:[#allocation3 + $0x158] sm:$0xff] %vm828_vm3, %v9411_v14  ;;  %1599 = vrot.lane.b32.xlu0 %v1598_v20, %s9412_s25 }
  0x44   : > { %6934 = vmatmul.msk.bf16.gmra.mxu0 %vm563_vm2, %v8814_v10  ;;  %922 = vst.msk [vmem:[#allocation3 + $0x160] sm:$0xff] %vm828_vm3, %v9411_v14  ;;  %v8824_v10 = vld [vmem:[%s9537_s21 + $0x60] sm:$0xff] }
  0x45   : > { %923 = vst.msk [vmem:[#allocation3 + $0x168] sm:$0xff] %vm828_vm3, %v9411_v14 }
  0x46   : > { %924 = vst.msk [vmem:[#allocation3 + $0x170] sm:$0xff] %vm828_vm3, %v9411_v14 }
  0x47   : > { %925 = vst.msk [vmem:[#allocation3 + $0x178] sm:$0xff] %vm828_vm3, %v9411_v14 }
  0x48   : > { %926 = vst.msk [vmem:[#allocation3 + $0x180] sm:$0xff] %vm828_vm3, %v9411_v14 }
  0x49   : > { %927 = vst.msk [vmem:[#allocation3 + $0x188] sm:$0xff] %vm828_vm3, %v9411_v14 }
  0x4a   : > { %928 = vst.msk [vmem:[#allocation3 + $0x190] sm:$0xff] %vm828_vm3, %v9411_v14 }
  0x4b   : > { %929 = vst.msk [vmem:[#allocation3 + $0x198] sm:$0xff] %vm828_vm3, %v9411_v14  ;;  %1608 = vrot.lane.b32.xlu0 %v1607_v24, %s9413_s26 }
  0x4c   : > { %930 = vst.msk [vmem:[#allocation3 + $0x1a0] sm:$0xff] %vm828_vm3, %v9411_v14 }
  0x4d   : > { %931 = vst.msk [vmem:[#allocation3 + $0x1a8] sm:$0xff] %vm828_vm3, %v9411_v14 }
  0x4e   : > { %932 = vst.msk [vmem:[#allocation3 + $0x1b0] sm:$0xff] %vm828_vm3, %v9411_v14 }
  0x4f   : > { %933 = vst.msk [vmem:[#allocation3 + $0x1b8] sm:$0xff] %vm828_vm3, %v9411_v14 }
  0x50   : > { %934 = vst.msk [vmem:[#allocation3 + $0x1c0] sm:$0xff] %vm828_vm3, %v9411_v14 }
  0x51   : > { %935 = vst.msk [vmem:[#allocation3 + $0x1c8] sm:$0xff] %vm828_vm3, %v9411_v14 }
  0x52   : > { %936 = vst.msk [vmem:[#allocation3 + $0x1d0] sm:$0xff] %vm828_vm3, %v9411_v14 }
  0x53   : > { %937 = vst.msk [vmem:[#allocation3 + $0x1d8] sm:$0xff] %vm828_vm3, %v9411_v14 }
  0x54   : > { %6935 = vmatmul.msk.bf16.gmra.mxu0 %vm563_vm2, %v8815_v11  ;;  %938 = vst.msk [vmem:[#allocation3 + $0x1e0] sm:$0xff] %vm828_vm3, %v9411_v14 }
  0x55   : > { %939 = vst.msk [vmem:[#allocation3 + $0x1e8] sm:$0xff] %vm828_vm3, %v9411_v14 }
  0x64   : > { %6936 = vmatmul.msk.bf16.gmra.mxu0 %vm563_vm2, %v8816_v12 }
  0x74   : > { %6937 = vmatmul.msk.bf16.gmra.mxu0 %vm563_vm2, %v8817_v13 }
  0x84   : > { %6938 = vmatmul.msk.bf16.gmra.mxu0 %vm563_vm2, %v8818_v16 }
  0x94   : > { %6939 = vmatmul.msk.bf16.gmra.mxu0 %vm563_vm2, %v8819_v17 }
  0xa1   : > { %v655_v22 = vpop.f32.mrf.mxu0 }
  0xa2   : > { %v656_v27 = vadd.f32 %v9666_v25, %v655_v22 }
  0xa4   : > { %6940 = vmatmul.msk.bf16.gmra.mxu0 %vm563_vm2, %v8820_v21  ;;  %v779_v30 = vmax.f32 %v656_v27, 0.0 }
  0xa6   : > { %829 = vst.msk [vmem:[#allocation2] sm:$0xff] %vm828_vm3, %v779_v30 }
  0xa9   : > { %v657_v26 = vpop.f32.mrf.mxu0 }
  0xaa   : > { %v658_v28 = vadd.f32 %v9666_v25, %v657_v26 }
  0xac   : > { %v780_v32 = vmax.f32 %v658_v28, 0.0 }
  0xad   : > { %v942_v37 = vld [vmem:[#allocation2] sm:$0xff] }
  0xae   : > { %830 = vst.msk [vmem:[#allocation2 + $0x8] sm:$0xff] %vm828_vm3, %v780_v32 }
  0xaf   : > { %944 = vst.msk [vmem:[#allocation3 + $0x11] sm:$0xff] %vm828_vm3, %v942_v37 }
  0xb1   : > { %v660_v31 = vpop.f32.mrf.mxu0 }
  0xb2   : > { %v661_v33 = vadd.f32 %v9666_v25, %v660_v31 }
  0xb4   : > { %v781_v34 = vmax.f32 %v661_v33, 0.0  ;;  %6941 = vmatmul.msk.bf16.gmra.mxu0 %vm563_vm2, %v8821_v29 }
  0xb5   : > { %v943_v39 = vld [vmem:[#allocation2 + $0x8] sm:$0x3f] }
  0xb6   : > { %831 = vst.msk [vmem:[#allocation2 + $0x10] sm:$0xff] %vm828_vm3, %v781_v34  ;;  %v8825_v34 = vld [vmem:[%s9537_s21 + $0x68] sm:$0xff] }
  0xb7   : > { %946 = vst.msk [vmem:[#allocation3 + $0x19] sm:$0x3f] %vm945_vm4, %v943_v39 }
  0xb9   : > { %v662_v35 = vpop.f32.mrf.mxu0 }
  0xba   : > { %v663_v36 = vadd.f32 %v9666_v25, %v662_v35 }
  0xbc   : > { %v782_v38 = vmax.f32 %v663_v36, 0.0 }
  0xbd   : > { %v947_v40 = vld [vmem:[#allocation2 + $0xe] sm:$0xff] }
  0xbe   : > { %832 = vst.msk [vmem:[#allocation2 + $0x18] sm:$0xff] %vm828_vm3, %v782_v38  ;;  %v1086_v46 = vld [vmem:[#allocation3 + $0x12] ss:$2 sm:$0x7f] }
  0xbf   : > { %949 = vst.msk [vmem:[#allocation3 + $0x21] sm:$0xff] %vm828_vm3, %v947_v40  ;;  %1088 = vrot.lane.b32.xlu0 %v1086_v46, %s9412_s25  ;;  %v1083_v47 = vld [vmem:[#allocation3 + $0x11] ss:$2 sm:$0x7f] }
  0xc0   : > { %1084 = vst.msk [vmem:[#allocation4 + $0x8] sm:$0x7f] %vm1056_vm5, %v1083_v47  ;;  %v1075_v52 = vld [vmem:[#allocation3 + $0x10] ss:$2 sm:$0x7f]  ;;  %v1062_v47 = vpop.permute.xlu0 %1061 }
  0xc1   : > { %v665_v42 = vpop.f32.mrf.mxu0 }
  0xc2   : > { %v666_v43 = vadd.f32 %v9666_v25, %v665_v42 }
  0xc4   : > { %v783_v44 = vmax.f32 %v666_v43, 0.0  ;;  %6942 = vmatmul.msk.bf16.gmra.mxu0 %vm563_vm2, %v8822_v41 }
  0xc5   : > { %v948_v45 = vld [vmem:[#allocation2 + $0x16] sm:$0x3f] }
  0xc6   : > { %833 = vst.msk [vmem:[#allocation2 + $0x20] sm:$0xff] %vm828_vm3, %v783_v44  ;;  %v8855_v44 = vld [vmem:[%s13286_s3 + $0x88] sm:$0xff] }
  0xc7   : > { %950 = vst.msk [vmem:[#allocation3 + $0x29] sm:$0x3f] %vm945_vm4, %v948_v45  ;;  %1077 = vrot.lane.b32.xlu0 %v1075_v52, %s9414_s30  ;;  %v1055_v45 = vld [vmem:[#allocation3] ss:$2 sm:$0x7f]  ;;  %2387 = vmatpush.bf16.msra.mxu3 %v8855_v44 }
  0xc8   : > { %1057 = vst.msk [vmem:[#allocation4] sm:$0x7f] %vm1056_vm5, %v1055_v45 }
  0xc9   : > { %v667_v48 = vpop.f32.mrf.mxu0  ;;  %1065 = vst.msk [vmem:[#allocation4] sm:$0x7f] %vm13297_vm9, %v1062_v47 }
  0xca   : > { %v668_v49 = vadd.f32 %v9666_v25, %v667_v48 }
  0xcc   : > { %v784_v50 = vmax.f32 %v668_v49, 0.0 }
  0xcd   : > { %v951_v51 = vld [vmem:[#allocation2 + $0x1c] sm:$0xff] }
  0xce   : > { %953 = vst.msk [vmem:[#allocation3 + $0x31] sm:$0xff] %vm828_vm3, %v951_v51  ;;  %v1093_v53 = vld [vmem:[#allocation3 + $0x20] ss:$2 sm:$0x7f] }
  0xcf   : > { %834 = vst.msk [vmem:[#allocation2 + $0x28] sm:$0xff] %vm828_vm3, %v784_v50  ;;  %1095 = vrot.lane.b32.xlu1 %v1093_v53, %s9413_s26  ;;  %v1116_v57 = vld [vmem:[#allocation3 + $0x21] ss:$2 sm:$0x7f]  ;;  %v8854_v50 = vld [vmem:[%s13286_s3 + $0x80] sm:$0xff] }
  0xd0   : > { %v1107_v58 = vld [vmem:[#allocation3 + $0x22] ss:$2 sm:$0x7f]  ;;  %v1100_v62 = vld [vmem:[#allocation3 + $0x21] ss:$2 sm:$0x7f]  ;;  %2388 = vmatpush.bf16.msra.mxu3 %v8854_v50 }
  0xd1   : > { %v670_v55 = vpop.f32.mrf.mxu0  ;;  %1108 = vst.msk [vmem:[#allocation4 + $0x10] sm:$0x7f] %vm1056_vm5, %v1107_v58  ;;  %v1109_v59 = vld [vmem:[#allocation3 + $0x20] ss:$2 sm:$0x7f]  ;;  %v1118_v0 = vrot.slane %v1116_v57, 1  ;;  %1102 = vrot.lane.b32.xlu0 %v1100_v62, %s9414_s30 }
  0xd2   : > { %v671_v56 = vadd.f32 %v9666_v25, %v670_v55  ;;  %v1111_v61 = vrot.slane %v1109_v59, 1  ;;  %v1126_v3 = vld [vmem:[#allocation3 + $0x22] ss:$2 sm:$0x7f] }
  0xd3   : > { %v1128_v7 = vrot.slane %v1126_v3, 1  ;;  %v8826_v55 = vld [vmem:[%s9537_s21 + $0x70] sm:$0xff] }
  0xd4   : > { %v785_v60 = vmax.f32 %v671_v56, 0.0  ;;  %6943 = vmatmul.msk.bf16.gmra.mxu0 %vm563_vm2, %v8823_v54  ;;  %1114 = vst.msk [vmem:[#allocation4] sm:$0x80] %vm1113_vm6, %v1111_v61 }
  0xd5   : > { %1115 = vst.msk [vmem:[#allocation4 + $0x18] sm:$0x3f] %vm945_vm4, %v1111_v61 }
  0xd6   : > { %v952_v63 = vld [vmem:[#allocation2 + $0x24] sm:$0x3f]  ;;  %835 = vst.msk [vmem:[#allocation2 + $0x30] sm:$0xff] %vm828_vm3, %v785_v60 }
  0xd7   : > { %954 = vst.msk [vmem:[#allocation3 + $0x39] sm:$0x3f] %vm945_vm4, %v952_v63  ;;  %1119 = vrot.lane.b32.xlu1 %v1118_v0, %s9412_s25  ;;  %v1070_v0 = vpop.permute.xlu0 %1069 }
  0xd8   : > { %1073 = vst.msk [vmem:[#allocation4] sm:$0x7f] %vm13295_vm10, %v1070_v0 }
  0xd9   : > { %v672_v1 = vpop.f32.mrf.mxu0 }
  0xda   : > { %v673_v2 = vadd.f32 %v9666_v25, %v672_v1 }
  0xdc   : > { %v786_v4 = vmax.f32 %v673_v2, 0.0 }
  0xdd   : > { %v955_v5 = vld [vmem:[#allocation2 + $0x2a] sm:$0xff]  ;;  %v956_v6 = vld [vmem:[#allocation2 + $0x32] sm:$0x3f] }
  0xde   : > { %957 = vst.msk [vmem:[#allocation3 + $0x41] sm:$0xff] %vm828_vm3, %v955_v5  ;;  %v1155_v8 = vld [vmem:[#allocation3 + $0x32] ss:$2 sm:$0x7f] }
  0xdf   : > { %958 = vst.msk [vmem:[#allocation3 + $0x49] sm:$0x3f] %vm945_vm4, %v956_v6  ;;  %v1157_v9 = vrot.slane %v1155_v8, 1  ;;  %1129 = vrot.lane.b32.xlu1 %v1128_v7, %s9413_s26  ;;  %v1148_v11 = vld [vmem:[#allocation3 + $0x31] ss:$2 sm:$0x7f] }
  0xe0   : > { %836 = vst.msk [vmem:[#allocation2 + $0x38] sm:$0xff] %vm828_vm3, %v786_v4  ;;  %v1150_v13 = vrot.slane %v1148_v11, 1  ;;  %v1137_v15 = vld [vmem:[#allocation3 + $0x30] ss:$2 sm:$0x7f] }
  0xe1   : > { %1158 = vrot.lane.b32.xlu0 %v1157_v9, %s9412_s25  ;;  %v675_v12 = vpop.f32.mrf.mxu0  ;;  %v1139_v17 = vrot.slane %v1137_v15, 1  ;;  %v1589_v6 = vld [vmem:[#allocation3 + $0x100] ss:$2 sm:$0x7f] }
  0xe2   : > { %v676_v14 = vadd.f32 %v9666_v25, %v675_v12  ;;  %1152 = vst.msk [vmem:[#allocation4 + $0x8] sm:$0x80] %vm1113_vm6, %v1150_v13  ;;  %v1591_v7 = vrot.slane %v1589_v6, 7  ;;  %v8844_v6 = vld [vmem:[%s13286_s3 + $0x30] sm:$0xff] }
  0xe3   : > { %1153 = vst.msk [vmem:[#allocation4 + $0x20] sm:$0x3f] %vm945_vm4, %v1150_v13  ;;  %v8827_v13 = vld [vmem:[%s9537_s21 + $0x78] sm:$0xff] }
  0xe4   : > { %v787_v16 = vmax.f32 %v676_v14, 0.0  ;;  %6944 = vmatmul.msk.bf16.gmra.mxu0 %vm563_vm2, %v8824_v10  ;;  %1594 = vst.msk [vmem:[#allocation4 + $0x90] sm:$0xfe] %vm1593_vm11, %v1591_v7 }
  0xe6   : > { %837 = vst.msk [vmem:[#allocation2 + $0x40] sm:$0xff] %vm828_vm3, %v787_v16  ;;  %v1164_v18 = vld [vmem:[#allocation3 + $0x40] ss:$2 sm:$0x7f] }
  0xe7   : > { %v959_v19 = vld [vmem:[#allocation2 + $0x38] sm:$0xff]  ;;  %v1166_v20 = vrot.slane %v1164_v18, 1  ;;  %1140 = vrot.lane.b32.xlu1 %v1139_v17, %s9414_s30  ;;  %v1173_v23 = vld [vmem:[#allocation3 + $0x41] ss:$2 sm:$0x7f]  ;;  %v1600_v18 = vpop.permute.xlu0 %1599 }
  0xe8   : > { %961 = vst.msk [vmem:[#allocation3 + $0x51] sm:$0xff] %vm828_vm3, %v959_v19  ;;  %v1182_v24 = vld [vmem:[#allocation3 + $0x42] ss:$2 sm:$0x7f]  ;;  %v1175_v32 = vrot.slane %v1173_v23, 1 }
  0xe9   : > { %1167 = vrot.lane.b32.xlu2 %v1166_v20, %s9413_s26  ;;  %v677_v21 = vpop.f32.mrf.mxu0  ;;  %v1184_v26 = vrot.slane %v1182_v24, 1  ;;  %v1188_v27 = vld [vmem:[#allocation3 + $0x40] ss:$2 sm:$0x7f]  ;;  %1603 = vst.msk [vmem:[#allocation4 + $0x90] sm:$0xfe] %vm13299_vm14, %v1600_v18 }
  0xea   : > { %v678_v22 = vadd.f32 %v9666_v25, %v677_v21  ;;  %v1196_v29 = vld [vmem:[#allocation3 + $0x41] ss:$2 sm:$0x7f]  ;;  %v1190_v31 = vrot.slane %v1188_v27, 2  ;;  %vm13313_vm14 = vcmask 520448  }
  0xeb   : > { %1186 = vst.msk [vmem:[#allocation4 + $0x10] sm:$0x80] %vm1113_vm6, %v1184_v26  ;;  %v1198_v33 = vrot.slane %v1196_v29, 2  ;;  %v1206_v38 = vld [vmem:[#allocation3 + $0x42] ss:$2 sm:$0x7f] }
  0xec   : > { %v788_v28 = vmax.f32 %v678_v22, 0.0  ;;  %1187 = vst.msk [vmem:[#allocation4 + $0x28] sm:$0x3f] %vm945_vm4, %v1184_v26  ;;  %v1208_v42 = vrot.slane %v1206_v38, 2  ;;  %v8830_v18 = vld [vmem:[%s9537_s21 + $0x90] sm:$0xff] }
  0xed   : > { %v960_v30 = vld [vmem:[#allocation2 + $0x40] sm:$0x3f]  ;;  %1193 = vst.msk [vmem:[#allocation4 + $0x18] sm:$0xc0] %vm13304_vm7, %v1190_v31 }
  0xee   : > { %962 = vst.msk [vmem:[#allocation3 + $0x59] sm:$0x3f] %vm945_vm4, %v960_v30 }
  0xef   : > { %838 = vst.msk [vmem:[#allocation2 + $0x48] sm:$0xff] %vm828_vm3, %v788_v28  ;;  %1176 = vrot.lane.b32.xlu1 %v1175_v32, %s9414_s30 }
  0xf0   : > { %1195 = vst.msk [vmem:[#allocation4 + $0x30] sm:$0x1f] %vm13303_vm8, %v1190_v31 }
  0xf1   : > { %1199 = vrot.lane.b32.xlu2 %v1198_v33, %s9412_s25  ;;  %v680_v35 = vpop.f32.mrf.mxu0 }
  0xf2   : > { %v681_v36 = vadd.f32 %v9666_v25, %v680_v35  ;;  %v2068_v16 = vld [vmem:[#allocation4 + $0x10] sm:$0xff] }
  0xf4   : > { %v789_v37 = vmax.f32 %v681_v36, 0.0  ;;  %6945 = vmatmul.msk.bf16.gmra.mxu0 %vm563_vm2, %v8825_v34  ;;  %v1609_v34 = vpop.permute.xlu0 %1608 }
  0xf5   : > { %v1235_v39 = vld [vmem:[#allocation3 + $0x52] ss:$2 sm:$0x7f]  ;;  %v1228_v43 = vld [vmem:[#allocation3 + $0x51] ss:$2 sm:$0x7f] }
  0xf6   : > { %v963_v40 = vld [vmem:[#allocation2 + $0x46] sm:$0xff]  ;;  %839 = vst.msk [vmem:[#allocation2 + $0x50] sm:$0xff] %vm828_vm3, %v789_v37  ;;  %v1237_v41 = vrot.slane %v1235_v39, 2  ;;  %v1230_v48 = vrot.slane %v1228_v43, 2 }
  0xf7   : > { %965 = vst.msk [vmem:[#allocation3 + $0x61] sm:$0xff] %vm828_vm3, %v963_v40  ;;  %v1217_v52 = vld [vmem:[#allocation3 + $0x50] ss:$2 sm:$0x7f] }
  0xf8   : > { %1238 = vrot.lane.b32.xlu1 %v1237_v41, %s9412_s25  ;;  %1232 = vst.msk [vmem:[#allocation4 + $0x20] sm:$0xc0] %vm13304_vm7, %v1230_v48  ;;  %v1219_v54 = vrot.slane %v1217_v52, 2  ;;  %v8828_v40 = vld [vmem:[%s9537_s21 + $0x80] sm:$0xff] }
  0xf9   : > { %1209 = vrot.lane.b32.xlu2 %v1208_v42, %s9413_s26  ;;  %v682_v46 = vpop.f32.mrf.mxu0  ;;  %1233 = vst.msk [vmem:[#allocation4 + $0x38] sm:$0x1f] %vm13303_vm8, %v1230_v48 }
  0xfa   : > { %v683_v49 = vadd.f32 %v9666_v25, %v682_v46  ;;  %1612 = vst.msk [vmem:[#allocation4 + $0x90] sm:$0xfe] %vm13294_vm15, %v1609_v34  ;;  %vm13300_vm15 = vcmask 1047296  }
  0xfc   : > { %v790_v51 = vmax.f32 %v683_v49, 0.0 }
  0xfd   : > { %v964_v53 = vld [vmem:[#allocation2 + $0x4e] sm:$0x3f] }
  0xfe   : > { %966 = vst.msk [vmem:[#allocation3 + $0x69] sm:$0x3f] %vm945_vm4, %v964_v53 }
  0xff   : > { %840 = vst.msk [vmem:[#allocation2 + $0x58] sm:$0xff] %vm828_vm3, %v790_v51 }
 0x101   : > { %1220 = vrot.lane.b32.xlu2 %v1219_v54, %s9414_s30  ;;  %v685_v56 = vpop.f32.mrf.mxu0 }
 0x102   : > { %v686_v57 = vadd.f32 %v9666_v25, %v685_v56 }
 0x104   : > { %v791_v58 = vmax.f32 %v686_v57, 0.0  ;;  %6946 = vmatmul.msk.bf16.gmra.mxu0 %vm563_vm2, %v8826_v55 }
 0x105   : > { %v1244_v59 = vld [vmem:[#allocation3 + $0x60] ss:$2 sm:$0x7f]  ;;  %v1276_v60 = vld [vmem:[#allocation3 + $0x61] ss:$2 sm:$0x7f] }
 0x106   : > { %v967_v61 = vld [vmem:[#allocation2 + $0x54] sm:$0xff]  ;;  %841 = vst.msk [vmem:[#allocation2 + $0x60] sm:$0xff] %vm828_vm3, %v791_v58  ;;  %v1246_v62 = vrot.slane %v1244_v59, 2  ;;  %v1278_v63 = vrot.slane %v1276_v60, 3 }
 0x107   : > { %969 = vst.msk [vmem:[#allocation3 + $0x71] sm:$0xff] %vm828_vm3, %v967_v61  ;;  %v1262_v1 = vld [vmem:[#allocation3 + $0x62] ss:$2 sm:$0x7f] }
 0x108   : > { %1279 = vrot.lane.b32.xlu0 %v1278_v63, %s9412_s25  ;;  %v1264_v3 = vrot.slane %v1262_v1, 2  ;;  %v1253_v5 = vld [vmem:[#allocation3 + $0x61] ss:$2 sm:$0x7f]  ;;  %v8845_v63 = vld [vmem:[%s13286_s3 + $0x38] sm:$0xff] }
 0x109   : > { %1247 = vrot.lane.b32.xlu2 %v1246_v62, %s9413_s26  ;;  %v687_v2 = vpop.f32.mrf.mxu0  ;;  %v1268_v8 = vld [vmem:[#allocation3 + $0x60] ss:$2 sm:$0x7f]  ;;  %v1255_v12 = vrot.slane %v1253_v5, 2  ;;  %2295 = vmatpush.bf16.msra.mxu1 %v8845_v63 }
 0x10a   : > { %v688_v4 = vadd.f32 %v9666_v25, %v687_v2  ;;  %1266 = vst.msk [vmem:[#allocation4 + $0x28] sm:$0xc0] %vm13304_vm7, %v1264_v3  ;;  %v1270_v10 = vrot.slane %v1268_v8, 3  ;;  %v1286_v21 = vld [vmem:[#allocation3 + $0x62] ss:$2 sm:$0x7f] }
 0x10b   : > { %1267 = vst.msk [vmem:[#allocation4 + $0x40] sm:$0x1f] %vm13303_vm8, %v1264_v3  ;;  %v1288_v29 = vrot.slane %v1286_v21, 3  ;;  %v8829_v62 = vld [vmem:[%s9537_s21 + $0x88] sm:$0xff]  ;;  %v8853_v21 = vld [vmem:[%s13286_s3 + $0x78] sm:$0xff]  ;;  %vm13312_vm8 = vcmask 782848  }
 0x10c   : > { %v792_v9 = vmax.f32 %v688_v4, 0.0  ;;  %1273 = vst.msk [vmem:[#allocation4 + $0x30] sm:$0xe0] %vm13302_vm12, %v1270_v10  ;;  %v8843_v8 = vld [vmem:[%s13286_s3 + $0x28] sm:$0xff]  ;;  %2338 = vmatpush.bf16.msra.mxu2 %v8853_v21  ;;  %vm1143_vm7 = vcmask 1048327  }
 0x10d   : > { %v968_v11 = vld [vmem:[#allocation2 + $0x5c] sm:$0x3f]  ;;  %1275 = vst.msk [vmem:[#allocation4 + $0x48] sm:$0xf] %vm13301_vm13, %v1270_v10  ;;  %2296 = vmatpush.bf16.msra.mxu1 %v8844_v6 }
 0x10e   : > { %970 = vst.msk [vmem:[#allocation3 + $0x79] sm:$0x3f] %vm945_vm4, %v968_v11 }
 0x10f   : > { %842 = vst.msk [vmem:[#allocation2 + $0x68] sm:$0xff] %vm828_vm3, %v792_v9 }
 0x111   : > { %1256 = vrot.lane.b32.xlu2 %v1255_v12, %s9414_s30  ;;  %v690_v14 = vpop.f32.mrf.mxu0  ;;  %v2071_v17 = vld [vmem:[#allocation4 + $0x28] sm:$0xff]  ;;  %2297 = vmatpush.bf16.msra.mxu1 %v8843_v8 }
 0x112   : > { %v691_v15 = vadd.f32 %v9666_v25, %v690_v14  ;;  %v2107_v19 = vpack.c.bf16 %v2071_v17, %v2068_v16  ;;  %v8842_v14 = vld [vmem:[%s13286_s3 + $0x20] sm:$0xff] }
 0x114   : > { %v793_v20 = vmax.f32 %v691_v15, 0.0  ;;  %6947 = vmatmul.msk.bf16.gmra.mxu0 %vm563_vm2, %v8827_v13  ;;  %7029 = vmatmul.msk.bf16.vlgmr.msra.gmra.mxu3 %vm828_vm3, %v2107_v19 }
 0x115   : > { %v1297_v22 = vld [vmem:[#allocation3 + $0x70] ss:$2 sm:$0x7f]  ;;  %v1308_v30 = vld [vmem:[#allocation3 + $0x71] ss:$2 sm:$0x7f]  ;;  %2298 = vmatpush.bf16.msra.mxu1 %v8842_v14 }
 0x116   : > { %v1315_v23 = vld [vmem:[#allocation3 + $0x72] ss:$2 sm:$0x7f]  ;;  %v972_v26 = vld [vmem:[#allocation2 + $0x6a] sm:$0x3f]  ;;  %843 = vst.msk [vmem:[#allocation2 + $0x70] sm:$0xff] %vm828_vm3, %v793_v20 }
 0x117   : > { %v971_v24 = vld [vmem:[#allocation2 + $0x62] sm:$0xff]  ;;  %v1299_v27 = vrot.slane %v1297_v22, 3  ;;  %v1317_v28 = vrot.slane %v1315_v23, 3  ;;  %974 = vst.msk [vmem:[#allocation3 + $0x89] sm:$0x3f] %vm945_vm4, %v972_v26  ;;  %v1310_v31 = vrot.slane %v1308_v30, 3 }
 0x118   : > { %973 = vst.msk [vmem:[#allocation3 + $0x81] sm:$0xff] %vm828_vm3, %v971_v24  ;;  %v8841_v20 = vld [vmem:[%s13286_s3 + $0x18] sm:$0xff] }
 0x119   : > { %1300 = vrot.lane.b32.xlu1 %v1299_v27, %s9414_s30  ;;  %1318 = vrot.lane.b32.xlu0 %v1317_v28, %s9412_s25  ;;  %v692_v32 = vpop.f32.mrf.mxu0  ;;  %1312 = vst.msk [vmem:[#allocation4 + $0x38] sm:$0xe0] %vm13302_vm12, %v1310_v31 }
 0x11a   : > { %1289 = vrot.lane.b32.xlu2 %v1288_v29, %s9413_s26  ;;  %v693_v33 = vadd.f32 %v9666_v25, %v692_v32  ;;  %1313 = vst.msk [vmem:[#allocation4 + $0x50] sm:$0xf] %vm13301_vm13, %v1310_v31  ;;  %2299 = vmatpush.bf16.msra.mxu1 %v8841_v20 }
 0x11c   : > { %v794_v35 = vmax.f32 %v693_v33, 0.0 }
 0x11d   : > { %v975_v36 = vld [vmem:[#allocation2 + $0x70] sm:$0xff] }
 0x11e   : > { %977 = vst.msk [vmem:[#allocation3 + $0x91] sm:$0xff] %vm828_vm3, %v975_v36  ;;  %v8840_v36 = vld [vmem:[%s13286_s3 + $0x10] sm:$0xff] }
 0x11f   : > { %844 = vst.msk [vmem:[#allocation2 + $0x78] sm:$0xff] %vm828_vm3, %v794_v35  ;;  %v1324_v37 = vld [vmem:[#allocation3 + $0x80] ss:$2 sm:$0x7f]  ;;  %2300 = vmatpush.bf16.msra.mxu1 %v8840_v36 }
 0x120   : > { %v1326_v38 = vrot.slane %v1324_v37, 3  ;;  %v1333_v39 = vld [vmem:[#allocation3 + $0x81] ss:$2 sm:$0x7f] }
 0x121   : > { %v1335_v41 = vrot.slane %v1333_v39, 3  ;;  %v1366_v42 = vld [vmem:[#allocation3 + $0x82] ss:$2 sm:$0x7f]  ;;  %v695_v43 = vpop.f32.mrf.mxu0 }
 0x122   : > { %1327 = vrot.lane.b32.xlu2 %v1326_v38, %s9413_s26  ;;  %v1368_v44 = vrot.slane %v1366_v42, 4  ;;  %v696_v45 = vadd.f32 %v9666_v25, %v695_v43  ;;  %v1342_v46 = vld [vmem:[#allocation3 + $0x82] ss:$2 sm:$0x7f] }
 0x123   : > { %1336 = vrot.lane.b32.xlu1 %v1335_v41, %s9414_s30  ;;  %v1344_v48 = vrot.slane %v1342_v46, 3  ;;  %v1348_v49 = vld [vmem:[#allocation3 + $0x80] ss:$2 sm:$0x7f] }
 0x124   : > { %1369 = vrot.lane.b32.xlu0 %v1368_v44, %s9413_s26  ;;  %v795_v47 = vmax.f32 %v696_v45, 0.0  ;;  %6948 = vmatmul.msk.bf16.gmra.mxu0 %vm563_vm2, %v8828_v40  ;;  %v1356_v50 = vld [vmem:[#allocation3 + $0x81] ss:$2 sm:$0x7f]  ;;  %v1350_v52 = vrot.slane %v1348_v49, 4 }
 0x125   : > { %1346 = vst.msk [vmem:[#allocation4 + $0x40] sm:$0xe0] %vm13302_vm12, %v1344_v48  ;;  %v1358_v53 = vrot.slane %v1356_v50, 4  ;;  %v8852_v38 = vld [vmem:[%s13286_s3 + $0x70] sm:$0xff]  ;;  %v8839_v40 = vld [vmem:[%s13286_s3 + $0x8] sm:$0xff]  ;;  %vm13309_vm12 = vcmask 785926  }
 0x126   : > { %v976_v51 = vld [vmem:[#allocation2 + $0x78] sm:$0x3f]  ;;  %845 = vst.msk [vmem:[#allocation2 + $0x80] sm:$0xff] %vm828_vm3, %v795_v47  ;;  %2339 = vmatpush.bf16.msra.mxu2 %v8852_v38  ;;  %v8851_v44 = vld [vmem:[%s13286_s3 + $0x68] sm:$0xff]  ;;  %2301 = vmatpush.bf16.msra.mxu1 %v8839_v40 }
 0x127   : > { %978 = vst.msk [vmem:[#allocation3 + $0x99] sm:$0x3f] %vm945_vm4, %v976_v51 }
 0x128   : > { %1347 = vst.msk [vmem:[#allocation4 + $0x58] sm:$0xf] %vm13301_vm13, %v1344_v48  ;;  %vm13307_vm13 = vcmask 783872  }
 0x129   : > { %v697_v54 = vpop.f32.mrf.mxu0  ;;  %1353 = vst.msk [vmem:[#allocation4 + $0x48] sm:$0xf0] %vm13296_vm0, %v1350_v52 }
 0x12a   : > { %v698_v55 = vadd.f32 %v9666_v25, %v697_v54  ;;  %1355 = vst.msk [vmem:[#allocation4 + $0x60] sm:$0x7] %vm13298_vm1, %v1350_v52  ;;  %2340 = vmatpush.bf16.msra.mxu2 %v8851_v44 }
 0x12b   : > { %1359 = vrot.lane.b32.xlu1 %v1358_v53, %s9412_s25  ;;  %v8838_v53 = vld [vmem:[%s13286_s3] sm:$0xff] }
 0x12c   : > { %v796_v56 = vmax.f32 %v698_v55, 0.0  ;;  %v2074_v47 = vld [vmem:[#allocation4 + $0x40] sm:$0xff]  ;;  %2302 = vmatpush.bf16.msra.mxu1 %v8838_v53 }
 0x12d   : > { %v979_v57 = vld [vmem:[#allocation2 + $0x7e] sm:$0xff] }
 0x12e   : > { %981 = vst.msk [vmem:[#allocation3 + $0xa1] sm:$0xff] %vm828_vm3, %v979_v57  ;;  %v1377_v58 = vld [vmem:[#allocation3 + $0x90] ss:$2 sm:$0x7f] }
 0x12f   : > { %846 = vst.msk [vmem:[#allocation2 + $0x88] sm:$0xff] %vm828_vm3, %v796_v56  ;;  %v1379_v59 = vrot.slane %v1377_v58, 4  ;;  %v1395_v60 = vld [vmem:[#allocation3 + $0x92] ss:$2 sm:$0x7f] }
 0x130   : > { %v1397_v61 = vrot.slane %v1395_v60, 4  ;;  %v1388_v1 = vld [vmem:[#allocation3 + $0x91] ss:$2 sm:$0x7f] }
 0x131   : > { %1380 = vrot.lane.b32.xlu2 %v1379_v59, %s9414_s30  ;;  %v700_v0 = vpop.f32.mrf.mxu0  ;;  %v1390_v3 = vrot.slane %v1388_v1, 4  ;;  %v1089_v9 = vpop.permute.xlu0 %1088  ;;  %v8831_v57 = vld [vmem:[%s9537_s21 + $0x98] sm:$0xff]  ;;  %v8850_v58 = vld [vmem:[%s13286_s3 + $0x60] sm:$0xff] }
 0x132   : > { %v701_v2 = vadd.f32 %v9666_v25, %v700_v0  ;;  %1091 = vst.msk [vmem:[#allocation4 + $0x8] sm:$0x7f] %vm13297_vm9, %v1089_v9  ;;  %vm13305_vm9 = vcmask 521472   ;;  %2341 = vmatpush.bf16.msra.mxu2 %v8850_v58 }
 0x133   : > { %1398 = vrot.lane.b32.xlu1 %v1397_v61, %s9412_s25  ;;  %1392 = vst.msk [vmem:[#allocation4 + $0x50] sm:$0xf0] %vm13296_vm0, %v1390_v3 }
 0x134   : > { %v797_v4 = vmax.f32 %v701_v2, 0.0  ;;  %6949 = vmatmul.msk.bf16.gmra.mxu0 %vm563_vm2, %v8829_v62  ;;  %1393 = vst.msk [vmem:[#allocation4 + $0x68] sm:$0x7] %vm13298_vm1, %v1390_v3  ;;  %v8849_v62 = vld [vmem:[%s13286_s3 + $0x58] sm:$0xff] }
 0x136   : > { %v980_v5 = vld [vmem:[#allocation2 + $0x86] sm:$0x3f]  ;;  %847 = vst.msk [vmem:[#allocation2 + $0x90] sm:$0xff] %vm828_vm3, %v797_v4  ;;  %2342 = vmatpush.bf16.msra.mxu2 %v8849_v62 }
 0x137   : > { %982 = vst.msk [vmem:[#allocation3 + $0xa9] sm:$0x3f] %vm945_vm4, %v980_v5  ;;  %v8848_v5 = vld [vmem:[%s13286_s3 + $0x50] sm:$0xff] }
 0x139   : > { %v702_v7 = vpop.f32.mrf.mxu0  ;;  %v1078_v22 = vpop.permute.xlu0 %1077 }
 0x13a   : > { %v703_v10 = vadd.f32 %v9666_v25, %v702_v7  ;;  %1081 = vst.msk [vmem:[#allocation4] sm:$0x7f] %vm13300_vm15, %v1078_v22  ;;  %2343 = vmatpush.bf16.msra.mxu2 %v8848_v5  ;;  %v8834_v5 = vld [vmem:[%s9537_s21 + $0xb0] sm:$0xff] }
 0x13c   : > { %v798_v11 = vmax.f32 %v703_v10, 0.0 }
 0x13d   : > { %v983_v12 = vld [vmem:[#allocation2 + $0x8c] sm:$0xff] }
 0x13e   : > { %985 = vst.msk [vmem:[#allocation3 + $0xb1] sm:$0xff] %vm828_vm3, %v983_v12  ;;  %v1413_v13 = vld [vmem:[#allocation3 + $0xa1] ss:$2 sm:$0x7f] }
 0x13f   : > { %848 = vst.msk [vmem:[#allocation2 + $0x98] sm:$0xff] %vm828_vm3, %v798_v11  ;;  %v1415_v15 = vrot.slane %v1413_v13, 4  ;;  %v1404_v16 = vld [vmem:[#allocation3 + $0xa0] ss:$2 sm:$0x7f] }
 0x140   : > { %v1406_v17 = vrot.slane %v1404_v16, 4  ;;  %v1422_v26 = vld [vmem:[#allocation3 + $0xa2] ss:$2 sm:$0x7f] }
 0x141   : > { %1416 = vrot.lane.b32.xlu2 %v1415_v15, %s9414_s30  ;;  %v705_v19 = vpop.f32.mrf.mxu0  ;;  %v1096_v23 = vpop.permute.xlu1 %1095  ;;  %v1424_v28 = vrot.slane %v1422_v26, 4  ;;  %v9854_v29 = vld [vmem:[#allocation3 + $0xa0] ss:$2 sm:$0x7f] }
 0x142   : > { %1407 = vrot.lane.b32.xlu0 %v1406_v17, %s9413_s26  ;;  %v706_v24 = vadd.f32 %v9666_v25, %v705_v19  ;;  %1098 = vst.msk [vmem:[#allocation4 + $0x8] sm:$0x7f] %vm13295_vm10, %v1096_v23  ;;  %v1446_v31 = vld [vmem:[#allocation3 + $0xa2] ss:$2 sm:$0x7f]  ;;  %v1430_v34 = vrot.slane %v9854_v29, 5 }
 0x143   : > { %v9852_v27 = vpop.permute.xlu2 %1167  ;;  %v1436_v32 = vld [vmem:[#allocation3 + $0xa1] ss:$2 sm:$0x7f]  ;;  %1426 = vst.msk [vmem:[#allocation4 + $0x58] sm:$0xf0] %vm13296_vm0, %v1424_v28  ;;  %v1448_v35 = vrot.slane %v1446_v31, 5  ;;  %v1103_v41 = vpop.permute.xlu0 %1102 }
 0x144   : > { %v799_v30 = vmax.f32 %v706_v24, 0.0  ;;  %6950 = vmatmul.msk.bf16.gmra.mxu0 %vm563_vm2, %v8830_v18  ;;  %vm1432_vm10 = vcmask 261123   ;;  %v1438_v37 = vrot.slane %v1436_v32, 5  ;;  %vm13306_vm0 = vcmask 523527   ;;  %1427 = vst.msk [vmem:[#allocation4 + $0x70] sm:$0x7] %vm13298_vm1, %v1424_v28 }
 0x145   : > { %1433 = vst.msk [vmem:[#allocation4 + $0x60] sm:$0xf8] %vm1432_vm10, %v1430_v34  ;;  %vm13314_vm1 = vcmask 523526   ;;  %v8847_v13 = vld [vmem:[%s13286_s3 + $0x48] sm:$0xff]  ;;  %v8846_v18 = vld [vmem:[%s13286_s3 + $0x40] sm:$0xff] }
 0x146   : > { %v984_v33 = vld [vmem:[#allocation2 + $0x94] sm:$0x3f]  ;;  %849 = vst.msk [vmem:[#allocation2 + $0xa0] sm:$0xff] %vm828_vm3, %v799_v30  ;;  %2344 = vmatpush.bf16.msra.mxu2 %v8847_v13  ;;  %v8832_v19 = vld [vmem:[%s9537_s21 + $0xa0] sm:$0xff] }
 0x147   : > { %986 = vst.msk [vmem:[#allocation3 + $0xb9] sm:$0x3f] %vm945_vm4, %v984_v33 }
 0x148   : > { %1105 = vst.msk [vmem:[#allocation4 + $0x8] sm:$0x7f] %vm13300_vm15, %v1103_v41  ;;  %vm13308_vm15 = vcmask 785927  }
 0x149   : > { %1449 = vrot.lane.b32.xlu2 %v1448_v35, %s9413_s26  ;;  %v707_v39 = vpop.f32.mrf.mxu0  ;;  %v1120_v42 = vpop.permute.xlu1 %1119 }
 0x14a   : > { %1439 = vrot.lane.b32.xlu0 %v1438_v37, %s9412_s25  ;;  %v708_v43 = vadd.f32 %v9666_v25, %v707_v39  ;;  %1123 = vst.msk [vmem:[#allocation4] sm:$0x80] %vm13306_vm0, %v1120_v42  ;;  %v2077_v48 = vld [vmem:[#allocation4 + $0x58] sm:$0xff]  ;;  %2345 = vmatpush.bf16.msra.mxu2 %v8846_v18 }
 0x14b   : > { %v1200_v45 = vpop.permute.xlu2 %1199  ;;  %1125 = vst.msk [vmem:[#allocation4 + $0x18] sm:$0x3f] %vm13305_vm9, %v1120_v42  ;;  %v2110_v51 = vpack.c.bf16 %v2077_v48, %v2074_v47 }
 0x14c   : > { %v800_v46 = vmax.f32 %v708_v43, 0.0  ;;  %1203 = vst.msk [vmem:[#allocation4 + $0x18] sm:$0xc0] %vm13314_vm1, %v1200_v45 }
 0x14d   : > { %v987_v49 = vld [vmem:[#allocation2 + $0x9a] sm:$0xff]  ;;  %v988_v50 = vld [vmem:[#allocation2 + $0xa2] sm:$0x3f]  ;;  %7030 = vmatmul.msk.bf16.gmra.mxu3 %vm828_vm3, %v2110_v51  ;;  %1205 = vst.msk [vmem:[#allocation4 + $0x30] sm:$0x1f] %vm13313_vm14, %v1200_v45 }
 0x14e   : > { %989 = vst.msk [vmem:[#allocation3 + $0xc1] sm:$0xff] %vm828_vm3, %v987_v49  ;;  %v1457_v52 = vld [vmem:[#allocation3 + $0xb0] ss:$2 sm:$0x7f] }
 0x14f   : > { %990 = vst.msk [vmem:[#allocation3 + $0xc9] sm:$0x3f] %vm945_vm4, %v988_v50  ;;  %v1459_v54 = vrot.slane %v1457_v52, 5  ;;  %v1475_v55 = vld [vmem:[#allocation3 + $0xb2] ss:$2 sm:$0x7f] }
 0x150   : > { %850 = vst.msk [vmem:[#allocation2 + $0xa8] sm:$0xff] %vm828_vm3, %v800_v46  ;;  %v1477_v56 = vrot.slane %v1475_v55, 5  ;;  %v1468_v43 = vld [vmem:[#allocation3 + $0xb1] ss:$2 sm:$0x7f] }
 0x151   : > { %1460 = vrot.lane.b32.xlu1 %v1459_v54, %s9414_s30  ;;  %v710_v59 = vpop.f32.mrf.mxu0  ;;  %v1130_v60 = vpop.permute.xlu1 %1129  ;;  %v1470_v45 = vrot.slane %v1468_v43, 5 }
 0x152   : > { %1478 = vrot.lane.b32.xlu0 %v1477_v56, %s9412_s25  ;;  %v711_v61 = vadd.f32 %v9666_v25, %v710_v59  ;;  %1133 = vst.msk [vmem:[#allocation4] sm:$0x80] %vm13308_vm15, %v1130_v60 }
 0x153   : > { %v1210_v63 = vpop.permute.xlu2 %1209  ;;  %1135 = vst.msk [vmem:[#allocation4 + $0x18] sm:$0x3f] %vm13307_vm13, %v1130_v60  ;;  %v1159_v1 = vpop.permute.xlu0 %1158 }
 0x154   : > { %v801_v0 = vmax.f32 %v711_v61, 0.0  ;;  %6951 = vmatmul.msk.bf16.gmra.mxu0 %vm563_vm2, %v8831_v57  ;;  %1213 = vst.msk [vmem:[#allocation4 + $0x18] sm:$0xc0] %vm13309_vm12, %v1210_v63  ;;  %v9973_v61 = vld [vmem:[%s13339_s2] ss:$0 sm:$0xff]  ;;  %s9294_s2 = smul.u32 56, %s9493_s17 }
 0x155   : > { %1215 = vst.msk [vmem:[#allocation4 + $0x30] sm:$0x1f] %vm13312_vm8, %v1210_v63 }
 0x156   : > { %851 = vst.msk [vmem:[#allocation2 + $0xb0] sm:$0xff] %vm828_vm3, %v801_v0  ;;  %v1484_v2 = vld [vmem:[#allocation3 + $0xc0] ss:$2 sm:$0x7f] }
 0x157   : > { %v991_v3 = vld [vmem:[#allocation2 + $0xa8] sm:$0xff]  ;;  %v1486_v4 = vrot.slane %v1484_v2, 5  ;;  %1161 = vst.msk [vmem:[#allocation4 + $0x8] sm:$0x80] %vm13306_vm0, %v1159_v1  ;;  %vm13310_vm0 = vcmask 1048326  }
 0x158   : > { %993 = vst.msk [vmem:[#allocation3 + $0xd1] sm:$0xff] %vm828_vm3, %v991_v3  ;;  %v1493_v6 = vld [vmem:[#allocation3 + $0xc1] ss:$2 sm:$0x7f] }
 0x159   : > { %1487 = vrot.lane.b32.xlu2 %v1486_v4, %s9413_s26  ;;  %v1495_v7 = vrot.slane %v1493_v6, 5  ;;  %v1526_v8 = vld [vmem:[#allocation3 + $0xc2] ss:$2 sm:$0x7f]  ;;  %v712_v9 = vpop.f32.mrf.mxu0  ;;  %1162 = vst.msk [vmem:[#allocation4 + $0x20] sm:$0x3f] %vm13305_vm9, %v1159_v1  ;;  %v1141_v10 = vpop.permute.xlu1 %1140 }
 0x15a   : > { %v1528_v11 = vrot.slane %v1526_v8, 6  ;;  %v713_v12 = vadd.f32 %v9666_v25, %v712_v9  ;;  %1170 = vst.msk [vmem:[#allocation4 + $0x8] sm:$0x80] %vm13308_vm15, %v9852_v27  ;;  %vm1145_vm9 = vcmask 1046272   ;;  %vm13315_vm15 = vcmask 254976  }
 0x15b   : > { %1496 = vrot.lane.b32.xlu1 %v1495_v7, %s9414_s30  ;;  %1171 = vst.msk [vmem:[#allocation4 + $0x20] sm:$0x3f] %vm13307_vm13, %v9852_v27  ;;  %v1221_v15 = vpop.permute.xlu2 %1220  ;;  %v1516_v17 = vld [vmem:[#allocation3 + $0xc1] ss:$2 sm:$0x7f]  ;;  %vm13311_vm13 = vcmask 1045248  }
 0x15c   : > { %1529 = vrot.lane.b32.xlu0 %v1528_v11, %s9413_s26  ;;  %v802_v14 = vmax.f32 %v713_v12, 0.0  ;;  %1144 = vst.msk [vmem:[#allocation4] sm:$0x80] %vm1143_vm7, %v1141_v10  ;;  %v1502_v20 = vld [vmem:[#allocation3 + $0xc2] ss:$2 sm:$0x7f] }
 0x15d   : > { %v992_v16 = vld [vmem:[#allocation2 + $0xb0] sm:$0x3f]  ;;  %1146 = vst.msk [vmem:[#allocation4 + $0x18] sm:$0x3f] %vm1145_vm9, %v1141_v10  ;;  %v1518_v21 = vrot.slane %v1516_v17, 6  ;;  %v1504_v26 = vrot.slane %v1502_v20, 5 }
 0x15e   : > { %994 = vst.msk [vmem:[#allocation3 + $0xd9] sm:$0x3f] %vm945_vm4, %v992_v16  ;;  %v1508_v47 = vld [vmem:[#allocation3 + $0xc0] ss:$2 sm:$0x7f] }
 0x15f   : > { %852 = vst.msk [vmem:[#allocation2 + $0xb8] sm:$0xff] %vm828_vm3, %v802_v14  ;;  %v1510_v50 = vrot.slane %v1508_v47, 6 }
 0x160   : > { %1224 = vst.msk [vmem:[#allocation4 + $0x18] sm:$0xc0] %vm13310_vm0, %v1221_v15 }
 0x161   : > { %v715_v22 = vpop.f32.mrf.mxu0  ;;  %1226 = vst.msk [vmem:[#allocation4 + $0x30] sm:$0x1f] %vm13311_vm13, %v1221_v15  ;;  %v1177_v23 = vpop.permute.xlu1 %1176 }
 0x162   : > { %v716_v24 = vadd.f32 %v9666_v25, %v715_v22  ;;  %1179 = vst.msk [vmem:[#allocation4 + $0x8] sm:$0x80] %vm1143_vm7, %v1177_v23 }
 0x163   : > { %1519 = vrot.lane.b32.xlu1 %v1518_v21, %s9412_s25  ;;  %1180 = vst.msk [vmem:[#allocation4 + $0x20] sm:$0x3f] %vm1145_vm9, %v1177_v23  ;;  %v1248_v31 = vpop.permute.xlu2 %1247  ;;  %v2066_v36 = vld [vmem:[#allocation4] sm:$0xff] }
 0x164   : > { %v803_v27 = vmax.f32 %v716_v24, 0.0  ;;  %6952 = vmatmul.msk.bf16.gmra.mxu0 %vm563_vm2, %v8832_v19  ;;  %1506 = vst.msk [vmem:[#allocation4 + $0x70] sm:$0xf8] %vm1432_vm10, %v1504_v26 }
 0x165   : > { %v1537_v28 = vld [vmem:[#allocation3 + $0xd0] ss:$2 sm:$0x7f]  ;;  %1507 = vst.msk [vmem:[#allocation4 + $0x88] sm:$0x3] %vm13315_vm15, %v1504_v26 }
 0x166   : > { %v1555_v30 = vld [vmem:[#allocation3 + $0xd2] ss:$2 sm:$0x7f]  ;;  %853 = vst.msk [vmem:[#allocation2 + $0xc0] sm:$0xff] %vm828_vm3, %v803_v27  ;;  %v1539_v32 = vrot.slane %v1537_v28, 6 }
 0x167   : > { %v995_v33 = vld [vmem:[#allocation2 + $0xb6] sm:$0xff]  ;;  %v1557_v35 = vrot.slane %v1555_v30, 6  ;;  %v2069_v37 = vld [vmem:[#allocation4 + $0x18] sm:$0xff]  ;;  %1435 = vst.msk [vmem:[#allocation4 + $0x78] sm:$0x3] %vm13315_vm15, %v1430_v34  ;;  %v8833_v34 = vld [vmem:[%s9537_s21 + $0xa8] sm:$0xff] }
 0x168   : > { %997 = vst.msk [vmem:[#allocation3 + $0xe1] sm:$0xff] %vm828_vm3, %v995_v33  ;;  %1540 = vrot.lane.b32.xlu2 %v1539_v32, %s9414_s30  ;;  %v2105_v38 = vpack.c.bf16 %v2069_v37, %v2066_v36  ;;  %v1548_v0 = vld [vmem:[#allocation3 + $0xd1] ss:$2 sm:$0x7f] }
 0x169   : > { %v717_v39 = vpop.f32.mrf.mxu0  ;;  %1472 = vst.msk [vmem:[#allocation4 + $0x68] sm:$0xf8] %vm1432_vm10, %v1470_v45  ;;  %v2067_v56 = vld [vmem:[#allocation4 + $0x8] sm:$0xff]  ;;  %v1550_v4 = vrot.slane %v1548_v0, 6  ;;  %v8835_v27 = vld [vmem:[%s9537_s21 + $0xb8] sm:$0xff] }
 0x16a   : > { %v718_v40 = vadd.f32 %v9666_v25, %v717_v39  ;;  %v1239_v41 = vpop.permute.xlu1 %1238  ;;  %2303 = vmatmul.bf16.vlgmr.msra.gmra.mxu1 %v2105_v38  ;;  %1473 = vst.msk [vmem:[#allocation4 + $0x80] sm:$0x3] %vm13315_vm15, %v1470_v45  ;;  %vm13317_vm15 = vcmask 1048325  }
 0x16b   : > { %1558 = vrot.lane.b32.xlu1 %v1557_v35, %s9412_s25  ;;  %1241 = vst.msk [vmem:[#allocation4 + $0x20] sm:$0xc0] %vm13314_vm1, %v1239_v41  ;;  %v1257_v29 = vpop.permute.xlu2 %1256  ;;  %vm13318_vm1 = vcmask 781824   ;;  %v2080_v7 = vld [vmem:[#allocation4 + $0x70] sm:$0xff] }
 0x16c   : > { %v804_v42 = vmax.f32 %v718_v40, 0.0  ;;  %1242 = vst.msk [vmem:[#allocation4 + $0x38] sm:$0x1f] %vm13313_vm14, %v1239_v41  ;;  %vm13319_vm14 = vcmask 785925   ;;  %v420_v41 = vld [vmem:[%s9537_s21 + $0xc0] sm:$0xf] }
 0x16d   : > { %v996_v44 = vld [vmem:[#allocation2 + $0xbe] sm:$0x3f]  ;;  %1250 = vst.msk [vmem:[#allocation4 + $0x20] sm:$0xc0] %vm13309_vm12, %v1248_v31  ;;  %vm1512_vm12 = vcmask 261122  }
 0x16e   : > { %998 = vst.msk [vmem:[#allocation3 + $0xe9] sm:$0x3f] %vm945_vm4, %v996_v44 }
 0x16f   : > { %854 = vst.msk [vmem:[#allocation2 + $0xc8] sm:$0xff] %vm828_vm3, %v804_v42 }
 0x170   : > { %1251 = vst.msk [vmem:[#allocation4 + $0x38] sm:$0x1f] %vm13312_vm8, %v1248_v31  ;;  %vm1284_vm8 = vcmask 519424  }
 0x171   : > { %1259 = vst.msk [vmem:[#allocation4 + $0x20] sm:$0xc0] %vm13310_vm0, %v1257_v29  ;;  %v720_v46 = vpop.f32.mrf.mxu0  ;;  %vm1514_vm0 = vcmask 253952  }
 0x172   : > { %1260 = vst.msk [vmem:[#allocation4 + $0x38] sm:$0x1f] %vm13311_vm13, %v1257_v29  ;;  %v721_v48 = vadd.f32 %v9666_v25, %v720_v46  ;;  %vm1282_vm13 = vcmask 523525   ;;  %v526_v46 = vunpack.c.l.b16 %v420_v41 }
 0x173   : > { %1513 = vst.msk [vmem:[#allocation4 + $0x78] sm:$0xfc] %vm1512_vm12, %v1510_v50 }
 0x174   : > { %v805_v49 = vmax.f32 %v721_v48, 0.0  ;;  %6953 = vmatmul.msk.bf16.gmra.mxu0 %vm563_vm2, %v8833_v34  ;;  %1515 = vst.msk [vmem:[#allocation4 + $0x90] sm:$0x1] %vm1514_vm0, %v1510_v50  ;;  %v1290_v1 = vpop.permute.xlu2 %1289 }
 0x175   : > { %v1573_v51 = vld [vmem:[#allocation3 + $0xe1] ss:$2 sm:$0x7f]  ;;  %v1564_v52 = vld [vmem:[#allocation3 + $0xe0] ss:$2 sm:$0x7f] }
 0x176   : > { %v999_v53 = vld [vmem:[#allocation2 + $0xc4] sm:$0xff]  ;;  %855 = vst.msk [vmem:[#allocation2 + $0xd0] sm:$0xff] %vm828_vm3, %v805_v49  ;;  %v1575_v54 = vrot.slane %v1573_v51, 6  ;;  %v1566_v55 = vrot.slane %v1564_v52, 6  ;;  %v551_v51 = vpack.c.b16 %v526_v46, %v526_v46 }
 0x177   : > { %1001 = vst.msk [vmem:[#allocation3 + $0x111] sm:$0xff] %vm828_vm3, %v999_v53  ;;  %v1582_v25 = vld [vmem:[#allocation3 + $0xe2] ss:$2 sm:$0x7f] }
 0x178   : > { %v2070_v57 = vld [vmem:[#allocation4 + $0x20] sm:$0xff]  ;;  %1576 = vrot.lane.b32.xlu2 %v1575_v54, %s9414_s30  ;;  %1567 = vrot.lane.b32.xlu0 %v1566_v55, %s9413_s26  ;;  %v1584_v58 = vrot.slane %v1582_v25, 6  ;;  %1552 = vst.msk [vmem:[#allocation4 + $0x80] sm:$0xfc] %vm1512_vm12, %v1550_v4 }
 0x179   : > { %v2106_v59 = vpack.c.bf16 %v2070_v57, %v2067_v56  ;;  %v722_v60 = vpop.f32.mrf.mxu0  ;;  %1553 = vst.msk [vmem:[#allocation4 + $0x98] sm:$0x1] %vm1514_vm0, %v1550_v4 }
 0x17a   : > { %v723_v62 = vadd.f32 %v9973_v61, %v722_v60  ;;  %v1280_v63 = vpop.permute.xlu0 %1279  ;;  %1586 = vst.msk [vmem:[#allocation4 + $0x88] sm:$0xfc] %vm1512_vm12, %v1584_v58  ;;  %vm13316_vm12 = vcmask 1044224  }
 0x17b   : > { %2346 = vmatmul.bf16.vlgmr.msra.gmra.mxu2 %v2106_v59  ;;  %1283 = vst.msk [vmem:[#allocation4 + $0x30] sm:$0xe0] %vm1282_vm13, %v1280_v63 }
 0x17c   : > { %v806_v2 = vmax.f32 %v723_v62, 0.0  ;;  %1285 = vst.msk [vmem:[#allocation4 + $0x48] sm:$0xf] %vm1284_vm8, %v1280_v63  ;;  %v1328_v26 = vpop.permute.xlu2 %1327 }
 0x17d   : > { %v1000_v3 = vld [vmem:[#allocation2 + $0xcc] sm:$0x3f]  ;;  %1293 = vst.msk [vmem:[#allocation4 + $0x30] sm:$0xe0] %vm13319_vm14, %v1290_v1 }
 0x17e   : > { %1002 = vst.msk [vmem:[#allocation3 + $0x119] sm:$0x3f] %vm945_vm4, %v1000_v3 }
 0x17f   : > { %856 = vst.msk [vmem:[#allocation2 + $0xd8] sm:$0xff] %vm828_vm3, %v806_v2 }
 0x180   : > { %1295 = vst.msk [vmem:[#allocation4 + $0x48] sm:$0xf] %vm13318_vm1, %v1290_v1 }
 0x181   : > { %v725_v6 = vpop.f32.mrf.mxu0  ;;  %v2083_v8 = vld [vmem:[#allocation4 + $0x88] sm:$0xff]  ;;  %1587 = vst.msk [vmem:[#allocation4 + $0xa0] sm:$0x1] %vm1514_vm0, %v1584_v58  ;;  %vm13331_vm0 = vcmask 523524  }
 0x182   : > { %v726_v9 = vadd.f32 %v9973_v61, %v725_v6  ;;  %v2113_v10 = vpack.c.bf16 %v2083_v8, %v2080_v7 }
 0x184   : > { %v807_v11 = vmax.f32 %v726_v9, 0.0  ;;  %7031 = vmatmul.msk.bf16.gmra.mxu3 %vm828_vm3, %v2113_v10  ;;  %6954 = vmatmul.msk.bf16.gmra.mxu0 %vm563_vm2, %v8834_v5 }
 0x185   : > { %v1629_v12 = vld [vmem:[#allocation3 + $0x112] ss:$2 sm:$0x7f]  ;;  %v1623_v33 = vld [vmem:[#allocation3 + $0x111] ss:$2 sm:$0x7f] }
 0x186   : > { %v1003_v13 = vld [vmem:[#allocation2 + $0xd2] sm:$0xff]  ;;  %857 = vst.msk [vmem:[#allocation2 + $0xe0] sm:$0xff] %vm828_vm3, %v807_v11  ;;  %v1631_v14 = vrot.slane %v1629_v12, 7  ;;  %v1004_v15 = vld [vmem:[#allocation2 + $0xda] sm:$0x3f]  ;;  %v1625_v40 = vrot.slane %v1623_v33, 7 }
 0x187   : > { %1005 = vst.msk [vmem:[#allocation3 + $0x121] sm:$0xff] %vm828_vm3, %v1003_v13  ;;  %v1614_v20 = vld [vmem:[#allocation3 + $0x110] ss:$2 sm:$0x7f] }
 0x188   : > { %1632 = vrot.lane.b32.xlu0 %v1631_v14, %s9412_s25  ;;  %1006 = vst.msk [vmem:[#allocation3 + $0x129] sm:$0x3f] %vm945_vm4, %v1004_v15  ;;  %v1616_v23 = vrot.slane %v1614_v20, 7 }
 0x189   : > { %v727_v16 = vpop.f32.mrf.mxu0  ;;  %1627 = vst.msk [vmem:[#allocation4 + $0x98] sm:$0xfe] %vm1593_vm11, %v1625_v40 }
 0x18a   : > { %v728_v17 = vadd.f32 %v9973_v61, %v727_v16 }
 0x18b   : > { %v1301_v18 = vpop.permute.xlu1 %1300  ;;  %v1319_v19 = vpop.permute.xlu0 %1318 }
 0x18c   : > { %1304 = vst.msk [vmem:[#allocation4 + $0x30] sm:$0xe0] %vm13317_vm15, %v1301_v18  ;;  %v808_v21 = vmax.f32 %v728_v17, 0.0  ;;  %v1381_v55 = vpop.permute.xlu2 %1380 }
 0x18d   : > { %1306 = vst.msk [vmem:[#allocation4 + $0x48] sm:$0xf] %vm13316_vm12, %v1301_v18  ;;  %v1007_v22 = vld [vmem:[#allocation2 + $0xe0] sm:$0xff] }
 0x18e   : > { %1321 = vst.msk [vmem:[#allocation4 + $0x38] sm:$0xe0] %vm1282_vm13, %v1319_v19 }
 0x18f   : > { %1009 = vst.msk [vmem:[#allocation3 + $0x131] sm:$0xff] %vm828_vm3, %v1007_v22  ;;  %v1660_v24 = vld [vmem:[#allocation3 + $0x121] ss:$2 sm:$0x7f] }
 0x190   : > { %858 = vst.msk [vmem:[#allocation2 + $0xe8] sm:$0xff] %vm828_vm3, %v808_v21  ;;  %1662 = vrot.lane.b32.xlu1 %v1660_v24, %s9412_s25  ;;  %1617 = vrot.lane.b32.xlu0 %v1616_v23, %s9414_s30  ;;  %v1637_v31 = vld [vmem:[#allocation3 + $0x120] ss:$2 sm:$0x7f] }
 0x191   : > { %1322 = vst.msk [vmem:[#allocation4 + $0x50] sm:$0xf] %vm1284_vm8, %v1319_v19  ;;  %v730_v28 = vpop.f32.mrf.mxu0  ;;  %v1666_v36 = vld [vmem:[#allocation3 + $0x122] ss:$2 sm:$0x7f]  ;;  %v1639_v37 = vrot.slane %v1637_v31, 7 }
 0x192   : > { %1330 = vst.msk [vmem:[#allocation4 + $0x38] sm:$0xe0] %vm13319_vm14, %v1328_v26  ;;  %v731_v30 = vadd.f32 %v9973_v61, %v730_v28  ;;  %v1653_v39 = vld [vmem:[#allocation3 + $0x122] ss:$2 sm:$0x7f]  ;;  %vm13320_vm14 = vcmask 1043200  }
 0x193   : > { %1331 = vst.msk [vmem:[#allocation4 + $0x50] sm:$0xf] %vm13318_vm1, %v1328_v26  ;;  %v1655_v42 = vrot.slane %v1653_v39, 7  ;;  %v1658_v44 = vld [vmem:[#allocation3 + $0x120] ss:$2 sm:$0x7f] }
 0x194   : > { %v809_v32 = vmax.f32 %v731_v30, 0.0  ;;  %6955 = vmatmul.msk.bf16.gmra.mxu0 %vm563_vm2, %v8835_v27  ;;  %v1645_v29 = vld [vmem:[#allocation3 + $0x121] ss:$2 sm:$0x7f]  ;;  %1659 = vst.msk [vmem:[#allocation4 + $0xa8] sm:$0x7f] %vm1056_vm5, %v1658_v44 }
 0x195   : > { %v1337_v35 = vpop.permute.xlu1 %1336  ;;  %1657 = vst.msk [vmem:[#allocation4 + $0xa0] sm:$0xfe] %vm1593_vm11, %v1655_v42  ;;  %v1647_v49 = vrot.slane %v1645_v29, 7  ;;  %vm13322_vm1 = vcmask 780800   ;;  %vm13321_vm11 = vcmask 1048324   ;;  %v2072_v63 = vld [vmem:[#allocation4 + $0x30] sm:$0xff] }
 0x196   : > { %859 = vst.msk [vmem:[#allocation2 + $0xf0] sm:$0xff] %vm828_vm3, %v809_v32  ;;  %v1370_v52 = vpop.permute.xlu0 %1369 }
 0x197   : > { %v1008_v38 = vld [vmem:[#allocation2 + $0xe8] sm:$0x3f]  ;;  %1339 = vst.msk [vmem:[#allocation4 + $0x38] sm:$0xe0] %vm13317_vm15, %v1337_v35  ;;  %vm13323_vm15 = vcmask 785924  }
 0x198   : > { %1340 = vst.msk [vmem:[#allocation4 + $0x50] sm:$0xf] %vm13316_vm12, %v1337_v35  ;;  %1668 = vrot.lane.b32.xlu1 %v1666_v36, %s9413_s26  ;;  %1640 = vrot.lane.b32.xlu0 %v1639_v37, %s9413_s26  ;;  %vm13330_vm12 = vcmask 518400  }
 0x199   : > { %v732_v43 = vpop.f32.mrf.mxu0  ;;  %1010 = vst.msk [vmem:[#allocation3 + $0x139] sm:$0x3f] %vm945_vm4, %v1008_v38 }
 0x19a   : > { %v733_v45 = vadd.f32 %v9973_v61, %v732_v43 }
 0x19b   : > { %v1417_v14 = vpop.permute.xlu2 %1416 }
 0x19c   : > { %v810_v34 = vmax.f32 %v733_v45, 0.0 }
 0x19d   : > { %v1011_v47 = vld [vmem:[#allocation2 + $0xee] sm:$0xff]  ;;  %v1360_v48 = vpop.permute.xlu1 %1359 }
 0x19e   : > { %1013 = vst.msk [vmem:[#allocation3 + $0x141] sm:$0xff] %vm828_vm3, %v1011_v47  ;;  %v2073_v28 = vld [vmem:[#allocation4 + $0x38] sm:$0xff] }
 0x19f   : > { %860 = vst.msk [vmem:[#allocation2 + $0xf8] sm:$0xff] %vm828_vm3, %v810_v34 }
 0x1a0   : > { %1363 = vst.msk [vmem:[#allocation4 + $0x48] sm:$0xf0] %vm13331_vm0, %v1360_v48  ;;  %v1683_v50 = vld [vmem:[#allocation3 + $0x132] ss:$2 sm:$0x7f]  ;;  %1648 = vrot.lane.b32.xlu0 %v1647_v49, %s9414_s30 }
 0x1a1   : > { %1365 = vst.msk [vmem:[#allocation4 + $0x60] sm:$0x7] %vm13330_vm12, %v1360_v48  ;;  %1685 = vrot.lane.b32.xlu1 %v1683_v50, %s9412_s25  ;;  %v735_v53 = vpop.f32.mrf.mxu0  ;;  %v1680_v58 = vld [vmem:[#allocation3 + $0x131] ss:$2 sm:$0x7f] }
 0x1a2   : > { %1373 = vst.msk [vmem:[#allocation4 + $0x48] sm:$0xf0] %vm13323_vm15, %v1370_v52  ;;  %v736_v54 = vadd.f32 %v9973_v61, %v735_v53  ;;  %v1673_v59 = vld [vmem:[#allocation3 + $0x130] ss:$2 sm:$0x7f] }
 0x1a3   : > { %1375 = vst.msk [vmem:[#allocation4 + $0x60] sm:$0x7] %vm13322_vm1, %v1370_v52  ;;  %v1450_v31 = vpop.permute.xlu2 %1449 }
 0x1a4   : > { %1384 = vst.msk [vmem:[#allocation4 + $0x48] sm:$0xf0] %vm13321_vm11, %v1381_v55  ;;  %v811_v25 = vmax.f32 %v736_v54, 0.0  ;;  %6956 = vmatmul.msk.bf16.gmra.mxu0 %vm563_vm2, %v551_v51  ;;  %vm13329_vm2 = vcmask 523523  }
 0x1a5   : > { %1386 = vst.msk [vmem:[#allocation4 + $0x60] sm:$0x7] %vm13320_vm14, %v1381_v55  ;;  %v1399_v56 = vpop.permute.xlu1 %1398 }
 0x1a6   : > { %861 = vst.msk [vmem:[#allocation2 + $0x100] sm:$0xff] %vm828_vm3, %v811_v25  ;;  %v1012_v57 = vld [vmem:[#allocation2 + $0xf6] sm:$0x3f]  ;;  %v2086_v25 = vld [vmem:[#allocation4 + $0xa0] sm:$0xff] }
 0x1a7   : > { %1401 = vst.msk [vmem:[#allocation4 + $0x50] sm:$0xf0] %vm13331_vm0, %v1399_v56 }
 0x1a8   : > { %1402 = vst.msk [vmem:[#allocation4 + $0x68] sm:$0x7] %vm13330_vm12, %v1399_v56  ;;  %vm13341_vm12 = vcmask 258048  }
 0x1a9   : > { %1675 = vrot.lane.b32.xlu1 %v1673_v59, %s9414_s30  ;;  %v737_v60 = vpop.f32.mrf.mxu0  ;;  %1014 = vst.msk [vmem:[#allocation3 + $0x149] sm:$0x3f] %vm945_vm4, %v1012_v57 }
 0x1aa   : > { %v738_v62 = vadd.f32 %v9973_v61, %v737_v60  ;;  %1681 = vst.msk [vmem:[#allocation4 + $0xb0] sm:$0x7f] %vm1056_vm5, %v1680_v58 }
 0x1ab   : > { %v2075_v0 = vld [vmem:[#allocation4 + $0x48] sm:$0xff] }
 0x1ac   : > { %v2108_v1 = vpack.c.bf16 %v2075_v0, %v2072_v63  ;;  %v812_v2 = vmax.f32 %v738_v62, 0.0 }
 0x1ad   : > { %v1015_v3 = vld [vmem:[#allocation2 + $0xfc] sm:$0xff] }
 0x1ae   : > { %1017 = vst.msk [vmem:[#allocation3 + $0x151] sm:$0xff] %vm828_vm3, %v1015_v3  ;;  %2308 = vmatmul.bf16.gmra.mxu1 %v2108_v1 }
 0x1af   : > { %862 = vst.msk [vmem:[#allocation2 + $0x108] sm:$0xff] %vm828_vm3, %v812_v2 }
 0x1b0   : > { %v1690_v4 = vld [vmem:[#allocation3 + $0x140] ss:$2 sm:$0x7f]  ;;  %v1712_v5 = vld [vmem:[#allocation3 + $0x141] ss:$2 sm:$0x7f] }
 0x1b1   : > { %1692 = vrot.lane.b32.xlu1 %v1690_v4, %s9413_s26  ;;  %v1714_v6 = vrot.slane %v1712_v5, 1  ;;  %v740_v7 = vpop.f32.mrf.mxu0  ;;  %v1697_v12 = vld [vmem:[#allocation3 + $0x141] ss:$2 sm:$0x7f] }
 0x1b2   : > { %v741_v8 = vadd.f32 %v9973_v61, %v740_v7  ;;  %v1720_v13 = vld [vmem:[#allocation3 + $0x142] ss:$2 sm:$0x7f] }
 0x1b3   : > { %1715 = vrot.lane.b32.xlu2 %v1714_v6, %s9412_s25  ;;  %v1704_v15 = vld [vmem:[#allocation3 + $0x142] ss:$2 sm:$0x7f]  ;;  %v1722_v17 = vrot.slane %v1720_v13, 1  ;;  %v1488_v43 = vpop.permute.xlu2 %1487 }
 0x1b4   : > { %v813_v9 = vmax.f32 %v741_v8, 0.0  ;;  %v1408_v10 = vpop.permute.xlu0 %1407  ;;  %v10047_v16 = vld [vmem:[#allocation3 + $0x140] ss:$2 sm:$0x7f]  ;;  %1705 = vst.msk [vmem:[#allocation4 + $0xb8] sm:$0x7f] %vm1056_vm5, %v1704_v15 }
 0x1b5   : > { %1410 = vst.msk [vmem:[#allocation4 + $0x50] sm:$0xf0] %vm13323_vm15, %v1408_v10  ;;  %v1708_v19 = vrot.slane %v10047_v16, 1  ;;  %vm13324_vm5 = vcmask 779776   ;;  %vm13325_vm15 = vcmask 1042176  }
 0x1b6   : > { %v1016_v11 = vld [vmem:[#allocation2 + $0x104] sm:$0x3f]  ;;  %863 = vst.msk [vmem:[#allocation2 + $0x110] sm:$0xff] %vm828_vm3, %v813_v9 }
 0x1b7   : > { %1018 = vst.msk [vmem:[#allocation3 + $0x159] sm:$0x3f] %vm945_vm4, %v1016_v11 }
 0x1b8   : > { %1411 = vst.msk [vmem:[#allocation4 + $0x68] sm:$0x7] %vm13322_vm1, %v1408_v10  ;;  %vm13326_vm1 = vcmask 1048323  }
 0x1b9   : > { %1419 = vst.msk [vmem:[#allocation4 + $0x50] sm:$0xf0] %vm13321_vm11, %v1417_v14  ;;  %1699 = vrot.lane.b32.xlu1 %v1697_v12, %s9414_s30  ;;  %v742_v18 = vpop.f32.mrf.mxu0  ;;  %vm13327_vm11 = vcmask 785923  }
 0x1ba   : > { %1420 = vst.msk [vmem:[#allocation4 + $0x68] sm:$0x7] %vm13320_vm14, %v1417_v14  ;;  %v743_v20 = vadd.f32 %v9973_v61, %v742_v18  ;;  %vm13328_vm14 = vcmask 517376  }
 0x1bb   : > { %1723 = vrot.lane.b32.xlu2 %v1722_v17, %s9413_s26  ;;  %1710 = vst.msk [vmem:[#allocation4 + $0xa8] sm:$0x80] %vm1113_vm6, %v1708_v19 }
 0x1bc   : > { %v814_v21 = vmax.f32 %v743_v20, 0.0  ;;  %v1440_v22 = vpop.permute.xlu0 %1439  ;;  %1711 = vst.msk [vmem:[#allocation4 + $0xc0] sm:$0x3f] %vm945_vm4, %v1708_v19 }
 0x1bd   : > { %v1019_v23 = vld [vmem:[#allocation2 + $0x10a] sm:$0xff]  ;;  %v1020_v24 = vld [vmem:[#allocation2 + $0x112] sm:$0x3f]  ;;  %1443 = vst.msk [vmem:[#allocation4 + $0x60] sm:$0xf8] %vm13329_vm2, %v1440_v22 }
 0x1be   : > { %1021 = vst.msk [vmem:[#allocation3 + $0x161] sm:$0xff] %vm828_vm3, %v1019_v23  ;;  %v1745_v26 = vld [vmem:[#allocation3 + $0x152] ss:$2 sm:$0x7f] }
 0x1bf   : > { %1022 = vst.msk [vmem:[#allocation3 + $0x169] sm:$0x3f] %vm945_vm4, %v1020_v24  ;;  %v1747_v27 = vrot.slane %v1745_v26, 1  ;;  %v1729_v39 = vld [vmem:[#allocation3 + $0x150] ss:$2 sm:$0x7f] }
 0x1c0   : > { %864 = vst.msk [vmem:[#allocation2 + $0x118] sm:$0xff] %vm828_vm3, %v814_v21  ;;  %v2076_v30 = vld [vmem:[#allocation4 + $0x50] sm:$0xff]  ;;  %v1731_v44 = vrot.slane %v1729_v39, 1 }
 0x1c1   : > { %1445 = vst.msk [vmem:[#allocation4 + $0x78] sm:$0x3] %vm13328_vm14, %v1440_v22  ;;  %v2109_v32 = vpack.c.bf16 %v2076_v30, %v2073_v28  ;;  %v745_v33 = vpop.f32.mrf.mxu0  ;;  %v1738_v51 = vld [vmem:[#allocation3 + $0x151] ss:$2 sm:$0x7f] }
 0x1c2   : > { %v746_v35 = vadd.f32 %v9973_v61, %v745_v33  ;;  %1453 = vst.msk [vmem:[#allocation4 + $0x60] sm:$0xf8] %vm13327_vm11, %v1450_v31  ;;  %v1740_v52 = vrot.slane %v1738_v51, 1  ;;  %v1541_v7 = vpop.permute.xlu2 %1540 }
 0x1c3   : > { %2351 = vmatmul.bf16.gmra.mxu2 %v2109_v32  ;;  %1748 = vrot.lane.b32.xlu2 %v1747_v27, %s9412_s25  ;;  %v1461_v36 = vpop.permute.xlu1 %1460  ;;  %1455 = vst.msk [vmem:[#allocation4 + $0x78] sm:$0x3] %vm13324_vm5, %v1450_v31 }
 0x1c4   : > { %v815_v37 = vmax.f32 %v746_v35, 0.0  ;;  %1464 = vst.msk [vmem:[#allocation4 + $0x60] sm:$0xf8] %vm13326_vm1, %v1461_v36  ;;  %v1479_v38 = vpop.permute.xlu0 %1478 }
 0x1c5   : > { %1466 = vst.msk [vmem:[#allocation4 + $0x78] sm:$0x3] %vm13325_vm15, %v1461_v36 }
 0x1c6   : > { %865 = vst.msk [vmem:[#allocation2 + $0x120] sm:$0xff] %vm828_vm3, %v815_v37  ;;  %v1784_v40 = vld [vmem:[#allocation3 + $0x161] ss:$2 sm:$0x7f] }
 0x1c7   : > { %v1023_v41 = vld [vmem:[#allocation2 + $0x118] sm:$0xff]  ;;  %1481 = vst.msk [vmem:[#allocation4 + $0x68] sm:$0xf8] %vm13329_vm2, %v1479_v38  ;;  %v1786_v42 = vrot.slane %v1784_v40, 2  ;;  %vm13340_vm2 = vcmask 261126  }
 0x1c8   : > { %1025 = vst.msk [vmem:[#allocation3 + $0x171] sm:$0xff] %vm828_vm3, %v1023_v41  ;;  %v1772_v29 = vld [vmem:[#allocation3 + $0x162] ss:$2 sm:$0x7f]  ;;  %vm13342_vm0 = vmmov %vm13340_vm2 }
 0x1c9   : > { %1482 = vst.msk [vmem:[#allocation4 + $0x80] sm:$0x3] %vm13328_vm14, %v1479_v38  ;;  %1787 = vrot.lane.b32.xlu0 %v1786_v42, %s9412_s25  ;;  %v747_v45 = vpop.f32.mrf.mxu0  ;;  %v1774_v46 = vrot.slane %v1772_v29, 1  ;;  %v1754_v50 = vld [vmem:[#allocation3 + $0x160] ss:$2 sm:$0x7f] }
 0x1ca   : > { %1490 = vst.msk [vmem:[#allocation4 + $0x68] sm:$0xf8] %vm13327_vm11, %v1488_v43  ;;  %v748_v34 = vadd.f32 %v9973_v61, %v747_v45  ;;  %v1756_v53 = vrot.slane %v1754_v50, 1  ;;  %v1763_v59 = vld [vmem:[#allocation3 + $0x161] ss:$2 sm:$0x7f] }
 0x1cb   : > { %1491 = vst.msk [vmem:[#allocation4 + $0x80] sm:$0x3] %vm13324_vm5, %v1488_v43  ;;  %1732 = vrot.lane.b32.xlu2 %v1731_v44, %s9414_s30  ;;  %vm1522_vm5 = vcmask 523522   ;;  %vm1543_vm11 = vcmask 1048322   ;;  %v1765_v4 = vrot.slane %v1763_v59, 1  ;;  %vm1545_vm14 = vcmask 1041152  }
 0x1cc   : > { %v816_v47 = vmax.f32 %v748_v34, 0.0  ;;  %1776 = vst.msk [vmem:[#allocation4 + $0xb8] sm:$0x80] %vm1113_vm6, %v1774_v46  ;;  %v1778_v8 = vld [vmem:[#allocation3 + $0x160] ss:$2 sm:$0x7f] }
 0x1cd   : > { %v1024_v48 = vld [vmem:[#allocation2 + $0x120] sm:$0x3f]  ;;  %v1497_v49 = vpop.permute.xlu1 %1496  ;;  %1777 = vst.msk [vmem:[#allocation4 + $0xd0] sm:$0x3f] %vm945_vm4, %v1774_v46  ;;  %v1780_v13 = vrot.slane %v1778_v8, 2  ;;  %v2078_v19 = vld [vmem:[#allocation4 + $0x60] sm:$0xff] }
 0x1ce   : > { %1026 = vst.msk [vmem:[#allocation3 + $0x179] sm:$0x3f] %vm945_vm4, %v1024_v48  ;;  %v1530_v3 = vpop.permute.xlu0 %1529  ;;  %v1792_v12 = vld [vmem:[#allocation3 + $0x162] ss:$2 sm:$0x7f] }
 0x1cf   : > { %866 = vst.msk [vmem:[#allocation2 + $0x128] sm:$0xff] %vm828_vm3, %v816_v47  ;;  %v1794_v16 = vrot.slane %v1792_v12, 2 }
 0x1d0   : > { %1499 = vst.msk [vmem:[#allocation4 + $0x68] sm:$0xf8] %vm13326_vm1, %v1497_v49  ;;  %vm1532_vm1 = vcmask 785922  }
 0x1d1   : > { %1500 = vst.msk [vmem:[#allocation4 + $0x80] sm:$0x3] %vm13325_vm15, %v1497_v49  ;;  %v750_v54 = vpop.f32.mrf.mxu0  ;;  %vm1524_vm15 = vcmask 516352  }
 0x1d2   : > { %v751_v55 = vadd.f32 %v9973_v61, %v750_v54  ;;  %1742 = vst.msk [vmem:[#allocation4 + $0xb0] sm:$0x80] %vm1113_vm6, %v1740_v52  ;;  %vm1534_vm6 = vcmask 778752   ;;  %v1577_v37 = vpop.permute.xlu2 %1576 }
 0x1d3   : > { %1757 = vrot.lane.b32.xlu2 %v1756_v53, %s9413_s26  ;;  %v2089_v56 = vld [vmem:[#allocation4 + $0xb8] sm:$0xff]  ;;  %1743 = vst.msk [vmem:[#allocation4 + $0xc8] sm:$0x3f] %vm945_vm4, %v1740_v52 }
 0x1d4   : > { %v817_v57 = vmax.f32 %v751_v55, 0.0  ;;  %v2116_v58 = vpack.c.bf16 %v2089_v56, %v2086_v25  ;;  %1782 = vst.msk [vmem:[#allocation4 + $0xc0] sm:$0xc0] %vm13340_vm2, %v1780_v13  ;;  %v10140_v25 = vld [vmem:[%s13287_s4] ss:$0 sm:$0xff]  ;;  %vm1620_vm2 = vcmask 1048321  }
 0x1d5   : > { %v1520_v60 = vpop.permute.xlu1 %1519  ;;  %v1801_v62 = vld [vmem:[#allocation3 + $0x170] ss:$2 sm:$0x7f]  ;;  %v1810_v14 = vld [vmem:[#allocation3 + $0x171] ss:$2 sm:$0x7f] }
 0x1d6   : > { %v1817_v63 = vld [vmem:[#allocation3 + $0x172] ss:$2 sm:$0x7f]  ;;  %867 = vst.msk [vmem:[#allocation2 + $0x130] sm:$0xff] %vm828_vm3, %v817_v57  ;;  %7032 = vmatmul.msk.bf16.gmra.mxu3 %vm828_vm3, %v2116_v58  ;;  %v1803_v1 = vrot.slane %v1801_v62, 2  ;;  %v1812_v15 = vrot.slane %v1810_v14, 2 }
 0x1d7   : > { %v1027_v0 = vld [vmem:[#allocation2 + $0x126] sm:$0xff]  ;;  %v1819_v2 = vrot.slane %v1817_v63, 2  ;;  %1523 = vst.msk [vmem:[#allocation4 + $0x78] sm:$0xfc] %vm1522_vm5, %v1520_v60  ;;  %v2079_v46 = vld [vmem:[#allocation4 + $0x68] sm:$0xff]  ;;  %v2390_v63 = vpop.f32.mrf.mxu3 }
 0x1d8   : > { %1029 = vst.msk [vmem:[#allocation3 + $0x181] sm:$0xff] %vm828_vm3, %v1027_v0  ;;  %1804 = vrot.lane.b32.xlu1 %v1803_v1, %s9414_s30 }
 0x1d9   : > { %1820 = vrot.lane.b32.xlu0 %v1819_v2, %s9412_s25  ;;  %1525 = vst.msk [vmem:[#allocation4 + $0x90] sm:$0x1] %vm1524_vm15, %v1520_v60  ;;  %v752_v5 = vpop.f32.mrf.mxu0 }
 0x1da   : > { %1533 = vst.msk [vmem:[#allocation4 + $0x78] sm:$0xfc] %vm1532_vm1, %v1530_v3  ;;  %v753_v6 = vadd.f32 %v9973_v61, %v752_v5 }
 0x1db   : > { %1535 = vst.msk [vmem:[#allocation4 + $0x90] sm:$0x1] %vm1534_vm6, %v1530_v3  ;;  %1766 = vrot.lane.b32.xlu2 %v1765_v4, %s9414_s30 }
 0x1dc   : > { %1544 = vst.msk [vmem:[#allocation4 + $0x78] sm:$0xfc] %vm1543_vm11, %v1541_v7  ;;  %v818_v9 = vmax.f32 %v753_v6, 0.0 }
 0x1dd   : > { %v1028_v10 = vld [vmem:[#allocation2 + $0x12e] sm:$0x3f]  ;;  %1546 = vst.msk [vmem:[#allocation4 + $0x90] sm:$0x1] %vm1545_vm14, %v1541_v7  ;;  %v1559_v11 = vpop.permute.xlu1 %1558 }
 0x1de   : > { %1030 = vst.msk [vmem:[#allocation3 + $0x189] sm:$0x3f] %vm945_vm4, %v1028_v10 }
 0x1df   : > { %868 = vst.msk [vmem:[#allocation2 + $0x138] sm:$0xff] %vm828_vm3, %v818_v9 }
 0x1e0   : > { %1561 = vst.msk [vmem:[#allocation4 + $0x80] sm:$0xfc] %vm1522_vm5, %v1559_v11  ;;  %vm2437_vm5 = vcmask 523264  }
 0x1e1   : > { %1562 = vst.msk [vmem:[#allocation4 + $0x98] sm:$0x1] %vm1524_vm15, %v1559_v11  ;;  %v755_v17 = vpop.f32.mrf.mxu0  ;;  %vm13343_vm15 = vmmov %vm13341_vm12 }
 0x1e2   : > { %v756_v18 = vadd.f32 %v9973_v61, %v755_v17  ;;  %1783 = vst.msk [vmem:[#allocation4 + $0xd8] sm:$0x1f] %vm13341_vm12, %v1780_v13 }
 0x1e3   : > { %v2081_v20 = vld [vmem:[#allocation4 + $0x78] sm:$0xff]  ;;  %1795 = vrot.lane.b32.xlu2 %v1794_v16, %s9413_s26  ;;  %1814 = vst.msk [vmem:[#allocation4 + $0xc8] sm:$0xc0] %vm13342_vm0, %v1812_v15 }
 0x1e4   : > { %v2111_v21 = vpack.c.bf16 %v2081_v20, %v2078_v19  ;;  %v819_v22 = vmax.f32 %v756_v18, 0.0  ;;  %1815 = vst.msk [vmem:[#allocation4 + $0xe0] sm:$0x1f] %vm13343_vm15, %v1812_v15 }
 0x1e5   : > { %v1826_v23 = vld [vmem:[#allocation3 + $0x180] ss:$2 sm:$0x7f]  ;;  %v1835_v24 = vld [vmem:[#allocation3 + $0x181] ss:$2 sm:$0x7f] }
 0x1e6   : > { %v1031_v26 = vld [vmem:[#allocation2 + $0x134] sm:$0xff]  ;;  %2313 = vmatmul.bf16.gmra.mxu1 %v2111_v21  ;;  %869 = vst.msk [vmem:[#allocation2 + $0x140] sm:$0xff] %vm828_vm3, %v819_v22  ;;  %v1837_v27 = vrot.slane %v1835_v24, 2  ;;  %v1828_v28 = vrot.slane %v1826_v23, 2  ;;  %v2392_v24 = vpop.f32.mrf.mxu3 }
 0x1e7   : > { %1033 = vst.msk [vmem:[#allocation3 + $0x191] sm:$0xff] %vm828_vm3, %v1031_v26  ;;  %v1864_v30 = vld [vmem:[#allocation3 + $0x182] ss:$2 sm:$0x7f]  ;;  %v2304_v55 = vpop.f32.mrf.mxu1 }
 0x1e8   : > { %1838 = vrot.lane.b32.xlu1 %v1837_v27, %s9414_s30  ;;  %v1866_v31 = vrot.slane %v1864_v30, 3  ;;  %v1856_v36 = vld [vmem:[#allocation3 + $0x181] ss:$2 sm:$0x7f]  ;;  %v2305_v60 = vadd.f32 %v10140_v25, %v2304_v55 }
 0x1e9   : > { %v757_v32 = vpop.f32.mrf.mxu0  ;;  %v1858_v40 = vrot.slane %v1856_v36, 3  ;;  %v1844_v41 = vld [vmem:[#allocation3 + $0x182] ss:$2 sm:$0x7f] }
 0x1ea   : > { %1867 = vrot.lane.b32.xlu0 %v1866_v31, %s9413_s26  ;;  %v758_v33 = vadd.f32 %v9973_v61, %v757_v32  ;;  %v1568_v35 = vpop.permute.xlu0 %1567  ;;  %v1846_v42 = vrot.slane %v1844_v41, 2  ;;  %v1850_v43 = vld [vmem:[#allocation3 + $0x180] ss:$2 sm:$0x7f] }
 0x1eb   : > { %1829 = vrot.lane.b32.xlu2 %v1828_v28, %s9413_s26  ;;  %1570 = vst.msk [vmem:[#allocation4 + $0x80] sm:$0xfc] %vm1532_vm1, %v1568_v35  ;;  %v1852_v45 = vrot.slane %v1850_v43, 3  ;;  %vm13344_vm1 = vmmov %vm13342_vm0  ;;  %vm13345_vm0 = vcmask 261125  }
 0x1ec   : > { %v820_v38 = vmax.f32 %v758_v33, 0.0  ;;  %1571 = vst.msk [vmem:[#allocation4 + $0x98] sm:$0x1] %vm1534_vm6, %v1568_v35  ;;  %vm13348_vm6 = vcmask 522496   ;;  %vm13349_vm15 = vmmov %vm13345_vm0 }
 0x1ed   : > { %v1032_v39 = vld [vmem:[#allocation2 + $0x13c] sm:$0x3f]  ;;  %1579 = vst.msk [vmem:[#allocation4 + $0x80] sm:$0xfc] %vm1543_vm11, %v1577_v37  ;;  %vm13347_vm11 = vcmask 523521  }
 0x1ee   : > { %1034 = vst.msk [vmem:[#allocation3 + $0x199] sm:$0x3f] %vm945_vm4, %v1032_v39 }
 0x1ef   : > { %870 = vst.msk [vmem:[#allocation2 + $0x148] sm:$0xff] %vm828_vm3, %v820_v38  ;;  %v2306_v5 = vpop.f32.mrf.mxu1 }
 0x1f0   : > { %1580 = vst.msk [vmem:[#allocation4 + $0x98] sm:$0x1] %vm1545_vm14, %v1577_v37  ;;  %1859 = vrot.lane.b32.xlu1 %v1858_v40, %s9412_s25  ;;  %vm13346_vm14 = vcmask 257024   ;;  %v2307_v17 = vadd.f32 %v10140_v25, %v2306_v5 }
 0x1f1   : > { %v760_v44 = vpop.f32.mrf.mxu0  ;;  %1848 = vst.msk [vmem:[#allocation4 + $0xd0] sm:$0xc0] %vm13344_vm1, %v1846_v42  ;;  %vm13350_vm1 = vmmov %vm13346_vm14 }
 0x1f2   : > { %v761_v29 = vadd.f32 %v9973_v61, %v760_v44  ;;  %1849 = vst.msk [vmem:[#allocation4 + $0xe8] sm:$0x1f] %vm13341_vm12, %v1846_v42  ;;  %vm13351_vm12 = vmmov %vm13345_vm0 }
 0x1f3   : > { %1854 = vst.msk [vmem:[#allocation4 + $0xd8] sm:$0xe0] %vm13345_vm0, %v1852_v45  ;;  %vm13352_vm0 = vcmask 784896  }
 0x1f4   : > { %v821_v34 = vmax.f32 %v761_v29, 0.0  ;;  %v2082_v47 = vld [vmem:[#allocation4 + $0x80] sm:$0xff]  ;;  %1855 = vst.msk [vmem:[#allocation4 + $0xf0] sm:$0xf] %vm13346_vm14, %v1852_v45  ;;  %vm13353_vm14 = vcmask 785921  }
 0x1f5   : > { %v2112_v48 = vpack.c.bf16 %v2082_v47, %v2079_v46  ;;  %v1873_v49 = vld [vmem:[#allocation3 + $0x190] ss:$2 sm:$0x7f]  ;;  %v1882_v19 = vld [vmem:[#allocation3 + $0x191] ss:$2 sm:$0x7f] }
 0x1f6   : > { %v1889_v50 = vld [vmem:[#allocation3 + $0x192] ss:$2 sm:$0x7f]  ;;  %v1036_v52 = vld [vmem:[#allocation2 + $0x14a] sm:$0x3f]  ;;  %871 = vst.msk [vmem:[#allocation2 + $0x150] sm:$0xff] %vm828_vm3, %v821_v34 }
 0x1f7   : > { %v1035_v51 = vld [vmem:[#allocation2 + $0x142] sm:$0xff]  ;;  %v1875_v53 = vrot.slane %v1873_v49, 3  ;;  %v1891_v54 = vrot.slane %v1889_v50, 3  ;;  %2356 = vmatmul.bf16.gmra.mxu2 %v2112_v48  ;;  %1038 = vst.msk [vmem:[#allocation3 + $0x1a9] sm:$0x3f] %vm945_vm4, %v1036_v52  ;;  %v1884_v22 = vrot.slane %v1882_v19, 3 }
 0x1f8   : > { %1037 = vst.msk [vmem:[#allocation3 + $0x1a1] sm:$0xff] %vm828_vm3, %v1035_v51  ;;  %v2092_v41 = vld [vmem:[#allocation4 + $0xd0] sm:$0xff] }
 0x1f9   : > { %1876 = vrot.lane.b32.xlu2 %v1875_v53, %s9414_s30  ;;  %1892 = vrot.lane.b32.xlu1 %v1891_v54, %s9412_s25  ;;  %v762_v56 = vpop.f32.mrf.mxu0  ;;  %1886 = vst.msk [vmem:[#allocation4 + $0xe0] sm:$0xe0] %vm13351_vm12, %v1884_v22  ;;  %vm13358_vm12 = vcmask 261124  }
 0x1fa   : > { %v763_v57 = vadd.f32 %v9973_v61, %v762_v56  ;;  %v1633_v58 = vpop.permute.xlu0 %1632 }
 0x1fb   : > { %1635 = vst.msk [vmem:[#allocation4 + $0x98] sm:$0xfe] %vm13347_vm11, %v1633_v58  ;;  %vm13354_vm11 = vcmask 523527  }
 0x1fc   : > { %v822_v59 = vmax.f32 %v763_v57, 0.0 }
 0x1fd   : > { %v1039_v62 = vld [vmem:[#allocation2 + $0x150] sm:$0xff] }
 0x1fe   : > { %1041 = vst.msk [vmem:[#allocation3 + $0x1b1] sm:$0xff] %vm828_vm3, %v1039_v62  ;;  %v2347_v0 = vpop.f32.mrf.mxu2 }
 0x1ff   : > { %872 = vst.msk [vmem:[#allocation2 + $0x158] sm:$0xff] %vm828_vm3, %v822_v59  ;;  %v2348_v1 = vadd.f32 %v2347_v0, %v2305_v60  ;;  %v1907_v2 = vld [vmem:[#allocation3 + $0x1a1] ss:$2 sm:$0x7f] }
 0x200   : > { %v1909_v3 = vrot.slane %v1907_v2, 3  ;;  %v1898_v4 = vld [vmem:[#allocation3 + $0x1a0] ss:$2 sm:$0x7f] }
 0x201   : > { %v2391_v6 = vadd.f32 %v2390_v63, %v2348_v1  ;;  %v1900_v7 = vrot.slane %v1898_v4, 3  ;;  %v765_v8 = vpop.f32.mrf.mxu0  ;;  %v1936_v13 = vld [vmem:[#allocation3 + $0x1a2] ss:$2 sm:$0x7f] }
 0x202   : > { %1910 = vrot.lane.b32.xlu2 %v1909_v3, %s9414_s30  ;;  %v1663_v9 = vpop.permute.xlu1 %1662  ;;  %v766_v10 = vadd.f32 %v9973_v61, %v765_v8  ;;  %v1618_v11 = vpop.permute.xlu0 %1617  ;;  %v1928_v15 = vld [vmem:[#allocation3 + $0x1a1] ss:$2 sm:$0x7f]  ;;  %v1916_v16 = vld [vmem:[#allocation3 + $0x1a2] ss:$2 sm:$0x7f] }
 0x203   : > { %v2424_v12 = vmax.f32 %v2391_v6, 0.0  ;;  %1665 = vst.msk [vmem:[#allocation4 + $0xa8] sm:$0x7f] %vm13348_vm6, %v1663_v9  ;;  %1901 = vrot.lane.b32.xlu0 %v1900_v7, %s9413_s26  ;;  %v1918_v18 = vrot.slane %v1916_v16, 3  ;;  %v1938_v26 = vrot.slane %v1936_v13, 4  ;;  %v1930_v28 = vrot.slane %v1928_v15, 4 }
 0x204   : > { %v823_v14 = vmax.f32 %v766_v10, 0.0  ;;  %1621 = vst.msk [vmem:[#allocation4 + $0x90] sm:$0xfe] %vm1620_vm2, %v1618_v11  ;;  %v1922_v39 = vld [vmem:[#allocation3 + $0x1a0] ss:$2 sm:$0x7f] }
 0x205   : > { %2438 = vst.msk [vmem:[#allocation5] sm:$0xff] %vm2437_vm5, %v2424_v12  ;;  %vm13355_vm6 = vcmask 521472   ;;  %v1924_v29 = vrot.slane %v1922_v39, 4 }
 0x206   : > { %v1040_v20 = vld [vmem:[#allocation2 + $0x158] sm:$0x3f]  ;;  %873 = vst.msk [vmem:[#allocation2 + $0x160] sm:$0xff] %vm828_vm3, %v823_v14  ;;  %v2349_v21 = vpop.f32.mrf.mxu2 }
 0x207   : > { %1042 = vst.msk [vmem:[#allocation3 + $0x1b9] sm:$0x3f] %vm945_vm4, %v1040_v20  ;;  %v2350_v23 = vadd.f32 %v2349_v21, %v2307_v17 }
 0x208   : > { %1920 = vst.msk [vmem:[#allocation4 + $0xe8] sm:$0xe0] %vm13349_vm15, %v1918_v18  ;;  %vm13356_vm15 = vmmov %vm13350_vm1 }
 0x209   : > { %v2393_v27 = vadd.f32 %v2392_v24, %v2350_v23  ;;  %v767_v30 = vpop.f32.mrf.mxu0  ;;  %1921 = vst.msk [vmem:[#allocation4 + $0x100] sm:$0xf] %vm13350_vm1, %v1918_v18  ;;  %vm13357_vm1 = vcmask 522496  }
 0x20a   : > { %1939 = vrot.lane.b32.xlu2 %v1938_v26, %s9413_s26  ;;  %v1669_v31 = vpop.permute.xlu1 %1668  ;;  %v768_v32 = vadd.f32 %v9973_v61, %v767_v30  ;;  %v1641_v33 = vpop.permute.xlu0 %1640  ;;  %1887 = vst.msk [vmem:[#allocation4 + $0xf8] sm:$0xf] %vm13356_vm15, %v1884_v22 }
 0x20b   : > { %v2425_v35 = vmax.f32 %v2393_v27, 0.0  ;;  %1671 = vst.msk [vmem:[#allocation4 + $0xa8] sm:$0x7f] %vm13352_vm0, %v1669_v31  ;;  %1931 = vrot.lane.b32.xlu0 %v1930_v28, %s9412_s25  ;;  %vm13359_vm0 = vcmask 785927   ;;  %v2084_v21 = vld [vmem:[#allocation4 + $0x90] sm:$0xff] }
 0x20c   : > { %v824_v36 = vmax.f32 %v768_v32, 0.0  ;;  %1643 = vst.msk [vmem:[#allocation4 + $0x98] sm:$0xfe] %vm13353_vm14, %v1641_v33  ;;  %vm13360_vm14 = vcmask 783872   ;;  %v2462_v26 = vld [vmem:[#allocation5 + $0x2] sm:$0x1f] }
 0x20d   : > { %v1043_v37 = vld [vmem:[#allocation2 + $0x15e] sm:$0xff]  ;;  %2439 = vst.msk [vmem:[#allocation5 + $0x8] sm:$0xff] %vm2437_vm5, %v2425_v35  ;;  %v1716_v38 = vpop.permute.xlu2 %1715 }
 0x20e   : > { %1045 = vst.msk [vmem:[#allocation3 + $0x1c1] sm:$0xff] %vm828_vm3, %v1043_v37  ;;  %v1961_v40 = vld [vmem:[#allocation3 + $0x1b2] ss:$2 sm:$0x7f] }
 0x20f   : > { %874 = vst.msk [vmem:[#allocation2 + $0x168] sm:$0xff] %vm828_vm3, %v824_v36  ;;  %v2095_v42 = vld [vmem:[#allocation4 + $0xe8] sm:$0xff]  ;;  %v1963_v43 = vrot.slane %v1961_v40, 4  ;;  %v1954_v51 = vld [vmem:[#allocation3 + $0x1b1] ss:$2 sm:$0x7f] }
 0x210   : > { %1718 = vst.msk [vmem:[#allocation4 + $0xa8] sm:$0x80] %vm13354_vm11, %v1716_v38  ;;  %v2119_v44 = vpack.c.bf16 %v2095_v42, %v2092_v41  ;;  %v1956_v53 = vrot.slane %v1954_v51, 4  ;;  %vm13362_vm11 = vmmov %vm13358_vm12  ;;  %v2452_v27 = vld [vmem:[#allocation5] sm:$0x1f] }
 0x211   : > { %1719 = vst.msk [vmem:[#allocation4 + $0xc0] sm:$0x3f] %vm13355_vm6, %v1716_v38  ;;  %v770_v45 = vpop.f32.mrf.mxu0  ;;  %vm13363_vm6 = vcmask 1047296   ;;  %v1945_v28 = vld [vmem:[#allocation3 + $0x1b0] ss:$2 sm:$0x7f] }
 0x212   : > { %7033 = vmatmul.msk.bf16.gmra.mxu3 %vm828_vm3, %v2119_v44  ;;  %v771_v34 = vadd.f32 %v9973_v61, %v770_v45  ;;  %v1649_v46 = vpop.permute.xlu0 %1648  ;;  %1926 = vst.msk [vmem:[#allocation4 + $0xf0] sm:$0xf0] %vm13358_vm12, %v1924_v29  ;;  %vm13365_vm12 = vcmask 523527   ;;  %v1947_v33 = vrot.slane %v1945_v28, 4 }
 0x213   : > { %v1686_v47 = vpop.permute.xlu1 %1685  ;;  %1964 = vrot.lane.b32.xlu0 %v1963_v43, %s9412_s25  ;;  %1651 = vst.msk [vmem:[#allocation4 + $0x98] sm:$0xfe] %vm1620_vm2, %v1649_v46  ;;  %vm13361_vm2 = vcmask 256000  }
 0x214   : > { %1688 = vst.msk [vmem:[#allocation4 + $0xb0] sm:$0x7f] %vm13357_vm1, %v1686_v47  ;;  %v825_v48 = vmax.f32 %v771_v34, 0.0  ;;  %v2488_v56 = vld [vmem:[#allocation5 + $0x7] sm:$0x1f]  ;;  %vm13364_vm15 = vmmov %vm13361_vm2  ;;  %vm2492_vm1 = vcmask 523269  }
 0x215   : > { %v1724_v49 = vpop.permute.xlu2 %1723  ;;  %1927 = vst.msk [vmem:[#allocation4 + $0x108] sm:$0x7] %vm13361_vm2, %v1924_v29  ;;  %v2490_v60 = vrot.slane %v2488_v56, 3  ;;  %v2505_v63 = vld [vmem:[#allocation5 + $0x9] sm:$0x1f]  ;;  %vm13367_vm2 = vcmask 784896   ;;  %v2395_v56 = vpop.f32.mrf.mxu3 }
 0x216   : > { %v1044_v50 = vld [vmem:[#allocation2 + $0x166] sm:$0x3f]  ;;  %875 = vst.msk [vmem:[#allocation2 + $0x170] sm:$0xff] %vm828_vm3, %v825_v48  ;;  %v2507_v4 = vrot.slane %v2505_v63, 3 }
 0x217   : > { %1046 = vst.msk [vmem:[#allocation3 + $0x1c9] sm:$0x3f] %vm945_vm4, %v1044_v50  ;;  %v2470_v31 = vld [vmem:[#allocation5 + $0x8] sm:$0x1f] }
 0x218   : > { %1726 = vst.msk [vmem:[#allocation4 + $0xa8] sm:$0x80] %vm13359_vm0, %v1724_v49  ;;  %vm2450_vm0 = vcmask 517120   ;;  %v2495_v43 = vld [vmem:[#allocation5 + $0x8] sm:$0x1f] }
 0x219   : > { %1727 = vst.msk [vmem:[#allocation4 + $0xc0] sm:$0x3f] %vm13360_vm14, %v1724_v49  ;;  %v772_v52 = vpop.f32.mrf.mxu0  ;;  %vm13366_vm14 = vcmask 521472   ;;  %v2497_v51 = vrot.slane %v2495_v43, 3 }
 0x21a   : > { %v773_v54 = vadd.f32 %v9973_v61, %v772_v52  ;;  %1958 = vst.msk [vmem:[#allocation4 + $0xf8] sm:$0xf0] %vm13362_vm11, %v1956_v53  ;;  %v2085_v29 = vld [vmem:[#allocation4 + $0x98] sm:$0xff] }
 0x21b   : > { %v1676_v55 = vpop.permute.xlu1 %1675  ;;  %1959 = vst.msk [vmem:[#allocation4 + $0x110] sm:$0x7] %vm13364_vm15, %v1956_v53 }
 0x21c   : > { %1678 = vst.msk [vmem:[#allocation4 + $0xa8] sm:$0x7f] %vm13363_vm6, %v1676_v55  ;;  %v826_v57 = vmax.f32 %v773_v54, 0.0  ;;  %vm13368_vm6 = vmmov %vm13364_vm15  ;;  %vm13369_vm15 = vcmask 1047296  }
 0x21d   : > { %v1047_v58 = vld [vmem:[#allocation2 + $0x16c] sm:$0xff]  ;;  %v1749_v59 = vpop.permute.xlu2 %1748  ;;  %2493 = vst.msk [vmem:[#allocation6] sm:$0xe0] %vm2492_vm1, %v2490_v60 }
 0x21e   : > { %1049 = vst.msk [vmem:[#allocation3 + $0x1d1] sm:$0xff] %vm828_vm3, %v1047_v58  ;;  %v1970_v62 = vld [vmem:[#allocation3 + $0x1c0] ss:$2 sm:$0x7f] }
 0x21f   : > { %876 = vst.msk [vmem:[#allocation2 + $0x178] sm:$0xff] %vm828_vm3, %v826_v57  ;;  %v1972_v0 = vrot.slane %v1970_v62, 4  ;;  %v1979_v1 = vld [vmem:[#allocation3 + $0x1c1] ss:$2 sm:$0x7f] }
 0x220   : > { %1751 = vst.msk [vmem:[#allocation4 + $0xb0] sm:$0x80] %vm13365_vm12, %v1749_v59  ;;  %v1981_v2 = vrot.slane %v1979_v1, 4  ;;  %v2000_v8 = vld [vmem:[#allocation3 + $0x1c1] ss:$2 sm:$0x7f] }
 0x221   : > { %1752 = vst.msk [vmem:[#allocation4 + $0xc8] sm:$0x3f] %vm13366_vm14, %v1749_v59  ;;  %1973 = vrot.lane.b32.xlu2 %v1972_v0, %s9413_s26  ;;  %v775_v3 = vpop.f32.mrf.mxu0  ;;  %v2002_v11 = vrot.slane %v2000_v8, 5  ;;  %v1988_v12 = vld [vmem:[#allocation3 + $0x1c2] ss:$2 sm:$0x7f] }
 0x222   : > { %1982 = vrot.lane.b32.xlu1 %v1981_v2, %s9414_s30  ;;  %v776_v5 = vadd.f32 %v9973_v61, %v775_v3  ;;  %2494 = vst.msk [vmem:[#allocation6 + $0x28] sm:$0x3] %vm2450_vm0, %v2490_v60  ;;  %v1990_v61 = vrot.slane %v1988_v12, 4  ;;  %v1994_v13 = vld [vmem:[#allocation3 + $0x1c0] ss:$2 sm:$0x7f] }
 0x223   : > { %v1693_v6 = vpop.permute.xlu1 %1692  ;;  %2509 = vst.msk [vmem:[#allocation6 + $0x8] sm:$0xe0] %vm2492_vm1, %v2507_v4  ;;  %v1996_v15 = vrot.slane %v1994_v13, 5  ;;  %vm13370_vm12 = vcmask 785927   ;;  %vm13371_vm14 = vcmask 783872  }
 0x224   : > { %1695 = vst.msk [vmem:[#allocation4 + $0xb0] sm:$0x7f] %vm13367_vm2, %v1693_v6  ;;  %v827_v7 = vmax.f32 %v776_v5, 0.0  ;;  %vm2453_vm2 = vcmask 520192   ;;  %v2464_v60 = vld [vmem:[#allocation5 + $0x7] sm:$0x1f] }
 0x225   : > { %v1733_v9 = vpop.permute.xlu2 %1732  ;;  %1992 = vst.msk [vmem:[#allocation4 + $0x100] sm:$0xf0] %vm13362_vm11, %v1990_v61  ;;  %vm13372_vm11 = vcmask 254976   ;;  %v2008_v42 = vld [vmem:[#allocation3 + $0x1c2] ss:$2 sm:$0x7f] }
 0x226   : > { %v1048_v10 = vld [vmem:[#allocation2 + $0x174] sm:$0x3f]  ;;  %877 = vst.msk [vmem:[#allocation2 + $0x180] sm:$0xff] %vm828_vm3, %v827_v7  ;;  %v2010_v50 = vrot.slane %v2008_v42, 5  ;;  %v2455_v62 = vld [vmem:[#allocation5 + $0x1] sm:$0x1f]  ;;  %v2397_v7 = vpop.f32.mrf.mxu3 }
 0x227   : > { %1050 = vst.msk [vmem:[#allocation3 + $0x1d9] sm:$0x3f] %vm945_vm4, %v1048_v10 }
 0x228   : > { %1735 = vst.msk [vmem:[#allocation4 + $0xa8] sm:$0x80] %vm1143_vm7, %v1733_v9 }
 0x229   : > { %1736 = vst.msk [vmem:[#allocation4 + $0xc0] sm:$0x3f] %vm1145_vm9, %v1733_v9  ;;  %v777_v14 = vpop.f32.mrf.mxu0 }
 0x22a   : > { %2003 = vrot.lane.b32.xlu1 %v2002_v11, %s9412_s25  ;;  %1993 = vst.msk [vmem:[#allocation4 + $0x118] sm:$0x7] %vm13368_vm6, %v1990_v61  ;;  %vm13376_vm6 = vcmask 782848  }
 0x22b   : > { %v1700_v16 = vpop.permute.xlu1 %1699  ;;  %1998 = vst.msk [vmem:[#allocation4 + $0x108] sm:$0xf8] %vm1432_vm10, %v1996_v15  ;;  %v2309_v49 = vpop.f32.mrf.mxu1 }
 0x22c   : > { %1702 = vst.msk [vmem:[#allocation4 + $0xb0] sm:$0x7f] %vm13369_vm15, %v1700_v16  ;;  %vm13377_vm15 = vmmov %vm13372_vm11  ;;  %v2098_v52 = vld [vmem:[#allocation4 + $0x100] sm:$0xff]  ;;  %v2310_v55 = vadd.f32 %v10140_v25, %v2309_v49 }
 0x22d   : > { %v1051_v17 = vld [vmem:[#allocation2 + $0x17a] sm:$0xff]  ;;  %v1052_v18 = vld [vmem:[#allocation2 + $0x182] sm:$0x3f]  ;;  %v1758_v19 = vpop.permute.xlu2 %1757  ;;  %1999 = vst.msk [vmem:[#allocation4 + $0x120] sm:$0x3] %vm13372_vm11, %v1996_v15 }
 0x22e   : > { %1053 = vst.msk [vmem:[#allocation3 + $0x1e1] sm:$0xff] %vm828_vm3, %v1051_v17  ;;  %v2033_v20 = vld [vmem:[#allocation3 + $0x1d2] ss:$2 sm:$0x7f] }
 0x22f   : > { %1054 = vst.msk [vmem:[#allocation3 + $0x1e9] sm:$0x3f] %vm945_vm4, %v1052_v18  ;;  %v2087_v22 = vld [vmem:[#allocation4 + $0xa8] sm:$0xff]  ;;  %v2035_v23 = vrot.slane %v2033_v20, 5  ;;  %vm13373_vm4 = vcmask 523526  }
 0x230   : > { %1760 = vst.msk [vmem:[#allocation4 + $0xb0] sm:$0x80] %vm13370_vm12, %v1758_v19  ;;  %v2114_v24 = vpack.c.bf16 %v2087_v22, %v2084_v21  ;;  %v2026_v40 = vld [vmem:[#allocation3 + $0x1d1] ss:$2 sm:$0x7f]  ;;  %vm13378_vm12 = vmmov %vm13372_vm11 }
 0x231   : > { %1761 = vst.msk [vmem:[#allocation4 + $0xc8] sm:$0x3f] %vm13371_vm14, %v1758_v19  ;;  %v2017_v44 = vld [vmem:[#allocation3 + $0x1d0] ss:$2 sm:$0x7f]  ;;  %v2028_v46 = vrot.slane %v2026_v40, 5  ;;  %vm13381_vm11 = vmmov %vm13373_vm4 }
 0x232   : > { %2318 = vmatmul.bf16.gmra.mxu1 %v2114_v24  ;;  %2036 = vrot.lane.b32.xlu1 %v2035_v23, %s9412_s25  ;;  %2510 = vst.msk [vmem:[#allocation6 + $0x30] sm:$0x3] %vm2450_vm0, %v2507_v4  ;;  %v2019_v48 = vrot.slane %v2017_v44, 5  ;;  %vm13380_vm14 = vcmask 1045248   ;;  %s13419_s25 = sand.u32 1, %s9400_s14  }
 0x233   : > { %2463 = vst.msk [vmem:[#allocation6 + $0x8] sm:$0x1f] %vm2453_vm2, %v2462_v26  ;;  %v2311_v63 = vpop.f32.mrf.mxu1  ;;  %s10924_s0 = smul.u32 56, %s13419_s25 }
 0x234   : > { %2454 = vst.msk [vmem:[#allocation6] sm:$0x1f] %vm2453_vm2, %v2452_v27  ;;  %v2312_v3 = vadd.f32 %v10140_v25, %v2311_v63 }
 0x235   : > { %v1767_v30 = vpop.permute.xlu2 %1766  ;;  %2471 = vst.msk [vmem:[#allocation6 + $0x10] sm:$0x1f] %vm2453_vm2, %v2470_v31  ;;  %s10982_s25 = scalar_lea.vmem [#allocation7], %s10924_s0 }
 0x236   : > { %1769 = vst.msk [vmem:[#allocation4 + $0xb0] sm:$0x80] %vm1143_vm7, %v1767_v30  ;;  %v2051_v32 = vld [vmem:[#allocation3 + $0x1e1] ss:$2 sm:$0x7f]  ;;  %vm13374_vm7 = vcmask 520448  }
 0x237   : > { %1770 = vst.msk [vmem:[#allocation4 + $0xc8] sm:$0x3f] %vm1145_vm9, %v1767_v30  ;;  %v2053_v35 = vrot.slane %v2051_v32, 5  ;;  %v2042_v36 = vld [vmem:[#allocation3 + $0x1e0] ss:$2 sm:$0x7f] }
 0x238   : > { %v2044_v37 = vrot.slane %v2042_v36, 5  ;;  %v2060_v38 = vld [vmem:[#allocation3 + $0x1e2] ss:$2 sm:$0x7f]  ;;  %vm13375_vm9 = vcmask 785926   ;;  %s6731_s0 = sshll.u32 %s10982_s25, 4  ;;  %s6732_s0 = int_to_ptr.vmem [resolvable:$true] %s6731_s0 }
 0x239   : > { %2054 = vrot.lane.b32.xlu2 %v2053_v35, %s9414_s30  ;;  %v2062_v39 = vrot.slane %v2060_v38, 5  ;;  %2030 = vst.msk [vmem:[#allocation4 + $0x110] sm:$0xf8] %vm1432_vm10, %v2028_v46 }
 0x23a   : > { %1948 = vrot.lane.b32.xlu1 %v1947_v33, %s9414_s30  ;;  %2045 = vrot.lane.b32.xlu0 %v2044_v37, %s9413_s26  ;;  %2031 = vst.msk [vmem:[#allocation4 + $0x128] sm:$0x3] %vm13378_vm12, %v2028_v46  ;;  %vm13386_vm12 = vmmov %vm13380_vm14 }
 0x23b   : > { %v1788_v41 = vpop.permute.xlu0 %1787  ;;  %2064 = vst.msk [vmem:[#allocation4 + $0x118] sm:$0xf8] %vm1432_vm10, %v2062_v39  ;;  %vm13379_vm10 = vcmask 1048326  }
 0x23c   : > { %1790 = vst.msk [vmem:[#allocation4 + $0xc0] sm:$0xc0] %vm13373_vm4, %v1788_v41  ;;  %vm13382_vm4 = vmmov %vm13374_vm7 }
 0x23d   : > { %v1796_v45 = vpop.permute.xlu2 %1795  ;;  %1791 = vst.msk [vmem:[#allocation4 + $0xd8] sm:$0x1f] %vm13374_vm7, %v1788_v41  ;;  %v2088_v34 = vld [vmem:[#allocation4 + $0xb0] sm:$0xff]  ;;  %vm13383_vm7 = vmmov %vm13375_vm9 }
 0x23e   : > { %1798 = vst.msk [vmem:[#allocation4 + $0xc0] sm:$0xc0] %vm13375_vm9, %v1796_v45  ;;  %v2115_v47 = vpack.c.bf16 %v2088_v34, %v2085_v29  ;;  %vm13384_vm9 = vmmov %vm13376_vm6 }
 0x23f   : > { %1799 = vst.msk [vmem:[#allocation4 + $0xd8] sm:$0x1f] %vm13376_vm6, %v1796_v45  ;;  %vm13385_vm6 = vmmov %vm13379_vm10 }
 0x240   : > { %2361 = vmatmul.bf16.gmra.mxu2 %v2115_v47  ;;  %2065 = vst.msk [vmem:[#allocation4 + $0x130] sm:$0x3] %vm13377_vm15, %v2062_v39  ;;  %vm2557_vm15 = vcmask 522242  }
 0x241   : > { %2020 = vrot.lane.b32.xlu2 %v2019_v48, %s9414_s30  ;;  %s6730_s30 = scalar_lea.hbm %s13293_s10, %s9294_s2 }
 0x242   : > { %2011 = vrot.lane.b32.xlu0 %v2010_v50, %s9413_s26  ;;  %2498 = vrot.lane.b32.xlu1 %v2497_v51, %s9413_s26  ;;  %v2101_v53 = vld [vmem:[#allocation4 + $0x118] sm:$0xff]  ;;  %v2400_v50 = vpop.f32.mrf.mxu3  ;;  %s6733_s27 = sshll.u32 %s6730_s30, 4  ;;  %s6734_s27 = int_to_ptr.hbm [resolvable:$true] %s6733_s27 }
 0x243   : > { %v2122_v54 = vpack.c.bf16 %v2101_v53, %v2098_v52  ;;  %s9360_s11 = sshra.s32 %s6734_s27, 4  ;;  %s9361_s11 = int_to_ptr.hbm [resolvable:$true] %s9360_s11 }
 0x244   : > { %s9362_s1 = scalar_lea.hbm %s9361_s11, 56  ;;  %p9367_p0 = scmp.lt.s32.totalorder %s9361_s11, %s13293_s10 }
 0x245   : > { %7034 = vmatmul.msk.bf16.gmra.mxu3 %vm828_vm3, %v2122_v54  ;;  %v1830_v5 = vpop.permute.xlu2 %1829  ;;  %p9363_p11 = scmp.ne.s32.totalorder %s9361_s11, %s9362_s1  ;;  %p9368_p1 = scmp.lt.s32.totalorder %s9366_s12, %s9362_s1 }
 0x246   : > { %v2352_v57 = vpop.f32.mrf.mxu2 }
 0x247   : > { %v2353_v58 = vadd.f32 %v2352_v57, %v2310_v55  ;;  %v2104_v8 = vld [vmem:[#allocation4 + $0x130] sm:$0x3]  ;;  %p9364_p12 = pnand %p9363_p11, %p9510_p5  ;;  %p9369_p2 = por %p9368_p1, %p9367_p0 }
 0x248   : > { %v2125_v11 = vpack.c.bf16 %v2104_v8, %v2104_v8 }
 0x249   : > { %v2396_v59 = vadd.f32 %v2395_v56, %v2353_v58  ;;  %p9365_p13 = pneg %p9364_p12 }
 0x24a   : > { %2466 = vrot.lane.b32.xlu1 %v2464_v60, %s9413_s26  ;;  %2457 = vrot.lane.b32.xlu0 %v2455_v62, %s9413_s26  ;;  %v1805_v0 = vpop.permute.xlu1 %1804 }
 0x24b   : > { %v2426_v1 = vmax.f32 %v2396_v59, 0.0  ;;  %1807 = vst.msk [vmem:[#allocation4 + $0xc0] sm:$0xc0] %vm13379_vm10, %v1805_v0  ;;  %v1821_v2 = vpop.permute.xlu0 %1820  ;;  %vm13388_vm10 = vcmask 781824   ;;  %p9370_p3 = pnand %p9369_p2, %p9365_p13 }
 0x24c   : > { %1808 = vst.msk [vmem:[#allocation4 + $0xd8] sm:$0x1f] %vm13380_vm14, %v1805_v0  ;;  %vm2612_vm14 = vcmask 523271  }
 0x24d   : > { %2440 = vst.msk [vmem:[#allocation5 + $0x10] sm:$0xff] %vm2437_vm5, %v2426_v1  ;;  %v2402_v1 = vpop.f32.mrf.mxu3 }
 0x24e   : > { %v2354_v4 = vpop.f32.mrf.mxu2  ;;  %1823 = vst.msk [vmem:[#allocation4 + $0xc8] sm:$0xc0] %vm13381_vm11, %v1821_v2  ;;  %vm13389_vm11 = vcmask 1048325  }
 0x24f   : > { %v2355_v6 = vadd.f32 %v2354_v4, %v2312_v3  ;;  %1824 = vst.msk [vmem:[#allocation4 + $0xe0] sm:$0x1f] %vm13382_vm4, %v1821_v2  ;;  %vm2614_vm4 = vcmask 519168  }
 0x250   : > { %1832 = vst.msk [vmem:[#allocation4 + $0xc8] sm:$0xc0] %vm13383_vm7, %v1830_v5  ;;  %vm13390_vm7 = vcmask 1044224  }
 0x251   : > { %v2398_v9 = vadd.f32 %v2397_v7, %v2355_v6  ;;  %1833 = vst.msk [vmem:[#allocation4 + $0xe0] sm:$0x1f] %vm13384_vm9, %v1830_v5  ;;  %vm13393_vm9 = vmmov %vm13389_vm11 }
 0x252   : > { %v2090_v44 = vld [vmem:[#allocation4 + $0xc0] sm:$0xff] }
 0x253   : > { %v2427_v10 = vmax.f32 %v2398_v9, 0.0  ;;  %v1877_v36 = vpop.permute.xlu2 %1876 }
 0x254   : > { %v2486_v12 = vld [vmem:[#allocation5 + $0x10] sm:$0x1f] }
 0x255   : > { %v2559_v61 = vld [vmem:[#allocation5 + $0xf] sm:$0x1f]  ;;  %2441 = vst.msk [vmem:[#allocation5 + $0x18] sm:$0xff] %vm2437_vm5, %v2427_v10  ;;  %7035 = vmatmul.msk.bf16.gmra.mxu3 %vm828_vm3, %v2125_v11  ;;  %vm13387_vm3 = vcmask 785925  }
 0x256   : > { %v2561_v13 = vrot.slane %v2559_v61, 6  ;;  %2487 = vst.msk [vmem:[#allocation6 + $0x20] sm:$0x1f] %vm2453_vm2, %v2486_v12  ;;  %v2553_v14 = vld [vmem:[#allocation5 + $0xe] sm:$0x1f] }
 0x257   : > { %v2511_v16 = vld [vmem:[#allocation5 + $0xe] sm:$0x1f]  ;;  %v2555_v17 = vrot.slane %v2553_v14, 6 }
 0x258   : > { %2562 = vrot.lane.b32.xlu2 %v2561_v13, %s9413_s26  ;;  %v2567_v18 = vld [vmem:[#allocation5 + $0x10] sm:$0x1f]  ;;  %v2513_v23 = vrot.slane %v2511_v16, 3 }
 0x259   : > { %2558 = vst.msk [vmem:[#allocation6 + $0x28] sm:$0x7c] %vm2557_vm15, %v2555_v17  ;;  %v2569_v24 = vrot.slane %v2567_v18, 6  ;;  %v2519_v26 = vld [vmem:[#allocation5 + $0xf] sm:$0x1f] }
 0x25a   : > { %v1839_v15 = vpop.permute.xlu1 %1838  ;;  %v2521_v27 = vrot.slane %v2519_v26, 3  ;;  %v2478_v42 = vld [vmem:[#allocation5 + $0xe] sm:$0x1f] }
 0x25b   : > { %1841 = vst.msk [vmem:[#allocation4 + $0xc8] sm:$0xc0] %vm13385_vm6, %v1839_v15  ;;  %vm13394_vm6 = vmmov %vm13390_vm7 }
 0x25c   : > { %v2547_v19 = vld [vmem:[#allocation5 + $0x17] sm:$0x1f]  ;;  %1842 = vst.msk [vmem:[#allocation4 + $0xe0] sm:$0x1f] %vm13386_vm12, %v1839_v15  ;;  %v1868_v32 = vpop.permute.xlu0 %1867  ;;  %v1911_v47 = vpop.permute.xlu2 %1910  ;;  %vm13395_vm12 = vcmask 523524  }
 0x25d   : > { %v2616_v20 = vld [vmem:[#allocation5 + $0x16] sm:$0x1f]  ;;  %v2549_v21 = vrot.slane %v2547_v19, 3  ;;  %2571 = vst.msk [vmem:[#allocation6 + $0x30] sm:$0x7c] %vm2557_vm15, %v2569_v24 }
 0x25e   : > { %v2618_v22 = vrot.slane %v2616_v20, 1  ;;  %v2572_v30 = vld [vmem:[#allocation5 + $0x15] sm:$0x1f]  ;;  %2523 = vst.msk [vmem:[#allocation6 + $0x10] sm:$0xe0] %vm2492_vm1, %v2521_v27 }
 0x25f   : > { %2551 = vst.msk [vmem:[#allocation6 + $0x20] sm:$0xe0] %vm2492_vm1, %v2549_v21  ;;  %v2608_v31 = vld [vmem:[#allocation5 + $0x15] sm:$0x1f]  ;;  %v2574_v33 = vrot.slane %v2572_v30, 6 }
 0x260   : > { %2619 = vrot.lane.b32.xlu0 %v2618_v22, %s9413_s26  ;;  %2514 = vrot.lane.b32.xlu2 %v2513_v23, %s9413_s26  ;;  %2552 = vst.msk [vmem:[#allocation6 + $0x48] sm:$0x3] %vm2450_vm0, %v2549_v21  ;;  %v2610_v35 = vrot.slane %v2608_v31, 1  ;;  %v2626_v37 = vld [vmem:[#allocation5 + $0x17] sm:$0x1f] }
 0x261   : > { %v2628_v38 = vrot.slane %v2626_v37, 1  ;;  %v2579_v40 = vld [vmem:[#allocation5 + $0x16] sm:$0x1f]  ;;  %2524 = vst.msk [vmem:[#allocation6 + $0x38] sm:$0x3] %vm2450_vm0, %v2521_v27 }
 0x262   : > { %v1860_v28 = vpop.permute.xlu1 %1859  ;;  %2613 = vst.msk [vmem:[#allocation6 + $0x28] sm:$0x80] %vm2612_vm14, %v2610_v35  ;;  %v2533_v41 = vld [vmem:[#allocation5 + $0x15] sm:$0x1f]  ;;  %v2581_v43 = vrot.slane %v2579_v40, 6  ;;  %v8861_v40 = vld [vmem:[%s13288_s5 + $0x28] sm:$0xff] }
 0x263   : > { %1862 = vst.msk [vmem:[#allocation4 + $0xd8] sm:$0xe0] %vm1282_vm13, %v1860_v28  ;;  %v2535_v29 = vrot.slane %v2533_v41, 3  ;;  %v2314_v46 = vpop.f32.mrf.mxu1  ;;  %v2091_v58 = vld [vmem:[#allocation4 + $0xc8] sm:$0xff]  ;;  %v8863_v21 = vld [vmem:[%s13288_s5 + $0x38] sm:$0xff] }
 0x264   : > { %1863 = vst.msk [vmem:[#allocation4 + $0xf0] sm:$0xf] %vm1284_vm8, %v1860_v28  ;;  %v2315_v49 = vadd.f32 %v10140_v25, %v2314_v46  ;;  %v1940_v56 = vpop.permute.xlu2 %1939  ;;  %3371 = vmatpush.bf16.msrb.mxu3 %v8863_v21  ;;  %v8862_v27 = vld [vmem:[%s13288_s5 + $0x30] sm:$0xff] }
 0x265   : > { %1870 = vst.msk [vmem:[#allocation4 + $0xd8] sm:$0xe0] %vm13387_vm3, %v1868_v32 }
 0x266   : > { %1871 = vst.msk [vmem:[#allocation4 + $0xf0] sm:$0xf] %vm13388_vm10, %v1868_v32 }
 0x267   : > { %1879 = vst.msk [vmem:[#allocation4 + $0xd8] sm:$0xe0] %vm13389_vm11, %v1877_v36  ;;  %vm13398_vm11 = vcmask 780800  }
 0x268   : > { %2575 = vrot.lane.b32.xlu0 %v2574_v33, %s9413_s26  ;;  %1880 = vst.msk [vmem:[#allocation4 + $0xf0] sm:$0xf] %vm13390_vm7, %v1877_v36  ;;  %vm13399_vm7 = vmmov %vm13395_vm12  ;;  %3372 = vmatpush.bf16.msrb.mxu3 %v8862_v27 }
 0x269   : > { %2615 = vst.msk [vmem:[#allocation6 + $0x50] sm:$0xf] %vm2614_vm4, %v2610_v35  ;;  %v10314_v35 = vpop.f32.mrf.mxu3 }
 0x26a   : > { %2630 = vst.msk [vmem:[#allocation6 + $0x30] sm:$0x80] %vm2612_vm14, %v2628_v38 }
 0x26b   : > { %v1893_v39 = vpop.permute.xlu1 %1892  ;;  %2631 = vst.msk [vmem:[#allocation6 + $0x58] sm:$0xf] %vm2614_vm4, %v2628_v38  ;;  %v2316_v55 = vpop.f32.mrf.mxu1 }
 0x26c   : > { %1895 = vst.msk [vmem:[#allocation4 + $0xe0] sm:$0xe0] %vm1282_vm13, %v1893_v39  ;;  %vm13392_vm13 = vmmov %vm13388_vm10  ;;  %vm13397_vm10 = vcmask 785924   ;;  %v2317_v62 = vadd.f32 %v10140_v25, %v2316_v55  ;;  %3373 = vmatpush.bf16.msrb.mxu3 %v8861_v40  ;;  %v8866_v40 = vld [vmem:[%s13288_s5 + $0x50] sm:$0xff] }
 0x26d   : > { %1896 = vst.msk [vmem:[#allocation4 + $0xf8] sm:$0xf] %vm1284_vm8, %v1893_v39  ;;  %vm13391_vm8 = vmmov %vm13387_vm3  ;;  %vm13396_vm3 = vcmask 518400  }
 0x26e   : > { %v2093_v45 = vld [vmem:[#allocation4 + $0xd8] sm:$0xff]  ;;  %2479 = vst.msk [vmem:[#allocation6 + $0x18] sm:$0x1f] %vm2453_vm2, %v2478_v42 }
 0x26f   : > { %v2117_v34 = vpack.c.bf16 %v2093_v45, %v2090_v44  ;;  %2583 = vst.msk [vmem:[#allocation6 + $0x38] sm:$0x7c] %vm2557_vm15, %v2581_v43  ;;  %v8860_v43 = vld [vmem:[%s13288_s5 + $0x20] sm:$0xff] }
 0x270   : > { %2537 = vst.msk [vmem:[#allocation6 + $0x18] sm:$0xe0] %vm2492_vm1, %v2535_v29  ;;  %3374 = vmatpush.bf16.msrb.mxu3 %v8860_v43 }
 0x271   : > { %2323 = vmatmul.bf16.gmra.mxu1 %v2117_v34  ;;  %2538 = vst.msk [vmem:[#allocation6 + $0x40] sm:$0x3] %vm2450_vm0, %v2535_v29  ;;  %v10331_v44 = vpop.f32.mrf.mxu3  ;;  %v8859_v29 = vld [vmem:[%s13288_s5 + $0x18] sm:$0xff] }
 0x274   : > { %3375 = vmatpush.bf16.msrb.mxu3 %v8859_v29 }
 0x275   : > { %v1902_v48 = vpop.permute.xlu0 %1901 }
 0x276   : > { %1904 = vst.msk [vmem:[#allocation4 + $0xe0] sm:$0xe0] %vm13391_vm8, %v1902_v48  ;;  %vm13400_vm8 = vmmov %vm13396_vm3 }
 0x277   : > { %1905 = vst.msk [vmem:[#allocation4 + $0xf8] sm:$0xf] %vm13392_vm13, %v1902_v48  ;;  %vm13401_vm13 = vmmov %vm13397_vm10 }
 0x278   : > { %1913 = vst.msk [vmem:[#allocation4 + $0xe0] sm:$0xe0] %vm13393_vm9, %v1911_v47  ;;  %vm13402_vm9 = vmmov %vm13398_vm11 }
 0x279   : > { %1914 = vst.msk [vmem:[#allocation4 + $0xf8] sm:$0xf] %vm13394_vm6, %v1911_v47  ;;  %vm13403_vm6 = vcmask 1048324   ;;  %v8858_v47 = vld [vmem:[%s13288_s5 + $0x10] sm:$0xff] }
 0x27a   : > { %v2357_v51 = vpop.f32.mrf.mxu2  ;;  %3376 = vmatpush.bf16.msrb.mxu3 %v8858_v47 }
 0x27b   : > { %v2358_v52 = vadd.f32 %v2357_v51, %v2315_v49  ;;  %v1974_v4 = vpop.permute.xlu2 %1973  ;;  %v8857_v51 = vld [vmem:[%s13288_s5 + $0x8] sm:$0xff] }
 0x27d   : > { %v2401_v53 = vadd.f32 %v2400_v50, %v2358_v52  ;;  %v1932_v54 = vpop.permute.xlu0 %1931 }
 0x27e   : > { %1934 = vst.msk [vmem:[#allocation4 + $0xf0] sm:$0xf0] %vm13395_vm12, %v1932_v54  ;;  %vm2678_vm12 = vcmask 523268   ;;  %3377 = vmatpush.bf16.msrb.mxu3 %v8857_v51 }
 0x27f   : > { %v2428_v57 = vmax.f32 %v2401_v53, 0.0  ;;  %1935 = vst.msk [vmem:[#allocation4 + $0x108] sm:$0x7] %vm13396_vm3, %v1932_v54  ;;  %v2094_v59 = vld [vmem:[#allocation4 + $0xe0] sm:$0xff]  ;;  %vm2680_vm3 = vcmask 516096  }
 0x280   : > { %1942 = vst.msk [vmem:[#allocation4 + $0xf0] sm:$0xf0] %vm13397_vm10, %v1940_v56  ;;  %v2118_v60 = vpack.c.bf16 %v2094_v59, %v2091_v58  ;;  %vm13404_vm10 = vcmask 1043200  }
 0x281   : > { %2442 = vst.msk [vmem:[#allocation5 + $0x20] sm:$0xff] %vm2437_vm5, %v2428_v57 }
 0x282   : > { %1943 = vst.msk [vmem:[#allocation4 + $0x108] sm:$0x7] %vm13398_vm11, %v1940_v56  ;;  %2366 = vmatmul.bf16.gmra.mxu2 %v2118_v60  ;;  %v2359_v63 = vpop.f32.mrf.mxu2  ;;  %vm13405_vm11 = vcmask 523523   ;;  %v8856_v56 = vld [vmem:[%s13288_s5] sm:$0xff] }
 0x283   : > { %v2360_v0 = vadd.f32 %v2359_v63, %v2317_v62  ;;  %3378 = vmatpush.bf16.msrb.mxu3 %v8856_v56 }
 0x285   : > { %v2403_v2 = vadd.f32 %v2402_v1, %v2360_v0  ;;  %v1965_v3 = vpop.permute.xlu0 %1964 }
 0x286   : > { %1967 = vst.msk [vmem:[#allocation4 + $0xf8] sm:$0xf0] %vm13399_vm7, %v1965_v3  ;;  %vm13406_vm7 = vcmask 517376  }
 0x287   : > { %v2429_v5 = vmax.f32 %v2403_v2, 0.0  ;;  %1968 = vst.msk [vmem:[#allocation4 + $0x110] sm:$0x7] %vm13400_vm8, %v1965_v3  ;;  %vm13407_vm8 = vmmov %vm13405_vm11 }
 0x288   : > { %1976 = vst.msk [vmem:[#allocation4 + $0xf8] sm:$0xf0] %vm13401_vm13, %v1974_v4  ;;  %v2682_v6 = vld [vmem:[#allocation5 + $0x1d] sm:$0x1f]  ;;  %v2698_v10 = vld [vmem:[#allocation5 + $0x23] sm:$0x1f]  ;;  %vm13408_vm13 = vmmov %vm13406_vm7 }
 0x289   : > { %v2632_v7 = vld [vmem:[#allocation5 + $0x1c] sm:$0x1f]  ;;  %2443 = vst.msk [vmem:[#allocation5 + $0x28] sm:$0xff] %vm2437_vm5, %v2429_v5  ;;  %v2684_v8 = vrot.slane %v2682_v6, 4  ;;  %v2700_v11 = vrot.slane %v2698_v10, 4 }
 0x28a   : > { %v2634_v9 = vrot.slane %v2632_v7, 1  ;;  %1977 = vst.msk [vmem:[#allocation4 + $0x110] sm:$0x7] %vm13402_vm9, %v1974_v4  ;;  %v2603_v12 = vld [vmem:[#allocation5 + $0x1e] sm:$0x1f]  ;;  %vm13412_vm9 = vcmask 779776  }
 0x28b   : > { %2685 = vrot.lane.b32.xlu2 %v2684_v8, %s9413_s26  ;;  %v2605_v61 = vrot.slane %v2603_v12, 6  ;;  %v2674_v13 = vld [vmem:[#allocation5 + $0x1c] sm:$0x1f]  ;;  %v2654_v26 = vld [vmem:[#allocation5 + $0x23] sm:$0x1f] }
 0x28c   : > { %2635 = vrot.lane.b32.xlu1 %v2634_v9, %s9413_s26  ;;  %v2692_v14 = vld [vmem:[#allocation5 + $0x1e] sm:$0x1f]  ;;  %v2676_v16 = vrot.slane %v2674_v13, 4  ;;  %v2656_v31 = vrot.slane %v2654_v26, 1  ;;  %v8870_v9 = vld [vmem:[%s13288_s5 + $0x70] sm:$0xff] }
 0x28d   : > { %2607 = vst.msk [vmem:[#allocation6 + $0x48] sm:$0x7c] %vm2557_vm15, %v2605_v61  ;;  %v2694_v17 = vrot.slane %v2692_v14, 4  ;;  %v2640_v18 = vld [vmem:[#allocation5 + $0x1d] sm:$0x1f]  ;;  %v8869_v14 = vld [vmem:[%s13288_s5 + $0x68] sm:$0xff] }
 0x28e   : > { %2679 = vst.msk [vmem:[#allocation6 + $0x50] sm:$0xf0] %vm2678_vm12, %v2676_v16  ;;  %v2591_v23 = vld [vmem:[#allocation5 + $0x1c] sm:$0x1f]  ;;  %v2642_v24 = vrot.slane %v2640_v18, 1 }
 0x28f   : > { %2681 = vst.msk [vmem:[#allocation6 + $0x78] sm:$0x1] %vm2680_vm3, %v2676_v16  ;;  %v2593_v30 = vrot.slane %v2591_v23, 6  ;;  %v8871_v5 = vld [vmem:[%s13288_s5 + $0x78] sm:$0xff] }
 0x290   : > { %2696 = vst.msk [vmem:[#allocation6 + $0x58] sm:$0xf0] %vm2678_vm12, %v2694_v17  ;;  %v2668_v19 = vld [vmem:[#allocation5 + $0x25] sm:$0x1f]  ;;  %v2720_v33 = vld [vmem:[#allocation5 + $0x2a] sm:$0x1f]  ;;  %3399 = vmatpush.bf16.msrb.mxu1 %v8871_v5 }
 0x291   : > { %2697 = vst.msk [vmem:[#allocation6 + $0x80] sm:$0x1] %vm2680_vm3, %v2694_v17  ;;  %v2670_v22 = vrot.slane %v2668_v19, 1  ;;  %v2706_v32 = vld [vmem:[#allocation5 + $0x24] sm:$0x1f]  ;;  %v2722_v38 = vrot.slane %v2720_v33, 4 }
 0x292   : > { %2644 = vst.msk [vmem:[#allocation6 + $0x38] sm:$0x80] %vm2612_vm14, %v2642_v24  ;;  %v2708_v37 = vrot.slane %v2706_v32, 4 }
 0x293   : > { %2701 = vrot.lane.b32.xlu2 %v2700_v11, %s9413_s26  ;;  %v2055_v28 = vpop.permute.xlu2 %2054  ;;  %2672 = vst.msk [vmem:[#allocation6 + $0x48] sm:$0x80] %vm2612_vm14, %v2670_v22 }
 0x294   : > { %v1983_v15 = vpop.permute.xlu1 %1982  ;;  %2673 = vst.msk [vmem:[#allocation6 + $0x70] sm:$0xf] %vm2614_vm4, %v2670_v22  ;;  %3400 = vmatpush.bf16.msrb.mxu1 %v8870_v9  ;;  %v8868_v22 = vld [vmem:[%s13288_s5 + $0x60] sm:$0xff] }
 0x295   : > { %1985 = vst.msk [vmem:[#allocation4 + $0xf8] sm:$0xf0] %vm13403_vm6, %v1983_v15  ;;  %v10346_v48 = vpop.f32.mrf.mxu3 }
 0x296   : > { %1986 = vst.msk [vmem:[#allocation4 + $0x110] sm:$0x7] %vm13404_vm10, %v1983_v15 }
 0x297   : > { %2645 = vst.msk [vmem:[#allocation6 + $0x60] sm:$0xf] %vm2614_vm4, %v2642_v24 }
 0x298   : > { %2595 = vst.msk [vmem:[#allocation6 + $0x40] sm:$0x7c] %vm2557_vm15, %v2593_v30  ;;  %vm13409_vm15 = vmmov %vm13403_vm6  ;;  %vm2565_vm6 = vcmask 1047042   ;;  %3401 = vmatpush.bf16.msrb.mxu1 %v8869_v14 }
 0x299   : > { %2658 = vst.msk [vmem:[#allocation6 + $0x40] sm:$0x80] %vm2612_vm14, %v2656_v31  ;;  %vm13410_vm14 = vmmov %vm13404_vm10  ;;  %vm13413_vm10 = vcmask 1048323  }
 0x29a   : > { %2659 = vst.msk [vmem:[#allocation6 + $0x68] sm:$0xf] %vm2614_vm4, %v2656_v31  ;;  %vm13411_vm4 = vcmask 785923  }
 0x29b   : > { %2710 = vst.msk [vmem:[#allocation6 + $0x60] sm:$0xf0] %vm2678_vm12, %v2708_v37  ;;  %v2021_v39 = vpop.permute.xlu2 %2020 }
 0x29c   : > { %v2004_v20 = vpop.permute.xlu1 %2003  ;;  %2711 = vst.msk [vmem:[#allocation6 + $0x88] sm:$0x1] %vm2680_vm3, %v2708_v37  ;;  %v2097_v49 = vld [vmem:[#allocation4 + $0xf8] sm:$0xff]  ;;  %3402 = vmatpush.bf16.msrb.mxu1 %v8868_v22 }
 0x29d   : > { %2006 = vst.msk [vmem:[#allocation4 + $0x108] sm:$0xf8] %vm13405_vm11, %v2004_v20  ;;  %vm13414_vm11 = vcmask 1042176   ;;  %v10363_v58 = vpop.f32.mrf.mxu3 }
 0x29e   : > { %2007 = vst.msk [vmem:[#allocation4 + $0x120] sm:$0x3] %vm13406_vm7, %v2004_v20  ;;  %vm2501_vm7 = vcmask 1048069  }
 0x29f   : > { %2724 = vst.msk [vmem:[#allocation6 + $0x68] sm:$0xf0] %vm2678_vm12, %v2722_v38 }
 0x2a0   : > { %2725 = vst.msk [vmem:[#allocation6 + $0x90] sm:$0x1] %vm2680_vm3, %v2722_v38 }
 0x2a4   : > { %v2037_v36 = vpop.permute.xlu1 %2036 }
 0x2a5   : > { %2039 = vst.msk [vmem:[#allocation4 + $0x110] sm:$0xf8] %vm13407_vm8, %v2037_v36  ;;  %vm2503_vm8 = vcmask 1041920  }
 0x2a6   : > { %2040 = vst.msk [vmem:[#allocation4 + $0x128] sm:$0x3] %vm13408_vm13, %v2037_v36  ;;  %vm13415_vm13 = vmmov %vm13411_vm4 }
 0x2ac   : > { %v1949_v41 = vpop.permute.xlu1 %1948  ;;  %v2046_v42 = vpop.permute.xlu0 %2045 }
 0x2ad   : > { %1951 = vst.msk [vmem:[#allocation4 + $0xf0] sm:$0xf0] %vm13409_vm15, %v1949_v41  ;;  %vm13416_vm15 = vmmov %vm13412_vm9 }
 0x2ae   : > { %1952 = vst.msk [vmem:[#allocation4 + $0x108] sm:$0x7] %vm13410_vm14, %v1949_v41  ;;  %vm13417_vm14 = vmmov %vm13413_vm10 }
 0x2af   : > { %2048 = vst.msk [vmem:[#allocation4 + $0x110] sm:$0xf8] %vm13411_vm4, %v2046_v42  ;;  %vm13418_vm4 = vmmov %vm13414_vm11  ;;  %v2319_v57 = vpop.f32.mrf.mxu1 }
 0x2b0   : > { %2049 = vst.msk [vmem:[#allocation4 + $0x128] sm:$0x3] %vm13412_vm9, %v2046_v42  ;;  %vm2460_vm9 = vcmask 1044992   ;;  %v2320_v63 = vadd.f32 %v10140_v25, %v2319_v57  ;;  %v8865_v42 = vld [vmem:[%s13288_s5 + $0x48] sm:$0xff] }
 0x2b1   : > { %2057 = vst.msk [vmem:[#allocation4 + $0x110] sm:$0xf8] %vm13413_vm10, %v2055_v28  ;;  %vm2622_vm10 = vcmask 1048071  }
 0x2b2   : > { %v2563_v45 = vpop.permute.xlu2 %2562  ;;  %2058 = vst.msk [vmem:[#allocation4 + $0x128] sm:$0x3] %vm13414_vm11, %v2055_v28  ;;  %vm2624_vm11 = vcmask 1043968   ;;  %v8867_v28 = vld [vmem:[%s13288_s5 + $0x58] sm:$0xff] }
 0x2b3   : > { %2566 = vst.msk [vmem:[#allocation6 + $0x28] sm:$0x7c] %vm2565_vm6, %v2563_v45  ;;  %3403 = vmatpush.bf16.msrb.mxu1 %v8867_v28 }
 0x2b4   : > { %v2499_v34 = vpop.permute.xlu1 %2498  ;;  %v2012_v46 = vpop.permute.xlu0 %2011  ;;  %v2096_v59 = vld [vmem:[#allocation4 + $0xf0] sm:$0xff] }
 0x2b5   : > { %2502 = vst.msk [vmem:[#allocation6] sm:$0xe0] %vm2501_vm7, %v2499_v34 }
 0x2b6   : > { %2504 = vst.msk [vmem:[#allocation6 + $0x28] sm:$0x3] %vm2503_vm8, %v2499_v34 }
 0x2b7   : > { %2014 = vst.msk [vmem:[#allocation4 + $0x108] sm:$0xf8] %vm13415_vm13, %v2012_v46  ;;  %v2321_v4 = vpop.f32.mrf.mxu1  ;;  %3404 = vmatpush.bf16.msrb.mxu1 %v8866_v40  ;;  %vm2690_vm13 = vcmask 1040896  }
 0x2b8   : > { %2015 = vst.msk [vmem:[#allocation4 + $0x120] sm:$0x3] %vm13416_vm15, %v2012_v46  ;;  %v2100_v50 = vld [vmem:[#allocation4 + $0x110] sm:$0xff]  ;;  %v2322_v10 = vadd.f32 %v10140_v25, %v2321_v4  ;;  %vm2799_vm15 = vcmask 523270  }
 0x2b9   : > { %2023 = vst.msk [vmem:[#allocation4 + $0x108] sm:$0xf8] %vm13417_vm14, %v2021_v39  ;;  %v2121_v53 = vpack.c.bf16 %v2100_v50, %v2097_v49  ;;  %v2103_v3 = vld [vmem:[#allocation4 + $0x128] sm:$0x3]  ;;  %vm2801_vm14 = vcmask 518144   ;;  %v8864_v49 = vld [vmem:[%s13288_s5 + $0x40] sm:$0xff] }
 0x2ba   : > { %v2515_v52 = vpop.permute.xlu2 %2514  ;;  %2024 = vst.msk [vmem:[#allocation4 + $0x120] sm:$0x3] %vm13418_vm4, %v2021_v39  ;;  %v2124_v8 = vpack.c.bf16 %v2103_v3, %v2103_v3  ;;  %vm2865_vm4 = vcmask 523267  }
 0x2bb   : > { %2517 = vst.msk [vmem:[#allocation6 + $0x8] sm:$0xe0] %vm2501_vm7, %v2515_v52  ;;  %2371 = vmatmul.bf16.gmra.mxu2 %v2121_v53  ;;  %3405 = vmatpush.bf16.msrb.mxu1 %v8865_v42  ;;  %v10425_v53 = vld [vmem:[%s13287_s4] ss:$0 sm:$0xff] }
 0x2bc   : > { %2518 = vst.msk [vmem:[#allocation6 + $0x30] sm:$0x3] %vm2503_vm8, %v2515_v52  ;;  %v2467_v54 = vpop.permute.xlu1 %2466  ;;  %v2458_v55 = vpop.permute.xlu0 %2457 }
 0x2bd   : > { %2469 = vst.msk [vmem:[#allocation6 + $0x8] sm:$0x1f] %vm2460_vm9, %v2467_v54 }
 0x2be   : > { %2461 = vst.msk [vmem:[#allocation6] sm:$0x1f] %vm2460_vm9, %v2458_v55 }
 0x2bf   : > { %3406 = vmatpush.bf16.msrb.mxu1 %v8864_v49 }
 0x2c0   : > { %v2099_v60 = vld [vmem:[#allocation4 + $0x108] sm:$0xff] }
 0x2c1   : > { %v2120_v62 = vpack.c.bf16 %v2099_v60, %v2096_v59  ;;  %v2102_v13 = vld [vmem:[#allocation4 + $0x120] sm:$0x3] }
 0x2c2   : > { %v2123_v25 = vpack.c.bf16 %v2102_v13, %v2102_v13 }
 0x2c3   : > { %2328 = vmatmul.bf16.gmra.mxu1 %v2120_v62  ;;  %v2362_v0 = vpop.f32.mrf.mxu2 }
 0x2c4   : > { %v2363_v1 = vadd.f32 %v2362_v0, %v2320_v63  ;;  %v3013_v56 = vld [vmem:[#allocation6 + $0x8] sm:$0xff] }
 0x2c5   : > { %v3012_v30 = vld [vmem:[#allocation6] sm:$0xff] }
 0x2c6   : > { %v2406_v2 = vadd.f32 %v10314_v35, %v2363_v1 }
 0x2c8   : > { %v2430_v6 = vmax.f32 %v2406_v2, 0.0  ;;  %v10370_v7 = vpop.f32.mrf.mxu3 }
 0x2ca   : > { %2444 = vst.msk [vmem:[#allocation5 + $0x30] sm:$0xff] %vm2437_vm5, %v2430_v6 }
 0x2cb   : > { %2376 = vmatmul.bf16.gmra.mxu2 %v2124_v8  ;;  %v2364_v11 = vpop.f32.mrf.mxu2 }
 0x2cc   : > { %v2365_v12 = vadd.f32 %v2364_v11, %v2322_v10 }
 0x2ce   : > { %v2408_v61 = vadd.f32 %v10331_v44, %v2365_v12 }
 0x2d0   : > { %v2431_v15 = vmax.f32 %v2408_v61, 0.0  ;;  %v10381_v16 = vpop.f32.mrf.mxu3 }
 0x2d1   : > { %v2746_v18 = vld [vmem:[#allocation5 + $0x32] sm:$0x1f]  ;;  %v2734_v19 = vld [vmem:[#allocation5 + $0x2c] sm:$0x1f] }
 0x2d2   : > { %v2620_v17 = vpop.permute.xlu0 %2619  ;;  %2445 = vst.msk [vmem:[#allocation5 + $0x38] sm:$0xff] %vm2437_vm5, %v2431_v15  ;;  %v2748_v20 = vrot.slane %v2746_v18, 7  ;;  %v2736_v21 = vrot.slane %v2734_v19, 4  ;;  %v2740_v36 = vld [vmem:[#allocation5 + $0x31] sm:$0x1f] }
 0x2d3   : > { %2623 = vst.msk [vmem:[#allocation6 + $0x28] sm:$0x80] %vm2622_vm10, %v2620_v17  ;;  %2333 = vmatmul.bf16.gmra.mxu1 %v2123_v25  ;;  %v2754_v37 = vld [vmem:[#allocation5 + $0x33] sm:$0x1f]  ;;  %v2742_v38 = vrot.slane %v2740_v36, 7 }
 0x2d4   : > { %2625 = vst.msk [vmem:[#allocation6 + $0x50] sm:$0xf] %vm2624_vm11, %v2620_v17  ;;  %2749 = vrot.lane.b32.xlu0 %v2748_v20, %s9413_s26  ;;  %v2756_v39 = vrot.slane %v2754_v37, 7  ;;  %v2596_v36 = vld [vmem:[#allocation5 + $0x1d] sm:$0x1f] }
 0x2d5   : > { %2738 = vst.msk [vmem:[#allocation6 + $0x70] sm:$0xf0] %vm2678_vm12, %v2736_v21  ;;  %vm2744_vm12 = vcmask 521217   ;;  %v2598_v37 = vrot.slane %v2596_v36, 6 }
 0x2d6   : > { %2739 = vst.msk [vmem:[#allocation6 + $0x98] sm:$0x1] %vm2680_vm3, %v2736_v21  ;;  %vm2688_vm3 = vcmask 1048068   ;;  %v2472_v21 = vld [vmem:[#allocation5 + $0x9] sm:$0x1f] }
 0x2d7   : > { %2745 = vst.msk [vmem:[#allocation6 + $0x78] sm:$0x3e] %vm2744_vm12, %v2742_v38 }
 0x2d8   : > { %v10392_v23 = vpop.f32.mrf.mxu3  ;;  %2758 = vst.msk [vmem:[#allocation6 + $0x80] sm:$0x3e] %vm2744_vm12, %v2756_v39 }
 0x2d9   : > { %v2803_v26 = vld [vmem:[#allocation5 + $0x39] sm:$0x1f] }
 0x2da   : > { %v2576_v24 = vpop.permute.xlu0 %2575  ;;  %v2759_v27 = vld [vmem:[#allocation5 + $0x38] sm:$0x1f]  ;;  %v3017_v31 = vld [vmem:[#allocation6 + $0x28] sm:$0xff]  ;;  %v2805_v32 = vrot.slane %v2803_v26, 2 }
 0x2db   : > { %2578 = vst.msk [vmem:[#allocation6 + $0x30] sm:$0x7c] %vm2565_vm6, %v2576_v24  ;;  %v2761_v33 = vrot.slane %v2759_v27, 7  ;;  %v3047_v35 = vpack.c.bf16 %v3017_v31, %v3012_v30  ;;  %v2795_v43 = vld [vmem:[#allocation5 + $0x38] sm:$0x1f] }
 0x2dc   : > { %2806 = vrot.lane.b32.xlu1 %v2805_v32, %s9413_s26  ;;  %v2813_v44 = vld [vmem:[#allocation5 + $0x3a] sm:$0x1f]  ;;  %v2797_v45 = vrot.slane %v2795_v43, 2 }
 0x2dd   : > { %2762 = vrot.lane.b32.xlu0 %v2761_v33, %s9413_s26  ;;  %3379 = vmatmul.bf16.vlgmr.msrb.gmra.mxu3 %v3047_v35  ;;  %v2766_v29 = vld [vmem:[#allocation5 + $0x39] sm:$0x1f]  ;;  %v2815_v46 = vrot.slane %v2813_v44, 2  ;;  %v2646_v32 = vld [vmem:[#allocation5 + $0x1e] sm:$0x1f] }
 0x2de   : > { %2800 = vst.msk [vmem:[#allocation6 + $0x78] sm:$0xc0] %vm2799_vm15, %v2797_v45  ;;  %v2768_v47 = vrot.slane %v2766_v29, 7  ;;  %v2648_v35 = vrot.slane %v2646_v32, 1  ;;  %v2771_v38 = vld [vmem:[#allocation5 + $0x3a] sm:$0x1f] }
 0x2df   : > { %2802 = vst.msk [vmem:[#allocation6 + $0xa0] sm:$0x7] %vm2801_vm14, %v2797_v45  ;;  %v2773_v39 = vrot.slane %v2771_v38, 7  ;;  %v2660_v32 = vld [vmem:[#allocation5 + $0x24] sm:$0x1f] }
 0x2e0   : > { %v2422_v41 = vpop.f32.mrf.mxu3  ;;  %2817 = vst.msk [vmem:[#allocation6 + $0x80] sm:$0xc0] %vm2799_vm15, %v2815_v46 }
 0x2e1   : > { %2818 = vst.msk [vmem:[#allocation6 + $0xa8] sm:$0x7] %vm2801_vm14, %v2815_v46 }
 0x2e2   : > { %2770 = vst.msk [vmem:[#allocation6 + $0x88] sm:$0x3e] %vm2744_vm12, %v2768_v47 }
 0x2e5   : > { %v2686_v34 = vpop.permute.xlu2 %2685 }
 0x2e6   : > { %2689 = vst.msk [vmem:[#allocation6 + $0x50] sm:$0xf0] %vm2688_vm3, %v2686_v34 }
 0x2e7   : > { %2691 = vst.msk [vmem:[#allocation6 + $0x78] sm:$0x1] %vm2690_vm13, %v2686_v34 }
 0x2ed   : > { %v2702_v50 = vpop.permute.xlu2 %2701 }
 0x2ee   : > { %2704 = vst.msk [vmem:[#allocation6 + $0x58] sm:$0xf0] %vm2688_vm3, %v2702_v50  ;;  %v2324_v52 = vpop.f32.mrf.mxu1 }
 0x2ef   : > { %2705 = vst.msk [vmem:[#allocation6 + $0x80] sm:$0x1] %vm2690_vm13, %v2702_v50  ;;  %v2325_v54 = vadd.f32 %v10425_v53, %v2324_v52 }
 0x2f6   : > { %v2326_v63 = vpop.f32.mrf.mxu1 }
 0x2f7   : > { %v2327_v1 = vadd.f32 %v10425_v53, %v2326_v63 }
 0x2fe   : > { %v2636_v51 = vpop.permute.xlu1 %2635 }
 0x2ff   : > { %2638 = vst.msk [vmem:[#allocation6 + $0x30] sm:$0x80] %vm2622_vm10, %v2636_v51 }
 0x300   : > { %2639 = vst.msk [vmem:[#allocation6 + $0x58] sm:$0xf] %vm2624_vm11, %v2636_v51 }
 0x305   : > { %v2367_v55 = vpop.f32.mrf.mxu2 }
 0x306   : > { %v3018_v57 = vld [vmem:[#allocation6 + $0x30] sm:$0xff]  ;;  %v2368_v59 = vadd.f32 %v2367_v55, %v2325_v54 }
 0x307   : > { %v3048_v60 = vpack.c.bf16 %v3018_v57, %v3013_v56 }
 0x308   : > { %v2411_v62 = vadd.f32 %v10346_v48, %v2368_v59 }
 0x309   : > { %3407 = vmatmul.bf16.vlgmr.msrb.gmra.mxu1 %v3048_v60 }
 0x30a   : > { %v2432_v0 = vmax.f32 %v2411_v62, 0.0 }
 0x30c   : > { %2446 = vst.msk [vmem:[#allocation5 + $0x40] sm:$0xff] %vm2437_vm5, %v2432_v0 }
 0x30d   : > { %v2369_v2 = vpop.f32.mrf.mxu2 }
 0x30e   : > { %v2370_v3 = vadd.f32 %v2369_v2, %v2327_v1 }
 0x310   : > { %v2413_v4 = vadd.f32 %v10363_v58, %v2370_v3  ;;  %v2525_v3 = vld [vmem:[#allocation5 + $0x10] sm:$0x1f] }
 0x312   : > { %v2433_v5 = vmax.f32 %v2413_v4, 0.0 }
 0x313   : > { %v2867_v6 = vld [vmem:[#allocation5 + $0x40] sm:$0x1f] }
 0x314   : > { %v2819_v8 = vld [vmem:[#allocation5 + $0x3f] sm:$0x1f]  ;;  %2447 = vst.msk [vmem:[#allocation5 + $0x48] sm:$0xff] %vm2437_vm5, %v2433_v5  ;;  %v2869_v9 = vrot.slane %v2867_v6, 5 }
 0x315   : > { %v2821_v10 = vrot.slane %v2819_v8, 2  ;;  %v2790_v61 = vld [vmem:[#allocation5 + $0x41] sm:$0x1f] }
 0x316   : > { %2870 = vrot.lane.b32.xlu2 %v2869_v9, %s9413_s26  ;;  %v2861_v13 = vld [vmem:[#allocation5 + $0x3f] sm:$0x1f]  ;;  %v2792_v14 = vrot.slane %v2790_v61, 7  ;;  %v2527_v9 = vrot.slane %v2525_v3, 3  ;;  %v8877_v3 = vld [vmem:[%s13288_s5 + $0xa8] sm:$0xff] }
 0x317   : > { %2822 = vrot.lane.b32.xlu1 %v2821_v10, %s9413_s26  ;;  %v2863_v58 = vrot.slane %v2861_v13, 5  ;;  %v2875_v15 = vld [vmem:[#allocation5 + $0x41] sm:$0x1f] }
 0x318   : > { %v2778_v17 = vld [vmem:[#allocation5 + $0x3f] sm:$0x1f]  ;;  %2794 = vst.msk [vmem:[#allocation6 + $0x98] sm:$0x3e] %vm2744_vm12, %v2792_v14  ;;  %v2877_v25 = vrot.slane %v2875_v15, 5 }
 0x319   : > { %v2780_v18 = vrot.slane %v2778_v17, 7  ;;  %2866 = vst.msk [vmem:[#allocation6 + $0xa0] sm:$0xf8] %vm2865_vm4, %v2863_v58  ;;  %v2827_v19 = vld [vmem:[#allocation5 + $0x40] sm:$0x1f] }
 0x31a   : > { %2879 = vst.msk [vmem:[#allocation6 + $0xa8] sm:$0xf8] %vm2865_vm4, %v2877_v25  ;;  %v2829_v26 = vrot.slane %v2827_v19, 2  ;;  %v2783_v43 = vld [vmem:[#allocation5 + $0x40] sm:$0x1f] }
 0x31b   : > { %v2918_v48 = vld [vmem:[#allocation5 + $0x47] sm:$0x1f]  ;;  %2782 = vst.msk [vmem:[#allocation6 + $0x90] sm:$0x3e] %vm2744_vm12, %v2780_v18  ;;  %v2785_v45 = vrot.slane %v2783_v43, 7  ;;  %vm2752_vm12 = vcmask 1046017  }
 0x31c   : > { %v2880_v11 = vld [vmem:[#allocation5 + $0x46] sm:$0x1f]  ;;  %2920 = vrot.lane.b32.xlu0 %v2918_v48, %s9413_s26  ;;  %2831 = vst.msk [vmem:[#allocation6 + $0x88] sm:$0xc0] %vm2799_vm15, %v2829_v26  ;;  %v2584_v19 = vld [vmem:[#allocation5 + $0x17] sm:$0x1f] }
 0x31d   : > { %v2882_v12 = vrot.slane %v2880_v11, 5  ;;  %v2855_v20 = vld [vmem:[#allocation5 + $0x48] sm:$0x1f]  ;;  %2832 = vst.msk [vmem:[#allocation6 + $0xb0] sm:$0x7] %vm2801_vm14, %v2829_v26 }
 0x31e   : > { %v2857_v22 = vrot.slane %v2855_v20, 2  ;;  %v2916_v24 = vld [vmem:[#allocation5 + $0x46] sm:$0x1f] }
 0x31f   : > { %2883 = vrot.lane.b32.xlu2 %v2882_v12, %s9413_s26  ;;  %2917 = vst.msk [vmem:[#allocation6 + $0xc8] sm:$0x1f] %vm2453_vm2, %v2916_v24  ;;  %v2924_v27 = vld [vmem:[#allocation5 + $0x48] sm:$0x1f] }
 0x320   : > { %v2841_v28 = vld [vmem:[#allocation5 + $0x46] sm:$0x1f]  ;;  %2859 = vst.msk [vmem:[#allocation6 + $0x98] sm:$0xc0] %vm2799_vm15, %v2857_v22 }
 0x321   : > { %v2887_v30 = vld [vmem:[#allocation5 + $0x47] sm:$0x1f]  ;;  %2860 = vst.msk [vmem:[#allocation6 + $0xc0] sm:$0x7] %vm2801_vm14, %v2857_v22  ;;  %v2843_v31 = vrot.slane %v2841_v28, 2 }
 0x322   : > { %2925 = vst.msk [vmem:[#allocation6 + $0xd0] sm:$0x1f] %vm2453_vm2, %v2924_v27  ;;  %v2889_v33 = vrot.slane %v2887_v30, 5  ;;  %v2586_v30 = vrot.slane %v2584_v19, 6  ;;  %v8890_v19 = vld [vmem:[%s13288_s5 + $0x110] sm:$0xff] }
 0x323   : > { %2845 = vst.msk [vmem:[#allocation6 + $0x90] sm:$0xc0] %vm2799_vm15, %v2843_v31  ;;  %vm2809_vm15 = vcmask 1048070  }
 0x324   : > { %2846 = vst.msk [vmem:[#allocation6 + $0xb8] sm:$0x7] %vm2801_vm14, %v2843_v31  ;;  %vm2811_vm14 = vcmask 1042944  }
 0x325   : > { %2891 = vst.msk [vmem:[#allocation6 + $0xb0] sm:$0xf8] %vm2865_vm4, %v2889_v33  ;;  %v2662_v33 = vrot.slane %v2660_v32, 1 }
 0x327   : > { %2474 = vrot.lane.b32.xlu2 %v2472_v21, %s9413_s26  ;;  %v2480_v21 = vld [vmem:[#allocation5 + $0xf] sm:$0x1f] }
 0x32f   : > { %2649 = vrot.lane.b32.xlu2 %v2648_v35, %s9413_s26  ;;  %v2539_v35 = vld [vmem:[#allocation5 + $0x16] sm:$0x1f] }
 0x330   : > { %v2541_v36 = vrot.slane %v2539_v35, 3 }
 0x337   : > { %2599 = vrot.lane.b32.xlu2 %v2598_v37, %s9413_s26  ;;  %v2833_v37 = vld [vmem:[#allocation5 + $0x41] sm:$0x1f] }
 0x338   : > { %v2835_v38 = vrot.slane %v2833_v37, 2 }
 0x33e   : > { %v2372_v40 = vpop.f32.mrf.mxu2 }
 0x33f   : > { %2774 = vrot.lane.b32.xlu2 %v2773_v39, %s9413_s26  ;;  %v2712_v39 = vld [vmem:[#allocation5 + $0x25] sm:$0x1f] }
 0x340   : > { %v2329_v41 = vpop.f32.mrf.mxu1 }
 0x341   : > { %v2330_v42 = vadd.f32 %v10425_v53, %v2329_v41  ;;  %v2714_v41 = vrot.slane %v2712_v39, 4 }
 0x343   : > { %v2373_v44 = vadd.f32 %v2372_v40, %v2330_v42  ;;  %v2847_v42 = vld [vmem:[#allocation5 + $0x47] sm:$0x1f] }
 0x344   : > { %v2849_v43 = vrot.slane %v2847_v42, 2 }
 0x345   : > { %v2416_v29 = vadd.f32 %v10370_v7, %v2373_v44  ;;  %v2726_v44 = vld [vmem:[#allocation5 + $0x2b] sm:$0x1f] }
 0x346   : > { %v2374_v34 = vpop.f32.mrf.mxu2  ;;  %v2750_v46 = vpop.permute.xlu0 %2749 }
 0x347   : > { %2786 = vrot.lane.b32.xlu2 %v2785_v45, %s9413_s26  ;;  %v2434_v47 = vmax.f32 %v2416_v29, 0.0  ;;  %2753 = vst.msk [vmem:[#allocation6 + $0x78] sm:$0x3e] %vm2752_vm12, %v2750_v46  ;;  %v2728_v29 = vrot.slane %v2726_v44, 4 }
 0x348   : > { %v2331_v49 = vpop.f32.mrf.mxu1 }
 0x349   : > { %2448 = vst.msk [vmem:[#allocation5 + $0x50] sm:$0xff] %vm2437_vm5, %v2434_v47  ;;  %v2332_v50 = vadd.f32 %v10425_v53, %v2331_v49  ;;  %v2892_v47 = vld [vmem:[#allocation5 + $0x48] sm:$0x1f] }
 0x34b   : > { %v2375_v51 = vadd.f32 %v2374_v34, %v2332_v50  ;;  %v2894_v50 = vrot.slane %v2892_v47, 5 }
 0x34d   : > { %v2418_v52 = vadd.f32 %v10381_v16, %v2375_v51 }
 0x34e   : > { %v2377_v54 = vpop.f32.mrf.mxu2  ;;  %v2807_v55 = vpop.permute.xlu1 %2806 }
 0x34f   : > { %v2435_v7 = vmax.f32 %v2418_v52, 0.0  ;;  %2810 = vst.msk [vmem:[#allocation6 + $0x78] sm:$0xc0] %vm2809_vm15, %v2807_v55  ;;  %v2763_v56 = vpop.permute.xlu0 %2762 }
 0x350   : > { %2812 = vst.msk [vmem:[#allocation6 + $0xa0] sm:$0x7] %vm2811_vm14, %v2807_v55  ;;  %v2334_v57 = vpop.f32.mrf.mxu1  ;;  %v2934_v59 = vld [vmem:[#allocation5 + $0x4f] sm:$0x1f] }
 0x351   : > { %v2926_v60 = vld [vmem:[#allocation5 + $0x4d] sm:$0x1f]  ;;  %2449 = vst.msk [vmem:[#allocation5 + $0x58] sm:$0xff] %vm2437_vm5, %v2435_v7  ;;  %v2335_v62 = vadd.f32 %v10425_v53, %v2334_v57  ;;  %2936 = vrot.lane.b32.xlu2 %v2934_v59, %s9413_s26  ;;  %v3022_v53 = vld [vmem:[#allocation6 + $0x50] sm:$0xff] }
 0x352   : > { %2928 = vrot.lane.b32.xlu0 %v2926_v60, %s9413_s26  ;;  %v2956_v16 = vld [vmem:[#allocation5 + $0x4e] sm:$0x1f]  ;;  %2765 = vst.msk [vmem:[#allocation6 + $0x80] sm:$0x3e] %vm2752_vm12, %v2763_v56  ;;  %v3023_v60 = vld [vmem:[#allocation6 + $0x58] sm:$0xff] }
 0x353   : > { %v2911_v63 = vld [vmem:[#allocation5 + $0x4f] sm:$0x1f]  ;;  %v2958_v0 = vrot.slane %v2956_v16, 3  ;;  %v2378_v2 = vadd.f32 %v2377_v54, %v2335_v62 }
 0x354   : > { %v2913_v1 = vrot.slane %v2911_v63, 5  ;;  %v2932_v48 = vld [vmem:[#allocation5 + $0x4e] sm:$0x1f]  ;;  %v8879_v63 = vld [vmem:[%s13288_s5 + $0xb8] sm:$0xff] }
 0x355   : > { %2959 = vrot.lane.b32.xlu1 %v2958_v0, %s9413_s26  ;;  %v2421_v4 = vadd.f32 %v10392_v23, %v2378_v2  ;;  %v2950_v58 = vld [vmem:[#allocation5 + $0x4d] sm:$0x1f]  ;;  %2933 = vst.msk [vmem:[#allocation6 + $0xd8] sm:$0x1f] %vm2453_vm2, %v2932_v48  ;;  %3427 = vmatpush.bf16.msrb.mxu2 %v8879_v63 }
 0x356   : > { %2915 = vst.msk [vmem:[#allocation6 + $0xc0] sm:$0xf8] %vm2865_vm4, %v2913_v1  ;;  %v2379_v5 = vpop.f32.mrf.mxu2  ;;  %v3027_v6 = vld [vmem:[#allocation6 + $0x78] sm:$0xff]  ;;  %v2952_v23 = vrot.slane %v2950_v58, 3  ;;  %v2964_v15 = vld [vmem:[#allocation5 + $0x4f] sm:$0x1f] }
 0x357   : > { %v2436_v8 = vmax.f32 %v2421_v4, 0.0  ;;  %v3052_v10 = vpack.c.bf16 %v3027_v6, %v3022_v53  ;;  %v2966_v17 = vrot.slane %v2964_v15, 3  ;;  %v2899_v25 = vld [vmem:[#allocation5 + $0x4d] sm:$0x1f]  ;;  %v8876_v5 = vld [vmem:[%s13288_s5 + $0xa0] sm:$0xff]  ;;  %v8875_v53 = vld [vmem:[%s13288_s5 + $0x98] sm:$0xff] }
 0x358   : > { %v2948_v11 = vld [vmem:[#allocation5 + $0x56] sm:$0x1f]  ;;  %v2336_v12 = vpop.f32.mrf.mxu1  ;;  %2954 = vst.msk [vmem:[#allocation6 + $0xc8] sm:$0xe0] %vm2492_vm1, %v2952_v23  ;;  %v2901_v18 = vrot.slane %v2899_v25, 5  ;;  %v8873_v48 = vld [vmem:[%s13288_s5 + $0x88] sm:$0xff] }
 0x359   : > { %v2942_v61 = vld [vmem:[#allocation5 + $0x55] sm:$0x1f]  ;;  %2949 = vst.msk [vmem:[#allocation6 + $0xe8] sm:$0x1f] %vm2453_vm2, %v2948_v11  ;;  %3384 = vmatmul.bf16.gmra.mxu3 %v3052_v10  ;;  %v2992_v27 = vld [vmem:[#allocation5 + $0x5b] sm:$0x1f] }
 0x35a   : > { %v2970_v13 = vld [vmem:[#allocation5 + $0x54] sm:$0x1f]  ;;  %2944 = vrot.lane.b32.xlu2 %v2942_v61, %s9413_s26  ;;  %2528 = vrot.lane.b32.xlu0 %v2527_v9, %s9413_s26  ;;  %2451 = vst.msk [vmem:[#allocation5 + $0x60] sm:$0x3] %vm2450_vm0, %v2436_v8  ;;  %v2994_v31 = vrot.slane %v2992_v27, 3  ;;  %v8885_v11 = vld [vmem:[%s13288_s5 + $0xe8] sm:$0xff] }
 0x35b   : > { %v2972_v14 = vrot.slane %v2970_v13, 3  ;;  %2955 = vst.msk [vmem:[#allocation6 + $0xf0] sm:$0x3] %vm2450_vm0, %v2952_v23  ;;  %v2940_v20 = vld [vmem:[#allocation5 + $0x54] sm:$0x1f]  ;;  %v8872_v12 = vld [vmem:[%s13288_s5 + $0x80] sm:$0xff] }
 0x35c   : > { %2968 = vst.msk [vmem:[#allocation6 + $0xd0] sm:$0xe0] %vm2492_vm1, %v2966_v17  ;;  %v2978_v22 = vld [vmem:[#allocation5 + $0x55] sm:$0x1f]  ;;  %v2904_v54 = vld [vmem:[#allocation5 + $0x4e] sm:$0x1f] }
 0x35d   : > { %2973 = vrot.lane.b32.xlu1 %v2972_v14, %s9413_s26  ;;  %2969 = vst.msk [vmem:[#allocation6 + $0xf8] sm:$0x3] %vm2450_vm0, %v2966_v17  ;;  %v2980_v26 = vrot.slane %v2978_v22, 3  ;;  %v2984_v34 = vld [vmem:[#allocation5 + $0x56] sm:$0x1f]  ;;  %v2906_v56 = vrot.slane %v2904_v54, 5 }
 0x35e   : > { %2941 = vst.msk [vmem:[#allocation6 + $0xe0] sm:$0x1f] %vm2453_vm2, %v2940_v20  ;;  %vm2873_vm2 = vcmask 1048067   ;;  %v2986_v46 = vrot.slane %v2984_v34, 3  ;;  %v8878_v2 = vld [vmem:[%s13288_s5 + $0xb0] sm:$0xff]  ;;  %v8887_v6 = vld [vmem:[%s13288_s5 + $0xf8] sm:$0xff] }
 0x35f   : > { %2903 = vst.msk [vmem:[#allocation6 + $0xb8] sm:$0xf8] %vm2865_vm4, %v2901_v18  ;;  %3428 = vmatpush.bf16.msrb.mxu2 %v8878_v2  ;;  %3455 = vmatpush.bf16.msra.mxu3 %v8887_v6  ;;  %v8874_v9 = vld [vmem:[%s13288_s5 + $0x90] sm:$0xff]  ;;  %v8884_v61 = vld [vmem:[%s13288_s5 + $0xe0] sm:$0xff]  ;;  %v8883_v13 = vld [vmem:[%s13288_s5 + $0xd8] sm:$0xff] }
 0x360   : > { %2982 = vst.msk [vmem:[#allocation6 + $0xd8] sm:$0xe0] %vm2492_vm1, %v2980_v26  ;;  %v8886_v10 = vld [vmem:[%s13288_s5 + $0xf0] sm:$0xff]  ;;  %v8881_v15 = vld [vmem:[%s13288_s5 + $0xc8] sm:$0xff]  ;;  %v8891_v17 = vld [vmem:[%s13288_s5 + $0x118] sm:$0xff] }
 0x361   : > { %v3006_v24 = vld [vmem:[#allocation5 + $0x5d] sm:$0x1f]  ;;  %2983 = vst.msk [vmem:[#allocation6 + $0x100] sm:$0x3] %vm2450_vm0, %v2980_v26  ;;  %v8882_v58 = vld [vmem:[%s13288_s5 + $0xd0] sm:$0xff]  ;;  %3487 = vmatpush.bf16.msra.mxu1 %v8891_v17  ;;  %v8889_v26 = vld [vmem:[%s13288_s5 + $0x108] sm:$0xff] }
 0x362   : > { %2482 = vrot.lane.b32.xlu0 %v2480_v21, %s9413_s26  ;;  %v3008_v28 = vrot.slane %v3006_v24, 3  ;;  %2996 = vst.msk [vmem:[#allocation6 + $0xe0] sm:$0xe0] %vm2492_vm1, %v2994_v31  ;;  %v2998_v51 = vld [vmem:[#allocation5 + $0x5c] sm:$0x1f] }
 0x363   : > { %2997 = vst.msk [vmem:[#allocation6 + $0x108] sm:$0x3] %vm2450_vm0, %v2994_v31  ;;  %v3000_v52 = vrot.slane %v2998_v51, 3  ;;  %3429 = vmatpush.bf16.msrb.mxu2 %v8877_v3  ;;  %3456 = vmatpush.bf16.msra.mxu3 %v8886_v10  ;;  %v8880_v18 = vld [vmem:[%s13288_s5 + $0xc0] sm:$0xff]  ;;  %v7764_v34 = vld [vmem:[%s13290_s7 + $0x478] sm:$0xf0] }
 0x364   : > { %3010 = vst.msk [vmem:[#allocation6 + $0xe8] sm:$0xe0] %vm2492_vm1, %v3008_v28  ;;  %v3026_v6 = vld [vmem:[#allocation6 + $0x70] sm:$0xff]  ;;  %v7756_v10 = vld [vmem:[%s13290_s7 + $0x468] sm:$0xf0] }
 0x365   : > { %2587 = vrot.lane.b32.xlu1 %v2586_v30, %s9413_s26  ;;  %3011 = vst.msk [vmem:[#allocation6 + $0x110] sm:$0x3] %vm2450_vm0, %v3008_v28  ;;  %3488 = vmatpush.bf16.msra.mxu1 %v8890_v19  ;;  %v8888_v28 = vld [vmem:[%s13288_s5 + $0x100] sm:$0xff] }
 0x367   : > { %3430 = vmatpush.bf16.msrb.mxu2 %v8876_v5  ;;  %3457 = vmatpush.bf16.msra.mxu3 %v8885_v11 }
 0x369   : > { %3489 = vmatpush.bf16.msra.mxu1 %v8889_v26  ;;  %v7243_v26 = vld [vmem:[%s13290_s7 + $0xf0] sm:$0xf] }
 0x36a   : > { %2663 = vrot.lane.b32.xlu0 %v2662_v33, %s9413_s26 }
 0x36b   : > { %3431 = vmatpush.bf16.msrb.mxu2 %v8875_v53  ;;  %3458 = vmatpush.bf16.msra.mxu3 %v8884_v61  ;;  %v3031_v53 = vld [vmem:[#allocation6 + $0x98] sm:$0xff] }
 0x36d   : > { %2542 = vrot.lane.b32.xlu1 %v2541_v36, %s9413_s26  ;;  %3490 = vmatpush.bf16.msra.mxu1 %v8888_v28  ;;  %v7307_v28 = vld [vmem:[%s13290_s7 + $0x70] sm:$0xf] }
 0x36f   : > { %3432 = vmatpush.bf16.msrb.mxu2 %v8874_v9  ;;  %3459 = vmatpush.bf16.msra.mxu3 %v8883_v13  ;;  %v9032_v9 = vld [vmem:[%s13290_s7 + $0x464] sm:$0xf] }
 0x370   : > { %v2871_v40 = vpop.permute.xlu2 %2870 }
 0x371   : > { %2874 = vst.msk [vmem:[#allocation6 + $0xa0] sm:$0xf8] %vm2873_vm2, %v2871_v40 }
 0x372   : > { %2836 = vrot.lane.b32.xlu0 %v2835_v38, %s9413_s26 }
 0x373   : > { %3433 = vmatpush.bf16.msrb.mxu2 %v8873_v48  ;;  %3460 = vmatpush.bf16.msra.mxu3 %v8882_v58  ;;  %v7759_v48 = vor.u32 %v9032_v9, %v7756_v10  ;;  %v3041_v58 = vld [vmem:[#allocation6 + $0xe8] sm:$0xff]  ;;  %v8899_v10 = vld [vmem:[%s13290_s7 + $0x34] sm:$0xf0] }
 0x374   : > { %v7275_v9 = vld [vmem:[%s13290_s7 + $0x30] sm:$0xf] }
 0x375   : > { %2715 = vrot.lane.b32.xlu1 %v2714_v41, %s9413_s26 }
 0x377   : > { %3434 = vmatpush.bf16.msrb.mxu2 %v8872_v12  ;;  %3461 = vmatpush.bf16.msra.mxu3 %v8881_v15 }
 0x378   : > { %v3032_v21 = vld [vmem:[#allocation6 + $0xa0] sm:$0xff] }
 0x379   : > { %v2884_v45 = vpop.permute.xlu2 %2883 }
 0x37a   : > { %2886 = vst.msk [vmem:[#allocation6 + $0xa8] sm:$0xf8] %vm2873_vm2, %v2884_v45  ;;  %2850 = vrot.lane.b32.xlu0 %v2849_v43, %s9413_s26 }
 0x37b   : > { %3462 = vmatpush.bf16.msra.mxu3 %v8880_v18  ;;  %v3046_v18 = vld [vmem:[#allocation6 + $0x110] sm:$0x3] }
 0x37c   : > { %v3066_v19 = vpack.c.bf16 %v3046_v18, %v3046_v18 }
 0x37d   : > { %2729 = vrot.lane.b32.xlu1 %v2728_v29, %s9413_s26  ;;  %v9034_v29 = vld [vmem:[%s13290_s7 + $0x474] sm:$0xf] }
 0x381   : > { %v2475_v49 = vpop.permute.xlu2 %2474 }
 0x382   : > { %2477 = vst.msk [vmem:[#allocation6 + $0x10] sm:$0x1f] %vm2460_vm9, %v2475_v49  ;;  %2987 = vrot.lane.b32.xlu0 %v2986_v46, %s9413_s26  ;;  %v7767_v46 = vor.u32 %v9034_v29, %v7764_v34 }
 0x384   : > { %4648 = vmatpush.bf16.msrb.mxu0 %v7767_v46  ;;  %v7227_v46 = vld [vmem:[%s13290_s7 + $0xd0] sm:$0xf] }
 0x385   : > { %2895 = vrot.lane.b32.xlu1 %v2894_v50, %s9413_s26 }
 0x388   : > { %4649 = vmatpush.bf16.msrb.mxu0 %v7759_v48 }
 0x389   : > { %v2650_v55 = vpop.permute.xlu2 %2649  ;;  %v2823_v7 = vpop.permute.xlu1 %2822 }
 0x38a   : > { %2652 = vst.msk [vmem:[#allocation6 + $0x38] sm:$0x80] %vm2622_vm10, %v2650_v55  ;;  %3001 = vrot.lane.b32.xlu0 %v3000_v52, %s9413_s26 }
 0x38b   : > { %2653 = vst.msk [vmem:[#allocation6 + $0x60] sm:$0xf] %vm2624_vm11, %v2650_v55 }
 0x38c   : > { %2825 = vst.msk [vmem:[#allocation6 + $0x80] sm:$0xc0] %vm2809_vm15, %v2823_v7 }
 0x38d   : > { %2826 = vst.msk [vmem:[#allocation6 + $0xa8] sm:$0x7] %vm2811_vm14, %v2823_v7  ;;  %2907 = vrot.lane.b32.xlu1 %v2906_v56, %s9413_s26 }
 0x38e   : > { %v2921_v57 = vpop.permute.xlu0 %2920 }
 0x38f   : > { %2923 = vst.msk [vmem:[#allocation6 + $0xc8] sm:$0x1f] %vm2460_vm9, %v2921_v57  ;;  %v3021_v57 = vld [vmem:[#allocation6 + $0x48] sm:$0xff] }
 0x391   : > { %v2600_v59 = vpop.permute.xlu2 %2599 }
 0x392   : > { %2602 = vst.msk [vmem:[#allocation6 + $0x40] sm:$0x7c] %vm2565_vm6, %v2600_v59 }
 0x393   : > { %v3028_v62 = vld [vmem:[#allocation6 + $0x80] sm:$0xff] }
 0x394   : > { %v3053_v16 = vpack.c.bf16 %v3028_v62, %v3023_v60  ;;  %v3033_v31 = vld [vmem:[#allocation6 + $0xa8] sm:$0xff]  ;;  %v3016_v60 = vld [vmem:[#allocation6 + $0x20] sm:$0xff] }
 0x395   : > { %v3051_v62 = vpack.c.bf16 %v3021_v57, %v3016_v60  ;;  %v8917_v60 = vld [vmem:[%s13290_s7 + $0xc4] sm:$0xf0] }
 0x396   : > { %3412 = vmatmul.bf16.gmra.mxu1 %v3053_v16 }
 0x399   : > { %v2775_v0 = vpop.permute.xlu2 %2774 }
 0x39a   : > { %2777 = vst.msk [vmem:[#allocation6 + $0x88] sm:$0x3e] %vm2752_vm12, %v2775_v0 }
 0x3a1   : > { %v2787_v1 = vpop.permute.xlu2 %2786 }
 0x3a2   : > { %2789 = vst.msk [vmem:[#allocation6 + $0x90] sm:$0x3e] %vm2752_vm12, %v2787_v1 }
 0x3ab   : > { %v2937_v4 = vpop.permute.xlu2 %2936 }
 0x3ac   : > { %2939 = vst.msk [vmem:[#allocation6 + $0xd8] sm:$0x1f] %vm2460_vm9, %v2937_v4 }
 0x3b4   : > { %v2945_v8 = vpop.permute.xlu2 %2944 }
 0x3b5   : > { %2947 = vst.msk [vmem:[#allocation6 + $0xe0] sm:$0x1f] %vm2460_vm9, %v2945_v8  ;;  %v3056_v8 = vpack.c.bf16 %v3031_v53, %v3026_v6  ;;  %v7211_v53 = vld [vmem:[%s13290_s7 + $0xb0] sm:$0xf] }
 0x3c4   : > { %v2929_v14 = vpop.permute.xlu0 %2928 }
 0x3c5   : > { %2931 = vst.msk [vmem:[#allocation6 + $0xd0] sm:$0x1f] %vm2460_vm9, %v2929_v14 }
 0x3c7   : > { %v2960_v23 = vpop.permute.xlu1 %2959 }
 0x3c8   : > { %2962 = vst.msk [vmem:[#allocation6 + $0xc8] sm:$0xe0] %vm2501_vm7, %v2960_v23 }
 0x3c9   : > { %2963 = vst.msk [vmem:[#allocation6 + $0xf0] sm:$0x3] %vm2503_vm8, %v2960_v23  ;;  %v3036_v23 = vld [vmem:[#allocation6 + $0xc0] sm:$0xff] }
 0x3ca   : > { %v3061_v15 = vpack.c.bf16 %v3041_v58, %v3036_v23  ;;  %v7203_v23 = vld [vmem:[%s13290_s7 + $0xa0] sm:$0xf] }
 0x3cc   : > { %v2529_v25 = vpop.permute.xlu0 %2528 }
 0x3cd   : > { %2531 = vst.msk [vmem:[#allocation6 + $0x10] sm:$0xe0] %vm2501_vm7, %v2529_v25 }
 0x3ce   : > { %2532 = vst.msk [vmem:[#allocation6 + $0x38] sm:$0x3] %vm2503_vm8, %v2529_v25 }
 0x3cf   : > { %v2974_v20 = vpop.permute.xlu1 %2973  ;;  %v3037_v22 = vld [vmem:[#allocation6 + $0xc8] sm:$0xff] }
 0x3d0   : > { %2976 = vst.msk [vmem:[#allocation6 + $0xd0] sm:$0xe0] %vm2501_vm7, %v2974_v20  ;;  %v3057_v24 = vpack.c.bf16 %v3037_v22, %v3032_v21  ;;  %v3042_v36 = vld [vmem:[#allocation6 + $0xf0] sm:$0x3]  ;;  %v10619_v21 = vpop.f32.mrf.mxu1 }
 0x3d1   : > { %2977 = vst.msk [vmem:[#allocation6 + $0xf8] sm:$0x3] %vm2503_vm8, %v2974_v20  ;;  %v3062_v40 = vpack.c.bf16 %v3042_v36, %v3042_v36  ;;  %v10617_v20 = vpop.f32.mrf.mxu3 }
 0x3d2   : > { %3389 = vmatmul.bf16.gmra.mxu3 %v3057_v24 }
 0x3d4   : > { %v2483_v27 = vpop.permute.xlu0 %2482  ;;  %v3014_v38 = vld [vmem:[#allocation6 + $0x10] sm:$0xff] }
 0x3d5   : > { %2485 = vst.msk [vmem:[#allocation6 + $0x18] sm:$0x1f] %vm2460_vm9, %v2483_v27  ;;  %v8923_v27 = vld [vmem:[%s13290_s7 + $0xf4] sm:$0xf0] }
 0x3d7   : > { %v2588_v30 = vpop.permute.xlu1 %2587  ;;  %v3038_v32 = vld [vmem:[#allocation6 + $0xd0] sm:$0xff] }
 0x3d8   : > { %2590 = vst.msk [vmem:[#allocation6 + $0x38] sm:$0x7c] %vm2565_vm6, %v2588_v30  ;;  %v3058_v33 = vpack.c.bf16 %v3038_v32, %v3033_v31  ;;  %v3043_v43 = vld [vmem:[#allocation6 + $0xf8] sm:$0x3]  ;;  %v10623_v24 = vpop.f32.mrf.mxu1  ;;  %v7244_v30 = vor.u32 %v8923_v27, %v7243_v26  ;;  %v8907_v31 = vld [vmem:[%s13290_s7 + $0x74] sm:$0xf0] }
 0x3d9   : > { %v3063_v45 = vpack.c.bf16 %v3043_v43, %v3043_v43  ;;  %v10621_v22 = vpop.f32.mrf.mxu3  ;;  %v8906_v32 = vld [vmem:[%s13290_s7 + $0x74] sm:$0xf]  ;;  %v8905_v43 = vld [vmem:[%s13290_s7 + $0x64] sm:$0xf0]  ;;  %v8896_v26 = vld [vmem:[%s13290_s7 + $0x24] sm:$0xf] }
 0x3da   : > { %3417 = vmatmul.bf16.gmra.mxu1 %v3058_v33  ;;  %v7309_v33 = vld [vmem:[%s13290_s7 + $0x78] sm:$0xf0]  ;;  %3642 = vmatpush.bf16.msra.mxu2 %v7244_v30  ;;  %v7269_v27 = vld [vmem:[%s13290_s7 + $0x28] sm:$0xf0] }
 0x3db   : > { %v7312_v36 = vor.u32 %v8906_v32, %v7309_v33  ;;  %v7272_v30 = vor.u32 %v8896_v26, %v7269_v27  ;;  %v7740_v32 = vld [vmem:[%s13290_s7 + $0x448] sm:$0xf0]  ;;  %v7195_v33 = vld [vmem:[%s13290_s7 + $0x90] sm:$0xf]  ;;  %v10857_v26 = vld [vmem:[%s13289_s6] ss:$0 sm:$0xff] }
 0x3dc   : > { %v2664_v35 = vpop.permute.xlu0 %2663 }
 0x3dd   : > { %2666 = vst.msk [vmem:[#allocation6 + $0x40] sm:$0x80] %vm2622_vm10, %v2664_v35  ;;  %3761 = vmatpush.bf16.msrb.mxu1 %v7312_v36 }
 0x3de   : > { %2667 = vst.msk [vmem:[#allocation6 + $0x68] sm:$0xf] %vm2624_vm11, %v2664_v35  ;;  %v7308_v35 = vor.u32 %v8907_v31, %v7307_v28  ;;  %v9028_v31 = vld [vmem:[%s13290_s7 + $0x444] sm:$0xf] }
 0x3df   : > { %v2543_v37 = vpop.permute.xlu1 %2542  ;;  %v3019_v39 = vld [vmem:[#allocation6 + $0x38] sm:$0xff]  ;;  %v7743_v36 = vor.u32 %v9028_v31, %v7740_v32  ;;  %v7708_v32 = vld [vmem:[%s13290_s7 + $0x408] sm:$0xf0] }
 0x3e0   : > { %2545 = vst.msk [vmem:[#allocation6 + $0x18] sm:$0xe0] %vm2501_vm7, %v2543_v37  ;;  %v3049_v41 = vpack.c.bf16 %v3019_v39, %v3014_v38  ;;  %3748 = vmatpush.bf16.msrb.mxu3 %v7308_v35  ;;  %v7235_v39 = vld [vmem:[%s13290_s7 + $0xe0] sm:$0xf]  ;;  %v9020_v31 = vld [vmem:[%s13290_s7 + $0x404] sm:$0xf] }
 0x3e1   : > { %2546 = vst.msk [vmem:[#allocation6 + $0x40] sm:$0x3] %vm2503_vm8, %v2543_v37  ;;  %v10643_v37 = vpop.f32.mrf.mxu3 }
 0x3e2   : > { %3394 = vmatmul.bf16.gmra.mxu3 %v3062_v40  ;;  %3435 = vmatmul.bf16.vlgmr.msrb.gmra.mxu2 %v3049_v41  ;;  %v8921_v40 = vld [vmem:[%s13290_s7 + $0xe4] sm:$0xf0]  ;;  %v7299_v41 = vld [vmem:[%s13290_s7 + $0x60] sm:$0xf] }
 0x3e3   : > { %v7300_v29 = vor.u32 %v8905_v43, %v7299_v41  ;;  %v8895_v41 = vld [vmem:[%s13290_s7 + $0x14] sm:$0xf0] }
 0x3e4   : > { %v2837_v42 = vpop.permute.xlu0 %2836 }
 0x3e5   : > { %2839 = vst.msk [vmem:[#allocation6 + $0x88] sm:$0xc0] %vm2809_vm15, %v2837_v42  ;;  %3749 = vmatpush.bf16.msrb.mxu3 %v7300_v29  ;;  %v9026_v29 = vld [vmem:[%s13290_s7 + $0x434] sm:$0xf] }
 0x3e6   : > { %2840 = vst.msk [vmem:[#allocation6 + $0xb0] sm:$0x7] %vm2811_vm14, %v2837_v42  ;;  %v7236_v42 = vor.u32 %v8921_v40, %v7235_v39  ;;  %v8911_v39 = vld [vmem:[%s13290_s7 + $0x94] sm:$0xf0]  ;;  %v7259_v40 = vld [vmem:[%s13290_s7 + $0x10] sm:$0xf] }
 0x3e7   : > { %v2716_v44 = vpop.permute.xlu1 %2715  ;;  %v3015_v49 = vld [vmem:[#allocation6 + $0x18] sm:$0xff]  ;;  %v7260_v43 = vor.u32 %v8895_v41, %v7259_v40  ;;  %v7711_v40 = vor.u32 %v9020_v31, %v7708_v32  ;;  %v7229_v41 = vld [vmem:[%s13290_s7 + $0xd8] sm:$0xf0]  ;;  %v3383_v32 = vadd.f32 %v10857_v26, %v10621_v22  ;;  %v7870_v22 = vld [vmem:[%s13290_s7 + $0x548] sm:$0xf0] }
 0x3e8   : > { %2718 = vst.msk [vmem:[#allocation6 + $0x60] sm:$0xf0] %vm2688_vm3, %v2716_v44  ;;  %v3020_v50 = vld [vmem:[#allocation6 + $0x40] sm:$0xff]  ;;  %3643 = vmatpush.bf16.msra.mxu2 %v7236_v42  ;;  %v7196_v42 = vor.u32 %v8911_v39, %v7195_v33  ;;  %v8918_v33 = vld [vmem:[%s13290_s7 + $0xd4] sm:$0xf] }
 0x3e9   : > { %2719 = vst.msk [vmem:[#allocation6 + $0x88] sm:$0x1] %vm2690_vm13, %v2716_v44  ;;  %v3050_v55 = vpack.c.bf16 %v3020_v50, %v3015_v49  ;;  %v8904_v44 = vld [vmem:[%s13290_s7 + $0x64] sm:$0xf]  ;;  %v7291_v49 = vld [vmem:[%s13290_s7 + $0x50] sm:$0xf] }
 0x3ea   : > { %3422 = vmatmul.bf16.gmra.mxu1 %v3063_v45  ;;  %v7301_v45 = vld [vmem:[%s13290_s7 + $0x68] sm:$0xf0]  ;;  %v8928_v31 = vld [vmem:[%s13290_s7 + $0x124] sm:$0xf] }
 0x3eb   : > { %v7304_v34 = vor.u32 %v8904_v44, %v7301_v45  ;;  %v8894_v44 = vld [vmem:[%s13290_s7 + $0x14] sm:$0xf]  ;;  %v7261_v45 = vld [vmem:[%s13290_s7 + $0x18] sm:$0xf0] }
 0x3ec   : > { %v2851_v47 = vpop.permute.xlu0 %2850 }
 0x3ed   : > { %2853 = vst.msk [vmem:[#allocation6 + $0x90] sm:$0xc0] %vm2809_vm15, %v2851_v47  ;;  %3762 = vmatpush.bf16.msrb.mxu1 %v7304_v34  ;;  %v7264_v34 = vor.u32 %v8894_v44, %v7261_v45  ;;  %v7232_v44 = vor.u32 %v8918_v33, %v7229_v41  ;;  %v8945_v41 = vld [vmem:[%s13290_s7 + $0x1a4] sm:$0xf0] }
 0x3ee   : > { %2854 = vst.msk [vmem:[#allocation6 + $0xb8] sm:$0x7] %vm2811_vm14, %v2851_v47  ;;  %v8919_v47 = vld [vmem:[%s13290_s7 + $0xd4] sm:$0xf0] }
 0x3ef   : > { %v2730_v51 = vpop.permute.xlu1 %2729  ;;  %v3024_v52 = vld [vmem:[#allocation6 + $0x60] sm:$0xff]  ;;  %v7228_v50 = vor.u32 %v8919_v47, %v7227_v46  ;;  %v7732_v46 = vld [vmem:[%s13290_s7 + $0x438] sm:$0xf0] }
 0x3f0   : > { %2732 = vst.msk [vmem:[#allocation6 + $0x68] sm:$0xf0] %vm2688_vm3, %v2730_v51  ;;  %v3029_v54 = vld [vmem:[#allocation6 + $0x88] sm:$0xff]  ;;  %v7735_v47 = vor.u32 %v9026_v29, %v7732_v46 }
 0x3f1   : > { %2733 = vst.msk [vmem:[#allocation6 + $0x90] sm:$0x1] %vm2690_vm13, %v2730_v51  ;;  %v3054_v7 = vpack.c.bf16 %v3029_v54, %v3024_v52  ;;  %v8903_v51 = vld [vmem:[%s13290_s7 + $0x54] sm:$0xf0]  ;;  %v8902_v52 = vld [vmem:[%s13290_s7 + $0x54] sm:$0xf]  ;;  %3644 = vmatpush.bf16.msra.mxu2 %v7228_v50 }
 0x3f2   : > { %3463 = vmatmul.bf16.vlgmr.msra.gmra.mxu3 %v3050_v55  ;;  %v7293_v54 = vld [vmem:[%s13290_s7 + $0x58] sm:$0xf0]  ;;  %v7292_v55 = vor.u32 %v8903_v51, %v7291_v49  ;;  %v7187_v49 = vld [vmem:[%s13290_s7 + $0x80] sm:$0xf]  ;;  %v8909_v50 = vld [vmem:[%s13290_s7 + $0x84] sm:$0xf0] }
 0x3f3   : > { %3440 = vmatmul.bf16.gmra.mxu2 %v3054_v7  ;;  %v7296_v7 = vor.u32 %v8902_v52, %v7293_v54  ;;  %v7251_v51 = vld [vmem:[%s13290_s7] sm:$0xf]  ;;  %v7421_v29 = vld [vmem:[%s13290_s7 + $0x1d0] sm:$0xf]  ;;  %v9066_v46 = vld [vmem:[%s13290_s7 + $0x574] sm:$0xf] }
 0x3f4   : > { %v2988_v56 = vpop.permute.xlu0 %2987  ;;  %3750 = vmatpush.bf16.msrb.mxu3 %v7292_v55  ;;  %v7188_v55 = vor.u32 %v8909_v50, %v7187_v49  ;;  %v7894_v50 = vld [vmem:[%s13290_s7 + $0x578] sm:$0xf0] }
 0x3f5   : > { %2990 = vst.msk [vmem:[#allocation6 + $0xd8] sm:$0xe0] %vm2501_vm7, %v2988_v56  ;;  %3763 = vmatpush.bf16.msrb.mxu1 %v7296_v7  ;;  %v8893_v7 = vld [vmem:[%s13290_s7 + $0x4] sm:$0xf0] }
 0x3f6   : > { %2991 = vst.msk [vmem:[#allocation6 + $0x100] sm:$0x3] %vm2503_vm8, %v2988_v56  ;;  %v10683_v56 = vpop.f32.mrf.mxu3 }
 0x3f7   : > { %v2896_v59 = vpop.permute.xlu1 %2895  ;;  %v3025_v63 = vld [vmem:[#allocation6 + $0x68] sm:$0xff] }
 0x3f8   : > { %2898 = vst.msk [vmem:[#allocation6 + $0xb0] sm:$0xf8] %vm2873_vm2, %v2896_v59  ;;  %v3030_v0 = vld [vmem:[#allocation6 + $0x90] sm:$0xff]  ;;  %v7219_v59 = vld [vmem:[%s13290_s7 + $0xc0] sm:$0xf] }
 0x3f9   : > { %v3055_v5 = vpack.c.bf16 %v3030_v0, %v3025_v63  ;;  %v8901_v63 = vld [vmem:[%s13290_s7 + $0x44] sm:$0xf0]  ;;  %v8900_v0 = vld [vmem:[%s13290_s7 + $0x44] sm:$0xf] }
 0x3fa   : > { %7180 = vmatmul.msk.bf16.vlgmr.msra.gmra.mxu1 %vm2437_vm5, %v3051_v62  ;;  %v7283_v62 = vld [vmem:[%s13290_s7 + $0x40] sm:$0xf] }
 0x3fc   : > { %v3002_v16 = vpop.permute.xlu0 %3001  ;;  %v3039_v3 = vld [vmem:[#allocation6 + $0xd8] sm:$0xff] }
 0x3fd   : > { %3004 = vst.msk [vmem:[#allocation6 + $0xe0] sm:$0xe0] %vm2501_vm7, %v3002_v16  ;;  %v3044_v12 = vld [vmem:[#allocation6 + $0x100] sm:$0x3] }
 0x3fe   : > { %3005 = vst.msk [vmem:[#allocation6 + $0x108] sm:$0x3] %vm2503_vm8, %v3002_v16  ;;  %v3064_v14 = vpack.c.bf16 %v3044_v12, %v3044_v12  ;;  %v7220_v16 = vor.u32 %v8917_v60, %v7219_v59  ;;  %v7277_v12 = vld [vmem:[%s13290_s7 + $0x38] sm:$0xf0]  ;;  %v8892_v59 = vld [vmem:[%s13290_s7 + $0x4] sm:$0xf] }
 0x3ff   : > { %v2908_v1 = vpop.permute.xlu1 %2907  ;;  %v3034_v2 = vld [vmem:[#allocation6 + $0xb0] sm:$0xff]  ;;  %v7253_v60 = vld [vmem:[%s13290_s7 + $0x8] sm:$0xf0] }
 0x400   : > { %2910 = vst.msk [vmem:[#allocation6 + $0xb8] sm:$0xf8] %vm2873_vm2, %v2908_v1  ;;  %v3059_v4 = vpack.c.bf16 %v3039_v3, %v3034_v2  ;;  %v7285_v1 = vld [vmem:[%s13290_s7 + $0x48] sm:$0xf0]  ;;  %v7284_v2 = vor.u32 %v8901_v63, %v7283_v62  ;;  %3645 = vmatpush.bf16.msra.mxu2 %v7220_v16  ;;  %v7252_v62 = vor.u32 %v8893_v7, %v7251_v51  ;;  %v9024_v63 = vld [vmem:[%s13290_s7 + $0x424] sm:$0xf] }
 0x401   : > { %v7288_v3 = vor.u32 %v8900_v0, %v7285_v1  ;;  %v7256_v16 = vor.u32 %v8892_v59, %v7253_v60  ;;  %v7724_v0 = vld [vmem:[%s13290_s7 + $0x428] sm:$0xf0]  ;;  %v8922_v1 = vld [vmem:[%s13290_s7 + $0xf4] sm:$0xf]  ;;  %v8916_v51 = vld [vmem:[%s13290_s7 + $0xc4] sm:$0xf]  ;;  %v3381_v7 = vadd.f32 %v10857_v26, %v10617_v20  ;;  %v7897_v59 = vor.u32 %v9066_v46, %v7894_v50 }
 0x402   : > { %3468 = vmatmul.bf16.gmra.mxu3 %v3055_v5  ;;  %v7748_v5 = vld [vmem:[%s13290_s7 + $0x458] sm:$0xf0]  ;;  %v8932_v60 = vld [vmem:[%s13290_s7 + $0x144] sm:$0xf]  ;;  %v8926_v50 = vld [vmem:[%s13290_s7 + $0x114] sm:$0xf] }
 0x403   : > { %3445 = vmatmul.bf16.gmra.mxu2 %v3059_v4  ;;  %v9030_v4 = vld [vmem:[%s13290_s7 + $0x454] sm:$0xf]  ;;  %3751 = vmatpush.bf16.msrb.mxu3 %v7284_v2  ;;  %v9064_v20 = vld [vmem:[%s13290_s7 + $0x564] sm:$0xf] }
 0x404   : > { %v3040_v61 = vld [vmem:[#allocation6 + $0xe0] sm:$0xff]  ;;  %v7751_v6 = vor.u32 %v9030_v4, %v7748_v5  ;;  %3764 = vmatpush.bf16.msrb.mxu1 %v7288_v3  ;;  %v7727_v3 = vor.u32 %v9024_v63, %v7724_v0  ;;  %v7245_v4 = vld [vmem:[%s13290_s7 + $0xf8] sm:$0xf0]  ;;  %v8938_v5 = vld [vmem:[%s13290_s7 + $0x174] sm:$0xf] }
 0x405   : > { %v3045_v17 = vld [vmem:[#allocation6 + $0x108] sm:$0x3]  ;;  %v8949_v63 = vld [vmem:[%s13290_s7 + $0x1c4] sm:$0xf0]  ;;  %v7886_v0 = vld [vmem:[%s13290_s7 + $0x568] sm:$0xf0] }
 0x406   : > { %v3065_v25 = vpack.c.bf16 %v3045_v17, %v3045_v17  ;;  %4650 = vmatpush.bf16.msrb.mxu0 %v7751_v6  ;;  %v7267_v17 = vld [vmem:[%s13290_s7 + $0x20] sm:$0xf]  ;;  %v7248_v6 = vor.u32 %v8922_v1, %v7245_v4  ;;  %v3409_v1 = vadd.f32 %v10619_v21, %v3381_v7  ;;  %v7213_v21 = vld [vmem:[%s13290_s7 + $0xb8] sm:$0xf0]  ;;  %v8943_v7 = vld [vmem:[%s13290_s7 + $0x194] sm:$0xf0] }
 0x407   : > { %v3035_v11 = vld [vmem:[#allocation6 + $0xb8] sm:$0xff] }
 0x408   : > { %v3060_v13 = vpack.c.bf16 %v3040_v61, %v3035_v11  ;;  %v8898_v11 = vld [vmem:[%s13290_s7 + $0x34] sm:$0xf]  ;;  %v7276_v61 = vor.u32 %v8899_v10, %v7275_v9  ;;  %v7437_v9 = vld [vmem:[%s13290_s7 + $0x1f0] sm:$0xf]  ;;  %v8955_v10 = vld [vmem:[%s13290_s7 + $0x1f4] sm:$0xf0] }
 0x40a   : > { %7181 = vmatmul.msk.bf16.gmra.mxu1 %vm2437_vm5, %v3056_v8  ;;  %v8915_v8 = vld [vmem:[%s13290_s7 + $0xb4] sm:$0xf0]  ;;  %3752 = vmatpush.bf16.msrb.mxu3 %v7276_v61  ;;  %v8920_v61 = vld [vmem:[%s13290_s7 + $0xe4] sm:$0xf] }
 0x40b   : > { %v7212_v48 = vor.u32 %v8915_v8, %v7211_v53  ;;  %4651 = vmatpush.bf16.msrb.mxu0 %v7743_v36  ;;  %v7374_v53 = vld [vmem:[%s13290_s7 + $0x178] sm:$0xf0] }
 0x40c   : > { %v7377_v8 = vor.u32 %v8938_v5, %v7374_v53  ;;  %v7889_v53 = vor.u32 %v9064_v20, %v7886_v0  ;;  %v7862_v20 = vld [vmem:[%s13290_s7 + $0x538] sm:$0xf0]  ;;  %v8908_v0 = vld [vmem:[%s13290_s7 + $0x84] sm:$0xf] }
 0x40d   : > { %3646 = vmatpush.bf16.msra.mxu2 %v7212_v48  ;;  %v9022_v48 = vld [vmem:[%s13290_s7 + $0x414] sm:$0xf] }
 0x40f   : > { %4652 = vmatpush.bf16.msrb.mxu0 %v7735_v47 }
 0x412   : > { %3473 = vmatmul.bf16.gmra.mxu3 %v3060_v13  ;;  %v7280_v13 = vor.u32 %v8898_v11, %v7277_v12  ;;  %v7438_v11 = vor.u32 %v8955_v10, %v7437_v9  ;;  %v7716_v12 = vld [vmem:[%s13290_s7 + $0x418] sm:$0xf0]  ;;  %v8930_v9 = vld [vmem:[%s13290_s7 + $0x134] sm:$0xf] }
 0x413   : > { %3450 = vmatmul.bf16.gmra.mxu2 %v3064_v14  ;;  %v10645_v38 = vpop.f32.mrf.mxu1  ;;  %4653 = vmatpush.bf16.msrb.mxu0 %v7727_v3 }
 0x414   : > { %3765 = vmatpush.bf16.msrb.mxu1 %v7280_v13  ;;  %v7237_v13 = vld [vmem:[%s13290_s7 + $0xe8] sm:$0xf0] }
 0x418   : > { %3766 = vmatpush.bf16.msrb.mxu1 %v7272_v30 }
 0x41a   : > { %7182 = vmatmul.msk.bf16.gmra.mxu1 %vm2437_vm5, %v3061_v15  ;;  %v8913_v15 = vld [vmem:[%s13290_s7 + $0xa4] sm:$0xf0] }
 0x41b   : > { %v10685_v57 = vpop.f32.mrf.mxu1  ;;  %v7204_v18 = vor.u32 %v8913_v15, %v7203_v23  ;;  %v7719_v23 = vor.u32 %v9022_v48, %v7716_v12  ;;  %v7240_v15 = vor.u32 %v8920_v61, %v7237_v13  ;;  %v7342_v48 = vld [vmem:[%s13290_s7 + $0x138] sm:$0xf0] }
 0x41c   : > { %3767 = vmatpush.bf16.msrb.mxu1 %v7264_v34  ;;  %v8951_v34 = vld [vmem:[%s13290_s7 + $0x1d4] sm:$0xf0] }
 0x41d   : > { %3647 = vmatpush.bf16.msra.mxu2 %v7204_v18  ;;  %v7366_v18 = vld [vmem:[%s13290_s7 + $0x168] sm:$0xf0]  ;;  %4654 = vmatpush.bf16.msrb.mxu0 %v7719_v23  ;;  %v7422_v49 = vor.u32 %v8951_v34, %v7421_v29  ;;  %v7345_v23 = vor.u32 %v8930_v9, %v7342_v48  ;;  %v7381_v9 = vld [vmem:[%s13290_s7 + $0x180] sm:$0xf]  ;;  %v9056_v48 = vld [vmem:[%s13290_s7 + $0x524] sm:$0xf] }
 0x420   : > { %3768 = vmatpush.bf16.msrb.mxu1 %v7256_v16  ;;  %v7413_v16 = vld [vmem:[%s13290_s7 + $0x1c0] sm:$0xf] }
 0x421   : > { %3648 = vmatpush.bf16.msra.mxu2 %v7196_v42  ;;  %v8934_v42 = vld [vmem:[%s13290_s7 + $0x154] sm:$0xf]  ;;  %4655 = vmatpush.bf16.msrb.mxu0 %v7711_v40  ;;  %v7414_v5 = vor.u32 %v8949_v63, %v7413_v16  ;;  %v7397_v40 = vld [vmem:[%s13290_s7 + $0x1a0] sm:$0xf] }
 0x422   : > { %3478 = vmatmul.bf16.gmra.mxu3 %v3065_v25  ;;  %v7398_v34 = vor.u32 %v8945_v41, %v7397_v40  ;;  %v9058_v63 = vld [vmem:[%s13290_s7 + $0x534] sm:$0xf] }
 0x424   : > { %4000 = vmatpush.bf16.msra.mxu1 %v7438_v11  ;;  %v8947_v11 = vld [vmem:[%s13290_s7 + $0x1b4] sm:$0xf0] }
 0x425   : > { %3649 = vmatpush.bf16.msra.mxu2 %v7188_v55  ;;  %v7221_v55 = vld [vmem:[%s13290_s7 + $0xc8] sm:$0xf0]  ;;  %4902 = vmatpush.bf16.msra.mxu0 %v7897_v59 }
 0x426   : > { %v7224_v3 = vor.u32 %v8916_v51, %v7221_v55  ;;  %v7389_v55 = vld [vmem:[%s13290_s7 + $0x190] sm:$0xf] }
 0x429   : > { %3655 = vmatpush.bf16.msrb.mxu2 %v7248_v6  ;;  %4903 = vmatpush.bf16.msra.mxu0 %v7889_v53  ;;  %v8924_v53 = vld [vmem:[%s13290_s7 + $0x104] sm:$0xf] }
 0x42a   : > { %7183 = vmatmul.msk.bf16.gmra.mxu1 %vm2437_vm5, %v3066_v19  ;;  %v8897_v19 = vld [vmem:[%s13290_s7 + $0x24] sm:$0xf0] }
 0x42b   : > { %v7268_v28 = vor.u32 %v8897_v19, %v7267_v17  ;;  %v8936_v17 = vld [vmem:[%s13290_s7 + $0x164] sm:$0xf]  ;;  %v7429_v19 = vld [vmem:[%s13290_s7 + $0x1e0] sm:$0xf] }
 0x42c   : > { %v7369_v27 = vor.u32 %v8936_v17, %v7366_v18  ;;  %v7878_v17 = vld [vmem:[%s13290_s7 + $0x558] sm:$0xf0] }
 0x42d   : > { %3753 = vmatpush.bf16.msrb.mxu3 %v7268_v28  ;;  %v8953_v28 = vld [vmem:[%s13290_s7 + $0x1e4] sm:$0xf0]  ;;  %3656 = vmatpush.bf16.msrb.mxu2 %v7240_v15  ;;  %v9062_v15 = vld [vmem:[%s13290_s7 + $0x554] sm:$0xf] }
 0x42e   : > { %v7430_v30 = vor.u32 %v8953_v28, %v7429_v19  ;;  %v8912_v28 = vld [vmem:[%s13290_s7 + $0xa4] sm:$0xf] }
 0x430   : > { %4001 = vmatpush.bf16.msra.mxu1 %v7430_v30  ;;  %v7205_v30 = vld [vmem:[%s13290_s7 + $0xa8] sm:$0xf0] }
 0x431   : > { %3754 = vmatpush.bf16.msrb.mxu3 %v7260_v43  ;;  %v7358_v43 = vld [vmem:[%s13290_s7 + $0x158] sm:$0xf0]  ;;  %3657 = vmatpush.bf16.msrb.mxu2 %v7232_v44 }
 0x432   : > { %v7361_v45 = vor.u32 %v8934_v42, %v7358_v43  ;;  %v9060_v42 = vld [vmem:[%s13290_s7 + $0x544] sm:$0xf]  ;;  %v3411_v43 = vadd.f32 %v10623_v24, %v3383_v32  ;;  %v7197_v24 = vld [vmem:[%s13290_s7 + $0x98] sm:$0xf0] }
 0x433   : > { %v7873_v46 = vor.u32 %v9060_v42, %v7870_v22 }
 0x434   : > { %4002 = vmatpush.bf16.msra.mxu1 %v7422_v49  ;;  %v8910_v49 = vld [vmem:[%s13290_s7 + $0x94] sm:$0xf] }
 0x435   : > { %3755 = vmatpush.bf16.msrb.mxu3 %v7252_v62  ;;  %v7350_v62 = vld [vmem:[%s13290_s7 + $0x148] sm:$0xf0]  ;;  %3658 = vmatpush.bf16.msrb.mxu2 %v7224_v3  ;;  %v7390_v3 = vor.u32 %v8943_v7, %v7389_v55  ;;  %v7502_v7 = vld [vmem:[%s13290_s7 + $0x270] sm:$0xf] }
 0x436   : > { %v7353_v4 = vor.u32 %v8932_v60, %v7350_v62  ;;  %v7200_v62 = vor.u32 %v8910_v49, %v7197_v24 }
 0x438   : > { %4003 = vmatpush.bf16.msra.mxu1 %v7414_v5  ;;  %v7189_v5 = vld [vmem:[%s13290_s7 + $0x88] sm:$0xf0] }
 0x439   : > { %3886 = vmatpush.bf16.msra.mxu3 %v7377_v8  ;;  %v8914_v8 = vld [vmem:[%s13290_s7 + $0xb4] sm:$0xf] }
 0x43a   : > { %v7216_v13 = vor.u32 %v8914_v8, %v7213_v21  ;;  %v3386_v8 = vadd.f32 %v10857_v26, %v10643_v37 }
 0x43c   : > { %3659 = vmatpush.bf16.msrb.mxu2 %v7216_v13  ;;  %v3414_v37 = vadd.f32 %v10645_v38, %v3386_v8  ;;  %v7846_v38 = vld [vmem:[%s13290_s7 + $0x518] sm:$0xf0]  ;;  %v8937_v8 = vld [vmem:[%s13290_s7 + $0x164] sm:$0xf0] }
 0x43d   : > { %3887 = vmatpush.bf16.msra.mxu3 %v7369_v27  ;;  %v7881_v27 = vor.u32 %v9062_v15, %v7878_v17 }
 0x43f   : > { %4904 = vmatpush.bf16.msra.mxu0 %v7881_v27 }
 0x441   : > { %3888 = vmatpush.bf16.msra.mxu3 %v7361_v45  ;;  %v7208_v45 = vor.u32 %v8912_v28, %v7205_v30 }
 0x443   : > { %3660 = vmatpush.bf16.msrb.mxu2 %v7208_v45  ;;  %4905 = vmatpush.bf16.msra.mxu0 %v7873_v46 }
 0x445   : > { %3889 = vmatpush.bf16.msra.mxu3 %v7353_v4  ;;  %v7865_v4 = vor.u32 %v9058_v63, %v7862_v20  ;;  %v7364_v63 = vld [vmem:[%s13290_s7 + $0x160] sm:$0xf] }
 0x447   : > { %3661 = vmatpush.bf16.msrb.mxu2 %v7200_v62  ;;  %4906 = vmatpush.bf16.msra.mxu0 %v7865_v4 }
 0x449   : > { %3890 = vmatpush.bf16.msra.mxu3 %v7345_v23 }
 0x455   : > { %v10729_v14 = vpop.f32.mrf.mxu3 }
 0x457   : > { %v10731_v58 = vpop.f32.mrf.mxu1 }
 0x45d   : > { %v10742_v25 = vpop.f32.mrf.mxu3 }
 0x45e   : > { %v3393_v24 = vadd.f32 %v10857_v26, %v10742_v25  ;;  %v8971_v25 = vld [vmem:[%s13290_s7 + $0x274] sm:$0xf0] }
 0x45f   : > { %v10762_v35 = vpop.f32.mrf.mxu1 }
 0x460   : > { %v3421_v62 = vadd.f32 %v10762_v35, %v3393_v24  ;;  %v7494_v35 = vld [vmem:[%s13290_s7 + $0x260] sm:$0xf] }
 0x465   : > { %v10794_v52 = vpop.f32.mrf.mxu3  ;;  %v10796_v54 = vpop.f32.mrf.mxu2 }
 0x466   : > { %v3437_v6 = vadd.f32 %v10796_v54, %v3409_v1  ;;  %v7405_v54 = vld [vmem:[%s13290_s7 + $0x1b0] sm:$0xf] }
 0x467   : > { %v10816_v2 = vpop.f32.mrf.mxu1  ;;  %v7406_v19 = vor.u32 %v8947_v11, %v7405_v54  ;;  %v7854_v54 = vld [vmem:[%s13290_s7 + $0x528] sm:$0xf0] }
 0x468   : > { %v7857_v15 = vor.u32 %v9056_v48, %v7854_v54  ;;  %v7496_v48 = vld [vmem:[%s13290_s7 + $0x268] sm:$0xf0]  ;;  %v3396_v54 = vadd.f32 %v10857_v26, %v10794_v52  ;;  %v7486_v52 = vld [vmem:[%s13290_s7 + $0x250] sm:$0xf] }
 0x469   : > { %4004 = vmatpush.bf16.msra.mxu1 %v7406_v19 }
 0x46a   : > { %4907 = vmatpush.bf16.msra.mxu0 %v7857_v15  ;;  %v8935_v15 = vld [vmem:[%s13290_s7 + $0x154] sm:$0xf0] }
 0x46d   : > { %v3397_v36 = vpop.f32.mrf.mxu3  ;;  %v10872_v39 = vpop.f32.mrf.mxu2  ;;  %4005 = vmatpush.bf16.msra.mxu1 %v7398_v34 }
 0x46e   : > { %v7334_v36 = vld [vmem:[%s13290_s7 + $0x128] sm:$0xf0] }
 0x46f   : > { %v3425_v47 = vpop.f32.mrf.mxu1  ;;  %v7337_v29 = vor.u32 %v8928_v31, %v7334_v36  ;;  %v7838_v36 = vld [vmem:[%s13290_s7 + $0x508] sm:$0xf0] }
 0x470   : > { %v3439_v47 = vadd.f32 %v10872_v39, %v3411_v43  ;;  %v7326_v39 = vld [vmem:[%s13290_s7 + $0x118] sm:$0xf0] }
 0x471   : > { %3891 = vmatpush.bf16.msra.mxu3 %v7337_v29  ;;  %v7329_v16 = vor.u32 %v8926_v50, %v7326_v39  ;;  %4006 = vmatpush.bf16.msra.mxu1 %v7390_v3  ;;  %v7503_v3 = vor.u32 %v8971_v25, %v7502_v7  ;;  %v8963_v25 = vld [vmem:[%s13290_s7 + $0x234] sm:$0xf0] }
 0x475   : > { %v3464_v10 = vpop.f32.mrf.mxu3  ;;  %3892 = vmatpush.bf16.msra.mxu3 %v7329_v16 }
 0x476   : > { %v10945_v12 = vpop.f32.mrf.mxu2  ;;  %v3465_v61 = vadd.f32 %v3464_v10, %v3437_v6  ;;  %v7318_v6 = vld [vmem:[%s13290_s7 + $0x108] sm:$0xf0]  ;;  %v8941_v10 = vld [vmem:[%s13290_s7 + $0x184] sm:$0xf0] }
 0x477   : > { %v3492_v18 = vpop.f32.mrf.mxu1  ;;  %v7321_v13 = vor.u32 %v8924_v53, %v7318_v6  ;;  %v7382_v23 = vor.u32 %v8941_v10, %v7381_v9  ;;  %v3442_v17 = vadd.f32 %v10945_v12, %v3414_v37  ;;  %v3388_v12 = vadd.f32 %v10857_v26, %v10683_v56  ;;  %v8969_v9 = vld [vmem:[%s13290_s7 + $0x264] sm:$0xf0]  ;;  %v8968_v10 = vld [vmem:[%s13290_s7 + $0x264] sm:$0xf] }
 0x478   : > { %v3493_v33 = vadd.f32 %v3492_v18, %v3465_v61  ;;  %v7192_v61 = vor.u32 %v8908_v0, %v7189_v5  ;;  %v9054_v18 = vld [vmem:[%s13290_s7 + $0x514] sm:$0xf]  ;;  %v3391_v56 = vadd.f32 %v10857_v26, %v10729_v14  ;;  %v7372_v14 = vld [vmem:[%s13290_s7 + $0x170] sm:$0xf] }
 0x479   : > { %3893 = vmatpush.bf16.msra.mxu3 %v7321_v13  ;;  %4007 = vmatpush.bf16.msra.mxu1 %v7382_v23  ;;  %v7849_v31 = vor.u32 %v9054_v18, %v7846_v38  ;;  %v3416_v40 = vadd.f32 %v10685_v57, %v3388_v12  ;;  %v7365_v13 = vor.u32 %v8937_v8, %v7364_v63  ;;  %v7356_v23 = vld [vmem:[%s13290_s7 + $0x150] sm:$0xf]  ;;  %v8967_v38 = vld [vmem:[%s13290_s7 + $0x254] sm:$0xf0]  ;;  %v8929_v8 = vld [vmem:[%s13290_s7 + $0x124] sm:$0xf0] }
 0x47a   : > { %v3511_v44 = vmax.f32 %v3493_v33, 0.0  ;;  %3662 = vmatpush.bf16.msrb.mxu2 %v7192_v61  ;;  %v9052_v33 = vld [vmem:[%s13290_s7 + $0x504] sm:$0xf]  ;;  %v3419_v46 = vadd.f32 %v10731_v58, %v3391_v56  ;;  %v8939_v58 = vld [vmem:[%s13290_s7 + $0x174] sm:$0xf0]  ;;  %v7499_v18 = vor.u32 %v8968_v10, %v7496_v48 }
 0x47b   : > { %4908 = vmatpush.bf16.msra.mxu0 %v7849_v31  ;;  %v7841_v42 = vor.u32 %v9052_v33, %v7838_v36  ;;  %v3424_v31 = vadd.f32 %v10816_v2, %v3396_v54  ;;  %v8933_v33 = vld [vmem:[%s13290_s7 + $0x144] sm:$0xf0]  ;;  %v7357_v36 = vor.u32 %v8935_v15, %v7356_v23  ;;  %v8960_v54 = vld [vmem:[%s13290_s7 + $0x224] sm:$0xf]  ;;  %v8927_v15 = vld [vmem:[%s13290_s7 + $0x114] sm:$0xf0] }
 0x47c   : > { %3518 = vst [vmem:[%s10982_s25] sm:$0xff] %v3511_v44  ;;  %v8961_v48 = vld [vmem:[%s13290_s7 + $0x224] sm:$0xf0] }
 0x47d   : > { %v3466_v51 = vpop.f32.mrf.mxu3 }
 0x47e   : > { %v3443_v59 = vpop.f32.mrf.mxu2  ;;  %v3467_v60 = vadd.f32 %v3466_v51, %v3439_v47 }
 0x47f   : > { %v3494_v1 = vpop.f32.mrf.mxu1  ;;  %v3444_v22 = vadd.f32 %v3443_v59, %v3416_v40  ;;  %4909 = vmatpush.bf16.msra.mxu0 %v7841_v42  ;;  %v8970_v59 = vld [vmem:[%s13290_s7 + $0x274] sm:$0xf]  ;;  %v7487_v40 = vor.u32 %v8967_v38, %v7486_v52 }
 0x480   : > { %v3495_v21 = vadd.f32 %v3494_v1, %v3467_v60  ;;  %v7504_v60 = vld [vmem:[%s13290_s7 + $0x278] sm:$0xf0]  ;;  %v7373_v1 = vor.u32 %v8939_v58, %v7372_v14  ;;  %v7470_v14 = vld [vmem:[%s13290_s7 + $0x230] sm:$0xf]  ;;  %v8958_v38 = vld [vmem:[%s13290_s7 + $0x214] sm:$0xf] }
 0x481   : > { %v7507_v6 = vor.u32 %v8970_v59, %v7504_v60  ;;  %v8962_v59 = vld [vmem:[%s13290_s7 + $0x234] sm:$0xf]  ;;  %v7472_v60 = vld [vmem:[%s13290_s7 + $0x238] sm:$0xf0] }
 0x482   : > { %v3512_v11 = vmax.f32 %v3495_v21, 0.0 }
 0x484   : > { %3519 = vst [vmem:[%s10982_s25 + $0x8] sm:$0xff] %v3512_v11 }
 0x485   : > { %v3469_v19 = vpop.f32.mrf.mxu3 }
 0x486   : > { %v3446_v27 = vpop.f32.mrf.mxu2  ;;  %v3470_v28 = vadd.f32 %v3469_v19, %v3442_v17  ;;  %v7495_v17 = vor.u32 %v8969_v9, %v7494_v35  ;;  %v9098_v19 = vld [vmem:[%s13290_s7 + $0x674] sm:$0xf]  ;;  %v7462_v35 = vld [vmem:[%s13290_s7 + $0x220] sm:$0xf] }
 0x487   : > { %v3497_v30 = vpop.f32.mrf.mxu1  ;;  %v3447_v49 = vadd.f32 %v3446_v27, %v3419_v46  ;;  %v8024_v27 = vld [vmem:[%s13290_s7 + $0x678] sm:$0xf0]  ;;  %v8964_v46 = vld [vmem:[%s13290_s7 + $0x244] sm:$0xf]  ;;  %v7463_v52 = vor.u32 %v8961_v48, %v7462_v35  ;;  %v7968_v35 = vld [vmem:[%s13290_s7 + $0x608] sm:$0xf0] }
 0x488   : > { %v3498_v32 = vadd.f32 %v3497_v30, %v3470_v28  ;;  %v8966_v28 = vld [vmem:[%s13290_s7 + $0x254] sm:$0xf]  ;;  %v7488_v30 = vld [vmem:[%s13290_s7 + $0x258] sm:$0xf0]  ;;  %v8027_v42 = vor.u32 %v9098_v19, %v8024_v27 }
 0x489   : > { %v7491_v2 = vor.u32 %v8966_v28, %v7488_v30  ;;  %v7456_v27 = vld [vmem:[%s13290_s7 + $0x218] sm:$0xf0]  ;;  %v9090_v30 = vld [vmem:[%s13290_s7 + $0x634] sm:$0xf] }
 0x48a   : > { %v3513_v41 = vmax.f32 %v3498_v32, 0.0  ;;  %v7348_v32 = vld [vmem:[%s13290_s7 + $0x140] sm:$0xf]  ;;  %v8950_v48 = vld [vmem:[%s13290_s7 + $0x1d4] sm:$0xf] }
 0x48b   : > { %v7349_v24 = vor.u32 %v8933_v33, %v7348_v32  ;;  %v7316_v32 = vld [vmem:[%s13290_s7 + $0x100] sm:$0xf]  ;;  %v8925_v33 = vld [vmem:[%s13290_s7 + $0x104] sm:$0xf0] }
 0x48c   : > { %3520 = vst [vmem:[%s10982_s25 + $0x10] sm:$0xff] %v3513_v41 }
 0x48d   : > { %v3471_v43 = vpop.f32.mrf.mxu3 }
 0x48e   : > { %v3448_v44 = vpop.f32.mrf.mxu2  ;;  %v3472_v45 = vadd.f32 %v3471_v43, %v3444_v22  ;;  %v7478_v22 = vld [vmem:[%s13290_s7 + $0x240] sm:$0xf] }
 0x48f   : > { %v3499_v29 = vpop.f32.mrf.mxu1  ;;  %v3449_v4 = vadd.f32 %v3448_v44, %v3421_v62  ;;  %v9096_v44 = vld [vmem:[%s13290_s7 + $0x664] sm:$0xf] }
 0x490   : > { %v3500_v34 = vadd.f32 %v3499_v29, %v3472_v45  ;;  %v8016_v45 = vld [vmem:[%s13290_s7 + $0x668] sm:$0xf0] }
 0x492   : > { %v3514_v47 = vmax.f32 %v3500_v34, 0.0  ;;  %v8965_v34 = vld [vmem:[%s13290_s7 + $0x244] sm:$0xf0] }
 0x493   : > { %v7479_v58 = vor.u32 %v8965_v34, %v7478_v22  ;;  %v8957_v22 = vld [vmem:[%s13290_s7 + $0x204] sm:$0xf0]  ;;  %v8954_v34 = vld [vmem:[%s13290_s7 + $0x1f4] sm:$0xf] }
 0x494   : > { %3521 = vst [vmem:[%s10982_s25 + $0x18] sm:$0xff] %v3514_v47  ;;  %v7480_v47 = vld [vmem:[%s13290_s7 + $0x248] sm:$0xf0] }
 0x495   : > { %v3474_v57 = vpop.f32.mrf.mxu3  ;;  %v7483_v7 = vor.u32 %v8964_v46, %v7480_v47  ;;  %v7439_v46 = vld [vmem:[%s13290_s7 + $0x1f8] sm:$0xf0]  ;;  %v8986_v47 = vld [vmem:[%s13290_s7 + $0x2f4] sm:$0xf] }
 0x496   : > { %v3451_v50 = vpop.f32.mrf.mxu2  ;;  %v3475_v51 = vadd.f32 %v3474_v57, %v3447_v49 }
 0x497   : > { %v3502_v39 = vpop.f32.mrf.mxu1  ;;  %v3452_v43 = vadd.f32 %v3451_v50, %v3424_v31  ;;  %v8019_v50 = vor.u32 %v9096_v44, %v8016_v45  ;;  %v7992_v31 = vld [vmem:[%s13290_s7 + $0x638] sm:$0xf0]  ;;  %v7448_v44 = vld [vmem:[%s13290_s7 + $0x208] sm:$0xf0]  ;;  %v9088_v45 = vld [vmem:[%s13290_s7 + $0x624] sm:$0xf] }
 0x498   : > { %v3503_v55 = vadd.f32 %v3502_v39, %v3475_v51  ;;  %v7340_v51 = vld [vmem:[%s13290_s7 + $0x130] sm:$0xf]  ;;  %v8931_v39 = vld [vmem:[%s13290_s7 + $0x134] sm:$0xf0] }
 0x49a   : > { %v3515_v16 = vmax.f32 %v3503_v55, 0.0 }
 0x49b   : > { %v7184_v20 = vld [vmem:[%s10982_s25 + $0x1] ss:$25 sm:$0x3]  ;;  %v3525_v0 = vld [vmem:[%s10982_s25] ss:$25 sm:$0x3] }
 0x49c   : > { %3522 = vst [vmem:[%s10982_s25 + $0x20] sm:$0xff] %v3515_v16  ;;  %v11085_v5 = vpack.c.bf16 %v7184_v20, %v7184_v20  ;;  %v3526_v53 = vpack.c.bf16 %v3525_v0, %v3525_v0  ;;  %v7313_v62 = vld [vmem:[%s10982_s25 + $0x2] ss:$25 sm:$0x3]  ;;  %v9094_v16 = vld [vmem:[%s13290_s7 + $0x654] sm:$0xf] }
 0x49d   : > { %v3476_v21 = vpop.f32.mrf.mxu3  ;;  %v7378_v20 = vld [vmem:[%s10982_s25 + $0x3] ss:$25 sm:$0x3] }
 0x49e   : > { %v3453_v37 = vpop.f32.mrf.mxu2  ;;  %v3477_v11 = vadd.f32 %v3476_v21, %v3449_v4  ;;  %3650 = vmatmul.bf16.vlgmr.msra.gmra.mxu2 %v11085_v5  ;;  %3756 = vmatmul.bf16.vlgmr.msrb.gmra.mxu3 %v3526_v53  ;;  %v8008_v0 = vld [vmem:[%s13290_s7 + $0x658] sm:$0xf0]  ;;  %v11189_v4 = vpack.c.bf16 %v7313_v62, %v7313_v62  ;;  %v11197_v9 = vpack.c.bf16 %v7378_v20, %v7378_v20  ;;  %v8952_v62 = vld [vmem:[%s13290_s7 + $0x1e4] sm:$0xf]  ;;  %v7561_v20 = vld [vmem:[%s13290_s7 + $0x2e8] sm:$0xf0] }
 0x49f   : > { %3769 = vmatmul.bf16.vlgmr.msrb.gmra.mxu1 %v3526_v53  ;;  %3873 = vmatpush.bf16.msra.mxu2 %v7373_v1  ;;  %v3504_v61 = vpop.f32.mrf.mxu1  ;;  %v7341_v1 = vor.u32 %v8931_v39, %v7340_v51  ;;  %v7471_v53 = vor.u32 %v8963_v25, %v7470_v14  ;;  %v8011_v10 = vor.u32 %v9094_v16, %v8008_v0  ;;  %v7464_v37 = vld [vmem:[%s13290_s7 + $0x228] sm:$0xf0]  ;;  %v7443_v14 = vld [vmem:[%s10982_s25 + $0x4] ss:$25 sm:$0x3] }
 0x4a0   : > { %4127 = vmatpush.bf16.msrb.mxu3 %v7503_v3  ;;  %4140 = vmatpush.bf16.msrb.mxu1 %v7507_v6  ;;  %v3505_v26 = vadd.f32 %v3504_v61, %v3477_v11  ;;  %v7332_v3 = vld [vmem:[%s13290_s7 + $0x120] sm:$0xf]  ;;  %v7475_v6 = vor.u32 %v8962_v59, %v7472_v60  ;;  %v9092_v11 = vld [vmem:[%s13290_s7 + $0x644] sm:$0xf]  ;;  %v8000_v61 = vld [vmem:[%s13290_s7 + $0x648] sm:$0xf0] }
 0x4a1   : > { %v7333_v23 = vor.u32 %v8929_v8, %v7332_v3  ;;  %v8003_v19 = vor.u32 %v9092_v11, %v8000_v61  ;;  %v7976_v25 = vld [vmem:[%s13290_s7 + $0x618] sm:$0xf0]  ;;  %v7431_v16 = vld [vmem:[%s13290_s7 + $0x1e8] sm:$0xf0]  ;;  %v7624_v0 = vld [vmem:[%s13290_s7 + $0x360] sm:$0xf]  ;;  %v4030_v3 = vpack.c.bf16 %v7443_v14, %v7443_v14 }
 0x4a2   : > { %v3516_v12 = vmax.f32 %v3505_v26, 0.0  ;;  %v7467_v26 = vor.u32 %v8960_v54, %v7464_v37  ;;  %v9084_v8 = vld [vmem:[%s13290_s7 + $0x604] sm:$0xf]  ;;  %v7423_v54 = vld [vmem:[%s13290_s7 + $0x1d8] sm:$0xf0] }
 0x4a3   : > { %3874 = vmatpush.bf16.msra.mxu2 %v7365_v13  ;;  %v7703_v41 = vld [vmem:[%s10982_s25 + $0x8] ss:$25 sm:$0x3]  ;;  %v7833_v28 = vld [vmem:[%s10982_s25 + $0xa] ss:$25 sm:$0x3] }
 0x4a4   : > { %3523 = vst [vmem:[%s10982_s25 + $0x28] sm:$0xff] %v3516_v12  ;;  %4128 = vmatpush.bf16.msrb.mxu3 %v7495_v17  ;;  %4141 = vmatpush.bf16.msrb.mxu1 %v7499_v18  ;;  %v11141_v56 = vpack.c.bf16 %v7703_v41, %v7703_v41  ;;  %v7454_v17 = vld [vmem:[%s13290_s7 + $0x210] sm:$0xf]  ;;  %v8959_v18 = vld [vmem:[%s13290_s7 + $0x214] sm:$0xf0]  ;;  %v11248_v41 = vpack.c.bf16 %v7833_v28, %v7833_v28 }
 0x4a5   : > { %v3479_v29 = vpop.f32.mrf.mxu3  ;;  %v8982_v37 = vld [vmem:[%s13290_s7 + $0x2d4] sm:$0xf]  ;;  %v7553_v11 = vld [vmem:[%s13290_s7 + $0x2d8] sm:$0xf0]  ;;  %v7616_v61 = vld [vmem:[%s13290_s7 + $0x350] sm:$0xf] }
 0x4a6   : > { %v3480_v49 = vadd.f32 %v3479_v29, %v3452_v43  ;;  %4656 = vmatmul.bf16.vlgmr.msrb.gmra.mxu0 %v11141_v56  ;;  %v8956_v43 = vld [vmem:[%s13290_s7 + $0x204] sm:$0xf]  ;;  %v7984_v29 = vld [vmem:[%s13290_s7 + $0x628] sm:$0xf0] }
 0x4a7   : > { %3875 = vmatpush.bf16.msra.mxu2 %v7357_v36  ;;  %5156 = vmatpush.bf16.msrb.mxu0 %v8027_v42  ;;  %v3507_v57 = vpop.f32.mrf.mxu1  ;;  %v7455_v36 = vor.u32 %v8959_v18, %v7454_v17  ;;  %v7446_v42 = vld [vmem:[%s13290_s7 + $0x200] sm:$0xf]  ;;  %v7451_v39 = vor.u32 %v8956_v43, %v7448_v44  ;;  %v8948_v18 = vld [vmem:[%s13290_s7 + $0x1c4] sm:$0xf]  ;;  %v7545_v28 = vld [vmem:[%s13290_s7 + $0x2c8] sm:$0xf0] }
 0x4a8   : > { %4129 = vmatpush.bf16.msrb.mxu3 %v7487_v40  ;;  %4142 = vmatpush.bf16.msrb.mxu1 %v7491_v2  ;;  %v3508_v55 = vadd.f32 %v3507_v57, %v3480_v49  ;;  %v7459_v40 = vor.u32 %v8958_v38, %v7456_v27  ;;  %v7995_v2 = vor.u32 %v9090_v30, %v7992_v31  ;;  %v7569_v57 = vld [vmem:[%s13290_s7 + $0x2f8] sm:$0xf0]  ;;  %v7415_v38 = vld [vmem:[%s13290_s7 + $0x1c8] sm:$0xf0]  ;;  %v7608_v30 = vld [vmem:[%s13290_s7 + $0x340] sm:$0xf] }
 0x4a9   : > { %v7317_v49 = vor.u32 %v8925_v33, %v7316_v32  ;;  %v7447_v51 = vor.u32 %v8957_v22, %v7446_v42  ;;  %v7572_v59 = vor.u32 %v8986_v47, %v7569_v57  ;;  %v8997_v31 = vld [vmem:[%s13290_s7 + $0x344] sm:$0xf0]  ;;  %v8146_v32 = vld [vmem:[%s13290_s7 + $0x768] sm:$0xf0]  ;;  %v7418_v33 = vor.u32 %v8948_v18, %v7415_v38  ;;  %v8946_v22 = vld [vmem:[%s13290_s7 + $0x1b4] sm:$0xf] }
 0x4aa   : > { %v3517_v63 = vmax.f32 %v3508_v55, 0.0  ;;  %v7987_v55 = vor.u32 %v9088_v45, %v7984_v29  ;;  %v7609_v42 = vor.u32 %v8997_v31, %v7608_v30  ;;  %v7407_v43 = vld [vmem:[%s13290_s7 + $0x1b8] sm:$0xf0]  ;;  %v7600_v29 = vld [vmem:[%s13290_s7 + $0x330] sm:$0xf] }
 0x4ab   : > { %3876 = vmatpush.bf16.msra.mxu2 %v7349_v24  ;;  %5157 = vmatpush.bf16.msrb.mxu0 %v8019_v50  ;;  %v7632_v24 = vld [vmem:[%s13290_s7 + $0x370] sm:$0xf]  ;;  %v9003_v50 = vld [vmem:[%s13290_s7 + $0x374] sm:$0xf0]  ;;  %v7537_v45 = vld [vmem:[%s13290_s7 + $0x2b8] sm:$0xf0] }
 0x4ac   : > { %3524 = vst [vmem:[%s10982_s25 + $0x30] sm:$0x3] %v3517_v63  ;;  %4130 = vmatpush.bf16.msrb.mxu3 %v7479_v58  ;;  %4143 = vmatpush.bf16.msrb.mxu1 %v7483_v7  ;;  %v7442_v58 = vor.u32 %v8954_v34, %v7439_v46  ;;  %v9086_v7 = vld [vmem:[%s13290_s7 + $0x614] sm:$0xf]  ;;  %v7633_v60 = vor.u32 %v9003_v50, %v7632_v24  ;;  %v8984_v63 = vld [vmem:[%s13290_s7 + $0x2e4] sm:$0xf] }
 0x4ad   : > { %v3481_v21 = vpop.f32.mrf.mxu3  ;;  %v8995_v34 = vld [vmem:[%s13290_s7 + $0x334] sm:$0xf0]  ;;  %v9126_v46 = vld [vmem:[%s13290_s7 + $0x754] sm:$0xf]  ;;  %v8138_v47 = vld [vmem:[%s13290_s7 + $0x758] sm:$0xf0] }
 0x4ae   : > { %3663 = vmatmul.bf16.vlgmr.msrb.gmra.mxu2 %v11085_v5  ;;  %3894 = vmatmul.bf16.vlgmr.msra.gmra.mxu3 %v11189_v4  ;;  %v7324_v5 = vld [vmem:[%s13290_s7 + $0x110] sm:$0xf]  ;;  %v7564_v21 = vor.u32 %v8984_v63, %v7561_v20  ;;  %v7601_v24 = vor.u32 %v8995_v34, %v7600_v29  ;;  %v8944_v50 = vld [vmem:[%s13290_s7 + $0x1a4] sm:$0xf]  ;;  %v8141_v14 = vor.u32 %v9126_v46, %v8138_v47  ;;  %v8942_v63 = vld [vmem:[%s13290_s7 + $0x194] sm:$0xf] }
 0x4af   : > { %3877 = vmatpush.bf16.msra.mxu2 %v7341_v1  ;;  %4008 = vmatmul.bf16.vlgmr.msra.gmra.mxu1 %v11197_v9  ;;  %v3509_v13 = vpop.f32.mrf.mxu1  ;;  %v7325_v12 = vor.u32 %v8927_v15, %v7324_v5  ;;  %v9001_v1 = vld [vmem:[%s13290_s7 + $0x364] sm:$0xf0]  ;;  %v7971_v5 = vor.u32 %v9084_v8, %v7968_v35  ;;  %v7426_v15 = vor.u32 %v8950_v48, %v7423_v54  ;;  %v7391_v20 = vld [vmem:[%s13290_s7 + $0x198] sm:$0xf0]  ;;  %v9122_v8 = vld [vmem:[%s13290_s7 + $0x734] sm:$0xf] }
 0x4b0   : > { %4131 = vmatpush.bf16.msrb.mxu3 %v7471_v53  ;;  %4144 = vmatpush.bf16.msrb.mxu1 %v7475_v6  ;;  %v7979_v53 = vor.u32 %v9086_v7, %v7976_v25  ;;  %v7434_v6 = vor.u32 %v8952_v62, %v7431_v16  ;;  %v8999_v13 = vld [vmem:[%s13290_s7 + $0x354] sm:$0xf0]  ;;  %v8993_v7 = vld [vmem:[%s13290_s7 + $0x324] sm:$0xf0]  ;;  %v9124_v25 = vld [vmem:[%s13290_s7 + $0x744] sm:$0xf] }
 0x4b1   : > { %5158 = vmatpush.bf16.msrb.mxu0 %v8011_v10  ;;  %v7625_v10 = vor.u32 %v9001_v1, %v7624_v0  ;;  %v7617_v17 = vor.u32 %v8999_v13, %v7616_v61  ;;  %v8974_v0 = vld [vmem:[%s13290_s7 + $0x294] sm:$0xf]  ;;  %v8122_v35 = vld [vmem:[%s13290_s7 + $0x738] sm:$0xf0]  ;;  %v7383_v48 = vld [vmem:[%s13290_s7 + $0x188] sm:$0xf0] }
 0x4b2   : > { %v7513_v61 = vld [vmem:[%s13290_s7 + $0x288] sm:$0xf0]  ;;  %v7576_v13 = vld [vmem:[%s13290_s7 + $0x300] sm:$0xf]  ;;  %v9019_v38 = vld [vmem:[%s13290_s7 + $0x3f4] sm:$0xf0] }
 0x4b3   : > { %3878 = vmatpush.bf16.msra.mxu2 %v7333_v23  ;;  %v9130_v23 = vld [vmem:[%s13290_s7 + $0x774] sm:$0xf]  ;;  %v9017_v29 = vld [vmem:[%s13290_s7 + $0x3e4] sm:$0xf0]  ;;  %v9016_v34 = vld [vmem:[%s13290_s7 + $0x3e4] sm:$0xf] }
 0x4b4   : > { %4132 = vmatpush.bf16.msrb.mxu3 %v7463_v52  ;;  %4145 = vmatpush.bf16.msrb.mxu1 %v7467_v26  ;;  %v7963_v52 = vld [vmem:[%s10982_s25 + $0xc] ss:$25 sm:$0x3]  ;;  %v7556_v26 = vor.u32 %v8982_v37, %v7553_v11 }
 0x4b5   : > { %5159 = vmatpush.bf16.msrb.mxu0 %v8003_v19  ;;  %v8980_v19 = vld [vmem:[%s13290_s7 + $0x2c4] sm:$0xf]  ;;  %v7691_v46 = vld [vmem:[%s13290_s7 + $0x3e8] sm:$0xf0] }
 0x4b6   : > { %4910 = vmatmul.bf16.vlgmr.msra.gmra.mxu0 %v11248_v41  ;;  %v8972_v11 = vld [vmem:[%s13290_s7 + $0x284] sm:$0xf] }
 0x4b7   : > { %3879 = vmatpush.bf16.msra.mxu2 %v7325_v12  ;;  %v9128_v12 = vld [vmem:[%s13290_s7 + $0x764] sm:$0xf] }
 0x4b8   : > { %4133 = vmatpush.bf16.msrb.mxu3 %v7455_v36  ;;  %4146 = vmatpush.bf16.msrb.mxu1 %v7459_v40  ;;  %v11368_v36 = vpack.c.bf16 %v7963_v52, %v7963_v52  ;;  %v7548_v40 = vor.u32 %v8980_v19, %v7545_v28  ;;  %v8149_v44 = vor.u32 %v9128_v12, %v8146_v32  ;;  %v7567_v52 = vld [vmem:[%s13290_s7 + $0x2f0] sm:$0xf]  ;;  %v9018_v19 = vld [vmem:[%s13290_s7 + $0x3f4] sm:$0xf] }
 0x4b9   : > { %5160 = vmatpush.bf16.msrb.mxu0 %v7995_v2  ;;  %v8978_v2 = vld [vmem:[%s13290_s7 + $0x2b4] sm:$0xf]  ;;  %v7516_v28 = vor.u32 %v8972_v11, %v7513_v61 }
 0x4ba   : > { %v7540_v57 = vor.u32 %v8978_v2, %v7537_v45  ;;  %v7508_v31 = vld [vmem:[%s10982_s25 + $0x5] ss:$25 sm:$0x3]  ;;  %v7559_v2 = vld [vmem:[%s13290_s7 + $0x2e0] sm:$0xf] }
 0x4bb   : > { %3880 = vmatpush.bf16.msra.mxu2 %v7317_v49  ;;  %v7410_v49 = vor.u32 %v8946_v22, %v7407_v43  ;;  %v7689_v45 = vld [vmem:[%s13290_s7 + $0x3e0] sm:$0xf]  ;;  %v11511_v47 = vpack.c.bf16 %v7508_v31, %v7508_v31  ;;  %v8977_v31 = vld [vmem:[%s13290_s7 + $0x2a4] sm:$0xf0] }
 0x4bc   : > { %4134 = vmatpush.bf16.msrb.mxu3 %v7447_v51  ;;  %4147 = vmatpush.bf16.msrb.mxu1 %v7451_v39  ;;  %v7399_v51 = vld [vmem:[%s13290_s7 + $0x1a8] sm:$0xf0]  ;;  %v8976_v39 = vld [vmem:[%s13290_s7 + $0x2a4] sm:$0xf] }
 0x4bd   : > { %5161 = vmatpush.bf16.msrb.mxu0 %v7987_v55  ;;  %v7529_v55 = vld [vmem:[%s13290_s7 + $0x2a8] sm:$0xf0] }
 0x4be   : > { %3881 = vmatmul.bf16.vlgmr.msra.gmra.mxu2 %v11189_v4  ;;  %v8154_v4 = vld [vmem:[%s13290_s7 + $0x778] sm:$0xf0]  ;;  %v7532_v62 = vor.u32 %v8976_v39, %v7529_v55  ;;  %v7690_v39 = vor.u32 %v9017_v29, %v7689_v45  ;;  %v7551_v55 = vld [vmem:[%s13290_s7 + $0x2d0] sm:$0xf] }
 0x4bf   : > { %4013 = vmatpush.bf16.msrb.mxu2 %v7442_v58  ;;  %4135 = vmatmul.bf16.vlgmr.msrb.gmra.mxu3 %v4030_v3  ;;  %v8157_v27 = vor.u32 %v9130_v23, %v8154_v4  ;;  %v7592_v58 = vld [vmem:[%s13290_s7 + $0x320] sm:$0xf]  ;;  %v8125_v23 = vor.u32 %v9122_v8, %v8122_v35  ;;  %v8989_v4 = vld [vmem:[%s13290_s7 + $0x304] sm:$0xf0]  ;;  %v7519_v29 = vld [vmem:[%s13290_s7 + $0x290] sm:$0xf] }
 0x4c0   : > { %4267 = vmatpush.bf16.msra.mxu3 %v7572_v59  ;;  %4381 = vmatpush.bf16.msra.mxu1 %v7633_v60  ;;  %v8130_v59 = vld [vmem:[%s13290_s7 + $0x748] sm:$0xf0]  ;;  %v7402_v60 = vor.u32 %v8944_v50, %v7399_v51  ;;  %v7593_v16 = vor.u32 %v8993_v7, %v7592_v58  ;;  %v7577_v30 = vor.u32 %v8989_v4, %v7576_v13  ;;  %v8983_v58 = vld [vmem:[%s13290_s7 + $0x2d4] sm:$0xf0]  ;;  %v7681_v7 = vld [vmem:[%s13290_s7 + $0x3d0] sm:$0xf] }
 0x4c1   : > { %4148 = vmatmul.bf16.vlgmr.msrb.gmra.mxu1 %v4030_v3  ;;  %5162 = vmatpush.bf16.msrb.mxu0 %v7979_v53  ;;  %v8133_v1 = vor.u32 %v9124_v25, %v8130_v59  ;;  %v7521_v3 = vld [vmem:[%s13290_s7 + $0x298] sm:$0xf0]  ;;  %v7584_v53 = vld [vmem:[%s13290_s7 + $0x310] sm:$0xf]  ;;  %v8098_v50 = vld [vmem:[%s13290_s7 + $0x708] sm:$0xf0] }
 0x4c2   : > { %v7524_v54 = vor.u32 %v8974_v0, %v7521_v3  ;;  %v9015_v25 = vld [vmem:[%s13290_s7 + $0x3d4] sm:$0xf0]  ;;  %v9014_v59 = vld [vmem:[%s13290_s7 + $0x3d4] sm:$0xf]  ;;  %v7543_v3 = vld [vmem:[%s13290_s7 + $0x2c0] sm:$0xf] }
 0x4c3   : > { %4014 = vmatpush.bf16.msrb.mxu2 %v7434_v6  ;;  %v8991_v6 = vld [vmem:[%s13290_s7 + $0x314] sm:$0xf0]  ;;  %v7682_v0 = vor.u32 %v9015_v25, %v7681_v7  ;;  %v9013_v35 = vld [vmem:[%s13290_s7 + $0x3c4] sm:$0xf0] }
 0x4c4   : > { %4268 = vmatpush.bf16.msra.mxu3 %v7564_v21  ;;  %4382 = vmatpush.bf16.msra.mxu1 %v7625_v10  ;;  %v7394_v21 = vor.u32 %v8942_v63, %v7391_v20  ;;  %v8940_v10 = vld [vmem:[%s13290_s7 + $0x184] sm:$0xf]  ;;  %v7585_v37 = vor.u32 %v8991_v6, %v7584_v53  ;;  %v7552_v63 = vor.u32 %v8983_v58, %v7551_v55  ;;  %v8981_v53 = vld [vmem:[%s13290_s7 + $0x2c4] sm:$0xf0]  ;;  %v7673_v6 = vld [vmem:[%s13290_s7 + $0x3c0] sm:$0xf] }
 0x4c5   : > { %5163 = vmatpush.bf16.msrb.mxu0 %v7971_v5  ;;  %v9120_v5 = vld [vmem:[%s13290_s7 + $0x724] sm:$0xf]  ;;  %v7386_v18 = vor.u32 %v8940_v10, %v7383_v48  ;;  %v7675_v10 = vld [vmem:[%s13290_s7 + $0x3c8] sm:$0xf0]  ;;  %v7674_v61 = vor.u32 %v9013_v35, %v7673_v6  ;;  %v8979_v4 = vld [vmem:[%s13290_s7 + $0x2b4] sm:$0xf0] }
 0x4c6   : > { %v8093_v20 = vld [vmem:[%s10982_s25 + $0xe] ss:$25 sm:$0x3]  ;;  %v7511_v58 = vld [vmem:[%s13290_s7 + $0x280] sm:$0xf] }
 0x4c7   : > { %4015 = vmatpush.bf16.msrb.mxu2 %v7426_v15  ;;  %v8114_v15 = vld [vmem:[%s13290_s7 + $0x728] sm:$0xf0]  ;;  %v9160_v48 = vld [vmem:[%s13290_s7 + $0x864] sm:$0xf]  ;;  %v11573_v11 = vpack.c.bf16 %v8093_v20, %v8093_v20  ;;  %v8973_v7 = vld [vmem:[%s13290_s7 + $0x284] sm:$0xf0] }
 0x4c8   : > { %4269 = vmatpush.bf16.msra.mxu3 %v7556_v26  ;;  %4383 = vmatpush.bf16.msra.mxu1 %v7617_v17  ;;  %v8987_v26 = vld [vmem:[%s13290_s7 + $0x2f4] sm:$0xf0]  ;;  %v7697_v17 = vld [vmem:[%s13290_s7 + $0x3f0] sm:$0xf]  ;;  %v8117_v12 = vor.u32 %v9120_v5, %v8114_v15  ;;  %v9152_v20 = vld [vmem:[%s13290_s7 + $0x824] sm:$0xf]  ;;  %v7512_v6 = vor.u32 %v8973_v7, %v7511_v58 }
 0x4c9   : > { %5410 = vmatpush.bf16.msra.mxu0 %v8157_v27  ;;  %v7699_v27 = vld [vmem:[%s13290_s7 + $0x3f8] sm:$0xf0]  ;;  %v7568_v32 = vor.u32 %v8987_v26, %v7567_v52  ;;  %v7698_v22 = vor.u32 %v9019_v38, %v7697_v17  ;;  %v7665_v5 = vld [vmem:[%s13290_s7 + $0x3b0] sm:$0xf]  ;;  %v9011_v52 = vld [vmem:[%s13290_s7 + $0x3b4] sm:$0xf0] }
 0x4ca   : > { %5164 = vmatmul.bf16.vlgmr.msrb.gmra.mxu0 %v11368_v36  ;;  %v7702_v43 = vor.u32 %v9018_v19, %v7699_v27  ;;  %v9010_v26 = vld [vmem:[%s13290_s7 + $0x3b4] sm:$0xf]  ;;  %v7667_v17 = vld [vmem:[%s13290_s7 + $0x3b8] sm:$0xf0]  ;;  %v7666_v27 = vor.u32 %v9011_v52, %v7665_v5  ;;  %v7626_v52 = vld [vmem:[%s13290_s7 + $0x368] sm:$0xf0] }
 0x4cb   : > { %4016 = vmatpush.bf16.msrb.mxu2 %v7418_v33  ;;  %v7573_v33 = vld [vmem:[%s10982_s25 + $0x6] ss:$25 sm:$0x3]  ;;  %v7805_v58 = vld [vmem:[%s13290_s7 + $0x4c8] sm:$0xf0] }
 0x4cc   : > { %4270 = vmatpush.bf16.msra.mxu3 %v7548_v40  ;;  %4384 = vmatpush.bf16.msra.mxu1 %v7609_v42  ;;  %v9118_v40 = vld [vmem:[%s13290_s7 + $0x714] sm:$0xf]  ;;  %v8106_v42 = vld [vmem:[%s13290_s7 + $0x718] sm:$0xf0]  ;;  %v11519_v51 = vpack.c.bf16 %v7573_v33, %v7573_v33  ;;  %v9009_v33 = vld [vmem:[%s13290_s7 + $0x3a4] sm:$0xf0] }
 0x4cd   : > { %5411 = vmatpush.bf16.msra.mxu0 %v8149_v44  ;;  %v8985_v44 = vld [vmem:[%s13290_s7 + $0x2e4] sm:$0xf0]  ;;  %v8268_v38 = vld [vmem:[%s13290_s7 + $0x858] sm:$0xf0]  ;;  %v9050_v35 = vld [vmem:[%s13290_s7 + $0x4f4] sm:$0xf] }
 0x4ce   : > { %v9192_v7 = vld [vmem:[%s13290_s7 + $0x964] sm:$0xf] }
 0x4cf   : > { %4017 = vmatpush.bf16.msrb.mxu2 %v7410_v49  ;;  %v8109_v49 = vor.u32 %v9118_v40, %v8106_v42  ;;  %v9008_v40 = vld [vmem:[%s13290_s7 + $0x3a4] sm:$0xf]  ;;  %v7659_v42 = vld [vmem:[%s13290_s7 + $0x3a8] sm:$0xf0] }
 0x4d0   : > { %4271 = vmatpush.bf16.msra.mxu3 %v7540_v57  ;;  %4385 = vmatpush.bf16.msra.mxu1 %v7601_v24  ;;  %v7560_v57 = vor.u32 %v8985_v44, %v7559_v2  ;;  %v9116_v24 = vld [vmem:[%s13290_s7 + $0x704] sm:$0xf]  ;;  %v7662_v45 = vor.u32 %v9008_v40, %v7659_v42  ;;  %v7618_v40 = vld [vmem:[%s13290_s7 + $0x358] sm:$0xf0]  ;;  %v7811_v42 = vld [vmem:[%s13290_s7 + $0x4d0] sm:$0xf] }
 0x4d1   : > { %5412 = vmatpush.bf16.msra.mxu0 %v8141_v14  ;;  %v7694_v14 = vor.u32 %v9016_v34, %v7691_v46  ;;  %v8975_v34 = vld [vmem:[%s13290_s7 + $0x294] sm:$0xf0]  ;;  %v7649_v46 = vld [vmem:[%s13290_s7 + $0x390] sm:$0xf] }
 0x4d2   : > { %v7520_v55 = vor.u32 %v8975_v34, %v7519_v29  ;;  %v8223_v34 = vld [vmem:[%s10982_s25 + $0x10] ss:$25 sm:$0x3] }
 0x4d3   : > { %4018 = vmatpush.bf16.msrb.mxu2 %v7402_v60  ;;  %v7683_v60 = vld [vmem:[%s13290_s7 + $0x3d8] sm:$0xf0] }
 0x4d4   : > { %4272 = vmatpush.bf16.msra.mxu3 %v7532_v62  ;;  %4386 = vmatpush.bf16.msra.mxu1 %v7593_v16  ;;  %v8284_v62 = vld [vmem:[%s13290_s7 + $0x878] sm:$0xf0]  ;;  %v8101_v16 = vor.u32 %v9116_v24, %v8098_v50  ;;  %v9006_v24 = vld [vmem:[%s13290_s7 + $0x394] sm:$0xf] }
 0x4d5   : > { %5413 = vmatpush.bf16.msra.mxu0 %v8133_v1  ;;  %v7686_v1 = vor.u32 %v9014_v59, %v7683_v60  ;;  %v7651_v50 = vld [vmem:[%s13290_s7 + $0x398] sm:$0xf0]  ;;  %v7641_v60 = vld [vmem:[%s13290_s7 + $0x380] sm:$0xf] }
 0x4d6   : > { %v7654_v59 = vor.u32 %v9006_v24, %v7651_v50  ;;  %v7610_v24 = vld [vmem:[%s13290_s7 + $0x348] sm:$0xf0]  ;;  %v7803_v50 = vld [vmem:[%s13290_s7 + $0x4c0] sm:$0xf] }
 0x4d7   : > { %4019 = vmatpush.bf16.msrb.mxu2 %v7394_v21  ;;  %v9012_v21 = vld [vmem:[%s13290_s7 + $0x3c4] sm:$0xf] }
 0x4d8   : > { %4273 = vmatpush.bf16.msra.mxu3 %v7524_v54  ;;  %4387 = vmatpush.bf16.msra.mxu1 %v7585_v37  ;;  %v8276_v54 = vld [vmem:[%s13290_s7 + $0x868] sm:$0xf0]  ;;  %v7544_v37 = vor.u32 %v8981_v53, %v7543_v3  ;;  %v7678_v13 = vor.u32 %v9012_v21, %v7675_v10  ;;  %v7634_v3 = vld [vmem:[%s13290_s7 + $0x378] sm:$0xf0]  ;;  %v7827_v53 = vld [vmem:[%s13290_s7 + $0x4f0] sm:$0xf] }
 0x4d9   : > { %5414 = vmatpush.bf16.msra.mxu0 %v8125_v23  ;;  %v7535_v23 = vld [vmem:[%s13290_s7 + $0x2b0] sm:$0xf]  ;;  %v8279_v15 = vor.u32 %v9160_v48, %v8276_v54  ;;  %v7829_v21 = vld [vmem:[%s13290_s7 + $0x4f8] sm:$0xf0] }
 0x4da   : > { %v7536_v19 = vor.u32 %v8979_v4, %v7535_v23  ;;  %v7638_v54 = vld [vmem:[%s10982_s25 + $0x7] ss:$25 sm:$0x3]  ;;  %v7832_v5 = vor.u32 %v9050_v35, %v7829_v21 }
 0x4db   : > { %4020 = vmatpush.bf16.msrb.mxu2 %v7386_v18  ;;  %v9158_v18 = vld [vmem:[%s13290_s7 + $0x854] sm:$0xf]  ;;  %v8236_v23 = vld [vmem:[%s13290_s7 + $0x818] sm:$0xf0] }
 0x4dc   : > { %4274 = vmatpush.bf16.msra.mxu3 %v7516_v28  ;;  %4388 = vmatpush.bf16.msra.mxu1 %v7577_v30  ;;  %v7670_v28 = vor.u32 %v9010_v26, %v7667_v17  ;;  %v7527_v30 = vld [vmem:[%s13290_s7 + $0x2a0] sm:$0xf]  ;;  %v9049_v17 = vld [vmem:[%s13290_s7 + $0x4e4] sm:$0xf0] }
 0x4dd   : > { %5415 = vmatpush.bf16.msra.mxu0 %v8117_v12  ;;  %v7657_v12 = vld [vmem:[%s13290_s7 + $0x3a0] sm:$0xf]  ;;  %v7528_v2 = vor.u32 %v8977_v31, %v7527_v30  ;;  %v9148_v30 = vld [vmem:[%s13290_s7 + $0x804] sm:$0xf]  ;;  %v8228_v31 = vld [vmem:[%s13290_s7 + $0x808] sm:$0xf0] }
 0x4de   : > { %4021 = vmatmul.bf16.vlgmr.msrb.gmra.mxu2 %v11197_v9  ;;  %v9162_v9 = vld [vmem:[%s13290_s7 + $0x874] sm:$0xf]  ;;  %v7658_v44 = vor.u32 %v9009_v33, %v7657_v12  ;;  %v7819_v26 = vld [vmem:[%s13290_s7 + $0x4e0] sm:$0xf] }
 0x4df   : > { %4254 = vmatpush.bf16.msra.mxu2 %v7568_v32  ;;  %4275 = vmatmul.bf16.vlgmr.msra.gmra.mxu3 %v11511_v47  ;;  %v8287_v8 = vor.u32 %v9162_v9, %v8284_v62  ;;  %v8271_v32 = vor.u32 %v9158_v18, %v8268_v38  ;;  %v9005_v9 = vld [vmem:[%s13290_s7 + $0x384] sm:$0xf0]  ;;  %v9004_v62 = vld [vmem:[%s13290_s7 + $0x384] sm:$0xf]  ;;  %v7821_v38 = vld [vmem:[%s13290_s7 + $0x4e8] sm:$0xf0]  ;;  %v7820_v12 = vor.u32 %v9049_v17, %v7819_v26 }
 0x4e0   : > { %4508 = vmatpush.bf16.msrb.mxu3 %v7698_v22  ;;  %4521 = vmatpush.bf16.msrb.mxu1 %v7702_v43  ;;  %v9156_v22 = vld [vmem:[%s13290_s7 + $0x844] sm:$0xf]  ;;  %v8260_v43 = vld [vmem:[%s13290_s7 + $0x848] sm:$0xf0]  ;;  %v7642_v10 = vor.u32 %v9005_v9, %v7641_v60  ;;  %v8998_v33 = vld [vmem:[%s13290_s7 + $0x354] sm:$0xf]  ;;  %v11771_v60 = vpack.c.bf16 %v8223_v34, %v8223_v34 }
 0x4e1   : > { %4389 = vmatmul.bf16.vlgmr.msra.gmra.mxu1 %v11519_v51  ;;  %5416 = vmatpush.bf16.msra.mxu0 %v8109_v49  ;;  %v8263_v49 = vor.u32 %v9156_v22, %v8260_v43  ;;  %v9048_v18 = vld [vmem:[%s13290_s7 + $0x4e4] sm:$0xf]  ;;  %v9047_v22 = vld [vmem:[%s13290_s7 + $0x4d4] sm:$0xf0]  ;;  %v9046_v43 = vld [vmem:[%s13290_s7 + $0x4d4] sm:$0xf]  ;;  %v7621_v29 = vor.u32 %v8998_v33, %v7618_v40 }
 0x4e2   : > { %v8988_v40 = vld [vmem:[%s13290_s7 + $0x304] sm:$0xf] }
 0x4e3   : > { %4255 = vmatpush.bf16.msra.mxu2 %v7560_v57  ;;  %v9007_v57 = vld [vmem:[%s13290_s7 + $0x394] sm:$0xf0]  ;;  %v9184_v34 = vld [vmem:[%s13290_s7 + $0x924] sm:$0xf] }
 0x4e4   : > { %4509 = vmatpush.bf16.msrb.mxu3 %v7690_v39  ;;  %4522 = vmatpush.bf16.msrb.mxu1 %v7694_v14  ;;  %v9154_v39 = vld [vmem:[%s13290_s7 + $0x834] sm:$0xf]  ;;  %v8252_v14 = vld [vmem:[%s13290_s7 + $0x838] sm:$0xf0]  ;;  %v7650_v25 = vor.u32 %v9007_v57, %v7649_v46  ;;  %v7812_v46 = vor.u32 %v9047_v22, %v7811_v42  ;;  %v8996_v57 = vld [vmem:[%s13290_s7 + $0x344] sm:$0xf] }
 0x4e5   : > { %5417 = vmatpush.bf16.msra.mxu0 %v8101_v16  ;;  %v8255_v16 = vor.u32 %v9154_v39, %v8252_v14  ;;  %v9045_v14 = vld [vmem:[%s13290_s7 + $0x4c4] sm:$0xf0]  ;;  %v7578_v42 = vld [vmem:[%s13290_s7 + $0x308] sm:$0xf0] }
 0x4e6   : > { %v7804_v9 = vor.u32 %v9045_v14, %v7803_v50  ;;  %v7581_v50 = vor.u32 %v8988_v40, %v7578_v42  ;;  %v9082_v14 = vld [vmem:[%s13290_s7 + $0x5f4] sm:$0xf]  ;;  %v9076_v40 = vld [vmem:[%s13290_s7 + $0x5c4] sm:$0xf]  ;;  %v7935_v42 = vld [vmem:[%s13290_s7 + $0x5c8] sm:$0xf0] }
 0x4e7   : > { %4256 = vmatpush.bf16.msra.mxu2 %v7552_v63  ;;  %v7643_v63 = vld [vmem:[%s13290_s7 + $0x388] sm:$0xf0] }
 0x4e8   : > { %4510 = vmatpush.bf16.msrb.mxu3 %v7682_v0  ;;  %4523 = vmatpush.bf16.msrb.mxu1 %v7686_v1  ;;  %v8244_v0 = vld [vmem:[%s13290_s7 + $0x828] sm:$0xf0]  ;;  %v9002_v1 = vld [vmem:[%s13290_s7 + $0x374] sm:$0xf]  ;;  %v7646_v48 = vor.u32 %v9004_v62, %v7643_v63  ;;  %v7602_v63 = vld [vmem:[%s13290_s7 + $0x338] sm:$0xf0] }
 0x4e9   : > { %5664 = vmatpush.bf16.msrb.mxu0 %v8287_v8  ;;  %v9051_v8 = vld [vmem:[%s13290_s7 + $0x4f4] sm:$0xf0] }
 0x4ea   : > { %5418 = vmatmul.bf16.vlgmr.msra.gmra.mxu0 %v11573_v11  ;;  %v7828_v4 = vor.u32 %v9051_v8, %v7827_v53  ;;  %v7797_v53 = vld [vmem:[%s13290_s7 + $0x4b8] sm:$0xf0] }
 0x4eb   : > { %4257 = vmatpush.bf16.msra.mxu2 %v7544_v37  ;;  %v8247_v37 = vor.u32 %v9152_v20, %v8244_v0  ;;  %v7795_v20 = vld [vmem:[%s13290_s7 + $0x4b0] sm:$0xf]  ;;  %v8398_v8 = vld [vmem:[%s13290_s7 + $0x958] sm:$0xf0] }
 0x4ec   : > { %4511 = vmatpush.bf16.msrb.mxu3 %v7674_v61  ;;  %4524 = vmatpush.bf16.msrb.mxu1 %v7678_v13  ;;  %v7637_v61 = vor.u32 %v9002_v1, %v7634_v3  ;;  %v9150_v13 = vld [vmem:[%s13290_s7 + $0x814] sm:$0xf]  ;;  %v9043_v1 = vld [vmem:[%s13290_s7 + $0x4b4] sm:$0xf0] }
 0x4ed   : > { %5665 = vmatpush.bf16.msrb.mxu0 %v8279_v15  ;;  %v9000_v15 = vld [vmem:[%s13290_s7 + $0x364] sm:$0xf]  ;;  %v9042_v3 = vld [vmem:[%s13290_s7 + $0x4b4] sm:$0xf]  ;;  %v7796_v21 = vor.u32 %v9043_v1, %v7795_v20  ;;  %v9033_v1 = vld [vmem:[%s13290_s7 + $0x464] sm:$0xf0] }
 0x4ef   : > { %4258 = vmatpush.bf16.msra.mxu2 %v7536_v19  ;;  %v4411_v19 = vpack.c.bf16 %v7638_v54, %v7638_v54  ;;  %v7594_v54 = vld [vmem:[%s13290_s7 + $0x328] sm:$0xf0] }
 0x4f0   : > { %4512 = vmatpush.bf16.msrb.mxu3 %v7666_v27  ;;  %4525 = vmatpush.bf16.msrb.mxu1 %v7670_v28  ;;  %v8239_v27 = vor.u32 %v9150_v13, %v8236_v23  ;;  %v7629_v28 = vor.u32 %v9000_v15, %v7626_v52  ;;  %v9041_v13 = vld [vmem:[%s13290_s7 + $0x4a4] sm:$0xf0]  ;;  %v9040_v23 = vld [vmem:[%s13290_s7 + $0x4a4] sm:$0xf]  ;;  %v8390_v15 = vld [vmem:[%s13290_s7 + $0x948] sm:$0xf0] }
 0x4f1   : > { %5666 = vmatpush.bf16.msrb.mxu0 %v8271_v32  ;;  %v7824_v32 = vor.u32 %v9048_v18, %v7821_v38  ;;  %v8990_v18 = vld [vmem:[%s13290_s7 + $0x314] sm:$0xf]  ;;  %v7586_v38 = vld [vmem:[%s13290_s7 + $0x318] sm:$0xf0] }
 0x4f2   : > { %v7589_v33 = vor.u32 %v8990_v18, %v7586_v38  ;;  %v8353_v38 = vld [vmem:[%s10982_s25 + $0x12] ss:$25 sm:$0x3] }
 0x4f3   : > { %4259 = vmatpush.bf16.msra.mxu2 %v7528_v2  ;;  %v7813_v2 = vld [vmem:[%s13290_s7 + $0x4d8] sm:$0xf0] }
 0x4f4   : > { %4513 = vmatpush.bf16.msrb.mxu3 %v7658_v44  ;;  %4526 = vmatpush.bf16.msrb.mxu1 %v7662_v45  ;;  %v9194_v44 = vld [vmem:[%s13290_s7 + $0x974] sm:$0xf]  ;;  %v8231_v45 = vor.u32 %v9148_v30, %v8228_v31  ;;  %v7781_v31 = vld [vmem:[%s13290_s7 + $0x498] sm:$0xf0] }
 0x4f5   : > { %5667 = vmatpush.bf16.msrb.mxu0 %v8263_v49  ;;  %v7816_v49 = vor.u32 %v9046_v43, %v7813_v2  ;;  %v9038_v30 = vld [vmem:[%s13290_s7 + $0x494] sm:$0xf]  ;;  %v7771_v2 = vld [vmem:[%s13290_s7 + $0x480] sm:$0xf] }
 0x4f6   : > { %v7784_v43 = vor.u32 %v9038_v30, %v7781_v31  ;;  %v7738_v30 = vld [vmem:[%s13290_s7 + $0x440] sm:$0xf]  ;;  %v9029_v31 = vld [vmem:[%s13290_s7 + $0x444] sm:$0xf0] }
 0x4f7   : > { %4260 = vmatpush.bf16.msra.mxu2 %v7520_v55  ;;  %v9044_v55 = vld [vmem:[%s13290_s7 + $0x4c4] sm:$0xf] }
 0x4f8   : > { %4514 = vmatpush.bf16.msrb.mxu3 %v7650_v25  ;;  %4527 = vmatpush.bf16.msrb.mxu1 %v7654_v59  ;;  %v8406_v25 = vld [vmem:[%s13290_s7 + $0x968] sm:$0xf0]  ;;  %v7613_v59 = vor.u32 %v8996_v57, %v7610_v24  ;;  %v7808_v62 = vor.u32 %v9044_v55, %v7805_v58  ;;  %v9035_v57 = vld [vmem:[%s13290_s7 + $0x474] sm:$0xf0]  ;;  %v7957_v24 = vld [vmem:[%s13290_s7 + $0x5f0] sm:$0xf] }
 0x4f9   : > { %5668 = vmatpush.bf16.msrb.mxu0 %v8255_v16  ;;  %v8994_v16 = vld [vmem:[%s13290_s7 + $0x334] sm:$0xf]  ;;  %v8409_v0 = vor.u32 %v9192_v7, %v8406_v25  ;;  %v7959_v55 = vld [vmem:[%s13290_s7 + $0x5f8] sm:$0xf0] }
 0x4fa   : > { %v7605_v35 = vor.u32 %v8994_v16, %v7602_v63  ;;  %v7768_v25 = vld [vmem:[%s10982_s25 + $0x9] ss:$25 sm:$0x3]  ;;  %v8366_v16 = vld [vmem:[%s13290_s7 + $0x918] sm:$0xf0]  ;;  %v7962_v20 = vor.u32 %v9082_v14, %v7959_v55 }
 0x4fb   : > { %4261 = vmatpush.bf16.msra.mxu2 %v7512_v6  ;;  %v9190_v6 = vld [vmem:[%s13290_s7 + $0x954] sm:$0xf]  ;;  %v7927_v14 = vld [vmem:[%s13290_s7 + $0x5b8] sm:$0xf0] }
 0x4fc   : > { %4515 = vmatpush.bf16.msrb.mxu3 %v7642_v10  ;;  %4528 = vmatpush.bf16.msrb.mxu1 %v7646_v48  ;;  %v7800_v10 = vor.u32 %v9042_v3, %v7797_v53  ;;  %v8992_v48 = vld [vmem:[%s13290_s7 + $0x324] sm:$0xf]  ;;  %v7949_v3 = vld [vmem:[%s13290_s7 + $0x5e0] sm:$0xf]  ;;  %v9081_v53 = vld [vmem:[%s13290_s7 + $0x5e4] sm:$0xf0] }
 0x4fd   : > { %5669 = vmatpush.bf16.msrb.mxu0 %v8247_v37  ;;  %v7787_v37 = vld [vmem:[%s13290_s7 + $0x4a0] sm:$0xf]  ;;  %v7597_v52 = vor.u32 %v8992_v48, %v7594_v54  ;;  %v9180_v48 = vld [vmem:[%s13290_s7 + $0x904] sm:$0xf]  ;;  %v8358_v54 = vld [vmem:[%s13290_s7 + $0x908] sm:$0xf0] }
 0x4fe   : > { %4262 = vmatmul.bf16.vlgmr.msra.gmra.mxu2 %v11511_v47  ;;  %v8414_v47 = vld [vmem:[%s13290_s7 + $0x978] sm:$0xf0]  ;;  %v7788_v26 = vor.u32 %v9041_v13, %v7787_v37  ;;  %v7950_v37 = vor.u32 %v9081_v53, %v7949_v3  ;;  %v7746_v13 = vld [vmem:[%s13290_s7 + $0x450] sm:$0xf]  ;;  %v9073_v3 = vld [vmem:[%s13290_s7 + $0x5a4] sm:$0xf0] }
 0x4ff   : > { %4394 = vmatpush.bf16.msrb.mxu2 %v7637_v61  ;;  %4516 = vmatmul.bf16.vlgmr.msrb.gmra.mxu3 %v4411_v19  ;;  %v8417_v39 = vor.u32 %v9194_v44, %v8414_v47  ;;  %v8401_v61 = vor.u32 %v9190_v6, %v8398_v8  ;;  %v9037_v44 = vld [vmem:[%s13290_s7 + $0x484] sm:$0xf0]  ;;  %v9036_v47 = vld [vmem:[%s13290_s7 + $0x484] sm:$0xf]  ;;  %v7951_v8 = vld [vmem:[%s13290_s7 + $0x5e8] sm:$0xf0] }
 0x500   : > { %4762 = vmatpush.bf16.msra.mxu3 %v7828_v4  ;;  %4775 = vmatpush.bf16.msra.mxu1 %v7832_v5  ;;  %v7789_v4 = vld [vmem:[%s13290_s7 + $0x4a8] sm:$0xf0]  ;;  %v9188_v5 = vld [vmem:[%s13290_s7 + $0x944] sm:$0xf]  ;;  %v7772_v58 = vor.u32 %v9037_v44, %v7771_v2  ;;  %v7739_v2 = vor.u32 %v9029_v31, %v7738_v30  ;;  %v11971_v44 = vpack.c.bf16 %v8353_v38, %v8353_v38  ;;  %v7706_v38 = vld [vmem:[%s13290_s7 + $0x400] sm:$0xf] }
 0x501   : > { %4529 = vmatmul.bf16.vlgmr.msrb.gmra.mxu1 %v4411_v19  ;;  %5670 = vmatpush.bf16.msrb.mxu0 %v8239_v27  ;;  %v7792_v17 = vor.u32 %v9040_v23, %v7789_v4  ;;  %v7779_v19 = vld [vmem:[%s13290_s7 + $0x490] sm:$0xf]  ;;  %v8393_v27 = vor.u32 %v9188_v5, %v8390_v15  ;;  %v9080_v6 = vld [vmem:[%s13290_s7 + $0x5e4] sm:$0xf]  ;;  %v9031_v23 = vld [vmem:[%s13290_s7 + $0x454] sm:$0xf0] }
 0x502   : > { %v7941_v4 = vld [vmem:[%s13290_s7 + $0x5d0] sm:$0xf]  ;;  %v9079_v5 = vld [vmem:[%s13290_s7 + $0x5d4] sm:$0xf0]  ;;  %v9078_v15 = vld [vmem:[%s13290_s7 + $0x5d4] sm:$0xf]  ;;  %v7747_v18 = vor.u32 %v9031_v23, %v7746_v13 }
 0x503   : > { %4395 = vmatpush.bf16.msrb.mxu2 %v7629_v28  ;;  %v9039_v28 = vld [vmem:[%s13290_s7 + $0x494] sm:$0xf0]  ;;  %v9072_v53 = vld [vmem:[%s13290_s7 + $0x5a4] sm:$0xf] }
 0x504   : > { %4763 = vmatpush.bf16.msra.mxu3 %v7820_v12  ;;  %4776 = vmatpush.bf16.msra.mxu1 %v7824_v32  ;;  %v9186_v12 = vld [vmem:[%s13290_s7 + $0x934] sm:$0xf]  ;;  %v8382_v32 = vld [vmem:[%s13290_s7 + $0x938] sm:$0xf0]  ;;  %v7780_v22 = vor.u32 %v9039_v28, %v7779_v19  ;;  %v7942_v19 = vor.u32 %v9079_v5, %v7941_v4  ;;  %v9071_v5 = vld [vmem:[%s13290_s7 + $0x594] sm:$0xf0] }
 0x505   : > { %5671 = vmatpush.bf16.msrb.mxu0 %v8231_v45  ;;  %v8385_v45 = vor.u32 %v9186_v12, %v8382_v32  ;;  %v7933_v12 = vld [vmem:[%s13290_s7 + $0x5c0] sm:$0xf] }
 0x507   : > { %4396 = vmatpush.bf16.msrb.mxu2 %v7621_v29  ;;  %v7773_v29 = vld [vmem:[%s13290_s7 + $0x488] sm:$0xf0] }
 0x508   : > { %4764 = vmatpush.bf16.msra.mxu3 %v7812_v46  ;;  %4777 = vmatpush.bf16.msra.mxu1 %v7816_v49  ;;  %v8374_v46 = vld [vmem:[%s13290_s7 + $0x928] sm:$0xf0]  ;;  %v7762_v49 = vld [vmem:[%s13290_s7 + $0x470] sm:$0xf]  ;;  %v7776_v7 = vor.u32 %v9036_v47, %v7773_v29 }
 0x509   : > { %5918 = vmatpush.bf16.msra.mxu0 %v8417_v39  ;;  %v9083_v39 = vld [vmem:[%s13290_s7 + $0x5f4] sm:$0xf0]  ;;  %v7730_v29 = vld [vmem:[%s13290_s7 + $0x430] sm:$0xf] }
 0x50a   : > { %5672 = vmatmul.bf16.vlgmr.msrb.gmra.mxu0 %v11771_v60  ;;  %v7958_v63 = vor.u32 %v9083_v39, %v7957_v24  ;;  %v9074_v39 = vld [vmem:[%s13290_s7 + $0x5b4] sm:$0xf] }
 0x50b   : > { %4397 = vmatpush.bf16.msrb.mxu2 %v7613_v59  ;;  %v8377_v59 = vor.u32 %v9184_v34, %v8374_v46  ;;  %v9027_v34 = vld [vmem:[%s13290_s7 + $0x434] sm:$0xf0]  ;;  %v7925_v46 = vld [vmem:[%s13290_s7 + $0x5b0] sm:$0xf] }
 0x50c   : > { %4765 = vmatpush.bf16.msra.mxu3 %v7804_v9  ;;  %4778 = vmatpush.bf16.msra.mxu1 %v7808_v62  ;;  %v7763_v9 = vor.u32 %v9035_v57, %v7762_v49  ;;  %v9182_v62 = vld [vmem:[%s13290_s7 + $0x914] sm:$0xf] }
 0x50d   : > { %5919 = vmatpush.bf16.msra.mxu0 %v8409_v0  ;;  %v7754_v0 = vld [vmem:[%s13290_s7 + $0x460] sm:$0xf] }
 0x50f   : > { %4398 = vmatpush.bf16.msrb.mxu2 %v7605_v35  ;;  %v4665_v35 = vpack.c.bf16 %v7768_v25, %v7768_v25  ;;  %v7731_v25 = vor.u32 %v9027_v34, %v7730_v29  ;;  %v9115_v34 = vld [vmem:[%s13290_s7 + $0x6f4] sm:$0xf0] }
 0x510   : > { %4766 = vmatpush.bf16.msra.mxu3 %v7796_v21  ;;  %4779 = vmatpush.bf16.msra.mxu1 %v7800_v10  ;;  %v8369_v21 = vor.u32 %v9182_v62, %v8366_v16  ;;  %v7755_v10 = vor.u32 %v9033_v1, %v7754_v0  ;;  %v7930_v62 = vor.u32 %v9074_v39, %v7927_v14  ;;  %v7917_v0 = vld [vmem:[%s13290_s7 + $0x5a0] sm:$0xf] }
 0x511   : > { %5920 = vmatpush.bf16.msra.mxu0 %v8401_v61  ;;  %v7954_v61 = vor.u32 %v9080_v6, %v7951_v8  ;;  %v7919_v6 = vld [vmem:[%s13290_s7 + $0x5a8] sm:$0xf0]  ;;  %v9220_v8 = vld [vmem:[%s13290_s7 + $0xa44] sm:$0xf] }
 0x513   : > { %4399 = vmatpush.bf16.msrb.mxu2 %v7597_v52  ;;  %v7943_v52 = vld [vmem:[%s13290_s7 + $0x5d8] sm:$0xf0] }
 0x514   : > { %4767 = vmatpush.bf16.msra.mxu3 %v7788_v26  ;;  %4780 = vmatpush.bf16.msra.mxu1 %v7792_v17  ;;  %v9226_v26 = vld [vmem:[%s13290_s7 + $0xa74] sm:$0xf]  ;;  %v8361_v17 = vor.u32 %v9180_v48, %v8358_v54  ;;  %v7922_v48 = vor.u32 %v9072_v53, %v7919_v6  ;;  %v7714_v54 = vld [vmem:[%s13290_s7 + $0x410] sm:$0xf]  ;;  %v9113_v53 = vld [vmem:[%s13290_s7 + $0x6e4] sm:$0xf0] }
 0x515   : > { %5921 = vmatpush.bf16.msra.mxu0 %v8393_v27  ;;  %v7946_v27 = vor.u32 %v9078_v15, %v7943_v52  ;;  %v9070_v15 = vld [vmem:[%s13290_s7 + $0x594] sm:$0xf]  ;;  %v7911_v52 = vld [vmem:[%s13290_s7 + $0x598] sm:$0xf0]  ;;  %v8081_v6 = vld [vmem:[%s13290_s7 + $0x6e8] sm:$0xf0] }
 0x516   : > { %v7914_v30 = vor.u32 %v9070_v15, %v7911_v52  ;;  %v9111_v15 = vld [vmem:[%s13290_s7 + $0x6d4] sm:$0xf0]  ;;  %v9110_v52 = vld [vmem:[%s13290_s7 + $0x6d4] sm:$0xf] }
 0x517   : > { %4400 = vmatpush.bf16.msrb.mxu2 %v7589_v33  ;;  %v9077_v33 = vld [vmem:[%s13290_s7 + $0x5c4] sm:$0xf0] }
 0x518   : > { %4768 = vmatpush.bf16.msra.mxu3 %v7780_v22  ;;  %4781 = vmatpush.bf16.msra.mxu1 %v7784_v43  ;;  %v9224_v22 = vld [vmem:[%s13290_s7 + $0xa64] sm:$0xf]  ;;  %v8536_v43 = vld [vmem:[%s13290_s7 + $0xa68] sm:$0xf0]  ;;  %v7934_v47 = vor.u32 %v9077_v33, %v7933_v12  ;;  %v7901_v12 = vld [vmem:[%s13290_s7 + $0x580] sm:$0xf] }
 0x519   : > { %5922 = vmatpush.bf16.msra.mxu0 %v8385_v45  ;;  %v7938_v45 = vor.u32 %v9076_v40, %v7935_v42  ;;  %v8539_v49 = vor.u32 %v9224_v22, %v8536_v43  ;;  %v9068_v33 = vld [vmem:[%s13290_s7 + $0x584] sm:$0xf]  ;;  %v7903_v42 = vld [vmem:[%s13290_s7 + $0x588] sm:$0xf0] }
 0x51a   : > { %v9216_v22 = vld [vmem:[%s13290_s7 + $0xa24] sm:$0xf]  ;;  %v8504_v43 = vld [vmem:[%s13290_s7 + $0xa28] sm:$0xf0] }
 0x51b   : > { %4401 = vmatpush.bf16.msrb.mxu2 %v7581_v50  ;;  %v9075_v50 = vld [vmem:[%s13290_s7 + $0x5b4] sm:$0xf0]  ;;  %v8507_v39 = vor.u32 %v9216_v22, %v8504_v43  ;;  %v9109_v43 = vld [vmem:[%s13290_s7 + $0x6c4] sm:$0xf0] }
 0x51c   : > { %4769 = vmatpush.bf16.msra.mxu3 %v7772_v58  ;;  %4782 = vmatpush.bf16.msra.mxu1 %v7776_v7  ;;  %v11945_v28 = vpop.f32.mrf.mxu1  ;;  %v9222_v58 = vld [vmem:[%s13290_s7 + $0xa54] sm:$0xf]  ;;  %v8528_v7 = vld [vmem:[%s13290_s7 + $0xa58] sm:$0xf0] }
 0x51d   : > { %5923 = vmatpush.bf16.msra.mxu0 %v8377_v59  ;;  %v8531_v1 = vor.u32 %v9222_v58, %v8528_v7 }
 0x51e   : > { %4402 = vmatmul.bf16.vlgmr.msrb.gmra.mxu2 %v11519_v51  ;;  %v8544_v51 = vld [vmem:[%s13290_s7 + $0xa78] sm:$0xf0] }
 0x51f   : > { %4635 = vmatpush.bf16.msra.mxu2 %v7763_v9  ;;  %4770 = vmatmul.bf16.vlgmr.msra.gmra.mxu3 %v4665_v35  ;;  %v8547_v32 = vor.u32 %v9226_v26, %v8544_v51  ;;  %v7926_v9 = vor.u32 %v9075_v50, %v7925_v46  ;;  %v9218_v26 = vld [vmem:[%s13290_s7 + $0xa34] sm:$0xf]  ;;  %v8512_v51 = vld [vmem:[%s13290_s7 + $0xa38] sm:$0xf0] }
 0x520   : > { %5016 = vmatpush.bf16.msrb.mxu3 %v7958_v63  ;;  %5029 = vmatpush.bf16.msrb.mxu1 %v7962_v20  ;;  %v7722_v63 = vld [vmem:[%s13290_s7 + $0x420] sm:$0xf]  ;;  %v9025_v20 = vld [vmem:[%s13290_s7 + $0x424] sm:$0xf0]  ;;  %v8515_v40 = vor.u32 %v9218_v26, %v8512_v51  ;;  %v9114_v46 = vld [vmem:[%s13290_s7 + $0x6f4] sm:$0xf] }
 0x521   : > { %4783 = vmatmul.bf16.vlgmr.msra.gmra.mxu1 %v4665_v35  ;;  %5924 = vmatpush.bf16.msra.mxu0 %v8369_v21  ;;  %v3651_v57 = vpop.f32.mrf.mxu2  ;;  %v3757_v24 = vpop.f32.mrf.mxu3  ;;  %v8520_v35 = vld [vmem:[%s13290_s7 + $0xa48] sm:$0xf0]  ;;  %v7723_v21 = vor.u32 %v9025_v20, %v7722_v63  ;;  %v7898_v50 = vld [vmem:[%s10982_s25 + $0xb] ss:$25 sm:$0x3] }
 0x522   : > { %v11992_v55 = vadd.f32 %v3757_v24, %v3651_v57  ;;  %v8523_v13 = vor.u32 %v9220_v8, %v8520_v35  ;;  %v7906_v24 = vor.u32 %v9068_v33, %v7903_v42  ;;  %v7884_v20 = vld [vmem:[%s13290_s7 + $0x560] sm:$0xf]  ;;  %v8073_v26 = vld [vmem:[%s13290_s7 + $0x6d8] sm:$0xf0]  ;;  %v9258_v51 = vld [vmem:[%s13290_s7 + $0xb74] sm:$0xf] }
 0x523   : > { %4636 = vmatpush.bf16.msra.mxu2 %v7755_v10  ;;  %v12000_v59 = vpop.f32.mrf.mxu0  ;;  %v7918_v10 = vor.u32 %v9073_v3, %v7917_v0  ;;  %v9065_v0 = vld [vmem:[%s13290_s7 + $0x564] sm:$0xf0] }
 0x524   : > { %5017 = vmatpush.bf16.msrb.mxu3 %v7950_v37  ;;  %5030 = vmatpush.bf16.msrb.mxu1 %v7954_v61  ;;  %v3772_v16 = vpop.f32.mrf.mxu1  ;;  %v9023_v37 = vld [vmem:[%s13290_s7 + $0x414] sm:$0xf0]  ;;  %v7909_v61 = vld [vmem:[%s13290_s7 + $0x590] sm:$0xf]  ;;  %v9061_v33 = vld [vmem:[%s13290_s7 + $0x544] sm:$0xf0] }
 0x525   : > { %5925 = vmatpush.bf16.msra.mxu0 %v8361_v17  ;;  %v7715_v17 = vor.u32 %v9023_v37, %v7714_v54  ;;  %v9212_v54 = vld [vmem:[%s13290_s7 + $0xa04] sm:$0xf]  ;;  %v8488_v37 = vld [vmem:[%s13290_s7 + $0xa08] sm:$0xf0] }
 0x527   : > { %4637 = vmatpush.bf16.msra.mxu2 %v7747_v18 }
 0x528   : > { %5018 = vmatpush.bf16.msrb.mxu3 %v7942_v19  ;;  %5031 = vmatpush.bf16.msrb.mxu1 %v7946_v27  ;;  %v9021_v19 = vld [vmem:[%s13290_s7 + $0x404] sm:$0xf0]  ;;  %v7910_v27 = vor.u32 %v9071_v5, %v7909_v61  ;;  %v8071_v5 = vld [vmem:[%s13290_s7 + $0x6d0] sm:$0xf] }
 0x529   : > { %6172 = vmatpush.bf16.msrb.mxu0 %v8547_v32  ;;  %v3653_v23 = vpop.f32.mrf.mxu2  ;;  %v3759_v4 = vpop.f32.mrf.mxu3  ;;  %v9069_v32 = vld [vmem:[%s13290_s7 + $0x584] sm:$0xf0]  ;;  %v7707_v29 = vor.u32 %v9021_v19, %v7706_v38 }
 0x52a   : > { %5926 = vmatmul.bf16.vlgmr.msra.gmra.mxu0 %v11971_v44  ;;  %v7902_v57 = vor.u32 %v9069_v32, %v7901_v12  ;;  %v7876_v23 = vld [vmem:[%s13290_s7 + $0x550] sm:$0xf]  ;;  %v9063_v4 = vld [vmem:[%s13290_s7 + $0x554] sm:$0xf0]  ;;  %v8076_v12 = vor.u32 %v9110_v52, %v8073_v26  ;;  %v7868_v32 = vld [vmem:[%s13290_s7 + $0x540] sm:$0xf] }
 0x52b   : > { %4638 = vmatpush.bf16.msra.mxu2 %v7739_v2  ;;  %v4659_v18 = vpop.f32.mrf.mxu0  ;;  %v7892_v2 = vld [vmem:[%s13290_s7 + $0x570] sm:$0xf] }
 0x52c   : > { %5019 = vmatpush.bf16.msrb.mxu3 %v7934_v47  ;;  %5032 = vmatpush.bf16.msrb.mxu1 %v7938_v45  ;;  %v12056_v31 = vpop.f32.mrf.mxu1  ;;  %v9067_v47 = vld [vmem:[%s13290_s7 + $0x574] sm:$0xf0]  ;;  %v8087_v45 = vld [vmem:[%s13290_s7 + $0x6f0] sm:$0xf]  ;;  %v7877_v18 = vor.u32 %v9063_v4, %v7876_v23 }
 0x52d   : > { %6173 = vmatpush.bf16.msrb.mxu0 %v8539_v49  ;;  %v8089_v49 = vld [vmem:[%s13290_s7 + $0x6f8] sm:$0xf0]  ;;  %v7893_v14 = vor.u32 %v9067_v47, %v7892_v2  ;;  %v9108_v2 = vld [vmem:[%s13290_s7 + $0x6c4] sm:$0xf]  ;;  %v8065_v47 = vld [vmem:[%s13290_s7 + $0x6c8] sm:$0xf0] }
 0x52e   : > { %v8092_v16 = vor.u32 %v9114_v46, %v8089_v49  ;;  %v7869_v46 = vor.u32 %v9061_v33, %v7868_v32  ;;  %v7844_v26 = vld [vmem:[%s13290_s7 + $0x510] sm:$0xf]  ;;  %v7836_v32 = vld [vmem:[%s13290_s7 + $0x500] sm:$0xf]  ;;  %v9053_v33 = vld [vmem:[%s13290_s7 + $0x504] sm:$0xf0] }
 0x52f   : > { %4639 = vmatpush.bf16.msra.mxu2 %v7731_v25  ;;  %v9214_v25 = vld [vmem:[%s13290_s7 + $0xa14] sm:$0xf] }
 0x530   : > { %5020 = vmatpush.bf16.msrb.mxu3 %v7926_v9  ;;  %5033 = vmatpush.bf16.msrb.mxu1 %v7930_v62  ;;  %v8496_v9 = vld [vmem:[%s13290_s7 + $0xa18] sm:$0xf0]  ;;  %v8088_v62 = vor.u32 %v9115_v34, %v8087_v45  ;;  %v9256_v45 = vld [vmem:[%s13290_s7 + $0xb64] sm:$0xf] }
 0x531   : > { %6174 = vmatpush.bf16.msrb.mxu0 %v8531_v1  ;;  %v3664_v58 = vpop.f32.mrf.mxu2  ;;  %v3895_v7 = vpop.f32.mrf.mxu3  ;;  %v8079_v1 = vld [vmem:[%s13290_s7 + $0x6e0] sm:$0xf] }
 0x532   : > { %v3771_v63 = vadd.f32 %v11945_v28, %v3664_v58  ;;  %v9112_v28 = vld [vmem:[%s13290_s7 + $0x6e4] sm:$0xf]  ;;  %v8080_v61 = vor.u32 %v9113_v53, %v8079_v1 }
 0x533   : > { %4640 = vmatpush.bf16.msra.mxu2 %v7723_v21  ;;  %v12111_v3 = vpop.f32.mrf.mxu0  ;;  %v4919_v21 = vpack.c.bf16 %v7898_v50, %v7898_v50  ;;  %v7860_v50 = vld [vmem:[%s13290_s7 + $0x530] sm:$0xf] }
 0x534   : > { %5021 = vmatpush.bf16.msrb.mxu3 %v7918_v10  ;;  %5034 = vmatpush.bf16.msrb.mxu1 %v7922_v48  ;;  %v12122_v8 = vadd.f32 %v3895_v7, %v3771_v63  ;;  %v4011_v35 = vpop.f32.mrf.mxu1  ;;  %v8499_v10 = vor.u32 %v9214_v25, %v8496_v9  ;;  %v7885_v48 = vor.u32 %v9065_v0, %v7884_v20  ;;  %v9107_v7 = vld [vmem:[%s13290_s7 + $0x6b4] sm:$0xf0]  ;;  %v9106_v25 = vld [vmem:[%s13290_s7 + $0x6b4] sm:$0xf]  ;;  %v8057_v9 = vld [vmem:[%s13290_s7 + $0x6b8] sm:$0xf0] }
 0x535   : > { %6175 = vmatpush.bf16.msrb.mxu0 %v8523_v13  ;;  %v8084_v13 = vor.u32 %v9112_v28, %v8081_v6  ;;  %v8060_v0 = vor.u32 %v9106_v25, %v8057_v9  ;;  %v7852_v28 = vld [vmem:[%s13290_s7 + $0x520] sm:$0xf]  ;;  %v9057_v6 = vld [vmem:[%s13290_s7 + $0x524] sm:$0xf0]  ;;  %v9147_v25 = vld [vmem:[%s13290_s7 + $0x7f4] sm:$0xf0] }
 0x536   : > { %v8047_v35 = vld [vmem:[%s13290_s7 + $0x6a0] sm:$0xf]  ;;  %v7853_v4 = vor.u32 %v9057_v6, %v7852_v28  ;;  %v9146_v9 = vld [vmem:[%s13290_s7 + $0x7f4] sm:$0xf]  ;;  %v8626_v28 = vld [vmem:[%s13290_s7 + $0xb18] sm:$0xf0] }
 0x537   : > { %4641 = vmatpush.bf16.msra.mxu2 %v7715_v17  ;;  %v8491_v17 = vor.u32 %v9212_v54, %v8488_v37  ;;  %v9104_v54 = vld [vmem:[%s13290_s7 + $0x6a4] sm:$0xf]  ;;  %v8049_v37 = vld [vmem:[%s13290_s7 + $0x6a8] sm:$0xf0] }
 0x538   : > { %5022 = vmatpush.bf16.msrb.mxu3 %v7910_v27  ;;  %5035 = vmatpush.bf16.msrb.mxu1 %v7914_v30  ;;  %v8483_v27 = vld [vmem:[%s10982_s25 + $0x14] ss:$25 sm:$0x3]  ;;  %v8072_v30 = vor.u32 %v9111_v15, %v8071_v5  ;;  %v8052_v52 = vor.u32 %v9104_v54, %v8049_v37  ;;  %v9145_v54 = vld [vmem:[%s13290_s7 + $0x7e4] sm:$0xf0] }
 0x539   : > { %6176 = vmatpush.bf16.msrb.mxu0 %v8515_v40  ;;  %v3666_v38 = vpop.f32.mrf.mxu2  ;;  %v3897_v19 = vpop.f32.mrf.mxu3  ;;  %v8063_v40 = vld [vmem:[%s13290_s7 + $0x6c0] sm:$0xf]  ;;  %v12182_v49 = vpack.c.bf16 %v8483_v27, %v8483_v27  ;;  %v9250_v27 = vld [vmem:[%s13290_s7 + $0xb34] sm:$0xf]  ;;  %v9144_v37 = vld [vmem:[%s13290_s7 + $0x7e4] sm:$0xf] }
 0x53a   : > { %v9102_v38 = vld [vmem:[%s13290_s7 + $0x694] sm:$0xf]  ;;  %v8041_v19 = vld [vmem:[%s13290_s7 + $0x698] sm:$0xf0] }
 0x53b   : > { %4642 = vmatpush.bf16.msra.mxu2 %v7707_v29  ;;  %v4913_v22 = vpop.f32.mrf.mxu0  ;;  %v8666_v29 = vld [vmem:[%s13290_s7 + $0xb68] sm:$0xf0] }
 0x53c   : > { %5023 = vmatpush.bf16.msrb.mxu3 %v7902_v57  ;;  %5036 = vmatpush.bf16.msrb.mxu1 %v7906_v24  ;;  %v8064_v57 = vor.u32 %v9109_v43, %v8063_v40  ;;  %v8068_v24 = vor.u32 %v9108_v2, %v8065_v47  ;;  %v8669_v58 = vor.u32 %v9256_v45, %v8666_v29  ;;  %v8031_v2 = vld [vmem:[%s13290_s7 + $0x680] sm:$0xf]  ;;  %v9101_v47 = vld [vmem:[%s13290_s7 + $0x684] sm:$0xf0]  ;;  %v9100_v45 = vld [vmem:[%s13290_s7 + $0x684] sm:$0xf] }
 0x53d   : > { %6177 = vmatpush.bf16.msrb.mxu0 %v8507_v39  ;;  %v9059_v39 = vld [vmem:[%s13290_s7 + $0x534] sm:$0xf0] }
 0x53e   : > { %4643 = vmatmul.bf16.vlgmr.msra.gmra.mxu2 %v11141_v56  ;;  %v8674_v56 = vld [vmem:[%s13290_s7 + $0xb78] sm:$0xf0]  ;;  %v12180_v34 = vpop.f32.mrf.mxu1  ;;  %v7861_v63 = vor.u32 %v9059_v39, %v7860_v50  ;;  %v8022_v50 = vld [vmem:[%s13290_s7 + $0x670] sm:$0xf]  ;;  %v9099_v39 = vld [vmem:[%s13290_s7 + $0x674] sm:$0xf0] }
 0x53f   : > { %4889 = vmatpush.bf16.msrb.mxu2 %v7893_v14  ;;  %5024 = vmatmul.bf16.vlgmr.msrb.gmra.mxu3 %v4919_v21  ;;  %v8677_v42 = vor.u32 %v9258_v51, %v8674_v56  ;;  %v8055_v14 = vld [vmem:[%s13290_s7 + $0x6b0] sm:$0xf]  ;;  %v9055_v51 = vld [vmem:[%s13290_s7 + $0x514] sm:$0xf0] }
 0x540   : > { %5270 = vmatpush.bf16.msra.mxu3 %v8088_v62  ;;  %5283 = vmatpush.bf16.msra.mxu1 %v8092_v16  ;;  %v9254_v62 = vld [vmem:[%s13290_s7 + $0xb54] sm:$0xf]  ;;  %v8658_v16 = vld [vmem:[%s13290_s7 + $0xb58] sm:$0xf0]  ;;  %v8056_v20 = vor.u32 %v9107_v7, %v8055_v14  ;;  %v8217_v14 = vld [vmem:[%s13290_s7 + $0x7f0] sm:$0xf] }
 0x541   : > { %5037 = vmatmul.bf16.vlgmr.msrb.gmra.mxu1 %v4919_v21  ;;  %6178 = vmatpush.bf16.msrb.mxu0 %v8499_v10  ;;  %v3882_v1 = vpop.f32.mrf.mxu2  ;;  %v8661_v21 = vor.u32 %v9254_v62, %v8658_v16  ;;  %v8219_v62 = vld [vmem:[%s13290_s7 + $0x7f8] sm:$0xf0]  ;;  %v8032_v16 = vor.u32 %v9101_v47, %v8031_v2  ;;  %v8218_v6 = vor.u32 %v9147_v25, %v8217_v14  ;;  %v9141_v47 = vld [vmem:[%s13290_s7 + $0x7c4] sm:$0xf0]  ;;  %v9091_v25 = vld [vmem:[%s13290_s7 + $0x634] sm:$0xf0] }
 0x542   : > { %v4136_v53 = vpop.f32.mrf.mxu3  ;;  %v3899_v10 = vadd.f32 %v3882_v1, %v11992_v55  ;;  %v8650_v55 = vld [vmem:[%s13290_s7 + $0xb48] sm:$0xf0]  ;;  %v8023_v1 = vor.u32 %v9099_v39, %v8022_v50 }
 0x543   : > { %4890 = vmatpush.bf16.msrb.mxu2 %v7885_v48  ;;  %v9105_v48 = vld [vmem:[%s13290_s7 + $0x6a4] sm:$0xf0] }
 0x544   : > { %5271 = vmatpush.bf16.msra.mxu3 %v8080_v61  ;;  %5284 = vmatpush.bf16.msra.mxu1 %v8084_v13  ;;  %v9252_v61 = vld [vmem:[%s13290_s7 + $0xb44] sm:$0xf]  ;;  %v4026_v13 = vadd.f32 %v12056_v31, %v3899_v10  ;;  %v8048_v15 = vor.u32 %v9105_v48, %v8047_v35  ;;  %v8039_v31 = vld [vmem:[%s13290_s7 + $0x690] sm:$0xf]  ;;  %v8222_v35 = vor.u32 %v9146_v9, %v8219_v62  ;;  %v9097_v10 = vld [vmem:[%s13290_s7 + $0x664] sm:$0xf0] }
 0x545   : > { %6179 = vmatpush.bf16.msrb.mxu0 %v8491_v17  ;;  %v8653_v17 = vor.u32 %v9252_v61, %v8650_v55  ;;  %v8209_v48 = vld [vmem:[%s13290_s7 + $0x7e0] sm:$0xf]  ;;  %v8211_v61 = vld [vmem:[%s13290_s7 + $0x7e8] sm:$0xf0]  ;;  %v8185_v9 = vld [vmem:[%s13290_s7 + $0x7b0] sm:$0xf] }
 0x546   : > { %v4151_v23 = vpop.f32.mrf.mxu1  ;;  %v12246_v56 = vadd.f32 %v4136_v53, %v4026_v13  ;;  %v9246_v53 = vld [vmem:[%s13290_s7 + $0xb14] sm:$0xf] }
 0x547   : > { %4891 = vmatpush.bf16.msrb.mxu2 %v7877_v18  ;;  %v12235_v5 = vpop.f32.mrf.mxu0  ;;  %v9103_v18 = vld [vmem:[%s13290_s7 + $0x694] sm:$0xf0]  ;;  %v8629_v13 = vor.u32 %v9246_v53, %v8626_v28 }
 0x548   : > { %5272 = vmatpush.bf16.msra.mxu3 %v8072_v30  ;;  %5285 = vmatpush.bf16.msra.mxu1 %v8076_v12  ;;  %v8642_v30 = vld [vmem:[%s13290_s7 + $0xb38] sm:$0xf0]  ;;  %v7845_v12 = vor.u32 %v9055_v51, %v7844_v26  ;;  %v8040_v40 = vor.u32 %v9103_v18, %v8039_v31  ;;  %v8214_v26 = vor.u32 %v9144_v37, %v8211_v61  ;;  %v8006_v51 = vld [vmem:[%s13290_s7 + $0x650] sm:$0xf]  ;;  %v9095_v31 = vld [vmem:[%s13290_s7 + $0x654] sm:$0xf0] }
 0x549   : > { %6426 = vmatpush.bf16.msra.mxu0 %v8677_v42  ;;  %v8044_v42 = vor.u32 %v9102_v38, %v8041_v19  ;;  %v3884_v22 = vpop.f32.mrf.mxu2  ;;  %v8645_v29 = vor.u32 %v9250_v27, %v8642_v30  ;;  %v9143_v18 = vld [vmem:[%s13290_s7 + $0x7d4] sm:$0xf0]  ;;  %v9142_v38 = vld [vmem:[%s13290_s7 + $0x7d4] sm:$0xf]  ;;  %v8203_v19 = vld [vmem:[%s13290_s7 + $0x7d8] sm:$0xf0] }
 0x54a   : > { %6180 = vmatmul.bf16.vlgmr.msrb.gmra.mxu0 %v12182_v49  ;;  %v4138_v43 = vpop.f32.mrf.mxu3  ;;  %v9290_v27 = vld [vmem:[%s13290_s7 + $0xc74] sm:$0xf]  ;;  %v9093_v22 = vld [vmem:[%s13290_s7 + $0x644] sm:$0xf0] }
 0x54b   : > { %4892 = vmatpush.bf16.msrb.mxu2 %v7869_v46  ;;  %v8033_v46 = vld [vmem:[%s13290_s7 + $0x688] sm:$0xf0]  ;;  %v8193_v43 = vld [vmem:[%s13290_s7 + $0x7c0] sm:$0xf] }
 0x54c   : > { %5273 = vmatpush.bf16.msra.mxu3 %v8064_v57  ;;  %5286 = vmatpush.bf16.msra.mxu1 %v8068_v24  ;;  %v9248_v57 = vld [vmem:[%s13290_s7 + $0xb24] sm:$0xf]  ;;  %v8634_v24 = vld [vmem:[%s13290_s7 + $0xb28] sm:$0xf0]  ;;  %v8194_v14 = vor.u32 %v9141_v47, %v8193_v43 }
 0x54d   : > { %6427 = vmatpush.bf16.msra.mxu0 %v8669_v58  ;;  %v7837_v58 = vor.u32 %v9053_v33, %v7836_v32  ;;  %v8613_v32 = vld [vmem:[%s10982_s25 + $0x16] ss:$25 sm:$0x3] }
 0x54e   : > { %v12388_v39 = vpack.c.bf16 %v8613_v32, %v8613_v32  ;;  %v9282_v32 = vld [vmem:[%s13290_s7 + $0xc34] sm:$0xf] }
 0x54f   : > { %4893 = vmatpush.bf16.msrb.mxu2 %v7861_v63  ;;  %v5167_v7 = vpop.f32.mrf.mxu0  ;;  %v8036_v63 = vor.u32 %v9100_v45, %v8033_v46  ;;  %v9140_v45 = vld [vmem:[%s13290_s7 + $0x7c4] sm:$0xf] }
 0x550   : > { %5274 = vmatpush.bf16.msra.mxu3 %v8056_v20  ;;  %5287 = vmatpush.bf16.msra.mxu1 %v8060_v0  ;;  %v8028_v20 = vld [vmem:[%s10982_s25 + $0xd] ss:$25 sm:$0x3]  ;;  %v8637_v0 = vor.u32 %v9248_v57, %v8634_v24  ;;  %v7990_v7 = vld [vmem:[%s13290_s7 + $0x630] sm:$0xf] }
 0x551   : > { %6428 = vmatpush.bf16.msra.mxu0 %v8661_v21  ;;  %v8014_v21 = vld [vmem:[%s13290_s7 + $0x660] sm:$0xf]  ;;  %v5173_v55 = vpack.c.bf16 %v8028_v20, %v8028_v20  ;;  %v9288_v46 = vld [vmem:[%s13290_s7 + $0xc64] sm:$0xf]  ;;  %v8796_v57 = vld [vmem:[%s13290_s7 + $0xc68] sm:$0xf0]  ;;  %v7991_v53 = vor.u32 %v9091_v25, %v7990_v7 }
 0x552   : > { %v8015_v23 = vor.u32 %v9097_v10, %v8014_v21  ;;  %v8799_v62 = vor.u32 %v9288_v46, %v8796_v57  ;;  %v8187_v20 = vld [vmem:[%s13290_s7 + $0x7b8] sm:$0xf0]  ;;  %v7982_v10 = vld [vmem:[%s13290_s7 + $0x620] sm:$0xf]  ;;  %v9133_v46 = vld [vmem:[%s13290_s7 + $0x784] sm:$0xf0] }
 0x553   : > { %4894 = vmatpush.bf16.msrb.mxu2 %v7853_v4  ;;  %v9244_v4 = vld [vmem:[%s13290_s7 + $0xb04] sm:$0xf]  ;;  %v8764_v7 = vld [vmem:[%s13290_s7 + $0xc28] sm:$0xf0]  ;;  %v8152_v25 = vld [vmem:[%s13290_s7 + $0x770] sm:$0xf] }
 0x554   : > { %5275 = vmatpush.bf16.msra.mxu3 %v8048_v15  ;;  %5288 = vmatpush.bf16.msra.mxu1 %v8052_v52  ;;  %v8618_v15 = vld [vmem:[%s13290_s7 + $0xb08] sm:$0xf0]  ;;  %v8210_v52 = vor.u32 %v9145_v54, %v8209_v48  ;;  %v9089_v48 = vld [vmem:[%s13290_s7 + $0x624] sm:$0xf0]  ;;  %v8177_v54 = vld [vmem:[%s13290_s7 + $0x7a0] sm:$0xf] }
 0x555   : > { %6429 = vmatpush.bf16.msra.mxu0 %v8653_v17  ;;  %v8201_v17 = vld [vmem:[%s13290_s7 + $0x7d0] sm:$0xf]  ;;  %v8621_v30 = vor.u32 %v9244_v4, %v8618_v15  ;;  %v9284_v4 = vld [vmem:[%s13290_s7 + $0xc44] sm:$0xf] }
 0x556   : > { %v8202_v33 = vor.u32 %v9143_v18, %v8201_v17  ;;  %v7974_v18 = vld [vmem:[%s13290_s7 + $0x610] sm:$0xf]  ;;  %v9132_v57 = vld [vmem:[%s13290_s7 + $0x784] sm:$0xf] }
 0x557   : > { %4895 = vmatpush.bf16.msrb.mxu2 %v7845_v12  ;;  %v8007_v12 = vor.u32 %v9095_v31, %v8006_v51  ;;  %v7983_v51 = vor.u32 %v9089_v48, %v7982_v10  ;;  %v9278_v10 = vld [vmem:[%s13290_s7 + $0xc14] sm:$0xf]  ;;  %v8756_v48 = vld [vmem:[%s13290_s7 + $0xc18] sm:$0xf0] }
 0x558   : > { %5276 = vmatpush.bf16.msra.mxu3 %v8040_v40  ;;  %5289 = vmatpush.bf16.msra.mxu1 %v8044_v42  ;;  %v8206_v40 = vor.u32 %v9142_v38, %v8203_v19  ;;  %v7998_v42 = vld [vmem:[%s13290_s7 + $0x640] sm:$0xf]  ;;  %v9087_v38 = vld [vmem:[%s13290_s7 + $0x614] sm:$0xf0] }
 0x559   : > { %6430 = vmatpush.bf16.msra.mxu0 %v8645_v29  ;;  %v8195_v29 = vld [vmem:[%s13290_s7 + $0x7c8] sm:$0xf0]  ;;  %v7999_v50 = vor.u32 %v9093_v22, %v7998_v42  ;;  %v7966_v42 = vld [vmem:[%s13290_s7 + $0x600] sm:$0xf]  ;;  %v9085_v22 = vld [vmem:[%s13290_s7 + $0x604] sm:$0xf0] }
 0x55b   : > { %4896 = vmatpush.bf16.msrb.mxu2 %v7837_v58  ;;  %v8198_v58 = vor.u32 %v9140_v45, %v8195_v29  ;;  %v8161_v29 = vld [vmem:[%s13290_s7 + $0x780] sm:$0xf] }
 0x55c   : > { %5277 = vmatpush.bf16.msra.mxu3 %v8032_v16  ;;  %5290 = vmatpush.bf16.msra.mxu1 %v8036_v63  ;;  %v9139_v16 = vld [vmem:[%s13290_s7 + $0x7b4] sm:$0xf0]  ;;  %v9138_v63 = vld [vmem:[%s13290_s7 + $0x7b4] sm:$0xf] }
 0x55d   : > { %6431 = vmatpush.bf16.msra.mxu0 %v8637_v0  ;;  %v9286_v0 = vld [vmem:[%s13290_s7 + $0xc54] sm:$0xf]  ;;  %v8186_v28 = vor.u32 %v9139_v16, %v8185_v9  ;;  %v9131_v9 = vld [vmem:[%s13290_s7 + $0x774] sm:$0xf0] }
 0x55e   : > { %4897 = vmatmul.bf16.vlgmr.msrb.gmra.mxu2 %v11248_v41  ;;  %v8804_v41 = vld [vmem:[%s13290_s7 + $0xc78] sm:$0xf0]  ;;  %v12386_v24 = vpop.f32.mrf.mxu1 }
 0x55f   : > { %5143 = vmatpush.bf16.msra.mxu2 %v8023_v1  ;;  %5278 = vmatmul.bf16.vlgmr.msra.gmra.mxu3 %v5173_v55  ;;  %v8807_v2 = vor.u32 %v9290_v27, %v8804_v41  ;;  %v8788_v1 = vld [vmem:[%s13290_s7 + $0xc58] sm:$0xf0]  ;;  %v9135_v41 = vld [vmem:[%s13290_s7 + $0x794] sm:$0xf0] }
 0x560   : > { %5524 = vmatpush.bf16.msrb.mxu3 %v8218_v6  ;;  %5537 = vmatpush.bf16.msrb.mxu1 %v8222_v35  ;;  %v8190_v6 = vor.u32 %v9138_v63, %v8187_v20  ;;  %v8791_v37 = vor.u32 %v9286_v0, %v8788_v1  ;;  %v7967_v63 = vor.u32 %v9085_v22, %v7966_v42  ;;  %v9179_v20 = vld [vmem:[%s13290_s7 + $0x8f4] sm:$0xf0]  ;;  %v9178_v0 = vld [vmem:[%s13290_s7 + $0x8f4] sm:$0xf]  ;;  %v8349_v1 = vld [vmem:[%s13290_s7 + $0x8f8] sm:$0xf0] }
 0x561   : > { %5291 = vmatmul.bf16.vlgmr.msra.gmra.mxu1 %v5173_v55  ;;  %6432 = vmatpush.bf16.msra.mxu0 %v8629_v13  ;;  %v4022_v35 = vpop.f32.mrf.mxu2  ;;  %v9137_v55 = vld [vmem:[%s13290_s7 + $0x7a4] sm:$0xf0]  ;;  %v9136_v13 = vld [vmem:[%s13290_s7 + $0x7a4] sm:$0xf] }
 0x562   : > { %v4276_v21 = vpop.f32.mrf.mxu3  ;;  %v4027_v61 = vadd.f32 %v4022_v35, %v12122_v8  ;;  %v8780_v8 = vld [vmem:[%s13290_s7 + $0xc48] sm:$0xf0]  ;;  %v8178_v31 = vor.u32 %v9137_v55, %v8177_v54  ;;  %v9129_v55 = vld [vmem:[%s13290_s7 + $0x764] sm:$0xf0] }
 0x563   : > { %5144 = vmatpush.bf16.msra.mxu2 %v8015_v23  ;;  %v8179_v23 = vld [vmem:[%s13290_s7 + $0x7a8] sm:$0xf0]  ;;  %v8783_v27 = vor.u32 %v9284_v4, %v8780_v8  ;;  %v9176_v4 = vld [vmem:[%s13290_s7 + $0x8e4] sm:$0xf] }
 0x564   : > { %5525 = vmatpush.bf16.msrb.mxu3 %v8210_v52  ;;  %5538 = vmatpush.bf16.msrb.mxu1 %v8214_v26  ;;  %v4154_v15 = vadd.f32 %v12180_v34, %v4027_v61  ;;  %v8182_v17 = vor.u32 %v9136_v13, %v8179_v23  ;;  %v8169_v34 = vld [vmem:[%s13290_s7 + $0x790] sm:$0xf]  ;;  %v8144_v61 = vld [vmem:[%s13290_s7 + $0x760] sm:$0xf]  ;;  %v9177_v23 = vld [vmem:[%s13290_s7 + $0x8e4] sm:$0xf0] }
 0x565   : > { %6433 = vmatpush.bf16.msra.mxu0 %v8621_v30  ;;  %v9134_v30 = vld [vmem:[%s13290_s7 + $0x794] sm:$0xf]  ;;  %v8170_v43 = vor.u32 %v9135_v41, %v8169_v34  ;;  %v8339_v13 = vld [vmem:[%s13290_s7 + $0x8e0] sm:$0xf]  ;;  %v8341_v8 = vld [vmem:[%s13290_s7 + $0x8e8] sm:$0xf0] }
 0x566   : > { %v4392_v52 = vpop.f32.mrf.mxu1  ;;  %v12452_v19 = vadd.f32 %v4276_v21, %v4154_v15  ;;  %v8153_v21 = vor.u32 %v9131_v9, %v8152_v25  ;;  %v8136_v34 = vld [vmem:[%s13290_s7 + $0x750] sm:$0xf]  ;;  %v9123_v9 = vld [vmem:[%s13290_s7 + $0x734] sm:$0xf0] }
 0x567   : > { %5145 = vmatpush.bf16.msra.mxu2 %v8007_v12  ;;  %v12441_v26 = vpop.f32.mrf.mxu0  ;;  %v8171_v12 = vld [vmem:[%s13290_s7 + $0x798] sm:$0xf0]  ;;  %v8759_v52 = vor.u32 %v9278_v10, %v8756_v48  ;;  %v8331_v41 = vld [vmem:[%s13290_s7 + $0x8d0] sm:$0xf]  ;;  %v8307_v10 = vld [vmem:[%s13290_s7 + $0x8a0] sm:$0xf] }
 0x568   : > { %5526 = vmatpush.bf16.msrb.mxu3 %v8202_v33  ;;  %5539 = vmatpush.bf16.msrb.mxu1 %v8206_v40  ;;  %v8772_v33 = vld [vmem:[%s13290_s7 + $0xc38] sm:$0xf0]  ;;  %v7975_v40 = vor.u32 %v9087_v38, %v7974_v18  ;;  %v8340_v18 = vor.u32 %v9177_v23, %v8339_v13  ;;  %v8344_v38 = vor.u32 %v9176_v4, %v8341_v8  ;;  %v8743_v42 = vld [vmem:[%s10982_s25 + $0x18] ss:$25 sm:$0x3] }
 0x569   : > { %6680 = vmatpush.bf16.msrb.mxu0 %v8807_v2  ;;  %v8174_v2 = vor.u32 %v9134_v30, %v8171_v12  ;;  %v4024_v47 = vpop.f32.mrf.mxu2  ;;  %v9175_v30 = vld [vmem:[%s13290_s7 + $0x8d4] sm:$0xf0]  ;;  %v9174_v12 = vld [vmem:[%s13290_s7 + $0x8d4] sm:$0xf]  ;;  %v8120_v25 = vld [vmem:[%s13290_s7 + $0x730] sm:$0xf] }
 0x56a   : > { %6434 = vmatmul.bf16.vlgmr.msra.gmra.mxu0 %v12388_v39  ;;  %v4278_v45 = vpop.f32.mrf.mxu3  ;;  %v8323_v47 = vld [vmem:[%s13290_s7 + $0x8c0] sm:$0xf] }
 0x56b   : > { %5146 = vmatpush.bf16.msra.mxu2 %v7999_v50  ;;  %v8775_v50 = vor.u32 %v9282_v32, %v8772_v33  ;;  %v8333_v32 = vld [vmem:[%s13290_s7 + $0x8d8] sm:$0xf0]  ;;  %v9173_v45 = vld [vmem:[%s13290_s7 + $0x8c4] sm:$0xf0] }
 0x56c   : > { %5527 = vmatpush.bf16.msrb.mxu3 %v8194_v14  ;;  %5540 = vmatpush.bf16.msrb.mxu1 %v8198_v58  ;;  %v8163_v14 = vld [vmem:[%s13290_s7 + $0x788] sm:$0xf0]  ;;  %v9280_v58 = vld [vmem:[%s13290_s7 + $0xc24] sm:$0xf]  ;;  %v8336_v22 = vor.u32 %v9174_v12, %v8333_v32  ;;  %v9117_v32 = vld [vmem:[%s13290_s7 + $0x704] sm:$0xf0] }
 0x56d   : > { %6681 = vmatpush.bf16.msrb.mxu0 %v8799_v62  ;;  %v8347_v62 = vld [vmem:[%s13290_s7 + $0x8f0] sm:$0xf]  ;;  %v8767_v35 = vor.u32 %v9280_v58, %v8764_v7  ;;  %v8324_v58 = vor.u32 %v9173_v45, %v8323_v47  ;;  %v9211_v47 = vld [vmem:[%s13290_s7 + $0x9f4] sm:$0xf0] }
 0x56e   : > { %v8348_v54 = vor.u32 %v9179_v20, %v8347_v62  ;;  %v8315_v62 = vld [vmem:[%s13290_s7 + $0x8b0] sm:$0xf]  ;;  %v8317_v20 = vld [vmem:[%s13290_s7 + $0x8b8] sm:$0xf0] }
 0x56f   : > { %5147 = vmatpush.bf16.msra.mxu2 %v7991_v53  ;;  %v5421_v16 = vpop.f32.mrf.mxu0  ;;  %v8162_v53 = vor.u32 %v9133_v46, %v8161_v29  ;;  %v9172_v29 = vld [vmem:[%s13290_s7 + $0x8c4] sm:$0xf]  ;;  %v8325_v46 = vld [vmem:[%s13290_s7 + $0x8c8] sm:$0xf0] }
 0x570   : > { %5528 = vmatpush.bf16.msrb.mxu3 %v8186_v28  ;;  %5541 = vmatpush.bf16.msrb.mxu1 %v8190_v6  ;;  %v8166_v28 = vor.u32 %v9132_v57, %v8163_v14  ;;  %v8158_v6 = vld [vmem:[%s10982_s25 + $0xf] ss:$25 sm:$0x3]  ;;  %v12582_v14 = vpack.c.bf16 %v8743_v42, %v8743_v42  ;;  %v8328_v7 = vor.u32 %v9172_v29, %v8325_v46  ;;  %v9171_v16 = vld [vmem:[%s13290_s7 + $0x8b4] sm:$0xf0] }
 0x571   : > { %6682 = vmatpush.bf16.msrb.mxu0 %v8791_v37  ;;  %v8352_v37 = vor.u32 %v9178_v0, %v8349_v1  ;;  %v5427_v15 = vpack.c.bf16 %v8158_v6, %v8158_v6  ;;  %v8121_v0 = vor.u32 %v9123_v9, %v8120_v25  ;;  %v8316_v1 = vor.u32 %v9171_v16, %v8315_v62  ;;  %v9164_v42 = vld [vmem:[%s13290_s7 + $0x884] sm:$0xf]  ;;  %v9210_v46 = vld [vmem:[%s13290_s7 + $0x9f4] sm:$0xf]  ;;  %v8274_v16 = vld [vmem:[%s13290_s7 + $0x860] sm:$0xf] }
 0x572   : > { %v8288_v62 = vld [vmem:[%s10982_s25 + $0x11] ss:$25 sm:$0x3] }
 0x573   : > { %5148 = vmatpush.bf16.msra.mxu2 %v7983_v51  ;;  %v8145_v51 = vor.u32 %v9129_v55, %v8144_v61  ;;  %v8309_v61 = vld [vmem:[%s13290_s7 + $0x8a8] sm:$0xf0] }
 0x574   : > { %5529 = vmatpush.bf16.msrb.mxu3 %v8178_v31  ;;  %5542 = vmatpush.bf16.msrb.mxu1 %v8182_v17  ;;  %v9276_v31 = vld [vmem:[%s13290_s7 + $0xc04] sm:$0xf]  ;;  %v8748_v17 = vld [vmem:[%s13290_s7 + $0xc08] sm:$0xf0] }
 0x575   : > { %6683 = vmatpush.bf16.msrb.mxu0 %v8783_v27  ;;  %v9127_v27 = vld [vmem:[%s13290_s7 + $0x754] sm:$0xf0]  ;;  %v8751_v33 = vor.u32 %v9276_v31, %v8748_v17  ;;  %v9166_v17 = vld [vmem:[%s13290_s7 + $0x894] sm:$0xf] }
 0x576   : > { %v9167_v31 = vld [vmem:[%s13290_s7 + $0x894] sm:$0xf0] }
 0x577   : > { %5149 = vmatpush.bf16.msra.mxu2 %v7975_v40  ;;  %v8137_v40 = vor.u32 %v9127_v27, %v8136_v34  ;;  %v8096_v34 = vld [vmem:[%s13290_s7 + $0x700] sm:$0xf] }
 0x578   : > { %5530 = vmatpush.bf16.msrb.mxu3 %v8170_v43  ;;  %5543 = vmatpush.bf16.msrb.mxu1 %v8174_v2  ;;  %v8128_v43 = vld [vmem:[%s13290_s7 + $0x740] sm:$0xf]  ;;  %v9125_v2 = vld [vmem:[%s13290_s7 + $0x744] sm:$0xf0]  ;;  %v8097_v29 = vor.u32 %v9117_v32, %v8096_v34  ;;  %v9203_v32 = vld [vmem:[%s13290_s7 + $0x9b4] sm:$0xf0] }
 0x579   : > { %6684 = vmatpush.bf16.msrb.mxu0 %v8775_v50  ;;  %v8129_v50 = vor.u32 %v9125_v2, %v8128_v43  ;;  %v9163_v43 = vld [vmem:[%s13290_s7 + $0x874] sm:$0xf0]  ;;  %v8477_v2 = vld [vmem:[%s13290_s7 + $0x9f0] sm:$0xf] }
 0x57a   : > { %v8478_v9 = vor.u32 %v9211_v47, %v8477_v2 }
 0x57b   : > { %5150 = vmatpush.bf16.msra.mxu2 %v7967_v63  ;;  %v9170_v63 = vld [vmem:[%s13290_s7 + $0x8b4] sm:$0xf] }
 0x57c   : > { %5531 = vmatpush.bf16.msrb.mxu3 %v8162_v53  ;;  %5544 = vmatpush.bf16.msrb.mxu1 %v8166_v28  ;;  %v8320_v53 = vor.u32 %v9170_v63, %v8317_v20  ;;  %v9161_v20 = vld [vmem:[%s13290_s7 + $0x864] sm:$0xf0] }
 0x57d   : > { %6685 = vmatpush.bf16.msrb.mxu0 %v8767_v35  ;;  %v8112_v35 = vld [vmem:[%s13290_s7 + $0x720] sm:$0xf] }
 0x57e   : > { %5151 = vmatmul.bf16.vlgmr.msra.gmra.mxu2 %v11368_v36  ;;  %v8332_v36 = vor.u32 %v9175_v30, %v8331_v41  ;;  %v12580_v57 = vpop.f32.mrf.mxu1 }
 0x57f   : > { %5397 = vmatpush.bf16.msrb.mxu2 %v8153_v21  ;;  %5532 = vmatmul.bf16.vlgmr.msrb.gmra.mxu3 %v5427_v15  ;;  %v9121_v21 = vld [vmem:[%s13290_s7 + $0x724] sm:$0xf0] }
 0x580   : > { %5778 = vmatpush.bf16.msra.mxu3 %v8348_v54  ;;  %5791 = vmatpush.bf16.msra.mxu1 %v8352_v37  ;;  %v9169_v54 = vld [vmem:[%s13290_s7 + $0x8a4] sm:$0xf0]  ;;  %v9168_v37 = vld [vmem:[%s13290_s7 + $0x8a4] sm:$0xf]  ;;  %v8113_v4 = vor.u32 %v9121_v21, %v8112_v35  ;;  %v8275_v35 = vor.u32 %v9161_v20, %v8274_v16 }
 0x581   : > { %5545 = vmatmul.bf16.vlgmr.msrb.gmra.mxu1 %v5427_v15  ;;  %6686 = vmatpush.bf16.msrb.mxu0 %v8759_v52  ;;  %v4263_v28 = vpop.f32.mrf.mxu2  ;;  %v8312_v8 = vor.u32 %v9168_v37, %v8309_v61  ;;  %v8104_v15 = vld [vmem:[%s13290_s7 + $0x710] sm:$0xf]  ;;  %v9119_v52 = vld [vmem:[%s13290_s7 + $0x714] sm:$0xf0] }
 0x582   : > { %v4517_v6 = vpop.f32.mrf.mxu3  ;;  %v4280_v48 = vadd.f32 %v4263_v28, %v12246_v56  ;;  %v8308_v56 = vor.u32 %v9169_v54, %v8307_v10  ;;  %v8471_v28 = vld [vmem:[%s13290_s7 + $0x9e8] sm:$0xf0]  ;;  %v8266_v10 = vld [vmem:[%s13290_s7 + $0x850] sm:$0xf]  ;;  %v9159_v54 = vld [vmem:[%s13290_s7 + $0x854] sm:$0xf0] }
 0x583   : > { %5398 = vmatpush.bf16.msrb.mxu2 %v8145_v51  ;;  %v8461_v37 = vld [vmem:[%s13290_s7 + $0x9d0] sm:$0xf]  ;;  %v9207_v61 = vld [vmem:[%s13290_s7 + $0x9d4] sm:$0xf0] }
 0x584   : > { %5779 = vmatpush.bf16.msra.mxu3 %v8340_v18  ;;  %5792 = vmatpush.bf16.msra.mxu1 %v8344_v38  ;;  %v4407_v55 = vadd.f32 %v12386_v24, %v4280_v48  ;;  %v8299_v24 = vld [vmem:[%s13290_s7 + $0x890] sm:$0xf]  ;;  %v8301_v18 = vld [vmem:[%s13290_s7 + $0x898] sm:$0xf0]  ;;  %v8105_v38 = vor.u32 %v9119_v52, %v8104_v15  ;;  %v9157_v15 = vld [vmem:[%s13290_s7 + $0x844] sm:$0xf0] }
 0x585   : > { %6687 = vmatpush.bf16.msrb.mxu0 %v8751_v33  ;;  %v8300_v27 = vor.u32 %v9167_v31, %v8299_v24  ;;  %v8304_v41 = vor.u32 %v9166_v17, %v8301_v18  ;;  %v8291_v33 = vld [vmem:[%s13290_s7 + $0x880] sm:$0xf]  ;;  %v9205_v24 = vld [vmem:[%s13290_s7 + $0x9c4] sm:$0xf0]  ;;  %v9204_v31 = vld [vmem:[%s13290_s7 + $0x9c4] sm:$0xf] }
 0x586   : > { %v4532_v13 = vpop.f32.mrf.mxu1  ;;  %v12634_v51 = vadd.f32 %v4517_v6, %v4407_v55  ;;  %v5681_v6 = vpack.c.bf16 %v8288_v62, %v8288_v62  ;;  %v9206_v55 = vld [vmem:[%s13290_s7 + $0x9d4] sm:$0xf]  ;;  %v8453_v52 = vld [vmem:[%s13290_s7 + $0x9c0] sm:$0xf]  ;;  %v8455_v17 = vld [vmem:[%s13290_s7 + $0x9c8] sm:$0xf0] }
 0x587   : > { %5399 = vmatpush.bf16.msrb.mxu2 %v8137_v40  ;;  %v12623_v23 = vpop.f32.mrf.mxu0  ;;  %v9165_v40 = vld [vmem:[%s13290_s7 + $0x884] sm:$0xf0]  ;;  %v8267_v13 = vor.u32 %v9159_v54, %v8266_v10  ;;  %v8454_v34 = vor.u32 %v9205_v24, %v8453_v52  ;;  %v8226_v10 = vld [vmem:[%s13290_s7 + $0x800] sm:$0xf]  ;;  %v9243_v52 = vld [vmem:[%s13290_s7 + $0xaf4] sm:$0xf0] }
 0x588   : > { %5780 = vmatpush.bf16.msra.mxu3 %v8332_v36  ;;  %5793 = vmatpush.bf16.msra.mxu1 %v8336_v22  ;;  %v8293_v36 = vld [vmem:[%s13290_s7 + $0x888] sm:$0xf0]  ;;  %v8282_v22 = vld [vmem:[%s13290_s7 + $0x870] sm:$0xf]  ;;  %v9242_v24 = vld [vmem:[%s13290_s7 + $0xaf4] sm:$0xf] }
 0x589   : > { %6688 = vmatmul.bf16.vlgmr.msrb.gmra.mxu0 %v12582_v14  ;;  %v4265_v30 = vpop.f32.mrf.mxu2  ;;  %v8283_v25 = vor.u32 %v9163_v43, %v8282_v22  ;;  %v8242_v22 = vld [vmem:[%s13290_s7 + $0x820] sm:$0xf] }
 0x58a   : > { %v4519_v12 = vpop.f32.mrf.mxu3  ;;  %v9155_v30 = vld [vmem:[%s13290_s7 + $0x834] sm:$0xf0] }
 0x58b   : > { %5400 = vmatpush.bf16.msrb.mxu2 %v8129_v50  ;;  %v8479_v50 = vld [vmem:[%s13290_s7 + $0x9f8] sm:$0xf0]  ;;  %v8445_v12 = vld [vmem:[%s13290_s7 + $0x9b0] sm:$0xf] }
 0x58c   : > { %5781 = vmatpush.bf16.msra.mxu3 %v8324_v58  ;;  %5794 = vmatpush.bf16.msra.mxu1 %v8328_v7  ;;  %v8292_v58 = vor.u32 %v9165_v40, %v8291_v33  ;;  %v8296_v7 = vor.u32 %v9164_v42, %v8293_v36  ;;  %v8482_v63 = vor.u32 %v9210_v46, %v8479_v50  ;;  %v9202_v33 = vld [vmem:[%s13290_s7 + $0x9b4] sm:$0xf]  ;;  %v8447_v40 = vld [vmem:[%s13290_s7 + $0x9b8] sm:$0xf0]  ;;  %v9201_v46 = vld [vmem:[%s13290_s7 + $0x9a4] sm:$0xf0] }
 0x58d   : > { %v8446_v36 = vor.u32 %v9203_v32, %v8445_v12  ;;  %v8450_v43 = vor.u32 %v9202_v33, %v8447_v40  ;;  %v8404_v32 = vld [vmem:[%s13290_s7 + $0x960] sm:$0xf]  ;;  %v9193_v33 = vld [vmem:[%s13290_s7 + $0x964] sm:$0xf0] }
 0x58e   : > { %v8599_v40 = vld [vmem:[%s13290_s7 + $0xae0] sm:$0xf] }
 0x58f   : > { %5401 = vmatpush.bf16.msrb.mxu2 %v8121_v0  ;;  %v5675_v45 = vpop.f32.mrf.mxu0  ;;  %v8469_v0 = vld [vmem:[%s13290_s7 + $0x9e0] sm:$0xf] }
 0x590   : > { %5782 = vmatpush.bf16.msra.mxu3 %v8316_v1  ;;  %5795 = vmatpush.bf16.msra.mxu1 %v8320_v53  ;;  %v9209_v1 = vld [vmem:[%s13290_s7 + $0x9e4] sm:$0xf0]  ;;  %v9208_v53 = vld [vmem:[%s13290_s7 + $0x9e4] sm:$0xf] }
 0x591   : > { %v8470_v21 = vor.u32 %v9209_v1, %v8469_v0  ;;  %v8474_v48 = vor.u32 %v9208_v53, %v8471_v28  ;;  %v9153_v45 = vld [vmem:[%s13290_s7 + $0x824] sm:$0xf0]  ;;  %v9151_v0 = vld [vmem:[%s13290_s7 + $0x814] sm:$0xf0]  ;;  %v8429_v1 = vld [vmem:[%s13290_s7 + $0x990] sm:$0xf] }
 0x592   : > { %v8243_v16 = vor.u32 %v9153_v45, %v8242_v22  ;;  %v9198_v28 = vld [vmem:[%s13290_s7 + $0x994] sm:$0xf]  ;;  %v8601_v22 = vld [vmem:[%s13290_s7 + $0xae8] sm:$0xf0] }
 0x593   : > { %5402 = vmatpush.bf16.msrb.mxu2 %v8113_v4  ;;  %v8462_v4 = vor.u32 %v9207_v61, %v8461_v37 }
 0x594   : > { %5783 = vmatpush.bf16.msra.mxu3 %v8308_v56  ;;  %5796 = vmatpush.bf16.msra.mxu1 %v8312_v8  ;;  %v8258_v56 = vld [vmem:[%s13290_s7 + $0x840] sm:$0xf] }
 0x597   : > { %5403 = vmatpush.bf16.msrb.mxu2 %v8105_v38  ;;  %v8259_v38 = vor.u32 %v9157_v15, %v8258_v56  ;;  %v8412_v56 = vld [vmem:[%s13290_s7 + $0x970] sm:$0xf] }
 0x598   : > { %5784 = vmatpush.bf16.msra.mxu3 %v8300_v27  ;;  %5797 = vmatpush.bf16.msra.mxu1 %v8304_v41  ;;  %v8250_v27 = vld [vmem:[%s13290_s7 + $0x830] sm:$0xf]  ;;  %v8458_v41 = vor.u32 %v9204_v31, %v8455_v17  ;;  %v8609_v31 = vld [vmem:[%s13290_s7 + $0xaf8] sm:$0xf0] }
 0x599   : > { %v8251_v42 = vor.u32 %v9155_v30, %v8250_v27  ;;  %v8607_v15 = vld [vmem:[%s13290_s7 + $0xaf0] sm:$0xf]  ;;  %v8612_v12 = vor.u32 %v9242_v24, %v8609_v31  ;;  %v9233_v31 = vld [vmem:[%s13290_s7 + $0xaa4] sm:$0xf0] }
 0x59a   : > { %v8608_v30 = vor.u32 %v9243_v52, %v8607_v15  ;;  %v8567_v15 = vld [vmem:[%s13290_s7 + $0xaa0] sm:$0xf] }
 0x59b   : > { %5404 = vmatpush.bf16.msrb.mxu2 %v8097_v29  ;;  %v8437_v29 = vld [vmem:[%s13290_s7 + $0x9a0] sm:$0xf] }
 0x59c   : > { %5785 = vmatpush.bf16.msra.mxu3 %v8292_v58  ;;  %5798 = vmatpush.bf16.msra.mxu1 %v8296_v7  ;;  %v9200_v58 = vld [vmem:[%s13290_s7 + $0x9a4] sm:$0xf]  ;;  %v8439_v7 = vld [vmem:[%s13290_s7 + $0x9a8] sm:$0xf0] }
 0x59d   : > { %v8442_v20 = vor.u32 %v9200_v58, %v8439_v7  ;;  %v8591_v58 = vld [vmem:[%s13290_s7 + $0xad0] sm:$0xf]  ;;  %v9239_v7 = vld [vmem:[%s13290_s7 + $0xad4] sm:$0xf0] }
 0x59e   : > { %5405 = vmatmul.bf16.vlgmr.msrb.gmra.mxu2 %v11573_v11  ;;  %v8463_v11 = vld [vmem:[%s13290_s7 + $0x9d8] sm:$0xf0]  ;;  %v4784_v18 = vpop.f32.mrf.mxu1 }
 0x59f   : > { %5651 = vmatpush.bf16.msra.mxu2 %v8283_v25  ;;  %5786 = vmatmul.bf16.vlgmr.msra.gmra.mxu3 %v5681_v6  ;;  %v8466_v8 = vor.u32 %v9206_v55, %v8463_v11  ;;  %v9197_v11 = vld [vmem:[%s13290_s7 + $0x984] sm:$0xf0] }
 0x5a0   : > { %6032 = vmatpush.bf16.msrb.mxu3 %v8478_v9  ;;  %6045 = vmatpush.bf16.msrb.mxu1 %v8482_v63  ;;  %v8438_v63 = vor.u32 %v9201_v46, %v8437_v29  ;;  %v8396_v46 = vld [vmem:[%s13290_s7 + $0x950] sm:$0xf] }
 0x5a1   : > { %5799 = vmatmul.bf16.vlgmr.msra.gmra.mxu1 %v5681_v6  ;;  %v4403_v2 = vpop.f32.mrf.mxu2  ;;  %v8431_v6 = vld [vmem:[%s13290_s7 + $0x998] sm:$0xf0] }
 0x5a2   : > { %v12758_v47 = vpop.f32.mrf.mxu3  ;;  %v4408_v50 = vadd.f32 %v4403_v2, %v12452_v19  ;;  %v8234_v19 = vld [vmem:[%s13290_s7 + $0x810] sm:$0xf]  ;;  %v8434_v37 = vor.u32 %v9198_v28, %v8431_v6  ;;  %v8405_v2 = vor.u32 %v9193_v33, %v8404_v32  ;;  %v9183_v33 = vld [vmem:[%s13290_s7 + $0x914] sm:$0xf0] }
 0x5a3   : > { %5652 = vmatpush.bf16.msra.mxu2 %v8275_v35  ;;  %v8235_v35 = vor.u32 %v9151_v0, %v8234_v19  ;;  %v8388_v19 = vld [vmem:[%s13290_s7 + $0x940] sm:$0xf]  ;;  %v8364_v32 = vld [vmem:[%s13290_s7 + $0x910] sm:$0xf] }
 0x5a4   : > { %6033 = vmatpush.bf16.msrb.mxu3 %v8470_v21  ;;  %6046 = vmatpush.bf16.msrb.mxu1 %v8474_v48  ;;  %v4535_v25 = vadd.f32 %v12580_v57, %v4408_v50  ;;  %v9199_v57 = vld [vmem:[%s13290_s7 + $0x994] sm:$0xf0]  ;;  %v8421_v48 = vld [vmem:[%s13290_s7 + $0x980] sm:$0xf] }
 0x5a5   : > { %v8430_v21 = vor.u32 %v9199_v57, %v8429_v1  ;;  %v9191_v50 = vld [vmem:[%s13290_s7 + $0x954] sm:$0xf0]  ;;  %v8583_v0 = vld [vmem:[%s13290_s7 + $0xac0] sm:$0xf]  ;;  %v9237_v1 = vld [vmem:[%s13290_s7 + $0xac4] sm:$0xf0] }
 0x5a6   : > { %v4786_v9 = vpop.f32.mrf.mxu1  ;;  %v4662_v53 = vadd.f32 %v12000_v59, %v4535_v25  ;;  %v9149_v59 = vld [vmem:[%s13290_s7 + $0x804] sm:$0xf0]  ;;  %v9238_v25 = vld [vmem:[%s13290_s7 + $0xad4] sm:$0xf]  ;;  %v9236_v57 = vld [vmem:[%s13290_s7 + $0xac4] sm:$0xf] }
 0x5a7   : > { %5653 = vmatpush.bf16.msra.mxu2 %v8267_v13  ;;  %v12777_v62 = vpop.f32.mrf.mxu0  ;;  %v9196_v13 = vld [vmem:[%s13290_s7 + $0x984] sm:$0xf]  ;;  %v8593_v9 = vld [vmem:[%s13290_s7 + $0xad8] sm:$0xf0] }
 0x5a8   : > { %6034 = vmatpush.bf16.msrb.mxu3 %v8462_v4  ;;  %6047 = vmatpush.bf16.msrb.mxu1 %v8466_v8  ;;  %v12807_v54 = vadd.f32 %v4784_v18, %v4662_v53  ;;  %v8423_v4 = vld [vmem:[%s13290_s7 + $0x988] sm:$0xf0]  ;;  %v9195_v8 = vld [vmem:[%s13290_s7 + $0x974] sm:$0xf0]  ;;  %v8227_v18 = vor.u32 %v9149_v59, %v8226_v10  ;;  %v8380_v59 = vld [vmem:[%s13290_s7 + $0x930] sm:$0xf] }
 0x5a9   : > { %v4405_v61 = vpop.f32.mrf.mxu2  ;;  %v8413_v27 = vor.u32 %v9195_v8, %v8412_v56  ;;  %v8585_v53 = vld [vmem:[%s13290_s7 + $0xac8] sm:$0xf0]  ;;  %v8372_v56 = vld [vmem:[%s13290_s7 + $0x920] sm:$0xf]  ;;  %v9185_v8 = vld [vmem:[%s13290_s7 + $0x924] sm:$0xf0] }
 0x5aa   : > { %v4773_v55 = vpop.f32.mrf.mxu3  ;;  %v4916_v28 = vadd.f32 %v12111_v3, %v12807_v54  ;;  %v8588_v10 = vor.u32 %v9236_v57, %v8585_v53  ;;  %v9235_v3 = vld [vmem:[%s13290_s7 + $0xab4] sm:$0xf0]  ;;  %v9234_v54 = vld [vmem:[%s13290_s7 + $0xab4] sm:$0xf] }
 0x5ab   : > { %5654 = vmatpush.bf16.msra.mxu2 %v8259_v38  ;;  %v8422_v38 = vor.u32 %v9197_v11, %v8421_v48  ;;  %v9187_v48 = vld [vmem:[%s13290_s7 + $0x934] sm:$0xf0]  ;;  %v8577_v55 = vld [vmem:[%s13290_s7 + $0xab8] sm:$0xf0] }
 0x5ac   : > { %6035 = vmatpush.bf16.msrb.mxu3 %v8454_v34  ;;  %6048 = vmatpush.bf16.msrb.mxu1 %v8458_v41  ;;  %v8426_v34 = vor.u32 %v9196_v13, %v8423_v4  ;;  %v8418_v41 = vld [vmem:[%s10982_s25 + $0x13] ss:$25 sm:$0x3]  ;;  %v8381_v11 = vor.u32 %v9187_v48, %v8380_v59  ;;  %v8580_v4 = vor.u32 %v9234_v54, %v8577_v55 }
 0x5ad   : > { %v9225_v48 = vld [vmem:[%s13290_s7 + $0xa64] sm:$0xf0]  ;;  %v9272_v54 = vld [vmem:[%s13290_s7 + $0xbe4] sm:$0xf]  ;;  %v8731_v55 = vld [vmem:[%s13290_s7 + $0xbe8] sm:$0xf0] }
 0x5af   : > { %5655 = vmatpush.bf16.msra.mxu2 %v8251_v42  ;;  %v5929_v17 = vpop.f32.mrf.mxu0  ;;  %v9241_v42 = vld [vmem:[%s13290_s7 + $0xae4] sm:$0xf0] }
 0x5b0   : > { %6036 = vmatpush.bf16.msrb.mxu3 %v8446_v36  ;;  %6049 = vmatpush.bf16.msrb.mxu1 %v8450_v43  ;;  %v9240_v36 = vld [vmem:[%s13290_s7 + $0xae4] sm:$0xf]  ;;  %v5935_v43 = vpack.c.bf16 %v8418_v41, %v8418_v41  ;;  %v8600_v45 = vor.u32 %v9241_v42, %v8599_v40  ;;  %v9231_v42 = vld [vmem:[%s13290_s7 + $0xa94] sm:$0xf0] }
 0x5b1   : > { %v8604_v29 = vor.u32 %v9240_v36, %v8601_v22  ;;  %v9232_v17 = vld [vmem:[%s13290_s7 + $0xaa4] sm:$0xf]  ;;  %v9230_v36 = vld [vmem:[%s13290_s7 + $0xa94] sm:$0xf]  ;;  %v8561_v22 = vld [vmem:[%s13290_s7 + $0xa98] sm:$0xf0] }
 0x5b3   : > { %5656 = vmatpush.bf16.msra.mxu2 %v8243_v16  ;;  %v8397_v16 = vor.u32 %v9191_v50, %v8396_v46  ;;  %v8551_v46 = vld [vmem:[%s13290_s7 + $0xa80] sm:$0xf]  ;;  %v9229_v50 = vld [vmem:[%s13290_s7 + $0xa84] sm:$0xf0] }
 0x5b4   : > { %6037 = vmatpush.bf16.msrb.mxu3 %v8438_v63  ;;  %6050 = vmatpush.bf16.msrb.mxu1 %v8442_v20  ;;  %v8592_v63 = vor.u32 %v9239_v7, %v8591_v58  ;;  %v9189_v20 = vld [vmem:[%s13290_s7 + $0x944] sm:$0xf0]  ;;  %v8552_v53 = vor.u32 %v9229_v50, %v8551_v46  ;;  %v9266_v46 = vld [vmem:[%s13290_s7 + $0xbb4] sm:$0xf]  ;;  %v8707_v50 = vld [vmem:[%s13290_s7 + $0xbb8] sm:$0xf0] }
 0x5b5   : > { %v8389_v6 = vor.u32 %v9189_v20, %v8388_v19  ;;  %v9275_v19 = vld [vmem:[%s13290_s7 + $0xbf4] sm:$0xf0] }
 0x5b7   : > { %5657 = vmatpush.bf16.msra.mxu2 %v8235_v35 }
 0x5b8   : > { %6038 = vmatpush.bf16.msrb.mxu3 %v8430_v21  ;;  %6051 = vmatpush.bf16.msrb.mxu1 %v8434_v37  ;;  %v8584_v21 = vor.u32 %v9237_v1, %v8583_v0  ;;  %v8575_v37 = vld [vmem:[%s13290_s7 + $0xab0] sm:$0xf]  ;;  %v9274_v0 = vld [vmem:[%s13290_s7 + $0xbf4] sm:$0xf]  ;;  %v8739_v1 = vld [vmem:[%s13290_s7 + $0xbf8] sm:$0xf0] }
 0x5b9   : > { %v8576_v13 = vor.u32 %v9235_v3, %v8575_v37  ;;  %v8742_v59 = vor.u32 %v9274_v0, %v8739_v1  ;;  %v8729_v37 = vld [vmem:[%s13290_s7 + $0xbe0] sm:$0xf]  ;;  %v9273_v3 = vld [vmem:[%s13290_s7 + $0xbe4] sm:$0xf0]  ;;  %v9264_v0 = vld [vmem:[%s13290_s7 + $0xba4] sm:$0xf] }
 0x5ba   : > { %v8699_v1 = vld [vmem:[%s13290_s7 + $0xba8] sm:$0xf0] }
 0x5bb   : > { %5658 = vmatpush.bf16.msra.mxu2 %v8227_v18  ;;  %v8569_v18 = vld [vmem:[%s13290_s7 + $0xaa8] sm:$0xf0] }
 0x5bc   : > { %6039 = vmatpush.bf16.msrb.mxu3 %v8422_v38  ;;  %6052 = vmatpush.bf16.msrb.mxu1 %v8426_v34  ;;  %v8373_v34 = vor.u32 %v9185_v8, %v8372_v56  ;;  %v8526_v56 = vld [vmem:[%s13290_s7 + $0xa50] sm:$0xf]  ;;  %v8734_v8 = vor.u32 %v9272_v54, %v8731_v55  ;;  %v8691_v54 = vld [vmem:[%s13290_s7 + $0xb98] sm:$0xf0] }
 0x5be   : > { %5659 = vmatmul.bf16.vlgmr.msra.gmra.mxu2 %v11771_v60  ;;  %v8596_v60 = vor.u32 %v9238_v25, %v8593_v9  ;;  %v5038_v35 = vpop.f32.mrf.mxu1  ;;  %v9228_v25 = vld [vmem:[%s13290_s7 + $0xa84] sm:$0xf]  ;;  %v8553_v9 = vld [vmem:[%s13290_s7 + $0xa88] sm:$0xf0] }
 0x5bf   : > { %5905 = vmatpush.bf16.msrb.mxu2 %v8413_v27  ;;  %6040 = vmatmul.bf16.vlgmr.msrb.gmra.mxu3 %v5935_v43  ;;  %v12903_v61 = vadd.f32 %v5038_v35, %v4916_v28  ;;  %v8556_v28 = vor.u32 %v9228_v25, %v8553_v9  ;;  %v8502_v25 = vld [vmem:[%s13290_s7 + $0xa20] sm:$0xf]  ;;  %v8710_v9 = vor.u32 %v9266_v46, %v8707_v50  ;;  %v9251_v46 = vld [vmem:[%s13290_s7 + $0xb34] sm:$0xf0] }
 0x5c0   : > { %6286 = vmatpush.bf16.msra.mxu3 %v8608_v30  ;;  %6299 = vmatpush.bf16.msra.mxu1 %v8612_v12  ;;  %v8568_v30 = vor.u32 %v9233_v31, %v8567_v15  ;;  %v8572_v12 = vor.u32 %v9232_v17, %v8569_v18  ;;  %v9223_v15 = vld [vmem:[%s13290_s7 + $0xa54] sm:$0xf0]  ;;  %v9270_v17 = vld [vmem:[%s13290_s7 + $0xbd4] sm:$0xf] }
 0x5c1   : > { %6053 = vmatmul.bf16.vlgmr.msrb.gmra.mxu1 %v5935_v43  ;;  %v4644_v52 = vpop.f32.mrf.mxu2  ;;  %v8365_v43 = vor.u32 %v9183_v33, %v8364_v32  ;;  %v9271_v31 = vld [vmem:[%s13290_s7 + $0xbd4] sm:$0xf0]  ;;  %v8527_v18 = vor.u32 %v9223_v15, %v8526_v56  ;;  %v9269_v32 = vld [vmem:[%s13290_s7 + $0xbc4] sm:$0xf0]  ;;  %v9268_v33 = vld [vmem:[%s13290_s7 + $0xbc4] sm:$0xf] }
 0x5c2   : > { %v12923_v24 = vpop.f32.mrf.mxu3  ;;  %v4661_v38 = vadd.f32 %v4644_v52, %v12634_v51  ;;  %v8559_v51 = vld [vmem:[%s13290_s7 + $0xa90] sm:$0xf]  ;;  %v8681_v56 = vld [vmem:[%s13290_s7 + $0xb80] sm:$0xf]  ;;  %v9260_v15 = vld [vmem:[%s13290_s7 + $0xb84] sm:$0xf] }
 0x5c3   : > { %5906 = vmatpush.bf16.msrb.mxu2 %v8405_v2  ;;  %v8356_v2 = vld [vmem:[%s13290_s7 + $0x900] sm:$0xf]  ;;  %v8721_v52 = vld [vmem:[%s13290_s7 + $0xbd0] sm:$0xf] }
 0x5c4   : > { %6287 = vmatpush.bf16.msra.mxu3 %v8600_v45  ;;  %6300 = vmatpush.bf16.msra.mxu1 %v8604_v29  ;;  %v12947_v40 = vadd.f32 %v12758_v47, %v4661_v38  ;;  %v8560_v47 = vor.u32 %v9231_v42, %v8559_v51  ;;  %v8564_v45 = vor.u32 %v9230_v36, %v8561_v22  ;;  %v9181_v29 = vld [vmem:[%s13290_s7 + $0x904] sm:$0xf0]  ;;  %v8715_v51 = vld [vmem:[%s13290_s7 + $0xbc8] sm:$0xf0] }
 0x5c5   : > { %v8357_v20 = vor.u32 %v9181_v29, %v8356_v2  ;;  %v8722_v38 = vor.u32 %v9271_v31, %v8721_v52  ;;  %v5170_v42 = vadd.f32 %v12235_v5, %v12903_v61  ;;  %v8705_v29 = vld [vmem:[%s13290_s7 + $0xbb0] sm:$0xf]  ;;  %v9267_v5 = vld [vmem:[%s13290_s7 + $0xbb4] sm:$0xf0] }
 0x5c6   : > { %v5040_v27 = vpop.f32.mrf.mxu1 }
 0x5c7   : > { %5907 = vmatpush.bf16.msrb.mxu2 %v8397_v16  ;;  %v12935_v41 = vpop.f32.mrf.mxu0  ;;  %v8542_v16 = vld [vmem:[%s13290_s7 + $0xa70] sm:$0xf] }
 0x5c8   : > { %6288 = vmatpush.bf16.msra.mxu3 %v8592_v63  ;;  %6301 = vmatpush.bf16.msra.mxu1 %v8596_v60  ;;  %v9227_v63 = vld [vmem:[%s13290_s7 + $0xa74] sm:$0xf0]  ;;  %v8737_v60 = vld [vmem:[%s13290_s7 + $0xbf0] sm:$0xf] }
 0x5c9   : > { %v4646_v58 = vpop.f32.mrf.mxu2  ;;  %v8738_v35 = vor.u32 %v9275_v19, %v8737_v60  ;;  %v9265_v60 = vld [vmem:[%s13290_s7 + $0xba4] sm:$0xf0] }
 0x5ca   : > { %v5027_v7 = vpop.f32.mrf.mxu3 }
 0x5cb   : > { %5908 = vmatpush.bf16.msrb.mxu2 %v8389_v6  ;;  %v8543_v6 = vor.u32 %v9227_v63, %v8542_v16  ;;  %v8706_v7 = vor.u32 %v9267_v5, %v8705_v29  ;;  %v9217_v16 = vld [vmem:[%s13290_s7 + $0xa24] sm:$0xf0]  ;;  %v8697_v63 = vld [vmem:[%s13290_s7 + $0xba0] sm:$0xf] }
 0x5cc   : > { %6289 = vmatpush.bf16.msra.mxu3 %v8584_v21  ;;  %6302 = vmatpush.bf16.msra.mxu1 %v8588_v10  ;;  %v8548_v21 = vld [vmem:[%s10982_s25 + $0x15] ss:$25 sm:$0x3]  ;;  %v8534_v10 = vld [vmem:[%s13290_s7 + $0xa60] sm:$0xf] }
 0x5cf   : > { %5909 = vmatpush.bf16.msrb.mxu2 %v8381_v11  ;;  %v6183_v57 = vpop.f32.mrf.mxu0  ;;  %v6189_v11 = vpack.c.bf16 %v8548_v21, %v8548_v21 }
 0x5d0   : > { %6290 = vmatpush.bf16.msra.mxu3 %v8576_v13  ;;  %6303 = vmatpush.bf16.msra.mxu1 %v8580_v4  ;;  %v8535_v13 = vor.u32 %v9225_v48, %v8534_v10  ;;  %v8730_v4 = vor.u32 %v9273_v3, %v8729_v37  ;;  %v8702_v10 = vor.u32 %v9264_v0, %v8699_v1  ;;  %v9263_v48 = vld [vmem:[%s13290_s7 + $0xb94] sm:$0xf0]  ;;  %v9262_v3 = vld [vmem:[%s13290_s7 + $0xb94] sm:$0xf] }
 0x5d3   : > { %5910 = vmatpush.bf16.msrb.mxu2 %v8373_v34  ;;  %v8518_v34 = vld [vmem:[%s13290_s7 + $0xa40] sm:$0xf] }
 0x5d4   : > { %6291 = vmatpush.bf16.msra.mxu3 %v8568_v30  ;;  %6304 = vmatpush.bf16.msra.mxu1 %v8572_v12  ;;  %v9221_v30 = vld [vmem:[%s13290_s7 + $0xa44] sm:$0xf0]  ;;  %v8713_v12 = vld [vmem:[%s13290_s7 + $0xbc0] sm:$0xf] }
 0x5d5   : > { %v8519_v36 = vor.u32 %v9221_v30, %v8518_v34  ;;  %v8714_v22 = vor.u32 %v9269_v32, %v8713_v12  ;;  %v8678_v32 = vld [vmem:[%s10982_s25 + $0x17] ss:$25 sm:$0x3] }
 0x5d7   : > { %5911 = vmatpush.bf16.msrb.mxu2 %v8365_v43  ;;  %v8510_v43 = vld [vmem:[%s13290_s7 + $0xa30] sm:$0xf] }
 0x5d8   : > { %6292 = vmatpush.bf16.msra.mxu3 %v8560_v47  ;;  %6305 = vmatpush.bf16.msra.mxu1 %v8564_v45  ;;  %v8718_v47 = vor.u32 %v9268_v33, %v8715_v51  ;;  %v9219_v45 = vld [vmem:[%s13290_s7 + $0xa34] sm:$0xf0]  ;;  %v8664_v33 = vld [vmem:[%s13290_s7 + $0xb60] sm:$0xf]  ;;  %v9257_v51 = vld [vmem:[%s13290_s7 + $0xb64] sm:$0xf0] }
 0x5d9   : > { %v8511_v58 = vor.u32 %v9219_v45, %v8510_v43  ;;  %v9255_v43 = vld [vmem:[%s13290_s7 + $0xb54] sm:$0xf0]  ;;  %v9253_v45 = vld [vmem:[%s13290_s7 + $0xb44] sm:$0xf0] }
 0x5db   : > { %5912 = vmatpush.bf16.msrb.mxu2 %v8357_v20 }
 0x5dc   : > { %6293 = vmatpush.bf16.msra.mxu3 %v8552_v53  ;;  %6306 = vmatpush.bf16.msra.mxu1 %v8556_v28  ;;  %v8503_v53 = vor.u32 %v9217_v16, %v8502_v25  ;;  %v8698_v28 = vor.u32 %v9265_v60, %v8697_v63  ;;  %v8632_v25 = vld [vmem:[%s13290_s7 + $0xb20] sm:$0xf]  ;;  %v8624_v60 = vld [vmem:[%s13290_s7 + $0xb10] sm:$0xf] }
 0x5de   : > { %5913 = vmatmul.bf16.vlgmr.msrb.gmra.mxu2 %v11971_v44  ;;  %v8723_v44 = vld [vmem:[%s13290_s7 + $0xbd8] sm:$0xf0]  ;;  %v5292_v2 = vpop.f32.mrf.mxu1 }
 0x5df   : > { %6159 = vmatpush.bf16.msra.mxu2 %v8543_v6  ;;  %6294 = vmatmul.bf16.vlgmr.msra.gmra.mxu3 %v6189_v11  ;;  %v8726_v27 = vor.u32 %v9270_v17, %v8723_v44  ;;  %v13064_v61 = vadd.f32 %v5292_v2, %v5170_v42  ;;  %v8494_v6 = vld [vmem:[%s13290_s7 + $0xa10] sm:$0xf]  ;;  %v8683_v17 = vld [vmem:[%s13290_s7 + $0xb88] sm:$0xf0]  ;;  %v6443_v42 = vpack.c.bf16 %v8678_v32, %v8678_v32  ;;  %v9279_v32 = vld [vmem:[%s13290_s7 + $0xc14] sm:$0xf0] }
 0x5e0   : > { %6540 = vmatpush.bf16.msrb.mxu3 %v8738_v35  ;;  %6553 = vmatpush.bf16.msrb.mxu1 %v8742_v59  ;;  %v9215_v59 = vld [vmem:[%s13290_s7 + $0xa14] sm:$0xf0]  ;;  %v8672_v44 = vld [vmem:[%s13290_s7 + $0xb70] sm:$0xf]  ;;  %v8686_v30 = vor.u32 %v9260_v15, %v8683_v17 }
 0x5e1   : > { %6307 = vmatmul.bf16.vlgmr.msra.gmra.mxu1 %v6189_v11  ;;  %v4898_v19 = vpop.f32.mrf.mxu2  ;;  %v8495_v55 = vor.u32 %v9215_v59, %v8494_v6  ;;  %v5424_v5 = vadd.f32 %v12441_v26, %v13064_v61  ;;  %v9249_v26 = vld [vmem:[%s13290_s7 + $0xb24] sm:$0xf0] }
 0x5e2   : > { %v13084_v20 = vpop.f32.mrf.mxu3  ;;  %v4915_v57 = vadd.f32 %v4898_v19, %v12947_v40  ;;  %v8689_v40 = vld [vmem:[%s13290_s7 + $0xb90] sm:$0xf]  ;;  %v8633_v63 = vor.u32 %v9249_v26, %v8632_v25  ;;  %v9247_v19 = vld [vmem:[%s13290_s7 + $0xb14] sm:$0xf0]  ;;  %v9245_v6 = vld [vmem:[%s13290_s7 + $0xb04] sm:$0xf0] }
 0x5e3   : > { %6160 = vmatpush.bf16.msra.mxu2 %v8535_v13  ;;  %v8690_v11 = vor.u32 %v9263_v48, %v8689_v40  ;;  %v8486_v13 = vld [vmem:[%s13290_s7 + $0xa00] sm:$0xf] }
 0x5e4   : > { %6541 = vmatpush.bf16.msrb.mxu3 %v8730_v4  ;;  %6554 = vmatpush.bf16.msrb.mxu1 %v8734_v8  ;;  %v5042_v37 = vadd.f32 %v12923_v24, %v4915_v57  ;;  %v9213_v24 = vld [vmem:[%s13290_s7 + $0xa04] sm:$0xf0]  ;;  %v8694_v4 = vor.u32 %v9262_v3, %v8691_v54  ;;  %v8794_v3 = vld [vmem:[%s13290_s7 + $0xc60] sm:$0xf] }
 0x5e5   : > { %v9261_v8 = vld [vmem:[%s13290_s7 + $0xb84] sm:$0xf0] }
 0x5e6   : > { %v5294_v35 = vpop.f32.mrf.mxu1  ;;  %v8682_v34 = vor.u32 %v9261_v8, %v8681_v56  ;;  %v9289_v54 = vld [vmem:[%s13290_s7 + $0xc64] sm:$0xf0] }
 0x5e7   : > { %6161 = vmatpush.bf16.msra.mxu2 %v8527_v18  ;;  %v13096_v21 = vpop.f32.mrf.mxu0  ;;  %v9259_v18 = vld [vmem:[%s13290_s7 + $0xb74] sm:$0xf0]  ;;  %v8802_v35 = vld [vmem:[%s13290_s7 + $0xc70] sm:$0xf]  ;;  %v9285_v56 = vld [vmem:[%s13290_s7 + $0xc44] sm:$0xf0] }
 0x5e8   : > { %6542 = vmatpush.bf16.msrb.mxu3 %v8722_v38  ;;  %6555 = vmatpush.bf16.msrb.mxu1 %v8726_v27  ;;  %v8487_v38 = vor.u32 %v9213_v24, %v8486_v13  ;;  %v8673_v12 = vor.u32 %v9259_v18, %v8672_v44  ;;  %v9287_v13 = vld [vmem:[%s13290_s7 + $0xc54] sm:$0xf0]  ;;  %v8762_v18 = vld [vmem:[%s13290_s7 + $0xc20] sm:$0xf] }
 0x5e9   : > { %v4900_v52 = vpop.f32.mrf.mxu2 }
 0x5ea   : > { %v5281_v31 = vpop.f32.mrf.mxu3  ;;  %v8770_v52 = vld [vmem:[%s13290_s7 + $0xc30] sm:$0xf] }
 0x5eb   : > { %6162 = vmatpush.bf16.msra.mxu2 %v8519_v36  ;;  %v8665_v36 = vor.u32 %v9257_v51, %v8664_v33 }
 0x5ec   : > { %6543 = vmatpush.bf16.msrb.mxu3 %v8714_v22  ;;  %6556 = vmatpush.bf16.msrb.mxu1 %v8718_v47  ;;  %v8656_v22 = vld [vmem:[%s13290_s7 + $0xb50] sm:$0xf]  ;;  %v8648_v47 = vld [vmem:[%s13290_s7 + $0xb40] sm:$0xf] }
 0x5ed   : > { %v8657_v2 = vor.u32 %v9255_v43, %v8656_v22  ;;  %v8649_v29 = vor.u32 %v9253_v45, %v8648_v47  ;;  %v9277_v22 = vld [vmem:[%s13290_s7 + $0xc04] sm:$0xf0] }
 0x5ef   : > { %6163 = vmatpush.bf16.msra.mxu2 %v8511_v58  ;;  %v6437_v27 = vpop.f32.mrf.mxu0 }
 0x5f0   : > { %6544 = vmatpush.bf16.msrb.mxu3 %v8706_v7  ;;  %6557 = vmatpush.bf16.msrb.mxu1 %v8710_v9 }
 0x5f3   : > { %6164 = vmatpush.bf16.msra.mxu2 %v8503_v53  ;;  %v8625_v53 = vor.u32 %v9247_v19, %v8624_v60 }
 0x5f4   : > { %6545 = vmatpush.bf16.msrb.mxu3 %v8698_v28  ;;  %6558 = vmatpush.bf16.msrb.mxu1 %v8702_v10  ;;  %v8616_v28 = vld [vmem:[%s13290_s7 + $0xb00] sm:$0xf]  ;;  %v9291_v10 = vld [vmem:[%s13290_s7 + $0xc74] sm:$0xf0] }
 0x5f5   : > { %v8617_v40 = vor.u32 %v9245_v6, %v8616_v28  ;;  %v8803_v48 = vor.u32 %v9291_v10, %v8802_v35 }
 0x5f7   : > { %6165 = vmatpush.bf16.msra.mxu2 %v8495_v55  ;;  %v8795_v55 = vor.u32 %v9289_v54, %v8794_v3 }
 0x5f8   : > { %6546 = vmatpush.bf16.msrb.mxu3 %v8690_v11  ;;  %6559 = vmatpush.bf16.msrb.mxu1 %v8694_v4  ;;  %v8786_v11 = vld [vmem:[%s13290_s7 + $0xc50] sm:$0xf]  ;;  %v8778_v4 = vld [vmem:[%s13290_s7 + $0xc40] sm:$0xf] }
 0x5f9   : > { %v8787_v24 = vor.u32 %v9287_v13, %v8786_v11  ;;  %v8779_v8 = vor.u32 %v9285_v56, %v8778_v4 }
 0x5fb   : > { %6166 = vmatpush.bf16.msra.mxu2 %v8487_v38 }
 0x5fc   : > { %6547 = vmatpush.bf16.msrb.mxu3 %v8682_v34  ;;  %6560 = vmatpush.bf16.msrb.mxu1 %v8686_v30 }
 0x5fe   : > { %6167 = vmatmul.bf16.vlgmr.msra.gmra.mxu2 %v12182_v49  ;;  %v8640_v49 = vld [vmem:[%s13290_s7 + $0xb30] sm:$0xf]  ;;  %v5546_v50 = vpop.f32.mrf.mxu1 }
 0x5ff   : > { %6413 = vmatpush.bf16.msrb.mxu2 %v8673_v12  ;;  %6548 = vmatmul.bf16.vlgmr.msrb.gmra.mxu3 %v6443_v42  ;;  %v5551_v58 = vadd.f32 %v5546_v50, %v5424_v5  ;;  %v8641_v7 = vor.u32 %v9251_v46, %v8640_v49  ;;  %v8754_v12 = vld [vmem:[%s13290_s7 + $0xc10] sm:$0xf] }
 0x600   : > { %6561 = vmatmul.bf16.vlgmr.msrb.gmra.mxu1 %v6443_v42  ;;  %v8755_v42 = vor.u32 %v9279_v32, %v8754_v12 }
 0x601   : > { %v5152_v61 = vpop.f32.mrf.mxu2  ;;  %v5678_v15 = vadd.f32 %v12623_v23, %v5551_v58  ;;  %v9281_v23 = vld [vmem:[%s13290_s7 + $0xc24] sm:$0xf0] }
 0x602   : > { %v5533_v9 = vpop.f32.mrf.mxu3  ;;  %v5169_v16 = vadd.f32 %v5152_v61, %v5042_v37  ;;  %v8763_v30 = vor.u32 %v9281_v23, %v8762_v18 }
 0x603   : > { %6414 = vmatpush.bf16.msrb.mxu2 %v8665_v36  ;;  %v8746_v36 = vld [vmem:[%s13290_s7 + $0xc00] sm:$0xf] }
 0x604   : > { %v5296_v57 = vadd.f32 %v13084_v20, %v5169_v16  ;;  %v8747_v47 = vor.u32 %v9277_v22, %v8746_v36 }
 0x606   : > { %v5548_v0 = vpop.f32.mrf.mxu1  ;;  %v13178_v1 = vpop.f32.mrf.mxu0 }
 0x607   : > { %6415 = vmatpush.bf16.msrb.mxu2 %v8657_v2 }
 0x609   : > { %v5154_v59 = vpop.f32.mrf.mxu2 }
 0x60a   : > { %v5535_v20 = vpop.f32.mrf.mxu3 }
 0x60b   : > { %6416 = vmatpush.bf16.msrb.mxu2 %v8649_v29 }
 0x60e   : > { %v6691_v37 = vpop.f32.mrf.mxu0 }
 0x60f   : > { %6417 = vmatpush.bf16.msrb.mxu2 %v8641_v7 }
 0x613   : > { %6418 = vmatpush.bf16.msrb.mxu2 %v8633_v63 }
 0x617   : > { %6419 = vmatpush.bf16.msrb.mxu2 %v8625_v53 }
 0x61b   : > { %6420 = vmatpush.bf16.msrb.mxu2 %v8617_v40 }
 0x61e   : > { %6421 = vmatmul.bf16.vlgmr.msrb.gmra.mxu2 %v12388_v39  ;;  %v9283_v39 = vld [vmem:[%s13290_s7 + $0xc34] sm:$0xf0]  ;;  %v5800_v31 = vpop.f32.mrf.mxu1 }
 0x61f   : > { %6667 = vmatpush.bf16.msra.mxu2 %v8803_v48  ;;  %v5805_v17 = vadd.f32 %v5800_v31, %v5678_v15  ;;  %v8771_v44 = vor.u32 %v9283_v39, %v8770_v52 }
 0x621   : > { %v5406_v38 = vpop.f32.mrf.mxu2  ;;  %v5932_v45 = vadd.f32 %v12777_v62, %v5805_v17 }
 0x622   : > { %v5423_v34 = vadd.f32 %v5406_v38, %v5296_v57  ;;  %v5787_v27 = vpop.f32.mrf.mxu3 }
 0x623   : > { %6668 = vmatpush.bf16.msra.mxu2 %v8795_v55 }
 0x624   : > { %v5550_v51 = vadd.f32 %v5533_v9, %v5423_v34 }
 0x626   : > { %v5802_v33 = vpop.f32.mrf.mxu1 }
 0x627   : > { %6669 = vmatpush.bf16.msra.mxu2 %v8787_v24 }
 0x629   : > { %v5408_v43 = vpop.f32.mrf.mxu2 }
 0x62a   : > { %v5789_v2 = vpop.f32.mrf.mxu3 }
 0x62b   : > { %6670 = vmatpush.bf16.msra.mxu2 %v8779_v8 }
 0x62f   : > { %6671 = vmatpush.bf16.msra.mxu2 %v8771_v44 }
 0x633   : > { %6672 = vmatpush.bf16.msra.mxu2 %v8763_v30 }
 0x637   : > { %6673 = vmatpush.bf16.msra.mxu2 %v8755_v42 }
 0x63b   : > { %6674 = vmatpush.bf16.msra.mxu2 %v8747_v47 }
 0x63e   : > { %6675 = vmatmul.bf16.vlgmr.msra.gmra.mxu2 %v12582_v14  ;;  %v6054_v29 = vpop.f32.mrf.mxu1 }
 0x63f   : > { %v6059_v5 = vadd.f32 %v6054_v29, %v5932_v45 }
 0x641   : > { %v5660_v49 = vpop.f32.mrf.mxu2 }
 0x642   : > { %v6041_v46 = vpop.f32.mrf.mxu3  ;;  %v5677_v50 = vadd.f32 %v5660_v49, %v5550_v51 }
 0x643   : > { %9373 = shalt.err (!%p9370_p3)
}
 0x644   : > { %s9415_s18 = smov 128   ;;  %s9416_s26 = smov 8   ;;  %v5804_v62 = vadd.f32 %v5787_v27, %v5677_v50  ;;  %v6186_v25 = vadd.f32 %v12935_v41, %v6059_v5  ;;  %v6695_v54 = vld [vmem:[%s13291_s8] sm:$0x3]  ;;  %vm6706_vm5 = vcmask 1041408  }
 0x645   : > { %9295 = dma.vmem_to_hbm [thread:$0]  (%p9510_p5), %s6732_s0, 896, %s6734_s27, %s6716_s28, %s9415_s18, %s9415_s18, %s9416_s26   ;;  %v6698_v11 = vperm.slane %v6695_v54, 1  ;;  %v6697_v56 = vperm.slane %v6695_v54, 0 }
 0x646   : > { %v6056_v14 = vpop.f32.mrf.mxu1  ;;  %s8811_s30 = sshll.u32 %s9528_s29, 2 }
 0x647   : > { %s370_s28 = scalar_lea.vmem %s13292_s9, %s8811_s30 }
 0x649   : > { %v5662_v58 = vpop.f32.mrf.mxu2 }
 0x64a   : > { %v6043_v7 = vpop.f32.mrf.mxu3 }
 0x65e   : > { %v6308_v26 = vpop.f32.mrf.mxu1 }
 0x65f   : > { %v6313_v61 = vadd.f32 %v6308_v26, %v6186_v25 }
 0x661   : > { %v5914_v9 = vpop.f32.mrf.mxu2  ;;  %v6440_v37 = vadd.f32 %v13096_v21, %v6313_v61 }
 0x662   : > { %v5931_v16 = vadd.f32 %v5914_v9, %v5804_v62  ;;  %v6295_v63 = vpop.f32.mrf.mxu3 }
 0x664   : > { %v6058_v19 = vadd.f32 %v6041_v46, %v5931_v16 }
 0x666   : > { %v6310_v60 = vpop.f32.mrf.mxu1 }
 0x669   : > { %v5916_v0 = vpop.f32.mrf.mxu2 }
 0x66a   : > { %v6297_v57 = vpop.f32.mrf.mxu3 }
 0x67d   : > { %v6562_v53 = vpop.f32.mrf.mxu1 }
 0x67e   : > { %v6567_v3 = vadd.f32 %v6562_v53, %v6440_v37 }
 0x680   : > { %v6694_v55 = vadd.f32 %v13178_v1, %v6567_v3 }
 0x681   : > { %v6168_v28 = vpop.f32.mrf.mxu2 }
 0x682   : > { %v6549_v6 = vpop.f32.mrf.mxu3  ;;  %v6185_v35 = vadd.f32 %v6168_v28, %v6058_v19  ;;  %v6702_v24 = vadd.f32 %v6698_v11, %v6694_v55 }
 0x684   : > { %v6312_v59 = vadd.f32 %v6295_v63, %v6185_v35  ;;  %v6705_v52 = vrot.slane %v6702_v24, 6 }
 0x685   : > { %v6564_v10 = vpop.f32.mrf.mxu1 }
 0x689   : > { %v6170_v20 = vpop.f32.mrf.mxu2 }
 0x68a   : > { %v6551_v40 = vpop.f32.mrf.mxu3 }
 0x6a1   : > { %v6422_v48 = vpop.f32.mrf.mxu2 }
 0x6a2   : > { %v6439_v13 = vadd.f32 %v6422_v48, %v6312_v59 }
 0x6a4   : > { %v6566_v4 = vadd.f32 %v6549_v6, %v6439_v13 }
 0x6a9   : > { %v6424_v41 = vpop.f32.mrf.mxu2 }
 0x6c1   : > { %v6676_v8 = vpop.f32.mrf.mxu2 }
 0x6c2   : > { %v6693_v15 = vadd.f32 %v6676_v8, %v6566_v4 }
 0x6c4   : > { %v6701_v21 = vadd.f32 %v6697_v56, %v6693_v15 }
 0x6c6   : > { %v6707_v39 = vsel %vm6706_vm5, %v6701_v21, %v6705_v52 }
 0x6c7   : > { %6709 = vst [vmem:[%s370_s28] sm:$0xf] %v6707_v39 }
 0x6c9   : > { %v6678_v31 = vpop.f32.mrf.mxu2 }
 0x6ca PF: > { %p9301_p4 = scmp.ge.s32.totalorder %s9408_s16, 2  ;;  %s6756_s11 = sand.u32 1, %s9396_s13  }
 0x6cb   : > { %s6757_s29 = scalar_lea.sflag [#allocation8], %s6756_s11 }
 0x6cc   : > { %p9298_p5 = pnand %p9301_p4, %p9514_p6 }
 0x6ce   : > { %p9299_p7 = pneg %p9298_p5 }
 0x6d0   : > { %9391 = dma.done.wait (%p9299_p7), %s6757_s29, 896  }
 0x6d1   : > { %9393 = vsyncadd (%p9299_p7), %s6757_s29, 4294966400  ;;  %p21_p8 = scmp.ge.s32.totalorder %s9497_s19, 4   ;;  %s13421_s13 = smov %s9400_s14 }
 0x6d2   : > { %s13422_s14 = smov %s9404_s15  ;;  %s13423_s15 = smov %s9508_s22 }
 0x6d3   : > { %s13424_s16 = smov %s9497_s19  ;;  %23 = sbr.rel (!%p21_p8) target bundleno = 7 (0x7), region = 216 }
 0x6d8   :  { %6763 = vsyncpa [#allocation8], 1 }
 0x6d9   :  { %6765 = vsyncpa [#allocation8 + $0x1], 1 }

</bundles_post_ra>
